<compile_context>
chip_gen: v5e
topology: v5e:2x2
jax: 0.10.0
libtpu: 0.0.40
codegen_flags: <defaults>
</compile_context>

<pallas_src>
import functools
import inspect
import math
import warnings

import jax
import jax.numpy as jnp
import numpy as np
from jax.experimental import pallas as pl
from jax.experimental.pallas import tpu as pltpu


def _layernorm(v, w, b, eps=1e-5):
    # torch semantics: (x - mean) / sqrt(var(unbiased=False) + eps) * w + b
    # rsqrt issues on the EUP slot instead of a VPU divide sequence.
    mean = jnp.mean(v, axis=-1, keepdims=True)
    var = jnp.mean((v - mean) ** 2, axis=-1, keepdims=True)
    return (v - mean) * jax.lax.rsqrt(var + eps) * w + b


def prenorm_attention_kernel(
    num_heads, mm_dtype, approx,
    x_ref,
    ln1w_ref, ln1b_ref,
    wqkv_ref, bqkv_ref,
    wo_ref, bo_ref,
    ln2w_ref, ln2b_ref,
    w1_ref, b1_ref,
    w2_ref, b2_ref,
    o_ref,
):
    bt, S, E = x_ref.shape
    M = bt * S
    d_k = E // num_heads

    x = x_ref[...].reshape(M, E)          # flatten batch tile (leading dims only)

    # ---- LayerNorm 1 ----
    h = _layernorm(x, ln1w_ref[0], ln1b_ref[0])

    # ---- Fused Q/K/V projection (attention scale pre-folded into Q cols) ----
    qkv = jnp.dot(h.astype(mm_dtype), wqkv_ref[...],
                  preferred_element_type=jnp.float32) + bqkv_ref[0]      # (M, 3E)

    # ---- Heads-batched layout: stack per-head slabs into a leading axis ----
    # Layout transforms stay on f32 (robust Mosaic lowering); MXU operands are
    # cast to mm_dtype right at each contraction (one cast per operand slab).
    # TODO(synk): a single pltpu.einshape relayout could replace these slices.
    def heads(base):
        slabs = [qkv[:, base + hd * d_k: base + (hd + 1) * d_k]
                 for hd in range(num_heads)]
        return jnp.stack(slabs, axis=0).reshape(num_heads * bt, S, d_k)

    q = heads(0).astype(mm_dtype)          # (nh*bt, S, d_k)
    k = heads(E).astype(mm_dtype)
    v = heads(2 * E).astype(mm_dtype)

    # ---- One scores einsum / softmax / PV einsum over the (nh*bt) batch ----
    s = jnp.einsum("gqd,gkd->gqk", q, k, preferred_element_type=jnp.float32)
    s = s - jnp.max(s, axis=-1, keepdims=True)
    p = jnp.exp(s)
    # NOTE: approx reciprocal (EUP) means fast-path rows don't sum to exactly 1.
    p = p * pl.reciprocal(jnp.sum(p, axis=-1, keepdims=True), approx=approx)
    a = jnp.einsum("gqk,gkd->gqd", p.astype(mm_dtype), v,
                   preferred_element_type=jnp.float32)                   # (nh*bt, S, d_k)

    # ---- Heads contracted through W_O: one batched MXU pass + 4-way reduce ----
    a = a.reshape(num_heads, M, d_k).astype(mm_dtype)
    att = jnp.einsum("hmd,hde->hme", a, wo_ref[...],
                     preferred_element_type=jnp.float32)                 # (nh, M, E)
    x1 = x + jnp.sum(att, axis=0) + bo_ref[0]

    # ---- LayerNorm 2 + MLP (Linear -> GELU -> Linear) + residual ----
    # TODO(synk): dropout omitted (dropout=0.0 / eval-mode identity).
    h2 = _layernorm(x1, ln2w_ref[0], ln2b_ref[0])
    m = jnp.dot(h2.astype(mm_dtype), w1_ref[...],
                preferred_element_type=jnp.float32) + b1_ref[0]
    if approx:
        m = jax.nn.gelu(m, approximate=True)            # tanh -> EUP slot
    else:
        # exact erf, matches torch nn.GELU() default (approximate='none')
        m = 0.5 * m * (1.0 + jax.lax.erf(m * (1.0 / math.sqrt(2.0))))
    m = jnp.dot(m.astype(mm_dtype), w2_ref[...],
                preferred_element_type=jnp.float32) + b2_ref[0]

    o_ref[...] = (x1 + m).reshape(bt, S, E).astype(o_ref.dtype)


def _tensorcores_per_chip():
    """Best-effort count of TensorCores one program addresses per chip."""
    devs = jax.devices()
    if not devs or devs[0].platform != "tpu":
        return 1
    # v7x exposes 2 TensorCores per chip; v5e/v6e expose 1.
    return 2 if "7" in devs[0].device_kind.lower() else 1


def _pick_batch_tile(batch, n_cores):
    """Largest bt dividing `batch` leaving >= n_cores grid steps.

    On single-TC chips (v5e/v6e) that is bt = batch (one grid step: ~0.35 us
    per-step overhead dwarfs the MXU work at these shapes, and M = B*S
    maximizes MXU row occupancy). On v7x keep >= 2 steps so both TCs get work.
    """
    if batch <= 1 or n_cores <= 1:
        return max(batch, 1)
    for bt in range(batch // n_cores, 0, -1):
        if batch % bt == 0:
            return bt
    return 1


def _blockspec_supports_pipeline_mode():
    """Feature/version check for single-buffered weight specs."""
    if not hasattr(pl, "Buffered"):
        return False
    try:
        return "pipeline_mode" in inspect.signature(pl.BlockSpec).parameters
    except (TypeError, ValueError):
        return False


def prenorm_attention_block(x, params, num_heads, *, precise=False,
                            batch_tile=None, single_buffer_weights=True):
    """x: (B, S, E) float32.  params: dict of (in, out)-layout weights."""
    B, S, E = x.shape
    H = params["w1"].shape[1]
    d_k = E // num_heads

    n_cores = _tensorcores_per_chip()
    bt = batch_tile if batch_tile is not None else _pick_batch_tile(B, n_cores)
    assert B % bt == 0, "batch must be divisible by the batch tile"
    grid = (B // bt,)

    # bf16 MXU operands on all generations (v5e MXU is bf16-native too);
    # LN/softmax/GELU/residuals stay f32 inside the kernel.
    mm_dtype = jnp.float32 if precise else jnp.bfloat16
    approx = not precise
    scale = 1.0 / math.sqrt(d_k)

    # Fuse Q/K/V into one (E, 3E) weight; fold 1/sqrt(d_k) into the Q columns
    # and bias (one-time constant transform, removes per-element score scaling).
    wqkv = jnp.concatenate(
        [params["wq"] * scale, params["wk"], params["wv"]], axis=1)
    bqkv = jnp.concatenate(
        [params["bq"] * scale, params["bk"], params["bv"]], axis=1)
    # W_O as (num_heads, d_k, E): per-head slabs are leading-index, so the
    # head contraction is one batched einsum and the output stays lane-dense.
    wo = params["wo"].reshape(num_heads, d_k, E)

    def cast(w):
        return w.astype(mm_dtype)

    args = (
        x,
        params["ln1_w"], params["ln1_b"],
        cast(wqkv), bqkv,
        cast(wo), params["bo"],
        params["ln2_w"], params["ln2_b"],
        cast(params["w1"]), params["b1"],
        cast(params["w2"]), params["b2"],
    )

    kernel = functools.partial(prenorm_attention_kernel, num_heads, mm_dtype,
                               approx)

    # Advisory cost estimate (helps XLA schedule/overlap this tiny kernel).
    Mtot = B * S
    flops = int(2 * Mtot * E * 3 * E                   # QKV projection
                + 2 * B * num_heads * S * S * d_k * 2  # scores + PV
                + 2 * Mtot * E * E                     # W_O
                + 2 * Mtot * E * H * 2)                # MLP up + down
    transcendentals = int(B * num_heads * S * S        # softmax exp
                          + Mtot * H                   # GELU
                          + 2 * Mtot                   # LN rsqrt
                          + B * num_heads * S)         # softmax reciprocal
    bytes_accessed = int(2 * x.size * x.dtype.itemsize
                         + sum(a.size * a.dtype.itemsize for a in args[1:]))
    cost = pl.CostEstimate(flops=flops, transcendentals=transcendentals,
                           bytes_accessed=bytes_accessed)

    # Generation-aware VMEM cap: v7x has 64 MiB/TC -> stay at 32 MiB there;
    # v5e/v6e (128 MiB parts) can afford a larger scoped limit.
    vmem_limit = (32 if n_cores == 2 else 64) * 1024 * 1024

    def build(single_buffer):
        def rep(shape):
            n = len(shape)

            def idx(b):
                return (0,) * n

            if single_buffer:
                # Constant-index weights don't need double buffering; this is
                # the VMEM saver once flash-style tiling at production sizes
                # lands (non-load-bearing at these shapes).
                return pl.BlockSpec(shape, idx, pipeline_mode=pl.Buffered(1))
            return pl.BlockSpec(shape, idx)

        in_specs = [
            pl.BlockSpec((bt, S, E), lambda b: (b, 0, 0)),   # x
            rep((1, E)), rep((1, E)),                        # ln1 w, b
            rep((E, 3 * E)), rep((1, 3 * E)),                # fused wqkv, bqkv
            rep((num_heads, d_k, E)), rep((1, E)),           # wo (heads-major), bo
            rep((1, E)), rep((1, E)),                        # ln2 w, b
            rep((E, H)), rep((1, H)),                        # w1, b1
            rep((H, E)), rep((1, E)),                        # w2, b2
        ]
        return pl.pallas_call(
            kernel,
            out_shape=jax.ShapeDtypeStruct((B, S, E), x.dtype),
            grid_spec=pltpu.PrefetchScalarGridSpec(
                num_scalar_prefetch=0,
                grid=grid,
                in_specs=in_specs,
                out_specs=pl.BlockSpec((bt, S, E), lambda b: (b, 0, 0)),
            ),
            compiler_params=pltpu.CompilerParams(
                dimension_semantics=("parallel",),
                vmem_limit_bytes=vmem_limit,
            ),
            cost_estimate=cost,
        )

    if single_buffer_weights and _blockspec_supports_pipeline_mode():
        try:
            return build(True)(*args)
        except Exception as err:
            # The ONLY difference vs. the retry below is pipeline_mode=
            # Buffered(1), so any genuine error (VMEM OOM, lowering bug)
            # re-raises loudly from the default build -- nothing is silently
            # masked; warn so the config change is visible.
            warnings.warn(
                "single-buffered weight specs rejected by this Pallas/Mosaic "
                f"version ({type(err).__name__}); retrying double-buffered.")
    return build(False)(*args)


def reference_forward(x, params, num_heads):
    """Pure-JAX f32 reference replicating the PyTorch module's forward."""
    B, S, E = x.shape
    d_k = E // num_heads

    def ln(v, w, b):
        mean = jnp.mean(v, axis=-1, keepdims=True)
        var = jnp.mean((v - mean) ** 2, axis=-1, keepdims=True)
        return (v - mean) / jnp.sqrt(var + 1e-5) * w[0] + b[0]

    h = ln(x, params["ln1_w"], params["ln1_b"])
    q = h @ params["wq"] + params["bq"][0]
    k = h @ params["wk"] + params["bk"][0]
    v = h @ params["wv"] + params["bv"][0]

    def split(t):
        return t.reshape(B, S, num_heads, d_k).transpose(0, 2, 1, 3)

    q, k, v = split(q), split(k), split(v)
    s = jnp.einsum("bhqd,bhkd->bhqk", q, k) / math.sqrt(d_k)
    p = jax.nn.softmax(s, axis=-1)
    att = jnp.einsum("bhqk,bhkd->bhqd", p, v)
    att = att.transpose(0, 2, 1, 3).reshape(B, S, E)
    att = att @ params["wo"] + params["bo"][0]
    x1 = x + att

    h2 = ln(x1, params["ln2_w"], params["ln2_b"])
    m = h2 @ params["w1"] + params["b1"][0]
    m = jax.nn.gelu(m, approximate=False)
    m = m @ params["w2"] + params["b2"][0]
    return x1 + m


def init_params(key, embed_dim, hidden_dim):
    keys = jax.random.split(key, 12)
    E, H = embed_dim, hidden_dim

    def lin(kw, kb, fan_in, fan_out):
        # kaiming-uniform-like init; weights stored (in, out)
        bound = 1.0 / math.sqrt(fan_in)
        w = jax.random.uniform(kw, (fan_in, fan_out), jnp.float32, -bound, bound)
        b = jax.random.uniform(kb, (1, fan_out), jnp.float32, -bound, bound)
        return w, b

    wq, bq = lin(keys[0], keys[1], E, E)
    wk, bk = lin(keys[2], keys[3], E, E)
    wv, bv = lin(keys[4], keys[5], E, E)
    wo, bo = lin(keys[6], keys[7], E, E)
    w1, b1 = lin(keys[8], keys[9], E, H)
    w2, b2 = lin(keys[10], keys[11], H, E)

    return {
        "ln1_w": jnp.ones((1, E), jnp.float32),
        "ln1_b": jnp.zeros((1, E), jnp.float32),
        "wq": wq, "bq": bq, "wk": wk, "bk": bk, "wv": wv, "bv": bv,
        "wo": wo, "bo": bo,
        "ln2_w": jnp.ones((1, E), jnp.float32),
        "ln2_b": jnp.zeros((1, E), jnp.float32),
        "w1": w1, "b1": b1, "w2": w2, "b2": b2,
    }


if __name__ == "__main__":
    # num_heads=4, head_size=32 -> embed=128 (lane-dense), hidden=2*embed=256.
    B, S, NUM_HEADS, HEAD_SIZE = 8, 8, 4, 32
    E = NUM_HEADS * HEAD_SIZE
    H = 2 * E

    key = jax.random.PRNGKey(0)
    kx, kp = jax.random.split(key)
    x = jax.random.normal(kx, (B, S, E), jnp.float32)
    params = init_params(kp, E, H)

    ref = jax.block_until_ready(reference_forward(x, params, NUM_HEADS))

    # Exact path (f32 MXU operands, exact reciprocal, exact erf GELU): tight
    # check against the PyTorch-equivalent f32 reference.
    out_precise = jax.block_until_ready(
        prenorm_attention_block(x, params, NUM_HEADS, precise=True))
    np.testing.assert_allclose(np.asarray(out_precise), np.asarray(ref),
                               rtol=1e-4, atol=1e-4)

    # Performance path (bf16 MXU operands, approx EUP reciprocal in the softmax
    # normalization, tanh GELU) -- recommended config on v5e/v6e/v7x; tolerance
    # loosened for bf16/approx numerics.
    out_fast = jax.block_until_ready(
        prenorm_attention_block(x, params, NUM_HEADS, precise=False))
    np.testing.assert_allclose(np.asarray(out_fast), np.asarray(ref),
                               rtol=1e-1, atol=1e-1)

    print("KERNEL_OK")
</pallas_src>

<mosaic_0001>
module attributes {stable_mosaic.version = 11 : i64} {
  func.func @prenorm_attention_kernel(%arg0: i32, %arg1: memref<8x8x128xf32, #tpu.memory_space<vmem>>, %arg2: memref<1x128xf32, #tpu.memory_space<vmem>>, %arg3: memref<1x128xf32, #tpu.memory_space<vmem>>, %arg4: memref<128x384xf32, #tpu.memory_space<vmem>>, %arg5: memref<1x384xf32, #tpu.memory_space<vmem>>, %arg6: memref<4x32x128xf32, #tpu.memory_space<vmem>>, %arg7: memref<1x128xf32, #tpu.memory_space<vmem>>, %arg8: memref<1x128xf32, #tpu.memory_space<vmem>>, %arg9: memref<1x128xf32, #tpu.memory_space<vmem>>, %arg10: memref<128x256xf32, #tpu.memory_space<vmem>>, %arg11: memref<1x256xf32, #tpu.memory_space<vmem>>, %arg12: memref<256x128xf32, #tpu.memory_space<vmem>>, %arg13: memref<1x128xf32, #tpu.memory_space<vmem>>, %arg14: memref<8x8x128xf32, #tpu.memory_space<vmem>>) attributes {dimension_semantics = [#tpu.dimension_semantics<parallel>], iteration_bounds = array<i64: 1>, scalar_prefetch = 0 : i64, scratch_operands = 0 : i64, tpu.core_type = #tpu.core_type<tc>, window_params = [{transform_indices = @transform_0, window_bounds = array<i64: 8, 8, 128>}, {pipeline_mode = #tpu.pipeline_mode<synchronous>, transform_indices = @transform_1, window_bounds = array<i64: 1, 128>}, {pipeline_mode = #tpu.pipeline_mode<synchronous>, transform_indices = @transform_2, window_bounds = array<i64: 1, 128>}, {pipeline_mode = #tpu.pipeline_mode<synchronous>, transform_indices = @transform_3, window_bounds = array<i64: 128, 384>}, {pipeline_mode = #tpu.pipeline_mode<synchronous>, transform_indices = @transform_4, window_bounds = array<i64: 1, 384>}, {pipeline_mode = #tpu.pipeline_mode<synchronous>, transform_indices = @transform_5, window_bounds = array<i64: 4, 32, 128>}, {pipeline_mode = #tpu.pipeline_mode<synchronous>, transform_indices = @transform_6, window_bounds = array<i64: 1, 128>}, {pipeline_mode = #tpu.pipeline_mode<synchronous>, transform_indices = @transform_7, window_bounds = array<i64: 1, 128>}, {pipeline_mode = #tpu.pipeline_mode<synchronous>, transform_indices = @transform_8, window_bounds = array<i64: 1, 128>}, {pipeline_mode = #tpu.pipeline_mode<synchronous>, transform_indices = @transform_9, window_bounds = array<i64: 128, 256>}, {pipeline_mode = #tpu.pipeline_mode<synchronous>, transform_indices = @transform_10, window_bounds = array<i64: 1, 256>}, {pipeline_mode = #tpu.pipeline_mode<synchronous>, transform_indices = @transform_11, window_bounds = array<i64: 256, 128>}, {pipeline_mode = #tpu.pipeline_mode<synchronous>, transform_indices = @transform_12, window_bounds = array<i64: 1, 128>}, {transform_indices = @transform_13, window_bounds = array<i64: 8, 8, 128>}]} {
    %c0 = arith.constant 0 : index
    %c0_0 = arith.constant 0 : index
    %c0_1 = arith.constant 0 : index
    %0 = vector.load %arg1[%c0, %c0_0, %c0_1] : memref<8x8x128xf32, #tpu.memory_space<vmem>>, vector<8x8x128xf32>
    %1 = vector.shape_cast %0 : vector<8x8x128xf32> to vector<64x128xf32>
    %c0_2 = arith.constant 0 : index
    %c0_3 = arith.constant 0 : index
    %2 = vector.load %arg2[%c0_2, %c0_3] : memref<1x128xf32, #tpu.memory_space<vmem>>, vector<1x128xf32>
    %3 = vector.shape_cast %2 : vector<1x128xf32> to vector<128xf32>
    %c0_4 = arith.constant 0 : index
    %c0_5 = arith.constant 0 : index
    %4 = vector.load %arg3[%c0_4, %c0_5] : memref<1x128xf32, #tpu.memory_space<vmem>>, vector<1x128xf32>
    %5 = vector.shape_cast %4 : vector<1x128xf32> to vector<128xf32>
    %cst = arith.constant dense<0.000000e+00> : vector<64xf32>
    %6 = vector.multi_reduction <add>, %1, %cst [1] : vector<64x128xf32> to vector<64xf32>
    %7 = vector.shape_cast %6 : vector<64xf32> to vector<64x1xf32>
    %cst_6 = arith.constant 1.280000e+02 : f32
    %8 = vector.broadcast %cst_6 : f32 to vector<64x1xf32>
    %9 = arith.divf %7, %8 : vector<64x1xf32>
    %10 = vector.broadcast %9 : vector<64x1xf32> to vector<64x128xf32>
    %11 = arith.subf %1, %10 : vector<64x128xf32>
    %12 = arith.mulf %11, %11 : vector<64x128xf32>
    %cst_7 = arith.constant dense<0.000000e+00> : vector<64xf32>
    %13 = vector.multi_reduction <add>, %12, %cst_7 [1] : vector<64x128xf32> to vector<64xf32>
    %14 = vector.shape_cast %13 : vector<64xf32> to vector<64x1xf32>
    %cst_8 = arith.constant 1.280000e+02 : f32
    %15 = vector.broadcast %cst_8 : f32 to vector<64x1xf32>
    %16 = arith.divf %14, %15 : vector<64x1xf32>
    %17 = vector.broadcast %9 : vector<64x1xf32> to vector<64x128xf32>
    %18 = arith.subf %1, %17 : vector<64x128xf32>
    %cst_9 = arith.constant 9.99999974E-6 : f32
    %19 = vector.broadcast %cst_9 : f32 to vector<64x1xf32>
    %20 = arith.addf %16, %19 : vector<64x1xf32>
    %21 = math.rsqrt %20 : vector<64x1xf32>
    %22 = vector.broadcast %21 : vector<64x1xf32> to vector<64x128xf32>
    %23 = arith.mulf %18, %22 : vector<64x128xf32>
    %24 = vector.shape_cast %3 : vector<128xf32> to vector<1x128xf32>
    %25 = vector.broadcast %24 : vector<1x128xf32> to vector<64x128xf32>
    %26 = arith.mulf %23, %25 : vector<64x128xf32>
    %27 = vector.shape_cast %5 : vector<128xf32> to vector<1x128xf32>
    %28 = vector.broadcast %27 : vector<1x128xf32> to vector<64x128xf32>
    %29 = arith.addf %26, %28 : vector<64x128xf32>
    %c0_10 = arith.constant 0 : index
    %c0_11 = arith.constant 0 : index
    %30 = vector.load %arg4[%c0_10, %c0_11] : memref<128x384xf32, #tpu.memory_space<vmem>>, vector<128x384xf32>
    %cst_12 = arith.constant dense<0.000000e+00> : vector<64x384xf32>
    %31 = tpu.matmul %29, %30, %cst_12 {dimension_numbers = #tpu.dot_dimension_numbers<[1], [0], [0], [1], [0, 0, 1, 1], [], []>} : vector<64x128xf32>, vector<128x384xf32>, vector<64x384xf32> -> vector<64x384xf32>
    %c0_13 = arith.constant 0 : index
    %c0_14 = arith.constant 0 : index
    %32 = vector.load %arg5[%c0_13, %c0_14] : memref<1x384xf32, #tpu.memory_space<vmem>>, vector<1x384xf32>
    %33 = vector.shape_cast %32 : vector<1x384xf32> to vector<384xf32>
    %34 = vector.shape_cast %33 : vector<384xf32> to vector<1x384xf32>
    %35 = vector.broadcast %34 : vector<1x384xf32> to vector<64x384xf32>
    %36 = arith.addf %31, %35 : vector<64x384xf32>
    %37 = vector.extract_strided_slice %36 {offsets = [0, 0], sizes = [64, 32], strides = [1, 1]} : vector<64x384xf32> to vector<64x32xf32>
    %38 = vector.extract_strided_slice %36 {offsets = [0, 32], sizes = [64, 32], strides = [1, 1]} : vector<64x384xf32> to vector<64x32xf32>
    %39 = vector.extract_strided_slice %36 {offsets = [0, 64], sizes = [64, 32], strides = [1, 1]} : vector<64x384xf32> to vector<64x32xf32>
    %40 = vector.extract_strided_slice %36 {offsets = [0, 96], sizes = [64, 32], strides = [1, 1]} : vector<64x384xf32> to vector<64x32xf32>
    %41 = vector.shape_cast %37 : vector<64x32xf32> to vector<1x64x32xf32>
    %42 = vector.shape_cast %38 : vector<64x32xf32> to vector<1x64x32xf32>
    %43 = vector.shape_cast %39 : vector<64x32xf32> to vector<1x64x32xf32>
    %44 = vector.shape_cast %40 : vector<64x32xf32> to vector<1x64x32xf32>
    %45 = tpu.concatenate %41, %42, %43, %44 in 0 : vector<1x64x32xf32>, vector<1x64x32xf32>, vector<1x64x32xf32>, vector<1x64x32xf32> -> vector<4x64x32xf32>
    %46 = vector.shape_cast %45 : vector<4x64x32xf32> to vector<32x8x32xf32>
    %47 = vector.extract_strided_slice %36 {offsets = [0, 128], sizes = [64, 32], strides = [1, 1]} : vector<64x384xf32> to vector<64x32xf32>
    %48 = vector.extract_strided_slice %36 {offsets = [0, 160], sizes = [64, 32], strides = [1, 1]} : vector<64x384xf32> to vector<64x32xf32>
    %49 = vector.extract_strided_slice %36 {offsets = [0, 192], sizes = [64, 32], strides = [1, 1]} : vector<64x384xf32> to vector<64x32xf32>
    %50 = vector.extract_strided_slice %36 {offsets = [0, 224], sizes = [64, 32], strides = [1, 1]} : vector<64x384xf32> to vector<64x32xf32>
    %51 = vector.shape_cast %47 : vector<64x32xf32> to vector<1x64x32xf32>
    %52 = vector.shape_cast %48 : vector<64x32xf32> to vector<1x64x32xf32>
    %53 = vector.shape_cast %49 : vector<64x32xf32> to vector<1x64x32xf32>
    %54 = vector.shape_cast %50 : vector<64x32xf32> to vector<1x64x32xf32>
    %55 = tpu.concatenate %51, %52, %53, %54 in 0 : vector<1x64x32xf32>, vector<1x64x32xf32>, vector<1x64x32xf32>, vector<1x64x32xf32> -> vector<4x64x32xf32>
    %56 = vector.shape_cast %55 : vector<4x64x32xf32> to vector<32x8x32xf32>
    %57 = vector.extract_strided_slice %36 {offsets = [0, 256], sizes = [64, 32], strides = [1, 1]} : vector<64x384xf32> to vector<64x32xf32>
    %58 = vector.extract_strided_slice %36 {offsets = [0, 288], sizes = [64, 32], strides = [1, 1]} : vector<64x384xf32> to vector<64x32xf32>
    %59 = vector.extract_strided_slice %36 {offsets = [0, 320], sizes = [64, 32], strides = [1, 1]} : vector<64x384xf32> to vector<64x32xf32>
    %60 = vector.extract_strided_slice %36 {offsets = [0, 352], sizes = [64, 32], strides = [1, 1]} : vector<64x384xf32> to vector<64x32xf32>
    %61 = vector.shape_cast %57 : vector<64x32xf32> to vector<1x64x32xf32>
    %62 = vector.shape_cast %58 : vector<64x32xf32> to vector<1x64x32xf32>
    %63 = vector.shape_cast %59 : vector<64x32xf32> to vector<1x64x32xf32>
    %64 = vector.shape_cast %60 : vector<64x32xf32> to vector<1x64x32xf32>
    %65 = tpu.concatenate %61, %62, %63, %64 in 0 : vector<1x64x32xf32>, vector<1x64x32xf32>, vector<1x64x32xf32>, vector<1x64x32xf32> -> vector<4x64x32xf32>
    %66 = vector.shape_cast %65 : vector<4x64x32xf32> to vector<32x8x32xf32>
    "tpu.trace_start"() <{level = 10 : i32, message = "gqd,gkd->gqk"}> : () -> ()
    %cst_15 = arith.constant dense<0.000000e+00> : vector<32x8x8xf32>
    %67 = tpu.matmul %46, %56, %cst_15 {dimension_numbers = #tpu.dot_dimension_numbers<[2], [2], [1], [1], [0, 0, 0, 1, 1, 1], [0], [0]>} : vector<32x8x32xf32>, vector<32x8x32xf32>, vector<32x8x8xf32> -> vector<32x8x8xf32>
    "tpu.trace_stop"() : () -> ()
    %cst_16 = arith.constant dense<0xFF800000> : vector<32x8xf32>
    %68 = vector.multi_reduction <maximumf>, %67, %cst_16 [2] : vector<32x8x8xf32> to vector<32x8xf32>
    %69 = vector.shape_cast %68 : vector<32x8xf32> to vector<32x8x1xf32>
    %70 = vector.broadcast %69 : vector<32x8x1xf32> to vector<32x8x8xf32>
    %71 = arith.subf %67, %70 : vector<32x8x8xf32>
    %72 = math.exp %71 : vector<32x8x8xf32>
    %cst_17 = arith.constant dense<0.000000e+00> : vector<32x8xf32>
    %73 = vector.multi_reduction <add>, %72, %cst_17 [2] : vector<32x8x8xf32> to vector<32x8xf32>
    %74 = vector.shape_cast %73 : vector<32x8xf32> to vector<32x8x1xf32>
    %75 = tpu.reciprocal %74 : vector<32x8x1xf32> -> vector<32x8x1xf32>
    %76 = vector.broadcast %75 : vector<32x8x1xf32> to vector<32x8x8xf32>
    %77 = arith.mulf %72, %76 : vector<32x8x8xf32>
    "tpu.trace_start"() <{level = 10 : i32, message = "gqk,gkd->gqd"}> : () -> ()
    %cst_18 = arith.constant dense<0.000000e+00> : vector<32x8x32xf32>
    %78 = tpu.matmul %77, %66, %cst_18 {dimension_numbers = #tpu.dot_dimension_numbers<[2], [1], [1], [2], [0, 0, 0, 1, 1, 2], [0], [0]>} : vector<32x8x8xf32>, vector<32x8x32xf32>, vector<32x8x32xf32> -> vector<32x8x32xf32>
    "tpu.trace_stop"() : () -> ()
    %79 = vector.shape_cast %78 : vector<32x8x32xf32> to vector<4x64x32xf32>
    %c0_19 = arith.constant 0 : index
    %c0_20 = arith.constant 0 : index
    %c0_21 = arith.constant 0 : index
    %80 = vector.load %arg6[%c0_19, %c0_20, %c0_21] : memref<4x32x128xf32, #tpu.memory_space<vmem>>, vector<4x32x128xf32>
    "tpu.trace_start"() <{level = 10 : i32, message = "hmd,hde->hme"}> : () -> ()
    %cst_22 = arith.constant dense<0.000000e+00> : vector<4x64x128xf32>
    %81 = tpu.matmul %79, %80, %cst_22 {dimension_numbers = #tpu.dot_dimension_numbers<[2], [1], [1], [2], [0, 0, 0, 1, 1, 2], [0], [0]>} : vector<4x64x32xf32>, vector<4x32x128xf32>, vector<4x64x128xf32> -> vector<4x64x128xf32>
    "tpu.trace_stop"() : () -> ()
    %cst_23 = arith.constant dense<0.000000e+00> : vector<64x128xf32>
    %82 = vector.multi_reduction <add>, %81, %cst_23 [0] : vector<4x64x128xf32> to vector<64x128xf32>
    %83 = arith.addf %1, %82 : vector<64x128xf32>
    %c0_24 = arith.constant 0 : index
    %c0_25 = arith.constant 0 : index
    %84 = vector.load %arg7[%c0_24, %c0_25] : memref<1x128xf32, #tpu.memory_space<vmem>>, vector<1x128xf32>
    %85 = vector.shape_cast %84 : vector<1x128xf32> to vector<128xf32>
    %86 = vector.shape_cast %85 : vector<128xf32> to vector<1x128xf32>
    %87 = vector.broadcast %86 : vector<1x128xf32> to vector<64x128xf32>
    %88 = arith.addf %83, %87 : vector<64x128xf32>
    %c0_26 = arith.constant 0 : index
    %c0_27 = arith.constant 0 : index
    %89 = vector.load %arg8[%c0_26, %c0_27] : memref<1x128xf32, #tpu.memory_space<vmem>>, vector<1x128xf32>
    %90 = vector.shape_cast %89 : vector<1x128xf32> to vector<128xf32>
    %c0_28 = arith.constant 0 : index
    %c0_29 = arith.constant 0 : index
    %91 = vector.load %arg9[%c0_28, %c0_29] : memref<1x128xf32, #tpu.memory_space<vmem>>, vector<1x128xf32>
    %92 = vector.shape_cast %91 : vector<1x128xf32> to vector<128xf32>
    %cst_30 = arith.constant dense<0.000000e+00> : vector<64xf32>
    %93 = vector.multi_reduction <add>, %88, %cst_30 [1] : vector<64x128xf32> to vector<64xf32>
    %94 = vector.shape_cast %93 : vector<64xf32> to vector<64x1xf32>
    %cst_31 = arith.constant 1.280000e+02 : f32
    %95 = vector.broadcast %cst_31 : f32 to vector<64x1xf32>
    %96 = arith.divf %94, %95 : vector<64x1xf32>
    %97 = vector.broadcast %96 : vector<64x1xf32> to vector<64x128xf32>
    %98 = arith.subf %88, %97 : vector<64x128xf32>
    %99 = arith.mulf %98, %98 : vector<64x128xf32>
    %cst_32 = arith.constant dense<0.000000e+00> : vector<64xf32>
    %100 = vector.multi_reduction <add>, %99, %cst_32 [1] : vector<64x128xf32> to vector<64xf32>
    %101 = vector.shape_cast %100 : vector<64xf32> to vector<64x1xf32>
    %cst_33 = arith.constant 1.280000e+02 : f32
    %102 = vector.broadcast %cst_33 : f32 to vector<64x1xf32>
    %103 = arith.divf %101, %102 : vector<64x1xf32>
    %104 = vector.broadcast %96 : vector<64x1xf32> to vector<64x128xf32>
    %105 = arith.subf %88, %104 : vector<64x128xf32>
    %cst_34 = arith.constant 9.99999974E-6 : f32
    %106 = vector.broadcast %cst_34 : f32 to vector<64x1xf32>
    %107 = arith.addf %103, %106 : vector<64x1xf32>
    %108 = math.rsqrt %107 : vector<64x1xf32>
    %109 = vector.broadcast %108 : vector<64x1xf32> to vector<64x128xf32>
    %110 = arith.mulf %105, %109 : vector<64x128xf32>
    %111 = vector.shape_cast %90 : vector<128xf32> to vector<1x128xf32>
    %112 = vector.broadcast %111 : vector<1x128xf32> to vector<64x128xf32>
    %113 = arith.mulf %110, %112 : vector<64x128xf32>
    %114 = vector.shape_cast %92 : vector<128xf32> to vector<1x128xf32>
    %115 = vector.broadcast %114 : vector<1x128xf32> to vector<64x128xf32>
    %116 = arith.addf %113, %115 : vector<64x128xf32>
    %c0_35 = arith.constant 0 : index
    %c0_36 = arith.constant 0 : index
    %117 = vector.load %arg10[%c0_35, %c0_36] : memref<128x256xf32, #tpu.memory_space<vmem>>, vector<128x256xf32>
    %cst_37 = arith.constant dense<0.000000e+00> : vector<64x256xf32>
    %118 = tpu.matmul %116, %117, %cst_37 {dimension_numbers = #tpu.dot_dimension_numbers<[1], [0], [0], [1], [0, 0, 1, 1], [], []>} : vector<64x128xf32>, vector<128x256xf32>, vector<64x256xf32> -> vector<64x256xf32>
    %c0_38 = arith.constant 0 : index
    %c0_39 = arith.constant 0 : index
    %119 = vector.load %arg11[%c0_38, %c0_39] : memref<1x256xf32, #tpu.memory_space<vmem>>, vector<1x256xf32>
    %120 = vector.shape_cast %119 : vector<1x256xf32> to vector<256xf32>
    %121 = vector.shape_cast %120 : vector<256xf32> to vector<1x256xf32>
    %122 = vector.broadcast %121 : vector<1x256xf32> to vector<64x256xf32>
    %123 = arith.addf %118, %122 : vector<64x256xf32>
    %cst_40 = arith.constant 5.000000e-01 : f32
    %124 = vector.broadcast %cst_40 : f32 to vector<64x256xf32>
    %125 = arith.mulf %124, %123 : vector<64x256xf32>
    %cst_41 = arith.constant 0.707106769 : f32
    %126 = vector.broadcast %cst_41 : f32 to vector<64x256xf32>
    %127 = arith.mulf %123, %126 : vector<64x256xf32>
    %128 = math.erf %127 : vector<64x256xf32>
    %cst_42 = arith.constant 1.000000e+00 : f32
    %129 = vector.broadcast %cst_42 : f32 to vector<64x256xf32>
    %130 = arith.addf %129, %128 : vector<64x256xf32>
    %131 = arith.mulf %125, %130 : vector<64x256xf32>
    %c0_43 = arith.constant 0 : index
    %c0_44 = arith.constant 0 : index
    %132 = vector.load %arg12[%c0_43, %c0_44] : memref<256x128xf32, #tpu.memory_space<vmem>>, vector<256x128xf32>
    %cst_45 = arith.constant dense<0.000000e+00> : vector<64x128xf32>
    %133 = tpu.matmul %131, %132, %cst_45 {dimension_numbers = #tpu.dot_dimension_numbers<[1], [0], [0], [1], [0, 0, 1, 1], [], []>} : vector<64x256xf32>, vector<256x128xf32>, vector<64x128xf32> -> vector<64x128xf32>
    %c0_46 = arith.constant 0 : index
    %c0_47 = arith.constant 0 : index
    %134 = vector.load %arg13[%c0_46, %c0_47] : memref<1x128xf32, #tpu.memory_space<vmem>>, vector<1x128xf32>
    %135 = vector.shape_cast %134 : vector<1x128xf32> to vector<128xf32>
    %136 = vector.shape_cast %135 : vector<128xf32> to vector<1x128xf32>
    %137 = vector.broadcast %136 : vector<1x128xf32> to vector<64x128xf32>
    %138 = arith.addf %133, %137 : vector<64x128xf32>
    %139 = arith.addf %88, %138 : vector<64x128xf32>
    %140 = vector.shape_cast %139 : vector<64x128xf32> to vector<8x8x128xf32>
    %c0_48 = arith.constant 0 : index
    %c0_49 = arith.constant 0 : index
    %c0_50 = arith.constant 0 : index
    %141 = vector.load %arg14[%c0_48, %c0_49, %c0_50] : memref<8x8x128xf32, #tpu.memory_space<vmem>>, vector<8x8x128xf32>
    tpu.vector_store %arg14[%c0_48, %c0_49, %c0_50], %140 {strides = array<i32>} : memref<8x8x128xf32, #tpu.memory_space<vmem>>, vector<8x8x128xf32>,
    return
  }
  func.func @transform_0(%arg0: i32) -> (i32, i32, i32) {
    %c0_i32 = arith.constant 0 : i32
    %c0_i32_0 = arith.constant 0 : i32
    %c0_i32_1 = arith.constant 0 : i32
    return %arg0, %c0_i32, %c0_i32_0 : i32, i32, i32
  }
  func.func @transform_1(%arg0: i32) -> (i32, i32) {
    %c0_i32 = arith.constant 0 : i32
    %c0_i32_0 = arith.constant 0 : i32
    %c0_i32_1 = arith.constant 0 : i32
    return %c0_i32, %c0_i32_0 : i32, i32
  }
  func.func @transform_2(%arg0: i32) -> (i32, i32) {
    %c0_i32 = arith.constant 0 : i32
    %c0_i32_0 = arith.constant 0 : i32
    %c0_i32_1 = arith.constant 0 : i32
    return %c0_i32, %c0_i32_0 : i32, i32
  }
  func.func @transform_3(%arg0: i32) -> (i32, i32) {
    %c0_i32 = arith.constant 0 : i32
    %c0_i32_0 = arith.constant 0 : i32
    %c0_i32_1 = arith.constant 0 : i32
    return %c0_i32, %c0_i32_0 : i32, i32
  }
  func.func @transform_4(%arg0: i32) -> (i32, i32) {
    %c0_i32 = arith.constant 0 : i32
    %c0_i32_0 = arith.constant 0 : i32
    %c0_i32_1 = arith.constant 0 : i32
    return %c0_i32, %c0_i32_0 : i32, i32
  }
  func.func @transform_5(%arg0: i32) -> (i32, i32, i32) {
    %c0_i32 = arith.constant 0 : i32
    %c0_i32_0 = arith.constant 0 : i32
    %c0_i32_1 = arith.constant 0 : i32
    %c0_i32_2 = arith.constant 0 : i32
    return %c0_i32, %c0_i32_0, %c0_i32_1 : i32, i32, i32
  }
  func.func @transform_6(%arg0: i32) -> (i32, i32) {
    %c0_i32 = arith.constant 0 : i32
    %c0_i32_0 = arith.constant 0 : i32
    %c0_i32_1 = arith.constant 0 : i32
    return %c0_i32, %c0_i32_0 : i32, i32
  }
  func.func @transform_7(%arg0: i32) -> (i32, i32) {
    %c0_i32 = arith.constant 0 : i32
    %c0_i32_0 = arith.constant 0 : i32
    %c0_i32_1 = arith.constant 0 : i32
    return %c0_i32, %c0_i32_0 : i32, i32
  }
  func.func @transform_8(%arg0: i32) -> (i32, i32) {
    %c0_i32 = arith.constant 0 : i32
    %c0_i32_0 = arith.constant 0 : i32
    %c0_i32_1 = arith.constant 0 : i32
    return %c0_i32, %c0_i32_0 : i32, i32
  }
  func.func @transform_9(%arg0: i32) -> (i32, i32) {
    %c0_i32 = arith.constant 0 : i32
    %c0_i32_0 = arith.constant 0 : i32
    %c0_i32_1 = arith.constant 0 : i32
    return %c0_i32, %c0_i32_0 : i32, i32
  }
  func.func @transform_10(%arg0: i32) -> (i32, i32) {
    %c0_i32 = arith.constant 0 : i32
    %c0_i32_0 = arith.constant 0 : i32
    %c0_i32_1 = arith.constant 0 : i32
    return %c0_i32, %c0_i32_0 : i32, i32
  }
  func.func @transform_11(%arg0: i32) -> (i32, i32) {
    %c0_i32 = arith.constant 0 : i32
    %c0_i32_0 = arith.constant 0 : i32
    %c0_i32_1 = arith.constant 0 : i32
    return %c0_i32, %c0_i32_0 : i32, i32
  }
  func.func @transform_12(%arg0: i32) -> (i32, i32) {
    %c0_i32 = arith.constant 0 : i32
    %c0_i32_0 = arith.constant 0 : i32
    %c0_i32_1 = arith.constant 0 : i32
    return %c0_i32, %c0_i32_0 : i32, i32
  }
  func.func @transform_13(%arg0: i32) -> (i32, i32, i32) {
    %c0_i32 = arith.constant 0 : i32
    %c0_i32_0 = arith.constant 0 : i32
    %c0_i32_1 = arith.constant 0 : i32
    return %arg0, %c0_i32, %c0_i32_0 : i32, i32, i32
  }
}

module attributes {stable_mosaic.version = 11 : i64} {
  func.func @prenorm_attention_kernel(%arg0: i32, %arg1: memref<8x8x128xf32, #tpu.memory_space<vmem>>, %arg2: memref<1x128xf32, #tpu.memory_space<vmem>>, %arg3: memref<1x128xf32, #tpu.memory_space<vmem>>, %arg4: memref<128x384xf32, #tpu.memory_space<vmem>>, %arg5: memref<1x384xf32, #tpu.memory_space<vmem>>, %arg6: memref<4x32x128xf32, #tpu.memory_space<vmem>>, %arg7: memref<1x128xf32, #tpu.memory_space<vmem>>, %arg8: memref<1x128xf32, #tpu.memory_space<vmem>>, %arg9: memref<1x128xf32, #tpu.memory_space<vmem>>, %arg10: memref<128x256xf32, #tpu.memory_space<vmem>>, %arg11: memref<1x256xf32, #tpu.memory_space<vmem>>, %arg12: memref<256x128xf32, #tpu.memory_space<vmem>>, %arg13: memref<1x128xf32, #tpu.memory_space<vmem>>, %arg14: memref<8x8x128xf32, #tpu.memory_space<vmem>>) attributes {dimension_semantics = [#tpu.dimension_semantics<parallel>], iteration_bounds = array<i64: 1>, scalar_prefetch = 0 : i64, scratch_operands = 0 : i64, tpu.core_type = #tpu.core_type<tc>, window_params = [{transform_indices = @transform_0, window_bounds = array<i64: 8, 8, 128>}, {pipeline_mode = #tpu.pipeline_mode<synchronous>, transform_indices = @transform_1, window_bounds = array<i64: 1, 128>}, {pipeline_mode = #tpu.pipeline_mode<synchronous>, transform_indices = @transform_2, window_bounds = array<i64: 1, 128>}, {pipeline_mode = #tpu.pipeline_mode<synchronous>, transform_indices = @transform_3, window_bounds = array<i64: 128, 384>}, {pipeline_mode = #tpu.pipeline_mode<synchronous>, transform_indices = @transform_4, window_bounds = array<i64: 1, 384>}, {pipeline_mode = #tpu.pipeline_mode<synchronous>, transform_indices = @transform_5, window_bounds = array<i64: 4, 32, 128>}, {pipeline_mode = #tpu.pipeline_mode<synchronous>, transform_indices = @transform_6, window_bounds = array<i64: 1, 128>}, {pipeline_mode = #tpu.pipeline_mode<synchronous>, transform_indices = @transform_7, window_bounds = array<i64: 1, 128>}, {pipeline_mode = #tpu.pipeline_mode<synchronous>, transform_indices = @transform_8, window_bounds = array<i64: 1, 128>}, {pipeline_mode = #tpu.pipeline_mode<synchronous>, transform_indices = @transform_9, window_bounds = array<i64: 128, 256>}, {pipeline_mode = #tpu.pipeline_mode<synchronous>, transform_indices = @transform_10, window_bounds = array<i64: 1, 256>}, {pipeline_mode = #tpu.pipeline_mode<synchronous>, transform_indices = @transform_11, window_bounds = array<i64: 256, 128>}, {pipeline_mode = #tpu.pipeline_mode<synchronous>, transform_indices = @transform_12, window_bounds = array<i64: 1, 128>}, {transform_indices = @transform_13, window_bounds = array<i64: 8, 8, 128>}]} {
    %c0 = arith.constant 0 : index
    %c0_0 = arith.constant 0 : index
    %c0_1 = arith.constant 0 : index
    %0 = vector.load %arg1[%c0, %c0_0, %c0_1] : memref<8x8x128xf32, #tpu.memory_space<vmem>>, vector<8x8x128xf32>
    %1 = vector.shape_cast %0 : vector<8x8x128xf32> to vector<64x128xf32>
    %c0_2 = arith.constant 0 : index
    %c0_3 = arith.constant 0 : index
    %2 = vector.load %arg2[%c0_2, %c0_3] : memref<1x128xf32, #tpu.memory_space<vmem>>, vector<1x128xf32>
    %3 = vector.shape_cast %2 : vector<1x128xf32> to vector<128xf32>
    %c0_4 = arith.constant 0 : index
    %c0_5 = arith.constant 0 : index
    %4 = vector.load %arg3[%c0_4, %c0_5] : memref<1x128xf32, #tpu.memory_space<vmem>>, vector<1x128xf32>
    %5 = vector.shape_cast %4 : vector<1x128xf32> to vector<128xf32>
    %cst = arith.constant dense<0.000000e+00> : vector<64xf32>
    %6 = vector.multi_reduction <add>, %1, %cst [1] : vector<64x128xf32> to vector<64xf32>
    %7 = vector.shape_cast %6 : vector<64xf32> to vector<64x1xf32>
    %cst_6 = arith.constant 1.280000e+02 : f32
    %8 = vector.broadcast %cst_6 : f32 to vector<64x1xf32>
    %9 = arith.divf %7, %8 : vector<64x1xf32>
    %10 = vector.broadcast %9 : vector<64x1xf32> to vector<64x128xf32>
    %11 = arith.subf %1, %10 : vector<64x128xf32>
    %12 = arith.mulf %11, %11 : vector<64x128xf32>
    %cst_7 = arith.constant dense<0.000000e+00> : vector<64xf32>
    %13 = vector.multi_reduction <add>, %12, %cst_7 [1] : vector<64x128xf32> to vector<64xf32>
    %14 = vector.shape_cast %13 : vector<64xf32> to vector<64x1xf32>
    %cst_8 = arith.constant 1.280000e+02 : f32
    %15 = vector.broadcast %cst_8 : f32 to vector<64x1xf32>
    %16 = arith.divf %14, %15 : vector<64x1xf32>
    %17 = vector.broadcast %9 : vector<64x1xf32> to vector<64x128xf32>
    %18 = arith.subf %1, %17 : vector<64x128xf32>
    %cst_9 = arith.constant 9.99999974E-6 : f32
    %19 = vector.broadcast %cst_9 : f32 to vector<64x1xf32>
    %20 = arith.addf %16, %19 : vector<64x1xf32>
    %21 = math.rsqrt %20 : vector<64x1xf32>
    %22 = vector.broadcast %21 : vector<64x1xf32> to vector<64x128xf32>
    %23 = arith.mulf %18, %22 : vector<64x128xf32>
    %24 = vector.shape_cast %3 : vector<128xf32> to vector<1x128xf32>
    %25 = vector.broadcast %24 : vector<1x128xf32> to vector<64x128xf32>
    %26 = arith.mulf %23, %25 : vector<64x128xf32>
    %27 = vector.shape_cast %5 : vector<128xf32> to vector<1x128xf32>
    %28 = vector.broadcast %27 : vector<1x128xf32> to vector<64x128xf32>
    %29 = arith.addf %26, %28 : vector<64x128xf32>
    %c0_10 = arith.constant 0 : index
    %c0_11 = arith.constant 0 : index
    %30 = vector.load %arg4[%c0_10, %c0_11] : memref<128x384xf32, #tpu.memory_space<vmem>>, vector<128x384xf32>
    %cst_12 = arith.constant dense<0.000000e+00> : vector<64x384xf32>
    %31 = tpu.matmul %29, %30, %cst_12 {dimension_numbers = #tpu.dot_dimension_numbers<[1], [0], [0], [1], [0, 0, 1, 1], [], []>} : vector<64x128xf32>, vector<128x384xf32>, vector<64x384xf32> -> vector<64x384xf32>
    %c0_13 = arith.constant 0 : index
    %c0_14 = arith.constant 0 : index
    %32 = vector.load %arg5[%c0_13, %c0_14] : memref<1x384xf32, #tpu.memory_space<vmem>>, vector<1x384xf32>
    %33 = vector.shape_cast %32 : vector<1x384xf32> to vector<384xf32>
    %34 = vector.shape_cast %33 : vector<384xf32> to vector<1x384xf32>
    %35 = vector.broadcast %34 : vector<1x384xf32> to vector<64x384xf32>
    %36 = arith.addf %31, %35 : vector<64x384xf32>
    %37 = vector.extract_strided_slice %36 {offsets = [0, 0], sizes = [64, 32], strides = [1, 1]} : vector<64x384xf32> to vector<64x32xf32>
    %38 = vector.extract_strided_slice %36 {offsets = [0, 32], sizes = [64, 32], strides = [1, 1]} : vector<64x384xf32> to vector<64x32xf32>
    %39 = vector.extract_strided_slice %36 {offsets = [0, 64], sizes = [64, 32], strides = [1, 1]} : vector<64x384xf32> to vector<64x32xf32>
    %40 = vector.extract_strided_slice %36 {offsets = [0, 96], sizes = [64, 32], strides = [1, 1]} : vector<64x384xf32> to vector<64x32xf32>
    %41 = vector.shape_cast %37 : vector<64x32xf32> to vector<1x64x32xf32>
    %42 = vector.shape_cast %38 : vector<64x32xf32> to vector<1x64x32xf32>
    %43 = vector.shape_cast %39 : vector<64x32xf32> to vector<1x64x32xf32>
    %44 = vector.shape_cast %40 : vector<64x32xf32> to vector<1x64x32xf32>
    %45 = tpu.concatenate %41, %42, %43, %44 in 0 : vector<1x64x32xf32>, vector<1x64x32xf32>, vector<1x64x32xf32>, vector<1x64x32xf32> -> vector<4x64x32xf32>
    %46 = vector.shape_cast %45 : vector<4x64x32xf32> to vector<32x8x32xf32>
    %47 = vector.extract_strided_slice %36 {offsets = [0, 128], sizes = [64, 32], strides = [1, 1]} : vector<64x384xf32> to vector<64x32xf32>
    %48 = vector.extract_strided_slice %36 {offsets = [0, 160], sizes = [64, 32], strides = [1, 1]} : vector<64x384xf32> to vector<64x32xf32>
    %49 = vector.extract_strided_slice %36 {offsets = [0, 192], sizes = [64, 32], strides = [1, 1]} : vector<64x384xf32> to vector<64x32xf32>
    %50 = vector.extract_strided_slice %36 {offsets = [0, 224], sizes = [64, 32], strides = [1, 1]} : vector<64x384xf32> to vector<64x32xf32>
    %51 = vector.shape_cast %47 : vector<64x32xf32> to vector<1x64x32xf32>
    %52 = vector.shape_cast %48 : vector<64x32xf32> to vector<1x64x32xf32>
    %53 = vector.shape_cast %49 : vector<64x32xf32> to vector<1x64x32xf32>
    %54 = vector.shape_cast %50 : vector<64x32xf32> to vector<1x64x32xf32>
    %55 = tpu.concatenate %51, %52, %53, %54 in 0 : vector<1x64x32xf32>, vector<1x64x32xf32>, vector<1x64x32xf32>, vector<1x64x32xf32> -> vector<4x64x32xf32>
    %56 = vector.shape_cast %55 : vector<4x64x32xf32> to vector<32x8x32xf32>
    %57 = vector.extract_strided_slice %36 {offsets = [0, 256], sizes = [64, 32], strides = [1, 1]} : vector<64x384xf32> to vector<64x32xf32>
    %58 = vector.extract_strided_slice %36 {offsets = [0, 288], sizes = [64, 32], strides = [1, 1]} : vector<64x384xf32> to vector<64x32xf32>
    %59 = vector.extract_strided_slice %36 {offsets = [0, 320], sizes = [64, 32], strides = [1, 1]} : vector<64x384xf32> to vector<64x32xf32>
    %60 = vector.extract_strided_slice %36 {offsets = [0, 352], sizes = [64, 32], strides = [1, 1]} : vector<64x384xf32> to vector<64x32xf32>
    %61 = vector.shape_cast %57 : vector<64x32xf32> to vector<1x64x32xf32>
    %62 = vector.shape_cast %58 : vector<64x32xf32> to vector<1x64x32xf32>
    %63 = vector.shape_cast %59 : vector<64x32xf32> to vector<1x64x32xf32>
    %64 = vector.shape_cast %60 : vector<64x32xf32> to vector<1x64x32xf32>
    %65 = tpu.concatenate %61, %62, %63, %64 in 0 : vector<1x64x32xf32>, vector<1x64x32xf32>, vector<1x64x32xf32>, vector<1x64x32xf32> -> vector<4x64x32xf32>
    %66 = vector.shape_cast %65 : vector<4x64x32xf32> to vector<32x8x32xf32>
    "tpu.trace_start"() <{level = 10 : i32, message = "gqd,gkd->gqk"}> : () -> ()
    %cst_15 = arith.constant dense<0.000000e+00> : vector<32x8x8xf32>
    %67 = tpu.matmul %46, %56, %cst_15 {dimension_numbers = #tpu.dot_dimension_numbers<[2], [2], [1], [1], [0, 0, 0, 1, 1, 1], [0], [0]>} : vector<32x8x32xf32>, vector<32x8x32xf32>, vector<32x8x8xf32> -> vector<32x8x8xf32>
    "tpu.trace_stop"() : () -> ()
    %cst_16 = arith.constant dense<0xFF800000> : vector<32x8xf32>
    %68 = vector.multi_reduction <maximumf>, %67, %cst_16 [2] : vector<32x8x8xf32> to vector<32x8xf32>
    %69 = vector.shape_cast %68 : vector<32x8xf32> to vector<32x8x1xf32>
    %70 = vector.broadcast %69 : vector<32x8x1xf32> to vector<32x8x8xf32>
    %71 = arith.subf %67, %70 : vector<32x8x8xf32>
    %72 = math.exp %71 : vector<32x8x8xf32>
    %cst_17 = arith.constant dense<0.000000e+00> : vector<32x8xf32>
    %73 = vector.multi_reduction <add>, %72, %cst_17 [2] : vector<32x8x8xf32> to vector<32x8xf32>
    %74 = vector.shape_cast %73 : vector<32x8xf32> to vector<32x8x1xf32>
    %75 = tpu.reciprocal %74 : vector<32x8x1xf32> -> vector<32x8x1xf32>
    %76 = vector.broadcast %75 : vector<32x8x1xf32> to vector<32x8x8xf32>
    %77 = arith.mulf %72, %76 : vector<32x8x8xf32>
    "tpu.trace_start"() <{level = 10 : i32, message = "gqk,gkd->gqd"}> : () -> ()
    %cst_18 = arith.constant dense<0.000000e+00> : vector<32x8x32xf32>
    %78 = tpu.matmul %77, %66, %cst_18 {dimension_numbers = #tpu.dot_dimension_numbers<[2], [1], [1], [2], [0, 0, 0, 1, 1, 2], [0], [0]>} : vector<32x8x8xf32>, vector<32x8x32xf32>, vector<32x8x32xf32> -> vector<32x8x32xf32>
    "tpu.trace_stop"() : () -> ()
    %79 = vector.shape_cast %78 : vector<32x8x32xf32> to vector<4x64x32xf32>
    %c0_19 = arith.constant 0 : index
    %c0_20 = arith.constant 0 : index
    %c0_21 = arith.constant 0 : index
    %80 = vector.load %arg6[%c0_19, %c0_20, %c0_21] : memref<4x32x128xf32, #tpu.memory_space<vmem>>, vector<4x32x128xf32>
    "tpu.trace_start"() <{level = 10 : i32, message = "hmd,hde->hme"}> : () -> ()
    %cst_22 = arith.constant dense<0.000000e+00> : vector<4x64x128xf32>
    %81 = tpu.matmul %79, %80, %cst_22 {dimension_numbers = #tpu.dot_dimension_numbers<[2], [1], [1], [2], [0, 0, 0, 1, 1, 2], [0], [0]>} : vector<4x64x32xf32>, vector<4x32x128xf32>, vector<4x64x128xf32> -> vector<4x64x128xf32>
    "tpu.trace_stop"() : () -> ()
    %cst_23 = arith.constant dense<0.000000e+00> : vector<64x128xf32>
    %82 = vector.multi_reduction <add>, %81, %cst_23 [0] : vector<4x64x128xf32> to vector<64x128xf32>
    %83 = arith.addf %1, %82 : vector<64x128xf32>
    %c0_24 = arith.constant 0 : index
    %c0_25 = arith.constant 0 : index
    %84 = vector.load %arg7[%c0_24, %c0_25] : memref<1x128xf32, #tpu.memory_space<vmem>>, vector<1x128xf32>
    %85 = vector.shape_cast %84 : vector<1x128xf32> to vector<128xf32>
    %86 = vector.shape_cast %85 : vector<128xf32> to vector<1x128xf32>
    %87 = vector.broadcast %86 : vector<1x128xf32> to vector<64x128xf32>
    %88 = arith.addf %83, %87 : vector<64x128xf32>
    %c0_26 = arith.constant 0 : index
    %c0_27 = arith.constant 0 : index
    %89 = vector.load %arg8[%c0_26, %c0_27] : memref<1x128xf32, #tpu.memory_space<vmem>>, vector<1x128xf32>
    %90 = vector.shape_cast %89 : vector<1x128xf32> to vector<128xf32>
    %c0_28 = arith.constant 0 : index
    %c0_29 = arith.constant 0 : index
    %91 = vector.load %arg9[%c0_28, %c0_29] : memref<1x128xf32, #tpu.memory_space<vmem>>, vector<1x128xf32>
    %92 = vector.shape_cast %91 : vector<1x128xf32> to vector<128xf32>
    %cst_30 = arith.constant dense<0.000000e+00> : vector<64xf32>
    %93 = vector.multi_reduction <add>, %88, %cst_30 [1] : vector<64x128xf32> to vector<64xf32>
    %94 = vector.shape_cast %93 : vector<64xf32> to vector<64x1xf32>
    %cst_31 = arith.constant 1.280000e+02 : f32
    %95 = vector.broadcast %cst_31 : f32 to vector<64x1xf32>
    %96 = arith.divf %94, %95 : vector<64x1xf32>
    %97 = vector.broadcast %96 : vector<64x1xf32> to vector<64x128xf32>
    %98 = arith.subf %88, %97 : vector<64x128xf32>
    %99 = arith.mulf %98, %98 : vector<64x128xf32>
    %cst_32 = arith.constant dense<0.000000e+00> : vector<64xf32>
    %100 = vector.multi_reduction <add>, %99, %cst_32 [1] : vector<64x128xf32> to vector<64xf32>
    %101 = vector.shape_cast %100 : vector<64xf32> to vector<64x1xf32>
    %cst_33 = arith.constant 1.280000e+02 : f32
    %102 = vector.broadcast %cst_33 : f32 to vector<64x1xf32>
    %103 = arith.divf %101, %102 : vector<64x1xf32>
    %104 = vector.broadcast %96 : vector<64x1xf32> to vector<64x128xf32>
    %105 = arith.subf %88, %104 : vector<64x128xf32>
    %cst_34 = arith.constant 9.99999974E-6 : f32
    %106 = vector.broadcast %cst_34 : f32 to vector<64x1xf32>
    %107 = arith.addf %103, %106 : vector<64x1xf32>
    %108 = math.rsqrt %107 : vector<64x1xf32>
    %109 = vector.broadcast %108 : vector<64x1xf32> to vector<64x128xf32>
    %110 = arith.mulf %105, %109 : vector<64x128xf32>
    %111 = vector.shape_cast %90 : vector<128xf32> to vector<1x128xf32>
    %112 = vector.broadcast %111 : vector<1x128xf32> to vector<64x128xf32>
    %113 = arith.mulf %110, %112 : vector<64x128xf32>
    %114 = vector.shape_cast %92 : vector<128xf32> to vector<1x128xf32>
    %115 = vector.broadcast %114 : vector<1x128xf32> to vector<64x128xf32>
    %116 = arith.addf %113, %115 : vector<64x128xf32>
    %c0_35 = arith.constant 0 : index
    %c0_36 = arith.constant 0 : index
    %117 = vector.load %arg10[%c0_35, %c0_36] : memref<128x256xf32, #tpu.memory_space<vmem>>, vector<128x256xf32>
    %cst_37 = arith.constant dense<0.000000e+00> : vector<64x256xf32>
    %118 = tpu.matmul %116, %117, %cst_37 {dimension_numbers = #tpu.dot_dimension_numbers<[1], [0], [0], [1], [0, 0, 1, 1], [], []>} : vector<64x128xf32>, vector<128x256xf32>, vector<64x256xf32> -> vector<64x256xf32>
    %c0_38 = arith.constant 0 : index
    %c0_39 = arith.constant 0 : index
    %119 = vector.load %arg11[%c0_38, %c0_39] : memref<1x256xf32, #tpu.memory_space<vmem>>, vector<1x256xf32>
    %120 = vector.shape_cast %119 : vector<1x256xf32> to vector<256xf32>
    %121 = vector.shape_cast %120 : vector<256xf32> to vector<1x256xf32>
    %122 = vector.broadcast %121 : vector<1x256xf32> to vector<64x256xf32>
    %123 = arith.addf %118, %122 : vector<64x256xf32>
    %cst_40 = arith.constant 5.000000e-01 : f32
    %124 = vector.broadcast %cst_40 : f32 to vector<64x256xf32>
    %125 = arith.mulf %124, %123 : vector<64x256xf32>
    %cst_41 = arith.constant 0.707106769 : f32
    %126 = vector.broadcast %cst_41 : f32 to vector<64x256xf32>
    %127 = arith.mulf %123, %126 : vector<64x256xf32>
    %128 = math.erf %127 : vector<64x256xf32>
    %cst_42 = arith.constant 1.000000e+00 : f32
    %129 = vector.broadcast %cst_42 : f32 to vector<64x256xf32>
    %130 = arith.addf %129, %128 : vector<64x256xf32>
    %131 = arith.mulf %125, %130 : vector<64x256xf32>
    %c0_43 = arith.constant 0 : index
    %c0_44 = arith.constant 0 : index
    %132 = vector.load %arg12[%c0_43, %c0_44] : memref<256x128xf32, #tpu.memory_space<vmem>>, vector<256x128xf32>
    %cst_45 = arith.constant dense<0.000000e+00> : vector<64x128xf32>
    %133 = tpu.matmul %131, %132, %cst_45 {dimension_numbers = #tpu.dot_dimension_numbers<[1], [0], [0], [1], [0, 0, 1, 1], [], []>} : vector<64x256xf32>, vector<256x128xf32>, vector<64x128xf32> -> vector<64x128xf32>
    %c0_46 = arith.constant 0 : index
    %c0_47 = arith.constant 0 : index
    %134 = vector.load %arg13[%c0_46, %c0_47] : memref<1x128xf32, #tpu.memory_space<vmem>>, vector<1x128xf32>
    %135 = vector.shape_cast %134 : vector<1x128xf32> to vector<128xf32>
    %136 = vector.shape_cast %135 : vector<128xf32> to vector<1x128xf32>
    %137 = vector.broadcast %136 : vector<1x128xf32> to vector<64x128xf32>
    %138 = arith.addf %133, %137 : vector<64x128xf32>
    %139 = arith.addf %88, %138 : vector<64x128xf32>
    %140 = vector.shape_cast %139 : vector<64x128xf32> to vector<8x8x128xf32>
    %c0_48 = arith.constant 0 : index
    %c0_49 = arith.constant 0 : index
    %c0_50 = arith.constant 0 : index
    %141 = vector.load %arg14[%c0_48, %c0_49, %c0_50] : memref<8x8x128xf32, #tpu.memory_space<vmem>>, vector<8x8x128xf32>
    tpu.vector_store %arg14[%c0_48, %c0_49, %c0_50], %140 {strides = array<i32>} : memref<8x8x128xf32, #tpu.memory_space<vmem>>, vector<8x8x128xf32>,
    return
  }
  func.func @transform_0(%arg0: i32) -> (i32, i32, i32) {
    %c0_i32 = arith.constant 0 : i32
    %c0_i32_0 = arith.constant 0 : i32
    %c0_i32_1 = arith.constant 0 : i32
    return %arg0, %c0_i32, %c0_i32_0 : i32, i32, i32
  }
  func.func @transform_1(%arg0: i32) -> (i32, i32) {
    %c0_i32 = arith.constant 0 : i32
    %c0_i32_0 = arith.constant 0 : i32
    %c0_i32_1 = arith.constant 0 : i32
    return %c0_i32, %c0_i32_0 : i32, i32
  }
  func.func @transform_2(%arg0: i32) -> (i32, i32) {
    %c0_i32 = arith.constant 0 : i32
    %c0_i32_0 = arith.constant 0 : i32
    %c0_i32_1 = arith.constant 0 : i32
    return %c0_i32, %c0_i32_0 : i32, i32
  }
  func.func @transform_3(%arg0: i32) -> (i32, i32) {
    %c0_i32 = arith.constant 0 : i32
    %c0_i32_0 = arith.constant 0 : i32
    %c0_i32_1 = arith.constant 0 : i32
    return %c0_i32, %c0_i32_0 : i32, i32
  }
  func.func @transform_4(%arg0: i32) -> (i32, i32) {
    %c0_i32 = arith.constant 0 : i32
    %c0_i32_0 = arith.constant 0 : i32
    %c0_i32_1 = arith.constant 0 : i32
    return %c0_i32, %c0_i32_0 : i32, i32
  }
  func.func @transform_5(%arg0: i32) -> (i32, i32, i32) {
    %c0_i32 = arith.constant 0 : i32
    %c0_i32_0 = arith.constant 0 : i32
    %c0_i32_1 = arith.constant 0 : i32
    %c0_i32_2 = arith.constant 0 : i32
    return %c0_i32, %c0_i32_0, %c0_i32_1 : i32, i32, i32
  }
  func.func @transform_6(%arg0: i32) -> (i32, i32) {
    %c0_i32 = arith.constant 0 : i32
    %c0_i32_0 = arith.constant 0 : i32
    %c0_i32_1 = arith.constant 0 : i32
    return %c0_i32, %c0_i32_0 : i32, i32
  }
  func.func @transform_7(%arg0: i32) -> (i32, i32) {
    %c0_i32 = arith.constant 0 : i32
    %c0_i32_0 = arith.constant 0 : i32
    %c0_i32_1 = arith.constant 0 : i32
    return %c0_i32, %c0_i32_0 : i32, i32
  }
  func.func @transform_8(%arg0: i32) -> (i32, i32) {
    %c0_i32 = arith.constant 0 : i32
    %c0_i32_0 = arith.constant 0 : i32
    %c0_i32_1 = arith.constant 0 : i32
    return %c0_i32, %c0_i32_0 : i32, i32
  }
  func.func @transform_9(%arg0: i32) -> (i32, i32) {
    %c0_i32 = arith.constant 0 : i32
    %c0_i32_0 = arith.constant 0 : i32
    %c0_i32_1 = arith.constant 0 : i32
    return %c0_i32, %c0_i32_0 : i32, i32
  }
  func.func @transform_10(%arg0: i32) -> (i32, i32) {
    %c0_i32 = arith.constant 0 : i32
    %c0_i32_0 = arith.constant 0 : i32
    %c0_i32_1 = arith.constant 0 : i32
    return %c0_i32, %c0_i32_0 : i32, i32
  }
  func.func @transform_11(%arg0: i32) -> (i32, i32) {
    %c0_i32 = arith.constant 0 : i32
    %c0_i32_0 = arith.constant 0 : i32
    %c0_i32_1 = arith.constant 0 : i32
    return %c0_i32, %c0_i32_0 : i32, i32
  }
  func.func @transform_12(%arg0: i32) -> (i32, i32) {
    %c0_i32 = arith.constant 0 : i32
    %c0_i32_0 = arith.constant 0 : i32
    %c0_i32_1 = arith.constant 0 : i32
    return %c0_i32, %c0_i32_0 : i32, i32
  }
  func.func @transform_13(%arg0: i32) -> (i32, i32, i32) {
    %c0_i32 = arith.constant 0 : i32
    %c0_i32_0 = arith.constant 0 : i32
    %c0_i32_1 = arith.constant 0 : i32
    return %arg0, %c0_i32, %c0_i32_0 : i32, i32, i32
  }
}

</mosaic_0001>

<bundles_post_ra>
// kernel: tpu_custom_call.1
= control target key start
LH: loop header
LB: loop body
LE: loop exit
PB: predicated region body
PF: predicated region fallthrough
CT: control target
= control target key end

     0   :  { %18 = vsyncpa [#allocation3], 0  ;;  %s7229_s0 = inlined_call_operand.hbm [shape: f32[8,8,128], index: 0, kind: input, shape index: {}]   ;;  %s7230_s1 = inlined_call_operand.hbm [shape: f32[1,128], index: 1, kind: input, shape index: {}]   ;;  %s7231_s2 = inlined_call_operand.hbm [shape: f32[1,128], index: 2, kind: input, shape index: {}]   ;;  %s7232_s3 = inlined_call_operand.hbm [shape: f32[128,384], index: 3, kind: input, shape index: {}]   ;;  %s7233_s4 = inlined_call_operand.vmem [shape: f32[1,384], index: 4, kind: input, shape index: {}]   ;;  %s7234_s5 = inlined_call_operand.hbm [shape: f32[4,32,128], index: 5, kind: input, shape index: {}]   ;;  %s7235_s6 = inlined_call_operand.hbm [shape: f32[1,128], index: 6, kind: input, shape index: {}]   ;;  %s7236_s7 = inlined_call_operand.vmem [shape: f32[1,128], index: 7, kind: input, shape index: {}]   ;;  %s7237_s8 = inlined_call_operand.vmem [shape: f32[1,128], index: 8, kind: input, shape index: {}]   ;;  %s7238_s9 = inlined_call_operand.hbm [shape: f32[128,256], index: 9, kind: input, shape index: {}]   ;;  %s7239_s10 = inlined_call_operand.vmem [shape: f32[1,256], index: 10, kind: input, shape index: {}]   ;;  %s7240_s11 = inlined_call_operand.hbm [shape: f32[256,128], index: 11, kind: input, shape index: {}]   ;;  %s7241_s12 = inlined_call_operand.vmem [shape: f32[1,128], index: 12, kind: input, shape index: {}]   ;;  %s7242_s13 = inlined_call_operand.hbm [shape: f32[8,8,128], index: 13, kind: output, shape index: {}]  }
   0x1   :  { %19 = vsyncpa [#allocation6], 0 }
   0x2   :  { %20 = vsyncpa [#allocation9], 0 }
   0x3   :  { %21 = vsyncpa [#allocation12], 0 }
   0x4   :  { %22 = vsyncpa [#allocation15], 0  ;;  %s42_s27 = sshll.u32 %s7230_s1, 4  ;;  %s43_s27 = int_to_ptr.hbm [resolvable:$true] %s42_s27 }
   0x5   :  { %23 = vsyncpa [#allocation4], 0  ;;  %s5147_s28 = smov [#allocation5]   ;;  %s63_s15 = sshll.u32 %s7232_s3, 4  ;;  %s64_s15 = int_to_ptr.hbm [resolvable:$true] %s63_s15 }
   0x6   :  { %s44_s29 = sshll.u32 %s5147_s28, 4  ;;  %s5148_s16 = smov [#allocation8]   ;;  %s45_s29 = int_to_ptr.vmem [resolvable:$true] %s44_s29 }
   0x7   :  { %47 = dma.hbm_to_vmem [thread:$0]  %s43_s27, 16, %s45_s29, [#allocation6]  }
   0x8   :  { %s65_s17 = sshll.u32 %s5148_s16, 4  ;;  %s5149_s18 = smov 384   ;;  %s66_s17 = int_to_ptr.vmem [resolvable:$true] %s65_s17 }
   0x9   :  { %s5150_s19 = smov 24   ;;  %s92_s1 = sshll.u32 %s7235_s6, 4  ;;  %s93_s1 = int_to_ptr.hbm [resolvable:$true] %s92_s1 }
   0xa   :  { %71 = dma.hbm_to_vmem [thread:$0]  %s64_s15, 6144, %s66_s17, [#allocation9], %s5149_s18, %s5149_s18, %s5150_s19  }
   0xb   :  { %s5151_s22 = smov [#allocation11]   ;;  %s28_s3 = sshll.u32 %s7229_s0, 4  ;;  %s29_s3 = int_to_ptr.hbm [resolvable:$true] %s28_s3 }
   0xc   :  { %s94_s23 = sshll.u32 %s5151_s22, 4  ;;  %s5152_s26 = smov [#allocation2]   ;;  %s95_s23 = int_to_ptr.vmem [resolvable:$true] %s94_s23 }
   0xd   :  { %97 = dma.hbm_to_vmem [thread:$0]  %s93_s1, 16, %s95_s23, [#allocation12]  }
   0xe   :  { %s30_s27 = sshll.u32 %s5152_s26, 4  ;;  %s5153_s28 = smov 128   ;;  %s31_s27 = int_to_ptr.vmem [resolvable:$true] %s30_s27 }
   0xf   :  { %s5154_s29 = smov 8   ;;  %s53_s14 = sshll.u32 %s7231_s2, 4  ;;  %s54_s14 = int_to_ptr.hbm [resolvable:$true] %s53_s14 }
  0x10   :  { %36 = dma.hbm_to_vmem [thread:$0]  %s29_s3, 1024, %s31_s27, [#allocation3], %s5153_s28, %s5153_s28, %s5154_s29  }
  0x11   :  { %s5155_s15 = smov [#allocation7]   ;;  %s78_s18 = sshll.u32 %s7234_s5, 4  ;;  %s79_s18 = int_to_ptr.hbm [resolvable:$true] %s78_s18 }
  0x12   :  { %s55_s16 = sshll.u32 %s5155_s15, 4  ;;  %s5156_s19 = smov [#allocation10]   ;;  %s56_s16 = int_to_ptr.vmem [resolvable:$true] %s55_s16 }
  0x13   :  { %58 = dma.hbm_to_vmem [thread:$0]  %s54_s14, 16, %s56_s16, [#allocation6]  }
  0x14   :  { %s80_s20 = sshll.u32 %s5156_s19, 4  ;;  %s106_s22 = sshll.u32 %s7238_s9, 4  ;;  %s81_s20 = int_to_ptr.vmem [resolvable:$true] %s80_s20  ;;  %s107_s22 = int_to_ptr.hbm [resolvable:$true] %s106_s22 }
  0x15   :  { %86 = dma.hbm_to_vmem [thread:$0]  %s79_s18, 2048, %s81_s20, [#allocation9], %s5153_s28, %s5153_s28, %s5154_s29  }
  0x16   :  { %s5157_s2 = smov [#allocation13]   ;;  %s121_s5 = sshll.u32 %s7240_s11, 4  ;;  %s122_s5 = int_to_ptr.hbm [resolvable:$true] %s121_s5 }
  0x17   :  { %s108_s23 = sshll.u32 %s5157_s2, 4  ;;  %s5158_s3 = smov 256   ;;  %s109_s23 = int_to_ptr.vmem [resolvable:$true] %s108_s23 }
  0x18   :  { %s5159_s26 = smov 16   ;;  %s5160_s27 = smov [#allocation14]  }
  0x19   :  { %114 = dma.hbm_to_vmem [thread:$0]  %s107_s22, 4096, %s109_s23, [#allocation12], %s5158_s3, %s5158_s3, %s5159_s26  }
  0x1a   :  { %s123_s6 = sshll.u32 %s5160_s27, 4  ;;  %s124_s6 = int_to_ptr.vmem [resolvable:$true] %s123_s6 }
  0x1b   :  { %129 = dma.hbm_to_vmem [thread:$0]  %s122_s5, 4096, %s124_s6, [#allocation15], %s5153_s28, %s5153_s28, %s5154_s29  }
  0x1c   :  { %5135 = dma.done.wait [#allocation3], 1024  }
  0x1d   :  { %5136 = vsyncadd [#allocation3], 4294966272 }
  0x1e   :  { %5137 = dma.done.wait [#allocation6], 32  }
  0x1f   :  { %5138 = vsyncadd [#allocation6], 4294967264 }
  0x20   :  { %5139 = dma.done.wait [#allocation9], 8192  }
  0x21   :  { %5140 = vsyncadd [#allocation9], 4294959104 }
  0x22   :  { %5141 = dma.done.wait [#allocation12], 4112  }
  0x23   :  { %5142 = vsyncadd [#allocation12], 4294963184 }
  0x24   :  { %5143 = dma.done.wait [#allocation15], 4096  }
  0x25   :  { %5144 = vsyncadd [#allocation15], 4294963200  ;;  %v168_v0 = vld [vmem:[#allocation2 + $0x20] sm:$0xff]  ;;  %v166_v1 = vld [vmem:[#allocation2 + $0x10] sm:$0xff]  ;;  %v5161_v7 = vmov 128.0   ;;  %s5163_s30 = smov 32  }
  0x26   :  { %v164_v2 = vld [vmem:[#allocation2] sm:$0xff]  ;;  %182 = vadd.xlane.f32.xlu2 %v168_v0  ;;  %178 = vadd.xlane.f32.xlu1 %v166_v1  ;;  %v169_v3 = vld [vmem:[#allocation2 + $0x28] sm:$0xff]  ;;  %v167_v4 = vld [vmem:[#allocation2 + $0x18] sm:$0xff]  ;;  %4717 = vrcp.f32 %v5161_v7  ;;  %s5164_s14 = smov 64   ;;  %s4476_s1 = sshll.u32 %s7242_s13, 4  ;;  %s4477_s1 = int_to_ptr.hbm [resolvable:$true] %s4476_s1 }
  0x27   :  { %174 = vadd.xlane.f32.xlu0 %v164_v2  ;;  %v165_v5 = vld [vmem:[#allocation2 + $0x8] sm:$0xff]  ;;  %v170_v6 = vld [vmem:[#allocation2 + $0x30] sm:$0xff]  ;;  %v410_v18 = vld [vmem:[#allocation8 + $0x178] sm:$0xff] }
  0x28   :  { %v408_v16 = vld [vmem:[#allocation8 + $0x168] sm:$0xff]  ;;  %v409_v17 = vld [vmem:[#allocation8 + $0x170] sm:$0xff]  ;;  %v406_v22 = vld [vmem:[#allocation8 + $0x158] sm:$0xff]  ;;  %501 = vmatpush.msra.mxu2 %v410_v18 }
  0x29   :  { %419 = vmatpush.msra.mxu0 %v408_v16  ;;  %460 = vmatpush.msra.mxu1 %v409_v17  ;;  %v405_v21 = vld [vmem:[#allocation8 + $0x150] sm:$0xff]  ;;  %v407_v23 = vld [vmem:[#allocation8 + $0x160] sm:$0xff]  ;;  %v402_v49 = vld [vmem:[#allocation8 + $0x138] sm:$0xff] }
  0x2a   :  { %502 = vmatpush.msra.mxu2 %v407_v23  ;;  %v5291_v39 = vld [vmem:[#allocation2 + $0x38] sm:$0xff]  ;;  %v403_v50 = vld [vmem:[#allocation8 + $0x140] sm:$0xff]  ;;  %v404_v51 = vld [vmem:[#allocation8 + $0x148] sm:$0xff] }
  0x2b   :  { %420 = vmatpush.msra.mxu0 %v405_v21  ;;  %461 = vmatpush.msra.mxu1 %v406_v22  ;;  %v399_v52 = vld [vmem:[#allocation8 + $0x120] sm:$0xff]  ;;  %v400_v53 = vld [vmem:[#allocation8 + $0x128] sm:$0xff]  ;;  %v401_v54 = vld [vmem:[#allocation8 + $0x130] sm:$0xff] }
  0x2c   :  { %v4718_v8 = vpop.eup %4717  ;;  %503 = vmatpush.msra.mxu2 %v404_v51  ;;  %v396_v55 = vld [vmem:[#allocation8 + $0x108] sm:$0xff]  ;;  %v397_v56 = vld [vmem:[#allocation8 + $0x110] sm:$0xff]  ;;  %v398_v57 = vld [vmem:[#allocation8 + $0x118] sm:$0xff] }
  0x2d   :  { %v191_v9 = vmul.f32 128.0, %v4718_v8  ;;  %vm195_vm0 = vweird.f32 %v4718_v8  ;;  %421 = vmatpush.msra.mxu0 %v402_v49  ;;  %462 = vmatpush.msra.mxu1 %v403_v50  ;;  %v393_v58 = vld [vmem:[#allocation8 + $0xf0] sm:$0xff]  ;;  %v394_v59 = vld [vmem:[#allocation8 + $0xf8] sm:$0xff]  ;;  %v395_v60 = vld [vmem:[#allocation8 + $0x100] sm:$0xff] }
  0x2e   :  { %184 = vadd.xlane.f32.xlu2 %v169_v3  ;;  %180 = vadd.xlane.f32.xlu1 %v167_v4  ;;  %v390_v61 = vld [vmem:[#allocation8 + $0xd8] sm:$0xff]  ;;  %v391_v62 = vld [vmem:[#allocation8 + $0xe0] sm:$0xff]  ;;  %v392_v63 = vld [vmem:[#allocation8 + $0xe8] sm:$0xff] }
  0x2f   :  { %176 = vadd.xlane.f32.xlu0 %v165_v5  ;;  %v192_v10 = vsub.f32 1.0, %v191_v9  ;;  %422 = vmatpush.msra.mxu0 %v399_v52  ;;  %v382_v7 = vld [vmem:[#allocation8 + $0x98] sm:$0xff]  ;;  %v372_v16 = vld [vmem:[#allocation8 + $0x48] sm:$0xff]  ;;  %v373_v17 = vld [vmem:[#allocation8 + $0x50] sm:$0xff] }
  0x30   :  { %463 = vmatpush.msra.mxu1 %v400_v53  ;;  %504 = vmatpush.msra.mxu2 %v401_v54  ;;  %v378_v9 = vld [vmem:[#allocation8 + $0x78] sm:$0xff]  ;;  %v371_v21 = vld [vmem:[#allocation8 + $0x40] sm:$0xff] }
  0x31   :  { %v193_v11 = vmul.f32 %v4718_v8, %v192_v10  ;;  %423 = vmatpush.msra.mxu0 %v396_v55  ;;  %v379_v10 = vld [vmem:[#allocation8 + $0x80] sm:$0xff]  ;;  %v374_v18 = vld [vmem:[#allocation8 + $0x58] sm:$0xff] }
  0x32   :  { %464 = vmatpush.msra.mxu1 %v397_v56  ;;  %505 = vmatpush.msra.mxu2 %v398_v57  ;;  %v366_v22 = vld [vmem:[#allocation8 + $0x18] sm:$0xff]  ;;  %v367_v23 = vld [vmem:[#allocation8 + $0x20] sm:$0xff] }
  0x33   :  { %v194_v12 = vadd.f32 %v4718_v8, %v193_v11  ;;  %424 = vmatpush.msra.mxu0 %v393_v58  ;;  %v380_v11 = vld [vmem:[#allocation8 + $0x88] sm:$0xff] }
  0x34   :  { %465 = vmatpush.msra.mxu1 %v394_v59  ;;  %506 = vmatpush.msra.mxu2 %v395_v60 }
  0x35   :  { %v5269_v13 = vsel %vm195_vm0, %v4718_v8, %v194_v12  ;;  %425 = vmatpush.msra.mxu0 %v390_v61  ;;  %v383_v8 = vld [vmem:[#allocation8 + $0xa0] sm:$0xff] }
  0x36   :  { %186 = vadd.xlane.f32.xlu1 %v170_v6  ;;  %7254 = vst [vmem:[#allocation23_spill] sm:$0xff] %v5269_v13  ;;  %466 = vmatpush.msra.mxu1 %v391_v62  ;;  %v375_v12 = vld [vmem:[#allocation8 + $0x60] sm:$0xff] }
  0x37   :  { %507 = vmatpush.msra.mxu2 %v392_v63 }
  0x99   :  { %v183_v14 = vpop.xlane.xlu2 %182  ;;  %v179_v15 = vpop.xlane.xlu1 %178 }
  0x9a   :  { %v199_v19 = vmul.f32 %v5269_v13, %v179_v15  ;;  %v175_v20 = vpop.xlane.xlu0 %174  ;;  %v201_v35 = vmul.f32 %v5269_v13, %v183_v14  ;;  %v376_v14 = vld [vmem:[#allocation8 + $0x68] sm:$0xff]  ;;  %v377_v15 = vld [vmem:[#allocation8 + $0x70] sm:$0xff] }
  0x9b   :  { %v197_v24 = vmul.f32 %v5269_v13, %v175_v20  ;;  %v370_v20 = vld [vmem:[#allocation8 + $0x38] sm:$0xff] }
  0x9c   :  { %v5273_v25 = vsub.f32 %v166_v1, %v199_v19  ;;  %v5296_v41 = vsub.f32 %v168_v0, %v201_v35  ;;  %v387_v0 = vld [vmem:[#allocation8 + $0xc0] sm:$0xff]  ;;  %v388_v1 = vld [vmem:[#allocation8 + $0xc8] sm:$0xff]  ;;  %v369_v19 = vld [vmem:[#allocation8 + $0x30] sm:$0xff] }
  0x9d   :  { %v5275_v26 = vsub.f32 %v164_v2, %v197_v24  ;;  %v389_v2 = vld [vmem:[#allocation8 + $0xd0] sm:$0xff]  ;;  %426 = vmatpush.msra.mxu0 %v387_v0  ;;  %467 = vmatpush.msra.mxu1 %v388_v1  ;;  %v368_v24 = vld [vmem:[#allocation8 + $0x28] sm:$0xff] }
  0x9e   :  { %v215_v27 = vmul.f32 %v5273_v25, %v5273_v25  ;;  %v217_v44 = vmul.f32 %v5296_v41, %v5296_v41  ;;  %508 = vmatpush.msra.mxu2 %v389_v2 }
  0x9f   :  { %v213_v28 = vmul.f32 %v5275_v26, %v5275_v26 }
  0xa0   :  { %225 = vadd.xlane.f32.xlu1 %v215_v27  ;;  %v363_v27 = vld [vmem:[#allocation8] sm:$0xff] }
  0xa1   :  { %221 = vadd.xlane.f32.xlu0 %v213_v28  ;;  %v185_v29 = vpop.xlane.xlu2 %184  ;;  %v181_v30 = vpop.xlane.xlu1 %180  ;;  %v364_v28 = vld [vmem:[#allocation8 + $0x8] sm:$0xff] }
  0xa2   :  { %v202_v31 = vmul.f32 %v5269_v13, %v185_v29  ;;  %v177_v32 = vpop.xlane.xlu0 %176  ;;  %v200_v37 = vmul.f32 %v5269_v13, %v181_v30  ;;  %v365_v29 = vld [vmem:[#allocation8 + $0x10] sm:$0xff] }
  0xa3   :  { %v198_v33 = vmul.f32 %v5269_v13, %v177_v32 }
  0xa4   :  { %v5283_v34 = vsub.f32 %v169_v3, %v202_v31  ;;  %v5298_v42 = vsub.f32 %v167_v4, %v200_v37  ;;  %v384_v3 = vld [vmem:[#allocation8 + $0xa8] sm:$0xff]  ;;  %v385_v4 = vld [vmem:[#allocation8 + $0xb0] sm:$0xff] }
  0xa5   :  { %v5286_v36 = vsub.f32 %v165_v5, %v198_v33  ;;  %v386_v5 = vld [vmem:[#allocation8 + $0xb8] sm:$0xff]  ;;  %427 = vmatpush.msra.mxu0 %v384_v3  ;;  %468 = vmatpush.msra.mxu1 %v385_v4 }
  0xa6   :  { %v218_v38 = vmul.f32 %v5283_v34, %v5283_v34  ;;  %v216_v45 = vmul.f32 %v5298_v42, %v5298_v42  ;;  %509 = vmatpush.msra.mxu2 %v386_v5  ;;  %v5327_v4 = vld [vmem:[#allocation5] ss:$0 sm:$0xff] }
  0xa7   :  { %v214_v40 = vmul.f32 %v5286_v36, %v5286_v36  ;;  %469 = vmatpush.msra.mxu1 %v382_v7 }
  0xa8   :  { %231 = vadd.xlane.f32.xlu1 %v218_v38  ;;  %510 = vmatpush.msra.mxu2 %v383_v8 }
  0xa9   :  { %188 = vadd.xlane.f32.xlu0 %v5291_v39  ;;  %223 = vadd.xlane.f32.xlu2 %v214_v40  ;;  %v187_v43 = vpop.xlane.xlu1 %186 }
  0xaa   :  { %v203_v46 = vmul.f32 %v5269_v13, %v187_v43  ;;  %470 = vmatpush.msra.mxu1 %v379_v10  ;;  %511 = vmatpush.msra.mxu2 %v380_v11 }
  0xac   :  { %v5305_v47 = vsub.f32 %v170_v6, %v203_v46  ;;  %v381_v6 = vld [vmem:[#allocation8 + $0x90] sm:$0xff]  ;;  %471 = vmatpush.msra.mxu1 %v376_v14  ;;  %512 = vmatpush.msra.mxu2 %v377_v15 }
  0xad   :  { %428 = vmatpush.msra.mxu0 %v381_v6 }
  0xae   :  { %v219_v48 = vmul.f32 %v5305_v47, %v5305_v47  ;;  %472 = vmatpush.msra.mxu1 %v373_v17  ;;  %513 = vmatpush.msra.mxu2 %v374_v18 }
  0xaf   :  { %429 = vmatpush.msra.mxu0 %v378_v9  ;;  %v5333_v9 = vld [vmem:[#allocation7] ss:$0 sm:$0xff] }
  0xb0   :  { %473 = vmatpush.msra.mxu1 %v370_v20  ;;  %514 = vmatpush.msra.mxu2 %v371_v21 }
  0xb1   :  { %229 = vadd.xlane.f32.xlu0 %v217_v44  ;;  %227 = vadd.xlane.f32.xlu2 %v216_v45 }
  0xb2   :  { %430 = vmatpush.msra.mxu0 %v375_v12  ;;  %474 = vmatpush.msra.mxu1 %v367_v23 }
  0xb3   :  { %515 = vmatpush.msra.mxu2 %v368_v24 }
  0xb4   :  { %431 = vmatpush.msra.mxu0 %v372_v16  ;;  %475 = vmatpush.msra.mxu1 %v364_v28 }
  0xb5   :  { %516 = vmatpush.msra.mxu2 %v365_v29 }
  0xb6   :  { %432 = vmatpush.msra.mxu0 %v369_v19 }
  0xb8   :  { %433 = vmatpush.msra.mxu0 %v366_v22 }
  0xb9   :  { %233 = vadd.xlane.f32.xlu2 %v219_v48 }
  0xba   :  { %434 = vmatpush.msra.mxu0 %v363_v27 }
 0x113   :  { %v226_v30 = vpop.xlane.xlu1 %225 }
 0x114   :  { %v239_v31 = vmul.f32 %v226_v30, %v5269_v13  ;;  %v222_v32 = vpop.xlane.xlu0 %221 }
 0x115   :  { %v237_v33 = vmul.f32 %v222_v32, %v5269_v13 }
 0x116   :  { %v247_v35 = vadd.f32 1e-05, %v239_v31 }
 0x117   :  { %v245_v37 = vadd.f32 1e-05, %v237_v33 }
 0x118   :  { %4719 = vrsqrt.f32 %v247_v35  ;;  %vm279_vm6 = vweird.f32 %v247_v35 }
 0x119   :  { %4721 = vrsqrt.f32 %v245_v37  ;;  %vm259_vm2 = vweird.f32 %v245_v37 }
 0x11b   :  { %v232_v54 = vpop.xlane.xlu1 %231 }
 0x11c   :  { %v224_v38 = vpop.xlane.xlu2 %223  ;;  %v189_v40 = vpop.xlane.xlu0 %188  ;;  %v242_v62 = vmul.f32 %v232_v54, %v5269_v13 }
 0x11d   :  { %v238_v43 = vmul.f32 %v224_v38, %v5269_v13  ;;  %v204_v44 = vmul.f32 %v5269_v13, %v189_v40 }
 0x11e   :  { %v5313_v45 = vpop.eup %4719  ;;  %v5330_v7 = vadd.f32 1e-05, %v242_v62 }
 0x11f   :  { %v4722_v46 = vpop.eup %4721  ;;  %v246_v48 = vadd.f32 1e-05, %v238_v43  ;;  %v5316_v49 = vsub.f32 %v5291_v39, %v204_v44  ;;  %v274_v50 = vmul.f32 %v5313_v45, %v247_v35  ;;  %vm280_vm7 = vweird.f32 %v5313_v45 }
 0x120   :  { %v254_v51 = vmul.f32 %v4722_v46, %v245_v37  ;;  %vm260_vm1 = vweird.f32 %v4722_v46  ;;  %vm5341_vm9 = vmor %vm279_vm6, %vm280_vm7  ;;  %vm309_vm0 = vweird.f32 %v5330_v7 }
 0x121   :  { %4723 = vrsqrt.f32 %v246_v48  ;;  %v220_v52 = vmul.f32 %v5316_v49, %v5316_v49  ;;  %v275_v55 = vmul.f32 %v5313_v45, %v274_v50  ;;  %vm261_vm3 = vmor %vm259_vm2, %vm260_vm1  ;;  %vm269_vm4 = vweird.f32 %v246_v48 }
 0x122   :  { %v255_v53 = vmul.f32 %v4722_v46, %v254_v51 }
 0x123   :  { %235 = vadd.xlane.f32.xlu0 %v220_v52  ;;  %v276_v0 = vmul.f32 0.5, %v275_v55 }
 0x124   :  { %v256_v56 = vmul.f32 0.5, %v255_v53  ;;  %v228_v57 = vpop.xlane.xlu2 %227  ;;  %v230_v58 = vpop.xlane.xlu0 %229 }
 0x125   :  { %v240_v59 = vmul.f32 %v228_v57, %v5269_v13  ;;  %v241_v39 = vmul.f32 %v230_v58, %v5269_v13  ;;  %v277_v10 = vsub.f32 1.5, %v276_v0 }
 0x126   :  { %v257_v60 = vsub.f32 1.5, %v256_v56 }
 0x127   :  { %v4724_v61 = vpop.eup %4723  ;;  %v248_v63 = vadd.f32 1e-05, %v240_v59  ;;  %v5325_v3 = vadd.f32 1e-05, %v241_v39  ;;  %v278_v19 = vmul.f32 %v5313_v45, %v277_v10 }
 0x128   :  { %v258_v1 = vmul.f32 %v4722_v46, %v257_v60  ;;  %v264_v2 = vmul.f32 %v4724_v61, %v246_v48  ;;  %vm270_vm5 = vweird.f32 %v4724_v61 }
 0x129   :  { %4725 = vrsqrt.f32 %v248_v63  ;;  %vm271_vm8 = vmor %vm269_vm4, %vm270_vm5  ;;  %v282_v30 = vsel %vm5341_vm9, %v5313_v45, %v278_v19  ;;  %vm289_vm10 = vweird.f32 %v248_v63  ;;  %vm299_vm13 = vweird.f32 %v5325_v3 }
 0x12a   :  { %v265_v5 = vmul.f32 %v4724_v61, %v264_v2  ;;  %4727 = vrsqrt.f32 %v5325_v3  ;;  %v262_v6 = vsel %vm261_vm3, %v4722_v46, %v258_v1  ;;  %v335_v40 = vmul.f32 %v282_v30, %v5273_v25 }
 0x12b   :  { %v333_v8 = vmul.f32 %v262_v6, %v5275_v26  ;;  %4729 = vrsqrt.f32 %v5330_v7  ;;  %vm734_vm9 = vcmask 261120  }
 0x12c   :  { %v266_v11 = vmul.f32 0.5, %v265_v5  ;;  %v234_v12 = vpop.xlane.xlu2 %233  ;;  %v346_v45 = vmul.f32 %v5327_v4, %v335_v40 }
 0x12d   :  { %v344_v14 = vmul.f32 %v5327_v4, %v333_v8  ;;  %v243_v17 = vmul.f32 %v234_v12, %v5269_v13 }
 0x12e   :  { %v267_v15 = vsub.f32 1.5, %v266_v11  ;;  %v357_v52 = vadd.f32 %v5333_v9, %v346_v45 }
 0x12f   :  { %v4726_v16 = vpop.eup %4725  ;;  %v355_v26 = vadd.f32 %v5333_v9, %v344_v14  ;;  %v251_v28 = vadd.f32 1e-05, %v243_v17 }
 0x130   :  { %v4728_v18 = vpop.eup %4727  ;;  %v268_v20 = vmul.f32 %v4724_v61, %v267_v15  ;;  %v284_v21 = vmul.f32 %v4726_v16, %v248_v63  ;;  %vm290_vm11 = vweird.f32 %v4726_v16 }
 0x131   :  { %v294_v23 = vmul.f32 %v4728_v18, %v5325_v3  ;;  %435 = vmatmul.f32.vlgmr.msra.gmra.mxu0 %v355_v26  ;;  %476 = vmatmul.f32.vlgmr.msra.gmra.mxu1 %v355_v26  ;;  %v4730_v33 = vpop.eup %4729  ;;  %4731 = vrsqrt.f32 %v251_v28  ;;  %vm291_vm12 = vmor %vm289_vm10, %vm290_vm11  ;;  %vm300_vm14 = vweird.f32 %v4728_v18  ;;  %vm319_vm3 = vweird.f32 %v251_v28 }
 0x132   :  { %v285_v24 = vmul.f32 %v4726_v16, %v284_v21  ;;  %517 = vmatmul.f32.vlgmr.msra.gmra.mxu2 %v355_v26  ;;  %v272_v27 = vsel %vm271_vm8, %v4724_v61, %v268_v20  ;;  %v304_v43 = vmul.f32 %v4730_v33, %v5330_v7  ;;  %vm301_vm15 = vmor %vm299_vm13, %vm300_vm14  ;;  %vm310_vm1 = vweird.f32 %v4730_v33  ;;  %v5374_v26 = vld [vmem:[%s7233_s4] sm:$0x7]  ;;  %s5162_s4 = smov 96  }
 0x133   :  { %v334_v29 = vmul.f32 %v272_v27, %v5286_v36  ;;  %v295_v32 = vmul.f32 %v4728_v18, %v294_v23  ;;  %vm311_vm2 = vmor %vm309_vm0, %vm310_vm1  ;;  %v5377_v19 = vperm.slane %v5374_v26, 0  ;;  %v5380_v20 = vperm.slane %v5374_v26, 1 }
 0x134   :  { %v286_v31 = vmul.f32 0.5, %v285_v24  ;;  %v305_v46 = vmul.f32 %v4730_v33, %v304_v43  ;;  %vm1503_vm10 = vcmask 64512  }
 0x135   :  { %v345_v35 = vmul.f32 %v5327_v4, %v334_v29  ;;  %v296_v44 = vmul.f32 0.5, %v295_v32 }
 0x136   :  { %v287_v37 = vsub.f32 1.5, %v286_v31  ;;  %v306_v53 = vmul.f32 0.5, %v305_v46 }
 0x137   :  { %v356_v38 = vadd.f32 %v5333_v9, %v345_v35  ;;  %v297_v50 = vsub.f32 1.5, %v296_v44  ;;  %v4732_v51 = vpop.eup %4731 }
 0x138   :  { %v288_v36 = vmul.f32 %v4726_v16, %v287_v37  ;;  %v314_v55 = vmul.f32 %v4732_v51, %v251_v28  ;;  %v307_v57 = vsub.f32 1.5, %v306_v53  ;;  %vm320_vm4 = vweird.f32 %v4732_v51 }
 0x139   :  { %438 = vmatmul.f32.gmra.mxu0 %v356_v38  ;;  %479 = vmatmul.f32.gmra.mxu1 %v356_v38  ;;  %v298_v54 = vmul.f32 %v4728_v18, %v297_v50  ;;  %vm321_vm5 = vmor %vm319_vm3, %vm320_vm4 }
 0x13a   :  { %520 = vmatmul.f32.gmra.mxu2 %v356_v38  ;;  %v292_v48 = vsel %vm291_vm12, %v4726_v16, %v288_v36  ;;  %v315_v58 = vmul.f32 %v4732_v51, %v314_v55 }
 0x13b   :  { %v336_v25 = vmul.f32 %v292_v48, %v5298_v42  ;;  %v302_v59 = vsel %vm301_vm15, %v4728_v18, %v298_v54  ;;  %v308_v42 = vmul.f32 %v4730_v33, %v307_v57 }
 0x13c   :  { %v337_v60 = vmul.f32 %v302_v59, %v5296_v41  ;;  %v316_v61 = vmul.f32 0.5, %v315_v58 }
 0x13d   :  { %v347_v56 = vmul.f32 %v5327_v4, %v336_v25  ;;  %v312_v63 = vsel %vm311_vm2, %v4730_v33, %v308_v42 }
 0x13e   :  { %v348_v62 = vmul.f32 %v5327_v4, %v337_v60  ;;  %v317_v0 = vsub.f32 1.5, %v316_v61  ;;  %v338_v2 = vmul.f32 %v312_v63, %v5283_v34  ;;  %v5493_v61 = vperm.slane %v5374_v26, 2 }
 0x13f   :  { %v358_v39 = vadd.f32 %v5333_v9, %v347_v56 }
 0x140   :  { %v359_v1 = vadd.f32 %v5333_v9, %v348_v62  ;;  %v318_v3 = vmul.f32 %v4732_v51, %v317_v0  ;;  %v349_v41 = vmul.f32 %v5327_v4, %v338_v2 }
 0x141   :  { %441 = vmatmul.f32.gmra.mxu0 %v357_v52  ;;  %482 = vmatmul.f32.gmra.mxu1 %v357_v52 }
 0x142   :  { %523 = vmatmul.f32.gmra.mxu2 %v357_v52  ;;  %v322_v5 = vsel %vm321_vm5, %v4732_v51, %v318_v3  ;;  %v360_v6 = vadd.f32 %v5333_v9, %v349_v41 }
 0x143   :  { %v339_v7 = vmul.f32 %v322_v5, %v5305_v47 }
 0x145   :  { %v350_v8 = vmul.f32 %v5327_v4, %v339_v7 }
 0x147   :  { %v361_v10 = vadd.f32 %v5333_v9, %v350_v8 }
 0x149   :  { %444 = vmatmul.f32.gmra.mxu0 %v358_v39  ;;  %485 = vmatmul.f32.gmra.mxu1 %v358_v39 }
 0x14a   :  { %526 = vmatmul.f32.gmra.mxu2 %v358_v39 }
 0x151   :  { %447 = vmatmul.f32.gmra.mxu0 %v359_v1  ;;  %488 = vmatmul.f32.gmra.mxu1 %v359_v1 }
 0x152   :  { %529 = vmatmul.f32.gmra.mxu2 %v359_v1 }
 0x159   :  { %450 = vmatmul.f32.gmra.mxu0 %v360_v6  ;;  %491 = vmatmul.f32.gmra.mxu1 %v360_v6 }
 0x15a   :  { %532 = vmatmul.f32.gmra.mxu2 %v360_v6 }
 0x161   :  { %453 = vmatmul.f32.gmra.mxu0 %v361_v10  ;;  %494 = vmatmul.f32.gmra.mxu1 %v361_v10 }
 0x162   :  { %535 = vmatmul.f32.gmra.mxu2 %v361_v10 }
 0x196   :  { %v236_v34 = vpop.xlane.xlu0 %235 }
 0x197   :  { %v244_v11 = vmul.f32 %v236_v34, %v5269_v13 }
 0x199   :  { %v252_v12 = vadd.f32 1e-05, %v244_v11 }
 0x19b   :  { %4733 = vrsqrt.f32 %v252_v12  ;;  %vm329_vm7 = vweird.f32 %v252_v12 }
 0x1a1   :  { %v4734_v14 = vpop.eup %4733 }
 0x1a2   :  { %v324_v15 = vmul.f32 %v4734_v14, %v252_v12  ;;  %vm330_vm6 = vweird.f32 %v4734_v14 }
 0x1a3   :  { %vm331_vm8 = vmor %vm329_vm7, %vm330_vm6 }
 0x1a4   :  { %v325_v16 = vmul.f32 %v4734_v14, %v324_v15 }
 0x1a6   :  { %v326_v17 = vmul.f32 0.5, %v325_v16 }
 0x1a8   :  { %v327_v47 = vsub.f32 1.5, %v326_v17 }
 0x1aa   :  { %v328_v18 = vmul.f32 %v4734_v14, %v327_v47 }
 0x1ac   :  { %v332_v21 = vsel %vm331_vm8, %v4734_v14, %v328_v18 }
 0x1ad   :  { %v340_v22 = vmul.f32 %v332_v21, %v5316_v49 }
 0x1ae   :  { %v436_v23 = vpop.f32.mrf.mxu0  ;;  %v477_v24 = vpop.f32.mrf.mxu1 }
 0x1af   :  { %v437_v27 = vadd.f32 %v436_v23, %v5377_v19  ;;  %v478_v28 = vadd.f32 %v477_v24, %v5380_v20  ;;  %v351_v29 = vmul.f32 %v5327_v4, %v340_v22 }
 0x1b1   :  { %606 = vrot.lane.b32.xlu1 %v478_v28, %s5162_s4  ;;  %4493 = vmatpush.xpose.msk.msra.mxu3 %vm734_vm9, %v478_v28  ;;  %v362_v30 = vadd.f32 %v5333_v9, %v351_v29 }
 0x1b2   :  { %550 = vrot.lane.b32.xlu2 %v437_v27, %s5162_s4  ;;  %638 = vrot.lane.b32.xlu0 %v478_v28, %s5163_s30 }
 0x1b3   :  { %456 = vmatmul.f32.gmra.mxu0 %v362_v30  ;;  %497 = vmatmul.f32.gmra.mxu1 %v362_v30 }
 0x1b4   :  { %538 = vmatmul.f32.gmra.mxu2 %v362_v30  ;;  %4494 = vmatmul.msk.f32.vlgmr.msra.gmra.mxu3 %vm734_vm9, %v437_v27 }
 0x1b5   :  { %v518_v57 = vpop.f32.mrf.mxu2 }
 0x1b6   :  { %v439_v49 = vpop.f32.mrf.mxu0  ;;  %v480_v31 = vpop.f32.mrf.mxu1  ;;  %v5500_v0 = vadd.f32 %v518_v57, %v5493_v61 }
 0x1b7   :  { %v5393_v4 = vadd.f32 %v480_v31, %v5380_v20  ;;  %v5399_v9 = vadd.f32 %v439_v49, %v5377_v19 }
 0x1b9   :  { %622 = vrot.lane.b32.xlu1 %v478_v28, %s5164_s14  ;;  %4495 = vmatpush.xpose.msk.msrb.mxu3 %vm734_vm9, %v5393_v4 }
 0x1ba   :  { %566 = vrot.lane.b32.xlu2 %v437_v27, %s5164_s14  ;;  %608 = vrot.lane.b32.xlu0 %v5393_v4, %s5162_s4 }
 0x1bc   :  { %4496 = vmatmul.msk.f32.vlgmr.msrb.gmra.mxu3 %vm734_vm9, %v5399_v9 }
 0x1bd   :  { %v521_v58 = vpop.f32.mrf.mxu2 }
 0x1be   :  { %v442_v32 = vpop.f32.mrf.mxu0  ;;  %v483_v33 = vpop.f32.mrf.mxu1  ;;  %v5497_v62 = vadd.f32 %v521_v58, %v5493_v61 }
 0x1bf   :  { %v5407_v35 = vadd.f32 %v483_v33, %v5380_v20  ;;  %v443_v37 = vadd.f32 %v442_v32, %v5377_v19 }
 0x1c0   :  { %v5506_v2 = vpack.i.bf16 %v5497_v62, %v5500_v0 }
 0x1c1   :  { %582 = vrot.lane.b32.xlu1 %v437_v27, %s5163_s30  ;;  %4497 = vmatpush.xpose.msk.msra.mxu3 %vm734_vm9, %v5407_v35 }
 0x1c2   :  { %552 = vrot.lane.b32.xlu2 %v5399_v9, %s5162_s4  ;;  %624 = vrot.lane.b32.xlu0 %v5393_v4, %s5164_s14 }
 0x1c4   :  { %4498 = vmatmul.msk.f32.vlgmr.msra.gmra.mxu3 %vm734_vm9, %v443_v37 }
 0x1c5   :  { %v5484_v59 = vpop.f32.mrf.mxu2 }
 0x1c6   :  { %v445_v38 = vpop.f32.mrf.mxu0  ;;  %v486_v40 = vpop.f32.mrf.mxu1 }
 0x1c7   :  { %v487_v43 = vadd.f32 %v486_v40, %v5380_v20  ;;  %v5423_v36 = vadd.f32 %v445_v38, %v5377_v19 }
 0x1c9   :  { %568 = vrot.lane.b32.xlu1 %v5399_v9, %s5164_s14  ;;  %4499 = vmatpush.xpose.msk.msrb.mxu3 %vm734_vm9, %v487_v43 }
 0x1ca   :  { %628 = vrot.lane.b32.xlu2 %v487_v43, %s5164_s14  ;;  %554 = vrot.lane.b32.xlu0 %v443_v37, %s5162_s4 }
 0x1cc   :  { %4500 = vmatmul.msk.f32.vlgmr.msrb.gmra.mxu3 %vm734_vm9, %v5423_v36 }
 0x1cd   :  { %v5488_v60 = vpop.f32.mrf.mxu2 }
 0x1ce   :  { %v448_v44 = vpop.f32.mrf.mxu0  ;;  %v489_v45 = vpop.f32.mrf.mxu1 }
 0x1cf   :  { %v5430_v46 = vadd.f32 %v489_v45, %v5380_v20  ;;  %v449_v48 = vadd.f32 %v448_v44, %v5377_v19 }
 0x1d1   :  { %610 = vrot.lane.b32.xlu1 %v5407_v35, %s5162_s4  ;;  %4501 = vmatpush.xpose.msk.msra.mxu3 %vm734_vm9, %v5430_v46 }
 0x1d2   :  { %626 = vrot.lane.b32.xlu0 %v5407_v35, %s5164_s14  ;;  %614 = vrot.lane.b32.xlu2 %v5430_v46, %s5162_s4 }
 0x1d4   :  { %4502 = vmatmul.msk.f32.vlgmr.msra.gmra.mxu3 %vm734_vm9, %v449_v48 }
 0x1d5   :  { %v5502_v1 = vpop.f32.mrf.mxu2 }
 0x1d6   :  { %v451_v50 = vpop.f32.mrf.mxu0  ;;  %v492_v51 = vpop.f32.mrf.mxu1 }
 0x1d7   :  { %v493_v52 = vadd.f32 %v492_v51, %v5380_v20  ;;  %v5446_v25 = vadd.f32 %v451_v50, %v5377_v19 }
 0x1d9   :  { %570 = vrot.lane.b32.xlu1 %v443_v37, %s5164_s14  ;;  %4503 = vmatpush.xpose.msk.msrb.mxu3 %vm734_vm9, %v493_v52 }
 0x1da   :  { %612 = vrot.lane.b32.xlu0 %v487_v43, %s5162_s4  ;;  %630 = vrot.lane.b32.xlu2 %v5430_v46, %s5164_s14 }
 0x1dc   :  { %4504 = vmatmul.msk.f32.vlgmr.msrb.gmra.mxu3 %vm734_vm9, %v5446_v25 }
 0x1dd   :  { %v533_v6 = vpop.f32.mrf.mxu2 }
 0x1de   :  { %v495_v53 = vpop.f32.mrf.mxu1  ;;  %v454_v54 = vpop.f32.mrf.mxu0  ;;  %v5571_v32 = vadd.f32 %v533_v6, %v5493_v61 }
 0x1df   :  { %v5454_v55 = vadd.f32 %v495_v53, %v5380_v20  ;;  %v5461_v56 = vadd.f32 %v454_v54, %v5377_v19 }
 0x1e0   :  { %7259 = vst [vmem:[#allocation26_spill] sm:$0xff] %v5571_v32 }
 0x1e1   :  { %556 = vrot.lane.b32.xlu1 %v5423_v36, %s5162_s4  ;;  %4505 = vmatpush.xpose.msk.msra.mxu3 %vm734_vm9, %v5454_v55 }
 0x1e2   :  { %572 = vrot.lane.b32.xlu0 %v5423_v36, %s5164_s14  ;;  %616 = vrot.lane.b32.xlu2 %v493_v52, %s5162_s4 }
 0x1e4   :  { %4506 = vmatmul.msk.f32.vlgmr.msra.gmra.mxu3 %vm734_vm9, %v5461_v56 }
 0x1e5   :  { %v536_v15 = vpop.f32.mrf.mxu2 }
 0x1e6   :  { %v5547_v22 = vadd.f32 %v536_v15, %v5493_v61 }
 0x1e8   :  { %7258 = vst [vmem:[#allocation25_spill] sm:$0xff] %v5547_v22 }
 0x1e9   :  { %558 = vrot.lane.b32.xlu1 %v449_v48, %s5162_s4 }
 0x1ea   :  { %576 = vrot.lane.b32.xlu2 %v5446_v25, %s5164_s14  ;;  %574 = vrot.lane.b32.xlu0 %v449_v48, %s5164_s14 }
 0x1f1   :  { %632 = vrot.lane.b32.xlu1 %v493_v52, %s5164_s14 }
 0x1f2   :  { %618 = vrot.lane.b32.xlu2 %v5454_v55, %s5162_s4  ;;  %560 = vrot.lane.b32.xlu0 %v5446_v25, %s5162_s4 }
 0x1f9   :  { %634 = vrot.lane.b32.xlu1 %v5454_v55, %s5164_s14 }
 0x1fa   :  { %578 = vrot.lane.b32.xlu2 %v5461_v56, %s5164_s14  ;;  %562 = vrot.lane.b32.xlu0 %v5461_v56, %s5162_s4 }
 0x202   :  { %586 = vrot.lane.b32.xlu0 %v443_v37, %s5163_s30 }
 0x20a   :  { %644 = vrot.lane.b32.xlu0 %v487_v43, %s5163_s30 }
 0x20c   :  { %v551_v39 = vpop.permute.xlu2 %550 }
 0x212   :  { %590 = vrot.lane.b32.xlu0 %v449_v48, %s5163_s30  ;;  %v5613_v48 = vadd.f32 %v5484_v59, %v5493_v61 }
 0x214   :  { %v5490_v42 = vpop.permute.xlu2 %566 }
 0x21a   :  { %648 = vrot.lane.b32.xlu0 %v493_v52, %s5163_s30 }
 0x21c   :  { %v553_v63 = vpop.permute.xlu2 %552 }
 0x222   :  { %4672 = vrot.lane.b32.xlu0 %v5506_v2, %s5164_s14 }
 0x223   :  { %v607_v3 = vpop.permute.xlu1 %606 }
 0x224   :  { %v5510_v41 = vpop.permute.xlu2 %628  ;;  %v5512_v5 = vpop.permute.xlu0 %638 }
 0x22a   :  { %4687 = vrot.lane.b32.xlu0 %v5506_v2, %s5163_s30 }
 0x22b   :  { %v623_v7 = vpop.permute.xlu1 %622 }
 0x22c   :  { %v615_v8 = vpop.permute.xlu2 %614  ;;  %v609_v10 = vpop.permute.xlu0 %608 }
 0x22d   :  { %4517 = vmatpush.xpose.msk.msrb.mxu0 %vm734_vm9, %v615_v8 }
 0x230   :  { %v457_v34 = vpop.f32.mrf.mxu0  ;;  %v498_v11 = vpop.f32.mrf.mxu1 }
 0x231   :  { %4525 = vmatpush.xpose.msk.msra.mxu0 %vm734_vm9, %v623_v7  ;;  %v458_v12 = vadd.f32 %v457_v34, %v5377_v19  ;;  %v5520_v14 = vadd.f32 %v498_v11, %v5380_v20 }
 0x233   :  { %v5522_v16 = vpop.permute.xlu1 %582  ;;  %636 = vrot.lane.b32.xlu0 %v5520_v14, %s5164_s14  ;;  %620 = vrot.lane.b32.xlu1 %v5520_v14, %s5162_s4 }
 0x234   :  { %v631_v17 = vpop.permute.xlu2 %630  ;;  %4507 = vmatpush.xpose.msk.msrb.mxu3 %vm734_vm9, %v5520_v14  ;;  %564 = vrot.lane.b32.xlu2 %v458_v12, %s5162_s4  ;;  %v625_v47 = vpop.permute.xlu0 %624 }
 0x237   :  { %4508 = vmatmul.msk.f32.vlgmr.msrb.gmra.mxu3 %vm734_vm9, %v458_v12  ;;  %v539_v26 = vpop.f32.mrf.mxu2  ;;  %v5550_v23 = vpop.f32.mrf.mxu3 }
 0x238   :  { %4509 = vmatpush.xpose.msk.msra.mxu3 %vm734_vm9, %v607_v3  ;;  %v5542_v21 = vadd.f32 %v539_v26, %v5493_v61 }
 0x23a   :  { %7257 = vst [vmem:[#allocation24_spill] sm:$0xff] %v5542_v21  ;;  %v5554_v24 = vpack.i.bf16 %v5542_v21, %v5547_v22 }
 0x23b   :  { %v5534_v18 = vpop.permute.xlu1 %568  ;;  %584 = vrot.lane.b32.xlu1 %v5399_v9, %s5163_s30  ;;  %596 = vrot.lane.b32.xlu0 %v458_v12, %s5163_s30 }
 0x23c   :  { %4511 = vmatpush.xpose.msk.msrb.mxu3 %vm734_vm9, %v609_v10  ;;  %v617_v19 = vpop.permute.xlu2 %616  ;;  %642 = vrot.lane.b32.xlu2 %v5407_v35, %s5163_s30  ;;  %v555_v20 = vpop.permute.xlu0 %554 }
 0x23d   :  { %4519 = vmatpush.xpose.msk.msrb.mxu1 %vm734_vm9, %v617_v19 }
 0x23f   :  { %4510 = vmatmul.msk.f32.vlgmr.msra.gmra.mxu3 %vm734_vm9, %v551_v39  ;;  %v5564_v30 = vpop.f32.mrf.mxu3 }
 0x240   :  { %v1507_v39 = vsel %vm1503_vm10, %v5564_v30, -inf }
 0x241   :  { %4527 = vmatpush.xpose.msk.msra.mxu1 %vm734_vm9, %v625_v47 }
 0x243   :  { %v611_v27 = vpop.permute.xlu1 %610  ;;  %646 = vrot.lane.b32.xlu1 %v5430_v46, %s5163_s30  ;;  %4692 = vrot.lane.b32.xlu0 %v5554_v24, %s5162_s4  ;;  %v5608_v46 = vadd.f32 %v5502_v1, %v5493_v61 }
 0x244   :  { %v577_v28 = vpop.permute.xlu2 %576  ;;  %640 = vrot.lane.b32.xlu2 %v5393_v4, %s5163_s30  ;;  %v627_v29 = vpop.permute.xlu0 %626  ;;  %4513 = vmatpush.xpose.msk.msra.mxu3 %vm734_vm9, %v611_v27  ;;  %v5578_v4 = vadd.f32 %v5488_v60, %v5493_v61 }
 0x245   :  { %7260 = vst [vmem:[#allocation27_spill] sm:$0xff] %v5608_v46  ;;  %v4661_v51 = vpack.i.bf16 %v5613_v48, %v5608_v46 }
 0x246   :  { %v4666_v33 = vpack.i.bf16 %v5578_v4, %v5571_v32 }
 0x247   :  { %4512 = vmatmul.msk.f32.vlgmr.msrb.gmra.mxu3 %vm734_vm9, %v553_v63  ;;  %v5588_v38 = vpop.f32.mrf.mxu3  ;;  %v1504_v63 = vsel %vm1503_vm10, %v5550_v23, -inf }
 0x248   :  { %v1510_v6 = vsel %vm1503_vm10, %v5588_v38, -inf }
 0x24b   :  { %v571_v49 = vpop.permute.xlu1 %570  ;;  %594 = vrot.lane.b32.xlu1 %v5461_v56, %s5163_s30 }
 0x24c   :  { %v619_v31 = vpop.permute.xlu2 %618  ;;  %588 = vrot.lane.b32.xlu2 %v5423_v36, %s5163_s30  ;;  %v613_v9 = vpop.permute.xlu0 %612 }
 0x24d   :  { %4515 = vmatpush.xpose.msk.msrb.mxu3 %vm734_vm9, %v613_v9  ;;  %4521 = vmatpush.xpose.msk.msrb.mxu2 %vm734_vm9, %v619_v31 }
 0x24f   :  { %4514 = vmatmul.msk.f32.vlgmr.msra.gmra.mxu3 %vm734_vm9, %v555_v20  ;;  %v5596_v36 = vpop.f32.mrf.mxu3 }
 0x250   :  { %v1513_v11 = vsel %vm1503_vm10, %v5596_v36, -inf }
 0x251   :  { %4529 = vmatpush.xpose.msk.msra.mxu2 %vm734_vm9, %v627_v29 }
 0x253   :  { %v557_v35 = vpop.permute.xlu1 %556  ;;  %4667 = vrot.lane.b32.xlu1 %v4666_v33, %s5162_s4 }
 0x254   :  { %650 = vrot.lane.b32.xlu2 %v5454_v55, %s5163_s30  ;;  %v5586_v37 = vpop.permute.xlu0 %572  ;;  %v579_v55 = vpop.permute.xlu2 %578 }
 0x257   :  { %4516 = vmatmul.msk.f32.vlgmr.msrb.gmra.mxu3 %vm734_vm9, %v557_v35  ;;  %v5615_v50 = vpop.f32.mrf.mxu3 }
 0x258   :  { %v1516_v53 = vsel %vm1503_vm10, %v5615_v50, -inf }
 0x25b   :  { %v559_v40 = vpop.permute.xlu1 %558  ;;  %4682 = vrot.lane.b32.xlu1 %v4666_v33, %s5164_s14 }
 0x25c   :  { %592 = vrot.lane.b32.xlu2 %v5446_v25, %s5163_s30  ;;  %v575_v43 = vpop.permute.xlu0 %574  ;;  %4518 = vmatmul.msk.f32.vlgmr.msrb.gmra.mxu0 %vm734_vm9, %v559_v40 }
 0x25d   :  { %4533 = vmatpush.xpose.msk.msrb.mxu0 %vm734_vm9, %v631_v17 }
 0x263   :  { %v633_v44 = vpop.permute.xlu1 %632  ;;  %580 = vrot.lane.b32.xlu1 %v458_v12, %s5164_s14 }
 0x264   :  { %4657 = vrot.lane.b32.xlu2 %v5506_v2, %s5162_s4  ;;  %v561_v45 = vpop.permute.xlu0 %560  ;;  %4526 = vmatmul.msk.f32.vlgmr.msra.gmra.mxu0 %vm734_vm9, %v5490_v42  ;;  %v5637_v42 = vpop.f32.mrf.mxu3 }
 0x265   :  { %4520 = vmatmul.msk.f32.vlgmr.msrb.gmra.mxu1 %vm734_vm9, %v561_v45  ;;  %4541 = vmatpush.xpose.msk.msra.mxu0 %vm734_vm9, %v5512_v5  ;;  %v1519_v1 = vsel %vm1503_vm10, %v5637_v42, -inf }
 0x266   :  { %4535 = vmatpush.xpose.msk.msrb.mxu1 %vm734_vm9, %v633_v44 }
 0x26b   :  { %v635_v52 = vpop.permute.xlu1 %634  ;;  %652 = vrot.lane.b32.xlu1 %v5520_v14, %s5163_s30 }
 0x26c   :  { %4662 = vrot.lane.b32.xlu2 %v4661_v51, %s5162_s4  ;;  %v563_v25 = vpop.permute.xlu0 %562  ;;  %4534 = vmatmul.msk.f32.vlgmr.msrb.gmra.mxu0 %vm734_vm9, %v575_v43  ;;  %v5649_v3 = vpop.f32.mrf.mxu3 }
 0x26d   :  { %4522 = vmatmul.msk.f32.vlgmr.msrb.gmra.mxu2 %vm734_vm9, %v563_v25  ;;  %4528 = vmatmul.msk.f32.vlgmr.msra.gmra.mxu1 %vm734_vm9, %v5534_v18  ;;  %v1522_v7 = vsel %vm1503_vm10, %v5649_v3, -inf }
 0x26e   :  { %4537 = vmatpush.xpose.msk.msrb.mxu2 %vm734_vm9, %v635_v52  ;;  %1517 = vmax.xlane.f32.xlu0 %v1516_v53 }
 0x274   :  { %4677 = vrot.lane.b32.xlu2 %v4661_v51, %s5164_s14  ;;  %v587_v54 = vpop.permute.xlu0 %586  ;;  %4542 = vmatmul.msk.f32.vlgmr.msra.gmra.mxu0 %vm734_vm9, %v5522_v16 }
 0x275   :  { %4530 = vmatmul.msk.f32.vlgmr.msra.gmra.mxu2 %vm734_vm9, %v571_v49  ;;  %4536 = vmatmul.msk.f32.vlgmr.msrb.gmra.mxu1 %vm734_vm9, %v577_v28 }
 0x27c   :  { %v645_v56 = vpop.permute.xlu0 %644 }
 0x27d   :  { %4538 = vmatmul.msk.f32.vlgmr.msrb.gmra.mxu2 %vm734_vm9, %v579_v55 }
 0x284   :  { %v591_v57 = vpop.permute.xlu0 %590 }
 0x28c   :  { %v649_v58 = vpop.permute.xlu0 %648 }
 0x28e   :  { %v565_v59 = vpop.permute.xlu2 %564 }
 0x294   :  { %v5639_v61 = vpop.permute.xlu0 %4672 }
 0x295   :  { %1508 = vmax.xlane.f32.xlu1 %v1507_v39 }
 0x296   :  { %v643_v60 = vpop.permute.xlu2 %642 }
 0x297   :  { %4545 = vmatpush.xpose.msk.msra.mxu2 %vm734_vm9, %v643_v60 }
 0x29a   :  { %4546 = vmatmul.msk.f32.vlgmr.msra.gmra.mxu2 %vm734_vm9, %v587_v54 }
 0x29c   :  { %v5651_v5 = vpop.permute.xlu0 %4687 }
 0x29d   :  { %1505 = vmax.xlane.f32.xlu2 %v1504_v63  ;;  %1520 = vmax.xlane.f32.xlu1 %v1519_v1  ;;  %7261 = vst [vmem:[#allocation28_spill] sm:$0xff] %v5651_v5 }
 0x29e   :  { %v641_v2 = vpop.permute.xlu2 %640 }
 0x29f   :  { %4543 = vmatpush.xpose.msk.msra.mxu1 %vm734_vm9, %v641_v2 }
 0x2a3   :  { %4551 = vmatpush.xpose.msk.msrb.mxu1 %vm734_vm9, %v649_v58 }
 0x2a5   :  { %1511 = vmax.xlane.f32.xlu2 %v1510_v6  ;;  %v621_v8 = vpop.permute.xlu1 %620  ;;  %1523 = vmax.xlane.f32.xlu1 %v1522_v7  ;;  %v637_v34 = vpop.permute.xlu0 %636 }
 0x2a6   :  { %v589_v10 = vpop.permute.xlu2 %588  ;;  %4523 = vmatpush.xpose.msk.msra.mxu3 %vm734_vm9, %v621_v8 }
 0x2a9   :  { %4524 = vmatmul.msk.f32.vlgmr.msra.gmra.mxu3 %vm734_vm9, %v565_v59 }
 0x2aa   :  { %4531 = vmatpush.xpose.msk.msrb.mxu3 %vm734_vm9, %v5510_v41 }
 0x2ad   :  { %1514 = vmax.xlane.f32.xlu2 %v1513_v11  ;;  %v585_v12 = vpop.permute.xlu1 %584  ;;  %v597_v27 = vpop.permute.xlu0 %596 }
 0x2ae   :  { %4539 = vmatpush.xpose.msk.msra.mxu3 %vm734_vm9, %v637_v34  ;;  %v651_v14 = vpop.permute.xlu2 %650  ;;  %4544 = vmatmul.msk.f32.vlgmr.msra.gmra.mxu1 %vm734_vm9, %v585_v12 }
 0x2af   :  { %4553 = vmatpush.xpose.msk.msrb.mxu2 %vm734_vm9, %v651_v14  ;;  %2313 = vmatpush.msra.mxu1 %v5497_v62 }
 0x2b1   :  { %4532 = vmatmul.msk.f32.vlgmr.msrb.gmra.mxu3 %vm734_vm9, %v5586_v37 }
 0x2b2   :  { %4547 = vmatpush.xpose.msk.msrb.mxu3 %vm734_vm9, %v645_v56 }
 0x2b3   :  { %2336 = vmatpush.msra.mxu2 %v5613_v48 }
 0x2b5   :  { %v647_v41 = vpop.permute.xlu1 %646  ;;  %v5700_v31 = vpop.permute.xlu0 %4692 }
 0x2b6   :  { %v593_v15 = vpop.permute.xlu2 %592  ;;  %4549 = vmatpush.xpose.msk.msrb.mxu0 %vm734_vm9, %v647_v41 }
 0x2b7   :  { %4552 = vmatmul.msk.f32.vlgmr.msrb.gmra.mxu1 %vm734_vm9, %v593_v15 }
 0x2b8   :  { %2405 = vmatpush.msrb.mxu1 %v5571_v32 }
 0x2b9   :  { %4550 = vmatmul.msk.f32.vlgmr.msrb.gmra.mxu0 %vm734_vm9, %v591_v57 }
 0x2ba   :  { %2290 = vmatpush.msra.mxu0 %v5500_v0  ;;  %v5676_v62 = vpop.f32.mrf.mxu3 }
 0x2bb   :  { %v1525_v16 = vsel %vm1503_vm10, %v5676_v62, -inf }
 0x2bc   :  { %2382 = vmatpush.msrb.mxu0 %v5608_v46  ;;  %1526 = vmax.xlane.f32.xlu1 %v1525_v16 }
 0x2bd   :  { %v595_v17 = vpop.permute.xlu1 %594 }
 0x2be   :  { %4554 = vmatmul.msk.f32.vlgmr.msrb.gmra.mxu2 %vm734_vm9, %v595_v17  ;;  %v5728_v55 = vpop.permute.xlu2 %4657 }
 0x2bf   :  { %2428 = vmatpush.msrb.mxu2 %v5547_v22 }
 0x2c2   :  { %v5683_v47 = vpop.f32.mrf.mxu3 }
 0x2c3   :  { %v1528_v0 = vsel %vm1503_vm10, %v5683_v47, -inf }
 0x2c4   :  { %1529 = vmax.xlane.f32.xlu0 %v1528_v0 }
 0x2c5   :  { %v5687_v26 = vpop.permute.xlu1 %4667 }
 0x2c6   :  { %v5734_v58 = vpop.permute.xlu2 %4662 }
 0x2ca   :  { %v5689_v18 = vpop.f32.mrf.mxu3 }
 0x2cb   :  { %v1531_v19 = vsel %vm1503_vm10, %v5689_v18, -inf }
 0x2cc   :  { %1532 = vmax.xlane.f32.xlu0 %v1531_v19 }
 0x2cd   :  { %v5693_v20 = vpop.permute.xlu1 %4682 }
 0x2ce   :  { %7262 = vst [vmem:[#allocation29_spill] sm:$0xff] %v5693_v20  ;;  %v5736_v59 = vpop.permute.xlu2 %4677 }
 0x2d2   :  { %v5695_v28 = vpop.f32.mrf.mxu3 }
 0x2d3   :  { %v1534_v29 = vsel %vm1503_vm10, %v5695_v28, -inf }
 0x2d4   :  { %1535 = vmax.xlane.f32.xlu0 %v1534_v29 }
 0x2d5   :  { %v581_v49 = vpop.permute.xlu1 %580 }
 0x2d6   :  { %4540 = vmatmul.msk.f32.vlgmr.msra.gmra.mxu3 %vm734_vm9, %v581_v49 }
 0x2d9   :  { %v5702_v9 = vpop.f32.mrf.mxu0 }
 0x2da   :  { %v5704_v33 = vpop.f32.mrf.mxu3 }
 0x2db   :  { %v1537_v35 = vsel %vm1503_vm10, %v5704_v33, -inf }
 0x2dc   :  { %1538 = vmax.xlane.f32.xlu0 %v1537_v35 }
 0x2dd   :  { %v653_v37 = vpop.permute.xlu1 %652 }
 0x2de   :  { %4548 = vmatmul.msk.f32.vlgmr.msrb.gmra.mxu3 %vm734_vm9, %v589_v10 }
 0x2df   :  { %4555 = vmatpush.xpose.msk.msra.mxu3 %vm734_vm9, %v653_v37  ;;  %v1540_v37 = vsel %vm1503_vm10, %v5702_v9, -inf }
 0x2e1   :  { %v1518_v40 = vpop.xlane.xlu0 %1517  ;;  %v5711_v43 = vpop.f32.mrf.mxu0 }
 0x2e2   :  { %v1604_v44 = vsub.f32 %v5615_v50, %v1518_v40  ;;  %v5714_v45 = vpop.f32.mrf.mxu1  ;;  %v1552_v0 = vsel %vm1503_vm10, %v5711_v43, -inf }
 0x2e3   :  { %2359 = vmatpush.msrb.mxu3 %v5578_v4 }
 0x2e4   :  { %v1640_v51 = vmul.f32 1.442695, %v1604_v44 }
 0x2e6   :  { %4556 = vmatmul.msk.f32.vlgmr.msra.gmra.mxu3 %vm734_vm9, %v597_v27  ;;  %4735 = vpow2.f32 %v1640_v51 }
 0x2e7   :  { %2451 = vmatpush.msra.mxu3 %v5542_v21 }
 0x2e9   :  { %v5718_v52 = vpop.f32.mrf.mxu0 }
 0x2ea   :  { %v1564_v25 = vsel %vm1503_vm10, %v5718_v52, -inf  ;;  %v5722_v53 = vpop.f32.mrf.mxu1 }
 0x2eb   :  { %1565 = vmax.xlane.f32.xlu0 %v1564_v25 }
 0x2ec   :  { %v5724_v54 = vpop.eup %4735 }
 0x2ed   :  { %v1708_v50 = vsel %vm1503_vm10, %v5724_v54, 0.0 }
 0x2f0   :  { %v5745_v12 = vpop.f32.mrf.mxu2 }
 0x2f2   :  { %v5730_v56 = vpop.f32.mrf.mxu1 }
 0x2f3   :  { %1709 = vadd.xlane.f32.xlu0 %v1708_v50  ;;  %v1567_v57 = vsel %vm1503_vm10, %v5730_v56, -inf }
 0x2f8   :  { %v5759_v27 = vpop.f32.mrf.mxu2 }
 0x2fb   :  { %1568 = vmax.xlane.f32.xlu0 %v1567_v57 }
 0x300   :  { %v5770_v51 = vpop.f32.mrf.mxu2 }
 0x301   :  { %v1570_v57 = vsel %vm1503_vm10, %v5770_v51, -inf }
 0x308   :  { %v1509_v39 = vpop.xlane.xlu1 %1508 }
 0x309   :  { %v1601_v60 = vsub.f32 %v5564_v30, %v1509_v39 }
 0x30b   :  { %v1634_v63 = vmul.f32 1.442695, %v1601_v60 }
 0x30d   :  { %4737 = vpow2.f32 %v1634_v63 }
 0x310   :  { %v1506_v1 = vpop.xlane.xlu2 %1505  ;;  %v1521_v2 = vpop.xlane.xlu1 %1520 }
 0x311   :  { %v1600_v6 = vsub.f32 %v5550_v23, %v1506_v1  ;;  %v1605_v7 = vsub.f32 %v5637_v42, %v1521_v2  ;;  %v1543_v1 = vsel %vm1503_vm10, %v5714_v45, -inf  ;;  %v1555_v2 = vsel %vm1503_vm10, %v5722_v53, -inf }
 0x313   :  { %v5741_v8 = vpop.eup %4737  ;;  %v1632_v10 = vmul.f32 1.442695, %v1600_v6  ;;  %v1642_v34 = vmul.f32 1.442695, %v1605_v7 }
 0x314   :  { %v1699_v11 = vsel %vm1503_vm10, %v5741_v8, 0.0 }
 0x315   :  { %4739 = vpow2.f32 %v1632_v10  ;;  %1700 = vadd.xlane.f32.xlu1 %v1699_v11  ;;  %v1546_v10 = vsel %vm1503_vm10, %v5745_v12, -inf }
 0x316   :  { %4741 = vpow2.f32 %v1642_v34  ;;  %v5793_v34 = vpop.f32.mrf.mxu0 }
 0x318   :  { %v1512_v30 = vpop.xlane.xlu2 %1511  ;;  %v1524_v14 = vpop.xlane.xlu1 %1523 }
 0x319   :  { %v1606_v41 = vsub.f32 %v5649_v3, %v1524_v14  ;;  %v1602_v23 = vsub.f32 %v5588_v38, %v1512_v30  ;;  %v1576_v14 = vsel %vm1503_vm10, %v5793_v34, -inf }
 0x31b   :  { %v5748_v15 = vpop.eup %4739  ;;  %v1644_v42 = vmul.f32 1.442695, %v1606_v41  ;;  %v1636_v3 = vmul.f32 1.442695, %v1602_v23 }
 0x31c   :  { %v5751_v16 = vpop.eup %4741  ;;  %v1696_v17 = vsel %vm1503_vm10, %v5748_v15, 0.0 }
 0x31d   :  { %1697 = vadd.xlane.f32.xlu2 %v1696_v17  ;;  %1553 = vmax.xlane.f32.xlu1 %v1552_v0  ;;  %v1711_v19 = vsel %vm1503_vm10, %v5751_v16, 0.0  ;;  %4743 = vpow2.f32 %v1644_v42 }
 0x31e   :  { %1712 = vadd.xlane.f32.xlu0 %v1711_v19  ;;  %4745 = vpow2.f32 %v1636_v3 }
 0x320   :  { %v1515_v38 = vpop.xlane.xlu2 %1514 }
 0x321   :  { %v1603_v29 = vsub.f32 %v5596_v36, %v1515_v38 }
 0x323   :  { %v1638_v49 = vmul.f32 1.442695, %v1603_v29  ;;  %v5762_v35 = vpop.eup %4743  ;;  %v5810_v29 = vpop.f32.mrf.mxu2 }
 0x324   :  { %v1714_v40 = vsel %vm1503_vm10, %v5762_v35, 0.0  ;;  %v5768_v44 = vpop.eup %4745 }
 0x325   :  { %4747 = vpow2.f32 %v1638_v49  ;;  %1541 = vmax.xlane.f32.xlu2 %v1540_v37  ;;  %v1702_v36 = vsel %vm1503_vm10, %v5768_v44, 0.0 }
 0x326   :  { %1715 = vadd.xlane.f32.xlu0 %v1714_v40 }
 0x32b   :  { %v5772_v25 = vpop.eup %4747  ;;  %v5795_v11 = vpop.f32.mrf.mxu1 }
 0x32c   :  { %v1705_v50 = vsel %vm1503_vm10, %v5772_v25, 0.0  ;;  %v1579_v41 = vsel %vm1503_vm10, %v5795_v11, -inf  ;;  %v5801_v23 = vpop.f32.mrf.mxu3 }
 0x32d   :  { %1703 = vadd.xlane.f32.xlu2 %v1702_v36  ;;  %1706 = vadd.xlane.f32.xlu1 %v1705_v50  ;;  %v1549_v19 = vsel %vm1503_vm10, %v5801_v23, -inf }
 0x32e   :  { %1571 = vmax.xlane.f32.xlu0 %v1570_v57 }
 0x32f   :  { %v1527_v39 = vpop.xlane.xlu1 %1526 }
 0x330   :  { %v1607_v60 = vsub.f32 %v5676_v62, %v1527_v39  ;;  %v1558_v62 = vsel %vm1503_vm10, %v5759_v27, -inf }
 0x332   :  { %v1646_v63 = vmul.f32 1.442695, %v1607_v60 }
 0x334   :  { %4749 = vpow2.f32 %v1646_v63  ;;  %v5812_v49 = vpop.f32.mrf.mxu3  ;;  %v5821_v39 = vpop.f32.mrf.mxu1 }
 0x335   :  { %1544 = vmax.xlane.f32.xlu2 %v1543_v1  ;;  %1556 = vmax.xlane.f32.xlu1 %v1555_v2  ;;  %v1561_v40 = vsel %vm1503_vm10, %v5812_v49, -inf  ;;  %7264 = vst [vmem:[#allocation31_spill] sm:$0xff] %v5821_v39  ;;  %v1591_v1 = vsel %vm1503_vm10, %v5821_v39, -inf }
 0x336   :  { %v5803_v42 = vpop.f32.mrf.mxu0 }
 0x337   :  { %v1530_v30 = vpop.xlane.xlu0 %1529  ;;  %7263 = vst [vmem:[#allocation30_spill] sm:$0xff] %v5803_v42  ;;  %v1588_v3 = vsel %vm1503_vm10, %v5803_v42, -inf }
 0x338   :  { %v1608_v17 = vsub.f32 %v5683_v47, %v1530_v30  ;;  %v1582_v47 = vsel %vm1503_vm10, %v5810_v29, -inf }
 0x33a   :  { %v5785_v6 = vpop.eup %4749  ;;  %v1648_v38 = vmul.f32 1.442695, %v1608_v17 }
 0x33b   :  { %v1717_v7 = vsel %vm1503_vm10, %v5785_v6, 0.0 }
 0x33c   :  { %1718 = vadd.xlane.f32.xlu0 %v1717_v7  ;;  %4751 = vpow2.f32 %v1648_v38 }
 0x33d   :  { %1547 = vmax.xlane.f32.xlu2 %v1546_v10  ;;  %1559 = vmax.xlane.f32.xlu1 %v1558_v62 }
 0x33f   :  { %v1533_v0 = vpop.xlane.xlu0 %1532 }
 0x340   :  { %v1609_v37 = vsub.f32 %v5689_v18, %v1533_v0 }
 0x341   :  { %v5832_v7 = vpop.f32.mrf.mxu2 }
 0x342   :  { %v1650_v50 = vmul.f32 1.442695, %v1609_v37  ;;  %v5819_v57 = vpop.eup %4751 }
 0x343   :  { %v1720_v2 = vsel %vm1503_vm10, %v5819_v57, 0.0 }
 0x344   :  { %4753 = vpow2.f32 %v1650_v50 }
 0x345   :  { %1577 = vmax.xlane.f32.xlu2 %v1576_v14  ;;  %1580 = vmax.xlane.f32.xlu1 %v1579_v41 }
 0x347   :  { %v1536_v36 = vpop.xlane.xlu0 %1535 }
 0x348   :  { %v1610_v18 = vsub.f32 %v5695_v28, %v1536_v36  ;;  %v1594_v28 = vsel %vm1503_vm10, %v5832_v7, -inf }
 0x34a   :  { %v1652_v10 = vmul.f32 1.442695, %v1610_v18  ;;  %v5834_v30 = vpop.eup %4753 }
 0x34b   :  { %v1723_v0 = vsel %vm1503_vm10, %v5834_v30, 0.0 }
 0x34c   :  { %4755 = vpow2.f32 %v1652_v10 }
 0x34d   :  { %1550 = vmax.xlane.f32.xlu2 %v1549_v19  ;;  %1589 = vmax.xlane.f32.xlu1 %v1588_v3 }
 0x34f   :  { %v1539_v62 = vpop.xlane.xlu0 %1538 }
 0x350   :  { %v1611_v17 = vsub.f32 %v5704_v33, %v1539_v62 }
 0x352   :  { %v1654_v19 = vmul.f32 1.442695, %v1611_v17  ;;  %v5845_v3 = vpop.eup %4755 }
 0x354   :  { %4757 = vpow2.f32 %v1654_v19 }
 0x355   :  { %1583 = vmax.xlane.f32.xlu2 %v1582_v47  ;;  %1562 = vmax.xlane.f32.xlu1 %v1561_v40  ;;  %v1726_v47 = vsel %vm1503_vm10, %v5845_v3, 0.0 }
 0x359   :  { %v5823_v60 = vpop.f32.mrf.mxu3 }
 0x35a   :  { %v1573_v63 = vsel %vm1503_vm10, %v5823_v60, -inf  ;;  %v5853_v33 = vpop.eup %4757 }
 0x35b   :  { %1574 = vmax.xlane.f32.xlu0 %v1573_v63  ;;  %7265 = vst [vmem:[#allocation32_spill] sm:$0xff] %v5853_v33  ;;  %v1729_v40 = vsel %vm1503_vm10, %v5853_v33, 0.0 }
 0x35d   :  { %1592 = vmax.xlane.f32.xlu1 %v1591_v1  ;;  %1721 = vadd.xlane.f32.xlu2 %v1720_v2 }
 0x35e   :  { %v5857_v36 = vpop.xlane.xlu0 %1565 }
 0x361   :  { %v5836_v14 = vpop.f32.mrf.mxu3 }
 0x362   :  { %v1585_v41 = vsel %vm1503_vm10, %v5836_v14, -inf }
 0x363   :  { %1595 = vmax.xlane.f32.xlu0 %v1594_v28 }
 0x365   :  { %1586 = vmax.xlane.f32.xlu1 %v1585_v41  ;;  %1724 = vadd.xlane.f32.xlu2 %v1723_v0 }
 0x366   :  { %v5859_v50 = vpop.xlane.xlu0 %1709 }
 0x367   :  { %4759 = vrcp.f32 %v5859_v50  ;;  %vm1853_vm8 = vweird.f32 %v5859_v50 }
 0x369   :  { %v5847_v38 = vpop.f32.mrf.mxu3 }
 0x36a   :  { %v1597_v37 = vsel %vm1503_vm10, %v5847_v38, -inf }
 0x36d   :  { %1598 = vmax.xlane.f32.xlu1 %v1597_v37  ;;  %1727 = vadd.xlane.f32.xlu2 %v1726_v47  ;;  %v5864_v1 = vpop.eup %4759 }
 0x36e   :  { %v5862_v18 = vpop.xlane.xlu0 %1568  ;;  %v1849_v17 = vmul.f32 %v5864_v1, %v5859_v50  ;;  %vm1854_vm4 = vweird.f32 %v5864_v1 }
 0x370   :  { %v1850_v21 = vsub.f32 1.0, %v1849_v17  ;;  %v4660_v17 = vunpack.i.h.bf16 %v5728_v55 }
 0x375   :  { %1730 = vadd.xlane.f32.xlu1 %v1729_v40 }
 0x388   :  { %v1701_v63 = vpop.xlane.xlu1 %1700 }
 0x389   :  { %4761 = vrcp.f32 %v1701_v63  ;;  %v1817_v37 = vand.u32 2147483648, %v1701_v63  ;;  %v1815_v40 = vand.u32 2147483647, %v1701_v63  ;;  %vm1811_vm12 = vweird.f32 %v1701_v63 }
 0x38b   :  { %v1818_v5 = vor.u32 1.1754944e-38, %v1817_v37  ;;  %vm1816_vm14 = vcmp.eq.f32.partialorder %v1815_v40, 8.507059e+37 }
 0x38f   :  { %v4762_v2 = vpop.eup %4761 }
 0x390   :  { %v1807_v10 = vmul.f32 %v4762_v2, %v1701_v63  ;;  %v1698_v62 = vpop.xlane.xlu2 %1697  ;;  %v1554_v28 = vpop.xlane.xlu1 %1553  ;;  %vm1812_vm11 = vweird.f32 %v4762_v2  ;;  %v1851_v63 = vmul.f32 %v5864_v1, %v1850_v21 }
 0x391   :  { %4763 = vrcp.f32 %v1698_v62  ;;  %v5866_v41 = vpop.xlane.xlu0 %1712  ;;  %v1616_v19 = vsub.f32 %v5711_v43, %v1554_v28  ;;  %vm1813_vm13 = vmor %vm1811_vm12, %vm1812_vm11  ;;  %vm1797_vm1 = vweird.f32 %v1698_v62 }
 0x392   :  { %v1808_v0 = vsub.f32 1.0, %v1807_v10  ;;  %4765 = vrcp.f32 %v5866_v41  ;;  %vm1867_vm3 = vweird.f32 %v5866_v41  ;;  %vm5918_vm11 = vmor %vm1853_vm8, %vm1854_vm4 }
 0x393   :  { %v1664_v13 = vmul.f32 1.442695, %v1616_v19  ;;  %v1801_v19 = vand.u32 2147483647, %v1698_v62 }
 0x394   :  { %v1809_v47 = vmul.f32 %v4762_v2, %v1808_v0 }
 0x395   :  { %4767 = vpow2.f32 %v1664_v13  ;;  %vm1802_vm6 = vcmp.eq.f32.partialorder %v1801_v19, 8.507059e+37  ;;  %v4659_v19 = vunpack.i.l.bf16 %v5728_v55  ;;  %v4669_v55 = vunpack.i.l.bf16 %v5687_v26 }
 0x396   :  { %v1810_v22 = vadd.f32 %v4762_v2, %v1809_v47  ;;  %v1803_v47 = vand.u32 2147483648, %v1698_v62 }
 0x397   :  { %v4764_v32 = vpop.eup %4763 }
 0x398   :  { %v4766_v39 = vpop.eup %4765  ;;  %v1814_v42 = vsel %vm1813_vm13, %v4762_v2, %v1810_v22  ;;  %v1793_v10 = vmul.f32 %v4764_v32, %v1698_v62  ;;  %v1542_v46 = vpop.xlane.xlu2 %1541  ;;  %vm1798_vm15 = vweird.f32 %v4764_v32 }
 0x399   :  { %v1819_v43 = vsel %vm1816_vm14, %v1818_v5, %v1814_v42  ;;  %v1863_v28 = vmul.f32 %v4766_v39, %v5866_v41  ;;  %v1612_v0 = vsub.f32 %v5702_v9, %v1542_v46  ;;  %v5874_v20 = vpop.xlane.xlu0 %1715  ;;  %v1873_v42 = vand.u32 2147483648, %v5866_v41  ;;  %vm5887_vm2 = vmor %vm1797_vm1, %vm1798_vm15 }
 0x39a   :  { %v1794_v13 = vsub.f32 1.0, %v1793_v10  ;;  %v2241_v22 = vmul.f32 %v5741_v8, %v1819_v43  ;;  %4769 = vrcp.f32 %v5874_v20  ;;  %vm1868_vm0 = vweird.f32 %v4766_v39 }
 0x39b   :  { %v1864_v37 = vsub.f32 1.0, %v1863_v28  ;;  %v1656_v33 = vmul.f32 1.442695, %v1612_v0  ;;  %v5879_v2 = vpop.eup %4767  ;;  %v1871_v8 = vand.u32 2147483647, %v5866_v41  ;;  %v1804_v43 = vor.u32 1.1754944e-38, %v1803_v47  ;;  %vm5896_vm5 = vmor %vm1867_vm3, %vm1868_vm0 }
 0x39c   :  { %v1795_v5 = vmul.f32 %v4764_v32, %v1794_v13  ;;  %4558 = vmatmul.msk.f32.vlgmr.msra.gmra.mxu1 %vm1503_vm10, %v2241_v22  ;;  %v1744_v21 = vsel %vm1503_vm10, %v5879_v2, 0.0  ;;  %v1874_v13 = vor.u32 1.1754944e-38, %v1873_v42 }
 0x39d   :  { %v1865_v46 = vmul.f32 %v4766_v39, %v1864_v37  ;;  %4771 = vpow2.f32 %v1656_v33  ;;  %2497 = vmatpush.msra.mxu1 %v4660_v17  ;;  %1745 = vadd.xlane.f32.xlu2 %v1744_v21  ;;  %v1852_v17 = vadd.f32 %v5864_v1, %v1851_v63  ;;  %vm1872_vm7 = vcmp.eq.f32.partialorder %v1871_v8, 8.507059e+37 }
 0x39e   :  { %v1796_v9 = vadd.f32 %v4764_v32, %v1795_v5  ;;  %v1857_v5 = vand.u32 2147483647, %v5859_v50  ;;  %v1620_v21 = vsub.f32 %v5718_v52, %v5857_v36 }
 0x39f   :  { %v1866_v10 = vadd.f32 %v4766_v39, %v1865_v46  ;;  %v1856_v42 = vsel %vm5918_vm11, %v5864_v1, %v1852_v17 }
 0x3a0   :  { %v1800_v33 = vsel %vm5887_vm2, %v4764_v32, %v1796_v9  ;;  %v5900_v28 = vpop.xlane.xlu2 %1703  ;;  %v5902_v0 = vpop.xlane.xlu1 %1706  ;;  %v1859_v32 = vand.u32 2147483648, %v5859_v50  ;;  %vm1858_vm12 = vcmp.eq.f32.partialorder %v1857_v5, 8.507059e+37  ;;  %v1672_v17 = vmul.f32 1.442695, %v1620_v21 }
 0x3a1   :  { %v1870_v41 = vsel %vm5896_vm5, %v4766_v39, %v1866_v10  ;;  %v5907_v37 = vpop.eup %4769  ;;  %v1805_v47 = vsel %vm1802_vm6, %v1804_v43, %v1800_v33  ;;  %4773 = vrcp.f32 %v5900_v28  ;;  %v5935_v10 = vpop.xlane.xlu0 %1571  ;;  %v4664_v43 = vunpack.i.l.bf16 %v5734_v58 }
 0x3a2   :  { %v1875_v63 = vsel %vm1872_vm7, %v1874_v13, %v1870_v41  ;;  %4775 = vrcp.f32 %v5902_v0  ;;  %v2240_v46 = vmul.f32 %v5748_v15, %v1805_v47  ;;  %v1860_v9 = vor.u32 1.1754944e-38, %v1859_v32 }
 0x3a3   :  { %v5911_v22 = vpop.eup %4771  ;;  %v1877_v8 = vmul.f32 %v5907_v37, %v5874_v20  ;;  %v2245_v40 = vmul.f32 %v5751_v16, %v1875_v63  ;;  %v1829_v5 = vand.u32 2147483647, %v5900_v28  ;;  %vm1825_vm15 = vweird.f32 %v5900_v28 }
 0x3a4   :  { %v1732_v50 = vsel %vm1503_vm10, %v5911_v22, 0.0  ;;  %4557 = vmatmul.msk.f32.vlgmr.msra.gmra.mxu0 %vm1503_vm10, %v2240_v46  ;;  %v1861_v1 = vsel %vm1858_vm12, %v1860_v9, %v1856_v42  ;;  %v1843_v46 = vand.u32 2147483647, %v5902_v0  ;;  %vm1839_vm1 = vweird.f32 %v5902_v0 }
 0x3a5   :  { %1733 = vadd.xlane.f32.xlu1 %v1732_v50  ;;  %2474 = vmatpush.msra.mxu0 %v4659_v19  ;;  %v1878_v41 = vsub.f32 1.0, %v1877_v8  ;;  %v2244_v39 = vmul.f32 %v5724_v54, %v1861_v1  ;;  %v1831_v19 = vand.u32 2147483648, %v5900_v28  ;;  %vm1882_vm2 = vweird.f32 %v5907_v37 }
 0x3a6   :  { %4562 = vmatmul.msk.f32.vlgmr.msrb.gmra.mxu1 %vm1503_vm10, %v2245_v40  ;;  %vm1830_vm3 = vcmp.eq.f32.partialorder %v1829_v5, 8.507059e+37  ;;  %vm1844_vm5 = vcmp.eq.f32.partialorder %v1843_v46, 8.507059e+37  ;;  %vm1881_vm6 = vweird.f32 %v5874_v20 }
 0x3a7   :  { %v4774_v15 = vpop.eup %4773  ;;  %2589 = vmatpush.msrb.mxu1 %v4669_v55  ;;  %v1879_v21 = vmul.f32 %v5907_v37, %v1878_v41  ;;  %v1832_v40 = vor.u32 1.1754944e-38, %v1831_v19  ;;  %v4665_v19 = vunpack.i.h.bf16 %v5734_v58  ;;  %vm5979_vm7 = vmor %vm1881_vm6, %vm1882_vm2 }
 0x3a8   :  { %v1545_v52 = vpop.xlane.xlu2 %1544  ;;  %v1557_v36 = vpop.xlane.xlu1 %1556  ;;  %v1821_v62 = vmul.f32 %v4774_v15, %v5900_v28  ;;  %vm1826_vm13 = vweird.f32 %v4774_v15 }
 0x3a9   :  { %v4776_v33 = vpop.eup %4775  ;;  %v1613_v16 = vsub.f32 %v5714_v45, %v1545_v52  ;;  %v1617_v32 = vsub.f32 %v5722_v53, %v1557_v36  ;;  %v1845_v45 = vand.u32 2147483648, %v5902_v0  ;;  %vm1827_vm0 = vmor %vm1825_vm15, %vm1826_vm13 }
 0x3aa   :  { %v1835_v13 = vmul.f32 %v4776_v33, %v5902_v0  ;;  %v1822_v47 = vsub.f32 1.0, %v1821_v62  ;;  %vm1840_vm14 = vweird.f32 %v4776_v33  ;;  %v1880_v62 = vadd.f32 %v5907_v37, %v1879_v21 }
 0x3ab   :  { %v1658_v63 = vmul.f32 1.442695, %v1613_v16  ;;  %v1666_v50 = vmul.f32 1.442695, %v1617_v32  ;;  %vm1841_vm4 = vmor %vm1839_vm1, %vm1840_vm14  ;;  %v1846_v28 = vor.u32 1.1754944e-38, %v1845_v45  ;;  %v1887_v0 = vand.u32 2147483648, %v5874_v20 }
 0x3ac   :  { %v1836_v42 = vsub.f32 1.0, %v1835_v13  ;;  %v1823_v9 = vmul.f32 %v4774_v15, %v1822_v47  ;;  %4561 = vmatmul.msk.f32.vlgmr.msrb.gmra.mxu0 %vm1503_vm10, %v2244_v39  ;;  %v4670_v39 = vunpack.i.h.bf16 %v5687_v26 }
 0x3ad   :  { %4777 = vpow2.f32 %v1658_v63  ;;  %2566 = vmatpush.msrb.mxu0 %v4664_v43  ;;  %v1888_v26 = vor.u32 1.1754944e-38, %v1887_v0 }
 0x3ae   :  { %v1837_v53 = vmul.f32 %v4776_v33, %v1836_v42  ;;  %4779 = vpow2.f32 %v1666_v50  ;;  %v1824_v8 = vadd.f32 %v4774_v15, %v1823_v9 }
 0x3af   :  { %4781 = vpow2.f32 %v1672_v17  ;;  %v5952_v54 = vpop.xlane.xlu0 %1718 }
 0x3b0   :  { %v1838_v55 = vadd.f32 %v4776_v33, %v1837_v53  ;;  %4783 = vrcp.f32 %v5952_v54  ;;  %v1548_v1 = vpop.xlane.xlu2 %1547  ;;  %v5956_v52 = vpop.xlane.xlu1 %1559  ;;  %v1828_v36 = vsel %vm1827_vm0, %v4774_v15, %v1824_v8  ;;  %v1885_v15 = vand.u32 2147483647, %v5874_v20 }
 0x3b1   :  { %v1833_v16 = vsel %vm1830_vm3, %v1832_v40, %v1828_v36  ;;  %v1614_v13 = vsub.f32 %v5745_v12, %v1548_v1  ;;  %v1899_v53 = vand.u32 2147483647, %v5952_v54  ;;  %v1901_v8 = vand.u32 2147483648, %v5952_v54 }
 0x3b2   :  { %v1842_v17 = vsel %vm1841_vm4, %v4776_v33, %v1838_v55  ;;  %v2242_v47 = vmul.f32 %v5768_v44, %v1833_v16  ;;  %vm1886_vm8 = vcmp.eq.f32.partialorder %v1885_v15, 8.507059e+37  ;;  %vm1895_vm12 = vweird.f32 %v5952_v54 }
 0x3b3   :  { %v5961_v41 = vpop.eup %4777  ;;  %v1847_v43 = vsel %vm1844_vm5, %v1846_v28, %v1842_v17  ;;  %v1660_v42 = vmul.f32 1.442695, %v1614_v13  ;;  %v4694_v28 = vunpack.i.l.bf16 %v5700_v31  ;;  %vm1900_vm14 = vcmp.eq.f32.partialorder %v1899_v53, 8.507059e+37 }
 0x3b4   :  { %v5966_v32 = vpop.eup %4779  ;;  %v2243_v5 = vmul.f32 %v5772_v25, %v1847_v43  ;;  %v1735_v33 = vsel %vm1503_vm10, %v5961_v41, 0.0  ;;  %v1884_v25 = vsel %vm5979_vm7, %v5907_v37, %v1880_v62  ;;  %4559 = vmatmul.msk.f32.vlgmr.msra.gmra.mxu2 %vm1503_vm10, %v2242_v47  ;;  %v1621_v37 = vsub.f32 %v5730_v56, %v5862_v18 }
 0x3b5   :  { %v5973_v63 = vpop.eup %4781  ;;  %1736 = vadd.xlane.f32.xlu0 %v1735_v33  ;;  %v1747_v20 = vsel %vm1503_vm10, %v5966_v32, 0.0  ;;  %2520 = vmatpush.msra.mxu2 %v4665_v19  ;;  %v1889_v9 = vsel %vm1886_vm8, %v1888_v26, %v1884_v25  ;;  %4785 = vpow2.f32 %v1660_v42  ;;  %v1902_v56 = vor.u32 1.1754944e-38, %v1901_v8 }
 0x3b6   :  { %v4784_v44 = vpop.eup %4783  ;;  %4560 = vmatmul.msk.f32.vlgmr.msrb.gmra.mxu3 %vm1503_vm10, %v2243_v5  ;;  %1748 = vadd.xlane.f32.xlu1 %v1747_v20  ;;  %v2246_v1 = vmul.f32 %v5762_v35, %v1889_v9  ;;  %v1756_v36 = vsel %vm1503_vm10, %v5973_v63, 0.0  ;;  %v4695_v13 = vunpack.i.h.bf16 %v5700_v31  ;;  %v1618_v33 = vsub.f32 %v5759_v27, %v5956_v52 }
 0x3b7   :  { %v1891_v58 = vmul.f32 %v4784_v44, %v5952_v54  ;;  %2543 = vmatpush.msrb.mxu3 %v4670_v39  ;;  %vm1896_vm11 = vweird.f32 %v4784_v44  ;;  %v1622_v25 = vsub.f32 %v5770_v51, %v5935_v10 }
 0x3b8   :  { %v1578_v46 = vpop.xlane.xlu2 %1577  ;;  %v1581_v50 = vpop.xlane.xlu1 %1580  ;;  %vm1897_vm13 = vmor %vm1895_vm12, %vm1896_vm11 }
 0x3b9   :  { %v1892_v45 = vsub.f32 1.0, %v1891_v58  ;;  %v1624_v21 = vsub.f32 %v5793_v34, %v1578_v46  ;;  %v1674_v34 = vmul.f32 1.442695, %v1621_v37  ;;  %v1625_v47 = vsub.f32 %v5795_v11, %v1581_v50 }
 0x3ba   :  { %v1676_v46 = vmul.f32 1.442695, %v1622_v25  ;;  %v4674_v25 = vunpack.i.l.bf16 %v5639_v61 }
 0x3bb   :  { %v1893_v40 = vmul.f32 %v4784_v44, %v1892_v45  ;;  %v1680_v55 = vmul.f32 1.442695, %v1624_v21  ;;  %v6004_v0 = vpop.eup %4785  ;;  %v1682_v31 = vmul.f32 1.442695, %v1625_v47 }
 0x3bc   :  { %4563 = vmatmul.msk.f32.vlgmr.msrb.gmra.mxu2 %vm1503_vm10, %v2246_v1 }
 0x3bd   :  { %v1894_v62 = vadd.f32 %v4784_v44, %v1893_v40  ;;  %4787 = vpow2.f32 %v1680_v55  ;;  %1757 = vadd.xlane.f32.xlu0 %v1756_v36  ;;  %2612 = vmatpush.msrb.mxu2 %v4694_v28 }
 0x3be   :  { %4789 = vpow2.f32 %v1674_v34 }
 0x3bf   :  { %v1898_v18 = vsel %vm1897_vm13, %v4784_v44, %v1894_v62 }
 0x3c0   :  { %v1903_v16 = vsel %vm1900_vm14, %v1902_v56, %v1898_v18  ;;  %v1551_v35 = vpop.xlane.xlu2 %1550  ;;  %v6002_v17 = vpop.xlane.xlu1 %1589 }
 0x3c1   :  { %v1615_v43 = vsub.f32 %v5801_v23, %v1551_v35  ;;  %v2247_v54 = vmul.f32 %v5785_v6, %v1903_v16  ;;  %v1738_v6 = vsel %vm1503_vm10, %v6004_v0, 0.0  ;;  %v1668_v23 = vmul.f32 1.442695, %v1618_v33 }
 0x3c3   :  { %v6009_v15 = vpop.eup %4787  ;;  %v1662_v5 = vmul.f32 1.442695, %v1615_v43  ;;  %4564 = vmatmul.msk.f32.vlgmr.msra.gmra.mxu3 %vm1503_vm10, %v2247_v54 }
 0x3c4   :  { %2635 = vmatpush.msra.mxu3 %v4695_v13  ;;  %v1768_v39 = vsel %vm1503_vm10, %v6009_v15, 0.0  ;;  %v6019_v12 = vpop.eup %4789 }
 0x3c5   :  { %4791 = vpow2.f32 %v1662_v5  ;;  %1769 = vadd.xlane.f32.xlu2 %v1768_v39  ;;  %1739 = vadd.xlane.f32.xlu0 %v1738_v6  ;;  %v1759_v58 = vsel %vm1503_vm10, %v6019_v12, 0.0 }
 0x3c6   :  { %4793 = vpow2.f32 %v1682_v31 }
 0x3c7   :  { %4795 = vpow2.f32 %v1668_v23 }
 0x3c8   :  { %v1584_v19 = vpop.xlane.xlu2 %1583  ;;  %v1563_v11 = vpop.xlane.xlu1 %1562 }
 0x3c9   :  { %v1626_v20 = vsub.f32 %v5810_v29, %v1584_v19  ;;  %v1619_v52 = vsub.f32 %v5812_v49, %v1563_v11 }
 0x3cb   :  { %v6022_v44 = vpop.eup %4791  ;;  %v1684_v27 = vmul.f32 1.442695, %v1626_v20  ;;  %v1670_v42 = vmul.f32 1.442695, %v1619_v52 }
 0x3cc   :  { %v1741_v26 = vsel %vm1503_vm10, %v6022_v44, 0.0  ;;  %v6033_v49 = vpop.eup %4793 }
 0x3cd   :  { %4797 = vpow2.f32 %v1684_v27  ;;  %1742 = vadd.xlane.f32.xlu1 %v1741_v26  ;;  %1760 = vadd.xlane.f32.xlu0 %v1759_v58  ;;  %v6035_v51 = vpop.eup %4795  ;;  %v1771_v37 = vsel %vm1503_vm10, %v6033_v49, 0.0 }
 0x3ce   :  { %v1575_v29 = vpop.xlane.xlu0 %1574  ;;  %v1750_v53 = vsel %vm1503_vm10, %v6035_v51, 0.0 }
 0x3cf   :  { %v1623_v45 = vsub.f32 %v5823_v60, %v1575_v29 }
 0x3d0   :  { %v6031_v50 = vpop.xlane.xlu1 %1592  ;;  %v1722_v9 = vpop.xlane.xlu2 %1721 }
 0x3d1   :  { %4799 = vrcp.f32 %v1722_v9  ;;  %v1678_v55 = vmul.f32 1.442695, %v1623_v45  ;;  %v1913_v18 = vand.u32 2147483647, %v1722_v9  ;;  %v1915_v16 = vand.u32 2147483648, %v1722_v9 }
 0x3d2   :  { %4801 = vpow2.f32 %v1670_v42  ;;  %vm1909_vm0 = vweird.f32 %v1722_v9 }
 0x3d3   :  { %v6037_v10 = vpop.eup %4797  ;;  %4803 = vpow2.f32 %v1676_v46  ;;  %v1916_v33 = vor.u32 1.1754944e-38, %v1915_v16  ;;  %vm1914_vm2 = vcmp.eq.f32.partialorder %v1913_v18, 8.507059e+37 }
 0x3d4   :  { %v1774_v21 = vsel %vm1503_vm10, %v6037_v10, 0.0 }
 0x3d5   :  { %1775 = vadd.xlane.f32.xlu2 %v1774_v21  ;;  %1772 = vadd.xlane.f32.xlu1 %v1771_v37 }
 0x3d6   :  { %1751 = vadd.xlane.f32.xlu0 %v1750_v53  ;;  %v1596_v40 = vpop.xlane.xlu0 %1595 }
 0x3d7   :  { %v4800_v8 = vpop.eup %4799  ;;  %v1630_v35 = vsub.f32 %v5832_v7, %v1596_v40 }
 0x3d8   :  { %v1905_v1 = vmul.f32 %v4800_v8, %v1722_v9  ;;  %v1587_v36 = vpop.xlane.xlu1 %1586  ;;  %v1725_v28 = vpop.xlane.xlu2 %1724  ;;  %vm1910_vm15 = vweird.f32 %v4800_v8 }
 0x3d9   :  { %v6046_v62 = vpop.eup %4801  ;;  %v1627_v60 = vsub.f32 %v5836_v14, %v1587_v36  ;;  %4805 = vrcp.f32 %v1725_v28  ;;  %vm1911_vm1 = vmor %vm1909_vm0, %vm1910_vm15  ;;  %v1692_v39 = vmul.f32 1.442695, %v1630_v35  ;;  %v1929_v26 = vand.u32 2147483648, %v1725_v28 }
 0x3da   :  { %v6049_v56 = vpop.eup %4803  ;;  %v1906_v34 = vsub.f32 1.0, %v1905_v1  ;;  %4807 = vpow2.f32 %v1678_v55  ;;  %v1753_v13 = vsel %vm1503_vm10, %v6046_v62, 0.0  ;;  %v1927_v42 = vand.u32 2147483647, %v1725_v28 }
 0x3db   :  { %v1686_v43 = vmul.f32 1.442695, %v1627_v60  ;;  %v1762_v14 = vsel %vm1503_vm10, %v6049_v56, 0.0  ;;  %vm1923_vm4 = vweird.f32 %v1725_v28  ;;  %v1930_v21 = vor.u32 1.1754944e-38, %v1929_v26 }
 0x3dc   :  { %v1907_v54 = vmul.f32 %v4800_v8, %v1906_v34  ;;  %vm1928_vm6 = vcmp.eq.f32.partialorder %v1927_v42, 8.507059e+37  ;;  %v4675_v60 = vunpack.i.h.bf16 %v5639_v61  ;;  %v7276_v42 = vld [vmem:[#allocation27_spill] sm:$0xff] }
 0x3dd   :  { %4809 = vpow2.f32 %v1686_v43  ;;  %1754 = vadd.xlane.f32.xlu1 %v1753_v13 }
 0x3de   :  { %v1908_v47 = vadd.f32 %v4800_v8, %v1907_v54  ;;  %1763 = vadd.xlane.f32.xlu0 %v1762_v14 }
 0x3df   :  { %v4806_v5 = vpop.eup %4805 }
 0x3e0   :  { %v1912_v7 = vsel %vm1911_vm1, %v4800_v8, %v1908_v47  ;;  %v1919_v6 = vmul.f32 %v4806_v5, %v1725_v28  ;;  %v1599_v31 = vpop.xlane.xlu1 %1598  ;;  %v1728_v23 = vpop.xlane.xlu2 %1727  ;;  %vm1924_vm3 = vweird.f32 %v4806_v5 }
 0x3e1   :  { %v1917_v19 = vsel %vm1914_vm2, %v1916_v33, %v1912_v7  ;;  %4811 = vrcp.f32 %v1728_v23  ;;  %v6056_v11 = vpop.eup %4807  ;;  %v1631_v58 = vsub.f32 %v5847_v38, %v1599_v31  ;;  %vm1925_vm5 = vmor %vm1923_vm4, %vm1924_vm3  ;;  %v1943_v28 = vand.u32 2147483648, %v1728_v23 }
 0x3e2   :  { %v1920_v20 = vsub.f32 1.0, %v1919_v6  ;;  %v2248_v27 = vmul.f32 %v5819_v57, %v1917_v19  ;;  %4813 = vpow2.f32 %v1692_v39  ;;  %v1765_v57 = vsel %vm1503_vm10, %v6056_v11, 0.0 }
 0x3e3   :  { %v6059_v52 = vpop.eup %4809  ;;  %v1694_v38 = vmul.f32 1.442695, %v1631_v58  ;;  %v1941_v18 = vand.u32 2147483647, %v1728_v23  ;;  %vm1937_vm8 = vweird.f32 %v1728_v23  ;;  %v1944_v54 = vor.u32 1.1754944e-38, %v1943_v28  ;;  %v7275_v58 = vld [vmem:[#allocation29_spill] sm:$0xff] }
 0x3e4   :  { %v1921_v29 = vmul.f32 %v4806_v5, %v1920_v20  ;;  %4565 = vmatmul.msk.f32.vlgmr.msra.gmra.mxu0 %vm1503_vm10, %v2248_v27  ;;  %v1777_v46 = vsel %vm1503_vm10, %v6059_v52, 0.0  ;;  %v4680_v33 = vunpack.i.h.bf16 %v5736_v59  ;;  %v4701_v20 = vpack.i.bf16 %v5578_v4, %v5613_v48 }
 0x3e5   :  { %2658 = vmatpush.msra.mxu0 %v4674_v25  ;;  %1778 = vadd.xlane.f32.xlu2 %v1777_v46  ;;  %vm1942_vm12 = vcmp.eq.f32.partialorder %v1941_v18, 8.507059e+37  ;;  %v7274_v25 = vld [vmem:[#allocation32_spill] sm:$0xff] }
 0x3e6   :  { %v1922_v9 = vadd.f32 %v4806_v5, %v1921_v29  ;;  %1766 = vadd.xlane.f32.xlu0 %v1765_v57  ;;  %v4685_v29 = vunpack.i.h.bf16 %v7275_v58  ;;  %v7278_v57 = vld [vmem:[#allocation31_spill] sm:$0xff] }
 0x3e7   :  { %v4812_v45 = vpop.eup %4811 }
 0x3e8   :  { %v1926_v37 = vsel %vm1925_vm5, %v4806_v5, %v1922_v9  ;;  %v1933_v53 = vmul.f32 %v4812_v45, %v1728_v23  ;;  %v1731_v8 = vpop.xlane.xlu1 %1730  ;;  %v6068_v40 = vpop.eup %4813  ;;  %vm1938_vm7 = vweird.f32 %v4812_v45  ;;  %v1629_v9 = vsub.f32 %v7278_v57, %v6031_v50 }
 0x3e9   :  { %v1931_v55 = vsel %vm1928_vm6, %v1930_v21, %v1926_v37  ;;  %4815 = vrcp.f32 %v1731_v8  ;;  %v1786_v16 = vsel %vm1503_vm10, %v6068_v40, 0.0  ;;  %vm1939_vm11 = vmor %vm1937_vm8, %vm1938_vm7  ;;  %v1957_v39 = vand.u32 2147483648, %v1731_v8 }
 0x3ea   :  { %v1934_v1 = vsub.f32 1.0, %v1933_v53  ;;  %v2249_v36 = vmul.f32 %v5834_v30, %v1931_v55  ;;  %4817 = vpow2.f32 %v1694_v38  ;;  %v1955_v6 = vand.u32 2147483647, %v1731_v8 }
 0x3eb   :  { %vm1951_vm14 = vweird.f32 %v1731_v8 }
 0x3ec   :  { %v1935_v34 = vmul.f32 %v4812_v45, %v1934_v1  ;;  %4566 = vmatmul.msk.f32.vlgmr.msra.gmra.mxu1 %vm1503_vm10, %v2249_v36  ;;  %vm1956_vm0 = vcmp.eq.f32.partialorder %v1955_v6, 8.507059e+37 }
 0x3ed   :  { %2681 = vmatpush.msra.mxu1 %v4675_v60  ;;  %1787 = vadd.xlane.f32.xlu2 %v1786_v16 }
 0x3ee   :  { %v1936_v35 = vadd.f32 %v4812_v45, %v1935_v34 }
 0x3ef   :  { %v4816_v43 = vpop.eup %4815 }
 0x3f0   :  { %v1940_v30 = vsel %vm1939_vm11, %v4812_v45, %v1936_v35  ;;  %v1947_v61 = vmul.f32 %v4816_v43, %v1731_v8  ;;  %v6075_v13 = vpop.eup %4817  ;;  %vm1952_vm13 = vweird.f32 %v4816_v43  ;;  %v1690_v45 = vmul.f32 1.442695, %v1629_v9 }
 0x3f1   :  { %v1945_v14 = vsel %vm1942_vm12, %v1944_v54, %v1940_v30  ;;  %v1789_v31 = vsel %vm1503_vm10, %v6075_v13, 0.0  ;;  %vm1953_vm15 = vmor %vm1951_vm14, %vm1952_vm13 }
 0x3f2   :  { %v1948_v47 = vsub.f32 1.0, %v1947_v61  ;;  %v2250_v5 = vmul.f32 %v5845_v3, %v1945_v14  ;;  %v1958_v3 = vor.u32 1.1754944e-38, %v1957_v39 }
 0x3f4   :  { %v1949_v7 = vmul.f32 %v4816_v43, %v1948_v47  ;;  %4567 = vmatmul.msk.f32.vlgmr.msra.gmra.mxu2 %vm1503_vm10, %v2250_v5 }
 0x3f5   :  { %2704 = vmatpush.msra.mxu2 %v4680_v33  ;;  %1790 = vadd.xlane.f32.xlu2 %v1789_v31 }
 0x3f6   :  { %v1950_v23 = vadd.f32 %v4816_v43, %v1949_v7  ;;  %4697 = vrot.lane.b32.xlu1 %v5554_v24, %s5164_s14  ;;  %v7277_v24 = vld [vmem:[#allocation30_spill] sm:$0xff]  ;;  %v4679_v7 = vunpack.i.l.bf16 %v5736_v59 }
 0x3f7   :  { %v1628_v46 = vsub.f32 %v7277_v24, %v6002_v17 }
 0x3f8   :  { %v1954_v19 = vsel %vm1953_vm15, %v4816_v43, %v1950_v23 }
 0x3f9   :  { %v1959_v27 = vsel %vm1956_vm0, %v1958_v3, %v1954_v19  ;;  %v1688_v48 = vmul.f32 1.442695, %v1628_v46 }
 0x3fa   :  { %4702 = vrot.lane.b32.xlu0 %v4701_v20, %s5163_s30  ;;  %v2251_v26 = vmul.f32 %v7274_v25, %v1959_v27 }
 0x3fc   :  { %4568 = vmatmul.msk.f32.vlgmr.msrb.gmra.mxu3 %vm1503_vm10, %v2251_v26  ;;  %v7279_v26 = vld [vmem:[#allocation28_spill] sm:$0xff] }
 0x3fd   :  { %2727 = vmatpush.msrb.mxu3 %v4685_v29  ;;  %v4689_v29 = vunpack.i.l.bf16 %v7279_v26 }
 0x40d   :  { %718 = vrot.lane.b32.xlu2 %v7276_v42, %s5163_s30 }
 0x410   :  { %v1746_v4 = vpop.xlane.xlu2 %1745 }
 0x411   :  { %4819 = vrcp.f32 %v1746_v4  ;;  %v2027_v14 = vand.u32 2147483648, %v1746_v4  ;;  %vm2021_vm6 = vweird.f32 %v1746_v4  ;;  %v2025_v5 = vand.u32 2147483647, %v1746_v4 }
 0x412   :  { %4821 = vpow2.f32 %v1688_v48 }
 0x413   :  { %4823 = vpow2.f32 %v1690_v45  ;;  %v2028_v31 = vor.u32 1.1754944e-38, %v2027_v14  ;;  %vm2026_vm8 = vcmp.eq.f32.partialorder %v2025_v5, 8.507059e+37  ;;  %v7280_v45 = vld [vmem:[#allocation26_spill] sm:$0xff] }
 0x417   :  { %v4820_v38 = vpop.eup %4819 }
 0x418   :  { %v1734_v21 = vpop.xlane.xlu1 %1733  ;;  %v6096_v37 = vpop.eup %4821  ;;  %v2017_v53 = vmul.f32 %v4820_v38, %v1746_v4  ;;  %vm2022_vm3 = vweird.f32 %v4820_v38 }
 0x419   :  { %4825 = vrcp.f32 %v1734_v21  ;;  %v6098_v8 = vpop.eup %4823  ;;  %v1780_v17 = vsel %vm1503_vm10, %v6096_v37, 0.0  ;;  %v1971_v28 = vand.u32 2147483648, %v1734_v21  ;;  %v1969_v16 = vand.u32 2147483647, %v1734_v21  ;;  %vm2023_vm7 = vmor %vm2021_vm6, %vm2022_vm3 }
 0x41a   :  { %v2018_v50 = vsub.f32 1.0, %v2017_v53  ;;  %v1783_v60 = vsel %vm1503_vm10, %v6098_v8, 0.0  ;;  %vm1965_vm2 = vweird.f32 %v1734_v21 }
 0x41b   :  { %v1972_v43 = vor.u32 1.1754944e-38, %v1971_v28  ;;  %vm1970_vm5 = vcmp.eq.f32.partialorder %v1969_v16, 8.507059e+37 }
 0x41c   :  { %v2019_v34 = vmul.f32 %v4820_v38, %v2018_v50 }
 0x41e   :  { %v2020_v30 = vadd.f32 %v4820_v38, %v2019_v34 }
 0x41f   :  { %v4826_v55 = vpop.eup %4825 }
 0x420   :  { %1781 = vadd.xlane.f32.xlu1 %v1780_v17  ;;  %v1961_v1 = vmul.f32 %v4826_v55, %v1734_v21  ;;  %vm1966_vm1 = vweird.f32 %v4826_v55  ;;  %v2024_v6 = vsel %vm2023_vm7, %v4820_v38, %v2020_v30  ;;  %v7281_v21 = vld [vmem:[#allocation25_spill] sm:$0xff]  ;;  %v4684_v30 = vunpack.i.l.bf16 %v7275_v58 }
 0x421   :  { %vm1967_vm4 = vmor %vm1965_vm2, %vm1966_vm1  ;;  %v2029_v3 = vsel %vm2026_vm8, %v2028_v31, %v2024_v6  ;;  %v4706_v38 = vpack.i.bf16 %v7281_v21, %v7280_v45 }
 0x422   :  { %v1962_v36 = vsub.f32 1.0, %v1961_v1  ;;  %v2256_v59 = vmul.f32 %v5879_v2, %v2029_v3 }
 0x424   :  { %1784 = vadd.xlane.f32.xlu0 %v1783_v60  ;;  %v1963_v18 = vmul.f32 %v4826_v55, %v1962_v36 }
 0x426   :  { %v1964_v35 = vadd.f32 %v4826_v55, %v1963_v18 }
 0x428   :  { %v1737_v54 = vpop.xlane.xlu0 %1736  ;;  %v1968_v61 = vsel %vm1967_vm4, %v4826_v55, %v1964_v35  ;;  %v7282_v55 = vld [vmem:[#allocation24_spill] sm:$0xff] }
 0x429   :  { %4827 = vrcp.f32 %v1737_v54  ;;  %v1973_v47 = vsel %vm1970_vm5, %v1972_v43, %v1968_v61  ;;  %v6104_v33 = vpop.xlane.xlu1 %1748  ;;  %v1985_v24 = vand.u32 2147483648, %v1737_v54  ;;  %v1983_v57 = vand.u32 2147483647, %v1737_v54 }
 0x42a   :  { %v2252_v39 = vmul.f32 %v5911_v22, %v1973_v47  ;;  %4829 = vrcp.f32 %v6104_v33  ;;  %vm1979_vm12 = vweird.f32 %v1737_v54  ;;  %v2041_v34 = vand.u32 2147483648, %v6104_v33 }
 0x42b   :  { %v1986_v2 = vor.u32 1.1754944e-38, %v1985_v24  ;;  %vm1984_vm14 = vcmp.eq.f32.partialorder %v1983_v57, 8.507059e+37  ;;  %vm2035_vm1 = vweird.f32 %v6104_v33  ;;  %v2039_v35 = vand.u32 2147483647, %v6104_v33 }
 0x42c   :  { %4569 = vmatmul.msk.f32.vlgmr.msrb.gmra.mxu0 %vm1503_vm10, %v2252_v39 }
 0x42d   :  { %2750 = vmatpush.msrb.mxu0 %v4679_v7  ;;  %vm2040_vm5 = vcmp.eq.f32.partialorder %v2039_v35, 8.507059e+37 }
 0x42f   :  { %v4828_v23 = vpop.eup %4827 }
 0x430   :  { %v1975_v19 = vmul.f32 %v4828_v23, %v1737_v54  ;;  %v1758_v20 = vpop.xlane.xlu0 %1757  ;;  %v4830_v27 = vpop.eup %4829  ;;  %vm1980_vm11 = vweird.f32 %v4828_v23 }
 0x431   :  { %4831 = vrcp.f32 %v1758_v20  ;;  %v2031_v22 = vmul.f32 %v4830_v27, %v6104_v33  ;;  %vm1981_vm13 = vmor %vm1979_vm12, %vm1980_vm11  ;;  %vm2036_vm15 = vweird.f32 %v4830_v27  ;;  %v2083_v16 = vand.u32 2147483648, %v1758_v20 }
 0x432   :  { %v1976_v25 = vsub.f32 1.0, %v1975_v19  ;;  %v2081_v43 = vand.u32 2147483647, %v1758_v20  ;;  %vm6131_vm2 = vmor %vm2035_vm1, %vm2036_vm15  ;;  %vm2077_vm3 = vweird.f32 %v1758_v20 }
 0x433   :  { %v2032_v46 = vsub.f32 1.0, %v2031_v22  ;;  %v2084_v7 = vor.u32 1.1754944e-38, %v2083_v16  ;;  %v4690_v22 = vunpack.i.h.bf16 %v7279_v26 }
 0x434   :  { %v1977_v42 = vmul.f32 %v4828_v23, %v1976_v25  ;;  %4573 = vmatmul.msk.f32.vlgmr.msra.gmra.mxu0 %vm1503_vm10, %v2256_v59  ;;  %vm2082_vm6 = vcmp.eq.f32.partialorder %v2081_v43, 8.507059e+37 }
 0x435   :  { %2842 = vmatpush.msra.mxu0 %v4689_v29  ;;  %v2033_v48 = vmul.f32 %v4830_v27, %v2032_v46 }
 0x436   :  { %v1978_v9 = vadd.f32 %v4828_v23, %v1977_v42 }
 0x437   :  { %v4832_v4 = vpop.eup %4831  ;;  %v2034_v28 = vadd.f32 %v4830_v27, %v2033_v48 }
 0x438   :  { %v1982_v53 = vsel %vm1981_vm13, %v4828_v23, %v1978_v9  ;;  %v2073_v17 = vmul.f32 %v4832_v4, %v1758_v20  ;;  %724 = vrot.lane.b32.xlu0 %v7282_v55, %s5163_s30  ;;  %v6119_v50 = vpop.xlane.xlu2 %1769  ;;  %v6121_v1 = vpop.xlane.xlu0 %1739  ;;  %vm2078_vm0 = vweird.f32 %v4832_v4 }
 0x439   :  { %4833 = vrcp.f32 %v6119_v50  ;;  %4707 = vrot.lane.b32.xlu1 %v4706_v38, %s5163_s30  ;;  %v1987_v36 = vsel %vm1984_vm14, %v1986_v2, %v1982_v53  ;;  %v2038_v5 = vsel %vm6131_vm2, %v4830_v27, %v2034_v28  ;;  %vm6137_vm4 = vmor %vm2077_vm3, %vm2078_vm0  ;;  %vm2133_vm11 = vweird.f32 %v6119_v50 }
 0x43a   :  { %v2074_v60 = vsub.f32 1.0, %v2073_v17  ;;  %4835 = vrcp.f32 %v6121_v1  ;;  %v2253_v54 = vmul.f32 %v5961_v41, %v1987_v36  ;;  %v2042_v41 = vor.u32 1.1754944e-38, %v2041_v34 }
 0x43b   :  { %v2139_v57 = vand.u32 2147483648, %v6119_v50  ;;  %v1999_v9 = vand.u32 2147483648, %v6121_v1  ;;  %v2137_v26 = vand.u32 2147483647, %v6119_v50  ;;  %vm1993_vm13 = vweird.f32 %v6121_v1 }
 0x43c   :  { %v2075_v18 = vmul.f32 %v4832_v4, %v2074_v60  ;;  %4570 = vmatmul.msk.f32.vlgmr.msrb.gmra.mxu1 %vm1503_vm10, %v2253_v54  ;;  %v2043_v19 = vsel %vm2040_vm5, %v2042_v41, %v2038_v5 }
 0x43d   :  { %2773 = vmatpush.msrb.mxu1 %v4684_v30  ;;  %v2257_v42 = vmul.f32 %v5966_v32, %v2043_v19  ;;  %v1997_v32 = vand.u32 2147483647, %v6121_v1  ;;  %vm2138_vm15 = vcmp.eq.f32.partialorder %v2137_v26, 8.507059e+37 }
 0x43e   :  { %v2076_v14 = vadd.f32 %v4832_v4, %v2075_v18 }
 0x43f   :  { %v4834_v47 = vpop.eup %4833  ;;  %vm1998_vm0 = vcmp.eq.f32.partialorder %v1997_v32, 8.507059e+37 }
 0x440   :  { %v4836_v33 = vpop.eup %4835  ;;  %v2080_v58 = vsel %vm6137_vm4, %v4832_v4, %v2076_v14  ;;  %v2129_v6 = vmul.f32 %v4834_v47, %v6119_v50  ;;  %v6145_v31 = vpop.xlane.xlu1 %1742  ;;  %vm2134_vm7 = vweird.f32 %v4834_v47  ;;  %v2140_v50 = vor.u32 1.1754944e-38, %v2139_v57 }
 0x441   :  { %v6147_v23 = vpop.xlane.xlu0 %1760  ;;  %v1989_v3 = vmul.f32 %v4836_v33, %v6121_v1  ;;  %4837 = vrcp.f32 %v6145_v31  ;;  %v2085_v20 = vsel %vm2082_vm6, %v2084_v7, %v2080_v58  ;;  %vm1994_vm8 = vweird.f32 %v4836_v33  ;;  %vm6158_vm12 = vmor %vm2133_vm11, %vm2134_vm7 }
 0x442   :  { %v2130_v27 = vsub.f32 1.0, %v2129_v6  ;;  %4839 = vrcp.f32 %v6147_v23  ;;  %v2260_v24 = vmul.f32 %v5973_v63, %v2085_v20  ;;  %vm6168_vm14 = vmor %vm1993_vm13, %vm1994_vm8  ;;  %v2000_v1 = vor.u32 1.1754944e-38, %v1999_v9 }
 0x443   :  { %v1990_v25 = vsub.f32 1.0, %v1989_v3  ;;  %vm2007_vm1 = vweird.f32 %v6145_v31  ;;  %v2013_v35 = vand.u32 2147483648, %v6145_v31  ;;  %v2097_v30 = vand.u32 2147483648, %v6147_v23 }
 0x444   :  { %v2131_v59 = vmul.f32 %v4834_v47, %v2130_v27  ;;  %4574 = vmatmul.msk.f32.vlgmr.msra.gmra.mxu1 %vm1503_vm10, %v2257_v42  ;;  %4577 = vmatmul.msk.f32.vlgmr.msrb.gmra.mxu0 %vm1503_vm10, %v2260_v24  ;;  %v2011_v61 = vand.u32 2147483647, %v6145_v31  ;;  %v2095_v14 = vand.u32 2147483647, %v6147_v23  ;;  %vm2091_vm5 = vweird.f32 %v6147_v23 }
 0x445   :  { %v1991_v29 = vmul.f32 %v4836_v33, %v1990_v25  ;;  %2865 = vmatpush.msra.mxu1 %v4690_v22 }
 0x446   :  { %v2132_v46 = vadd.f32 %v4834_v47, %v2131_v59  ;;  %vm2012_vm7 = vcmp.eq.f32.partialorder %v2011_v61, 8.507059e+37  ;;  %vm2096_vm8 = vcmp.eq.f32.partialorder %v2095_v14, 8.507059e+37 }
 0x447   :  { %v4838_v4 = vpop.eup %4837  ;;  %v1992_v45 = vadd.f32 %v4836_v33, %v1991_v29 }
 0x448   :  { %v2003_v21 = vmul.f32 %v4838_v4, %v6145_v31  ;;  %v6173_v38 = vpop.xlane.xlu1 %1772  ;;  %v4840_v53 = vpop.eup %4839  ;;  %v2136_v2 = vsel %vm6158_vm12, %v4834_v47, %v2132_v46  ;;  %vm2008_vm2 = vweird.f32 %v4838_v4 }
 0x449   :  { %v1996_v17 = vsel %vm6168_vm14, %v4836_v33, %v1992_v45  ;;  %v6179_v55 = vpop.xlane.xlu0 %1751  ;;  %v2087_v60 = vmul.f32 %v4840_v53, %v6147_v23  ;;  %4841 = vrcp.f32 %v6173_v38  ;;  %v2141_v28 = vsel %vm2138_vm15, %v2140_v50, %v2136_v2  ;;  %vm6191_vm4 = vmor %vm2007_vm1, %vm2008_vm2  ;;  %v6196_v41 = vpop.xlane.xlu2 %1775 }
 0x44a   :  { %v2004_v36 = vsub.f32 1.0, %v2003_v21  ;;  %v2001_v34 = vsel %vm1998_vm0, %v2000_v1, %v1996_v17  ;;  %4843 = vrcp.f32 %v6179_v55  ;;  %vm2092_vm3 = vweird.f32 %v4840_v53 }
 0x44b   :  { %v2088_v16 = vsub.f32 1.0, %v2087_v60  ;;  %v2254_v47 = vmul.f32 %v6004_v0, %v2001_v34  ;;  %v2264_v5 = vmul.f32 %v6009_v15, %v2141_v28  ;;  %vm2093_vm6 = vmor %vm2091_vm5, %vm2092_vm3  ;;  %v2014_v15 = vor.u32 1.1754944e-38, %v2013_v35 }
 0x44c   :  { %v2005_v18 = vmul.f32 %v4838_v4, %v2004_v36  ;;  %v2098_v23 = vor.u32 1.1754944e-38, %v2097_v30  ;;  %v2151_v59 = vand.u32 2147483647, %v6173_v38  ;;  %v2153_v29 = vand.u32 2147483648, %v6173_v38 }
 0x44d   :  { %v2089_v54 = vmul.f32 %v4840_v53, %v2088_v16  ;;  %4571 = vmatmul.msk.f32.vlgmr.msrb.gmra.mxu2 %vm1503_vm10, %v2254_v47  ;;  %4581 = vmatmul.msk.f32.vlgmr.msra.gmra.mxu0 %vm1503_vm10, %v2264_v5  ;;  %v2053_v42 = vand.u32 2147483647, %v6179_v55  ;;  %vm2147_vm12 = vweird.f32 %v6173_v38  ;;  %v2055_v9 = vand.u32 2147483648, %v6179_v55 }
 0x44e   :  { %v2006_v43 = vadd.f32 %v4838_v4, %v2005_v18  ;;  %vm6227_vm15 = vcmp.eq.f32.partialorder %v2151_v59, 8.507059e+37  ;;  %vm2049_vm0 = vweird.f32 %v6179_v55 }
 0x44f   :  { %v2090_v33 = vadd.f32 %v4840_v53, %v2089_v54  ;;  %v4842_v7 = vpop.eup %4841  ;;  %vm6232_vm1 = vcmp.eq.f32.partialorder %v2053_v42, 8.507059e+37  ;;  %v2167_v42 = vand.u32 2147483648, %v6196_v41 }
 0x450   :  { %v6198_v58 = vpop.xlane.xlu1 %1754  ;;  %v2010_v6 = vsel %vm6191_vm4, %v4838_v4, %v2006_v43  ;;  %v2143_v3 = vmul.f32 %v4842_v7, %v6173_v38  ;;  %v4844_v19 = vpop.eup %4843  ;;  %vm2148_vm11 = vweird.f32 %v4842_v7 }
 0x451   :  { %4845 = vrcp.f32 %v6198_v58  ;;  %v6205_v0 = vpop.xlane.xlu0 %1763  ;;  %v2094_v31 = vsel %vm2093_vm6, %v4840_v53, %v2090_v33  ;;  %v2015_v20 = vsel %vm2012_vm7, %v2014_v15, %v2010_v6  ;;  %v2045_v22 = vmul.f32 %v4844_v19, %v6179_v55  ;;  %vm6223_vm14 = vmor %vm2147_vm12, %vm2148_vm11 }
 0x452   :  { %4847 = vrcp.f32 %v6196_v41  ;;  %v2099_v27 = vsel %vm2096_vm8, %v2098_v23, %v2094_v31  ;;  %v2144_v25 = vsub.f32 1.0, %v2143_v3  ;;  %v2255_v4 = vmul.f32 %v6022_v44, %v2015_v20 }
 0x453   :  { %4849 = vrcp.f32 %v6205_v0  ;;  %v2046_v46 = vsub.f32 1.0, %v2045_v22  ;;  %v2261_v48 = vmul.f32 %v6019_v12, %v2099_v27  ;;  %vm2050_vm13 = vweird.f32 %v4844_v19 }
 0x454   :  { %v2145_v24 = vmul.f32 %v4842_v7, %v2144_v25  ;;  %v2154_v44 = vor.u32 1.1754944e-38, %v2153_v29  ;;  %4572 = vmatmul.msk.f32.vlgmr.msra.gmra.mxu3 %vm1503_vm10, %v2255_v4  ;;  %vm2051_vm2 = vmor %vm2049_vm0, %vm2050_vm13  ;;  %v2056_v55 = vor.u32 1.1754944e-38, %v2055_v9  ;;  %v2067_v60 = vand.u32 2147483647, %v6198_v58 }
 0x455   :  { %v2047_v45 = vmul.f32 %v4844_v19, %v2046_v46  ;;  %4578 = vmatmul.msk.f32.vlgmr.msrb.gmra.mxu1 %vm1503_vm10, %v2261_v48  ;;  %v2069_v28 = vand.u32 2147483648, %v6198_v58  ;;  %vm2063_vm4 = vweird.f32 %v6198_v58  ;;  %vm2105_vm8 = vweird.f32 %v6205_v0 }
 0x456   :  { %v2146_v26 = vadd.f32 %v4842_v7, %v2145_v24  ;;  %vm2068_vm6 = vcmp.eq.f32.partialorder %v2067_v60, 8.507059e+37  ;;  %v2109_v3 = vand.u32 2147483647, %v6205_v0  ;;  %v2165_v53 = vand.u32 2147483647, %v6196_v41 }
 0x457   :  { %v4846_v57 = vpop.eup %4845  ;;  %v2048_v17 = vadd.f32 %v4844_v19, %v2047_v45  ;;  %v2070_v14 = vor.u32 1.1754944e-38, %v2069_v28  ;;  %v2168_v38 = vor.u32 1.1754944e-38, %v2167_v42 }
 0x458   :  { %v2059_v32 = vmul.f32 %v4846_v57, %v6198_v58  ;;  %v6219_v63 = vpop.xlane.xlu2 %1778  ;;  %v6221_v21 = vpop.eup %4847  ;;  %v2150_v2 = vsel %vm6223_vm14, %v4842_v7, %v2146_v26  ;;  %vm2064_vm3 = vweird.f32 %v4846_v57  ;;  %vm2110_vm12 = vcmp.eq.f32.partialorder %v2109_v3, 8.507059e+37 }
 0x459   :  { %4851 = vrcp.f32 %v6219_v63  ;;  %v6241_v1 = vpop.xlane.xlu0 %1766  ;;  %v4850_v36 = vpop.eup %4849  ;;  %v2155_v34 = vsel %vm6227_vm15, %v2154_v44, %v2150_v2  ;;  %v2052_v18 = vsel %vm2051_vm2, %v4844_v19, %v2048_v17  ;;  %v2157_v43 = vmul.f32 %v6221_v21, %v6196_v41  ;;  %vm2065_vm5 = vmor %vm2063_vm4, %vm2064_vm3 }
 0x45a   :  { %v2060_v50 = vsub.f32 1.0, %v2059_v32  ;;  %v2101_v35 = vmul.f32 %v4850_v36, %v6205_v0  ;;  %v2057_v54 = vsel %vm6232_vm1, %v2056_v55, %v2052_v18  ;;  %4853 = vrcp.f32 %v6241_v1 }
 0x45b   :  { %v2258_v47 = vmul.f32 %v6035_v51, %v2057_v54  ;;  %v2265_v5 = vmul.f32 %v6033_v49, %v2155_v34  ;;  %v2158_v15 = vsub.f32 1.0, %v2157_v43  ;;  %vm2106_vm7 = vweird.f32 %v4850_v36  ;;  %v3011_v54 = vld [vmem:[#allocation10 + $0x18] sm:$0xff] }
 0x45c   :  { %v2061_v16 = vmul.f32 %v4846_v57, %v2060_v50  ;;  %v2102_v61 = vsub.f32 1.0, %v2101_v35  ;;  %v2111_v49 = vand.u32 2147483648, %v6205_v0  ;;  %vm2107_vm11 = vmor %vm2105_vm8, %vm2106_vm7  ;;  %v2123_v24 = vand.u32 2147483647, %v6241_v1 }
 0x45d   :  { %4575 = vmatmul.msk.f32.vlgmr.msra.gmra.mxu2 %vm1503_vm10, %v2258_v47  ;;  %4582 = vmatmul.msk.f32.vlgmr.msra.gmra.mxu1 %vm1503_vm10, %v2265_v5  ;;  %v2159_v25 = vmul.f32 %v6221_v21, %v2158_v15  ;;  %v2125_v0 = vand.u32 2147483648, %v6241_v1  ;;  %vm2162_vm14 = vweird.f32 %v6221_v21  ;;  %vm2161_vm15 = vweird.f32 %v6196_v41  ;;  %v6310_v5 = vpop.f32.mrf.mxu0 }
 0x45e   :  { %v2062_v30 = vadd.f32 %v4846_v57, %v2061_v16  ;;  %v2103_v7 = vmul.f32 %v4850_v36, %v2102_v61  ;;  %v2112_v59 = vor.u32 1.1754944e-38, %v2111_v49  ;;  %vm2119_vm0 = vweird.f32 %v6241_v1  ;;  %vm6284_vm2 = vmor %vm2161_vm15, %vm2162_vm14  ;;  %v3009_v61 = vld [vmem:[#allocation10 + $0x8] sm:$0xff] }
 0x45f   :  { %v6257_v39 = vpop.eup %4851  ;;  %v2160_v48 = vadd.f32 %v6221_v21, %v2159_v25  ;;  %v2126_v44 = vor.u32 1.1754944e-38, %v2125_v0  ;;  %vm2124_vm4 = vcmp.eq.f32.partialorder %v2123_v24, 8.507059e+37  ;;  %v2179_v55 = vand.u32 2147483647, %v6219_v63 }
 0x460   :  { %v2066_v33 = vsel %vm2065_vm5, %v4846_v57, %v2062_v30  ;;  %v6259_v6 = vpop.xlane.xlu2 %1787  ;;  %v2171_v58 = vmul.f32 %v6257_v39, %v6219_v63  ;;  %v2104_v51 = vadd.f32 %v4850_v36, %v2103_v7  ;;  %v4854_v23 = vpop.eup %4853  ;;  %vm2176_vm3 = vweird.f32 %v6257_v39  ;;  %v3010_v30 = vld [vmem:[#allocation10 + $0x10] sm:$0xff] }
 0x461   :  { %v2071_v31 = vsel %vm2068_vm6, %v2070_v14, %v2066_v33  ;;  %v2115_v27 = vmul.f32 %v4854_v23, %v6241_v1  ;;  %vm2120_vm13 = vweird.f32 %v4854_v23  ;;  %v2164_v41 = vsel %vm6284_vm2, %v6221_v21, %v2160_v48  ;;  %v3008_v14 = vld [vmem:[#allocation10] sm:$0xff] }
 0x462   :  { %v2259_v19 = vmul.f32 %v6046_v62, %v2071_v31  ;;  %v2172_v20 = vsub.f32 1.0, %v2171_v58  ;;  %v2108_v22 = vsel %vm2107_vm11, %v4850_v36, %v2104_v51  ;;  %vm2121_vm1 = vmor %vm2119_vm0, %vm2120_vm13  ;;  %vm2175_vm5 = vweird.f32 %v6219_v63 }
 0x463   :  { %v2116_v29 = vsub.f32 1.0, %v2115_v27  ;;  %v2113_v46 = vsel %vm2110_vm12, %v2112_v59, %v2108_v22  ;;  %vm2166_vm6 = vcmp.eq.f32.partialorder %v2165_v53, 8.507059e+37  ;;  %vm2177_vm7 = vmor %vm2175_vm5, %vm2176_vm3  ;;  %vm2180_vm8 = vcmp.eq.f32.partialorder %v2179_v55, 8.507059e+37 }
 0x464   :  { %4576 = vmatmul.msk.f32.vlgmr.msrb.gmra.mxu3 %vm1503_vm10, %v2259_v19  ;;  %v2173_v62 = vmul.f32 %v6257_v39, %v2172_v20  ;;  %v2262_v12 = vmul.f32 %v6049_v56, %v2113_v46  ;;  %v2181_v56 = vand.u32 2147483648, %v6219_v63  ;;  %v2169_v18 = vsel %vm2166_vm6, %v2168_v38, %v2164_v41 }
 0x465   :  { %v2117_v57 = vmul.f32 %v4854_v23, %v2116_v29  ;;  %v2266_v43 = vmul.f32 %v6037_v10, %v2169_v18  ;;  %vm2217_vm11 = vweird.f32 %v6259_v6  ;;  %v2221_v27 = vand.u32 2147483647, %v6259_v6 }
 0x466   :  { %v2174_v17 = vadd.f32 %v6257_v39, %v2173_v62  ;;  %v2182_v35 = vor.u32 1.1754944e-38, %v2181_v56  ;;  %v2223_v42 = vand.u32 2147483648, %v6259_v6 }
 0x467   :  { %v2118_v45 = vadd.f32 %v4854_v23, %v2117_v57  ;;  %v6323_v57 = vpop.f32.mrf.mxu1 }
 0x468   :  { %v4698_v9 = vpop.permute.xlu1 %4697  ;;  %v6276_v4 = vpop.xlane.xlu2 %1790  ;;  %v2178_v21 = vsel %vm2177_vm7, %v6257_v39, %v2174_v17 }
 0x469   :  { %v4700_v26 = vunpack.i.h.bf16 %v4698_v9  ;;  %v4699_v32 = vunpack.i.l.bf16 %v4698_v9  ;;  %v2122_v50 = vsel %vm2121_vm1, %v4854_v23, %v2118_v45  ;;  %v2183_v63 = vsel %vm2180_vm8, %v2182_v35, %v2178_v21  ;;  %v6315_v23 = vpop.f32.mrf.mxu0 }
 0x46a   :  { %v2127_v36 = vsel %vm2124_vm4, %v2126_v44, %v2122_v50  ;;  %4855 = vrcp.f32 %v6276_v4  ;;  %v2237_v0 = vand.u32 2147483648, %v6276_v4  ;;  %vm2231_vm0 = vweird.f32 %v6276_v4 }
 0x46b   :  { %2819 = vmatpush.msra.mxu3 %v4700_v26  ;;  %2796 = vmatpush.msrb.mxu2 %v4699_v32  ;;  %v2263_v34 = vmul.f32 %v6056_v11, %v2127_v36  ;;  %v2267_v11 = vmul.f32 %v6059_v52, %v2183_v63  ;;  %4857 = vrcp.f32 %v6259_v6  ;;  %v2235_v48 = vand.u32 2147483647, %v6276_v4 }
 0x46c   :  { %v4703_v1 = vpop.permute.xlu0 %4702  ;;  %4579 = vmatmul.msk.f32.vlgmr.msrb.gmra.mxu2 %vm1503_vm10, %v2262_v12  ;;  %v2238_v44 = vor.u32 1.1754944e-38, %v2237_v0 }
 0x46d   :  { %v4705_v60 = vunpack.i.h.bf16 %v4703_v1  ;;  %v4704_v28 = vunpack.i.l.bf16 %v4703_v1  ;;  %4580 = vmatmul.msk.f32.vlgmr.msra.gmra.mxu3 %vm1503_vm10, %v2263_v34  ;;  %vm2236_vm7 = vcmp.eq.f32.partialorder %v2235_v48, 8.507059e+37 }
 0x46f   :  { %2888 = vmatpush.msra.mxu2 %v4704_v28  ;;  %2911 = vmatpush.msrb.mxu3 %v4705_v60  ;;  %v2407_v35 = vpop.f32.mrf.mxu1 }
 0x470   :  { %v719_v16 = vpop.permute.xlu2 %718  ;;  %v4856_v47 = vpop.eup %4855 }
 0x471   :  { %2934 = vmatpush.msrb.mxu0 %v719_v16  ;;  %v6308_v10 = vpop.eup %4857  ;;  %v2227_v39 = vmul.f32 %v4856_v47, %v6276_v4  ;;  %vm2232_vm13 = vweird.f32 %v4856_v47  ;;  %v2476_v17 = vpop.f32.mrf.mxu0 }
 0x472   :  { %v2213_v33 = vmul.f32 %v6308_v10, %v6259_v6  ;;  %vm2218_vm14 = vweird.f32 %v6308_v10  ;;  %vm6329_vm2 = vmor %vm2231_vm0, %vm2232_vm13  ;;  %v2224_v6 = vor.u32 1.1754944e-38, %v2223_v42 }
 0x473   :  { %3060 = vmatpush.msra.mxu0 %v3011_v54  ;;  %v2228_v15 = vsub.f32 1.0, %v2227_v39  ;;  %vm6339_vm5 = vmor %vm2217_vm11, %vm2218_vm14  ;;  %vm2222_vm11 = vcmp.eq.f32.partialorder %v2221_v27, 8.507059e+37  ;;  %v3020_v39 = vld [vmem:[#allocation10 + $0x60] sm:$0xff] }
 0x474   :  { %4583 = vmatmul.msk.f32.vlgmr.msra.gmra.mxu2 %vm1503_vm10, %v2266_v43  ;;  %v2214_v58 = vsub.f32 1.0, %v2213_v33  ;;  %v3012_v33 = vld [vmem:[#allocation10 + $0x20] sm:$0xff] }
 0x475   :  { %4584 = vmatmul.msk.f32.vlgmr.msrb.gmra.mxu3 %vm1503_vm10, %v2267_v11  ;;  %3061 = vmatpush.msra.mxu0 %v3010_v30  ;;  %v2229_v49 = vmul.f32 %v4856_v47, %v2228_v15 }
 0x476   :  { %v2215_v20 = vmul.f32 %v6308_v10, %v2214_v58 }
 0x477   :  { %3062 = vmatpush.msra.mxu0 %v3009_v61  ;;  %v2230_v24 = vadd.f32 %v4856_v47, %v2229_v49  ;;  %v3015_v61 = vld [vmem:[#allocation10 + $0x38] sm:$0xff]  ;;  %v2499_v15 = vpop.f32.mrf.mxu1 }
 0x478   :  { %v2216_v9 = vadd.f32 %v6308_v10, %v2215_v20 }
 0x479   :  { %3063 = vmatpush.msra.mxu0 %v3008_v14  ;;  %v2234_v38 = vsel %vm6329_vm2, %v4856_v47, %v2230_v24  ;;  %v3022_v14 = vld [vmem:[#allocation10 + $0x70] sm:$0xff] }
 0x47a   :  { %v2220_v56 = vsel %vm6339_vm5, %v6308_v10, %v2216_v9  ;;  %v2239_v36 = vsel %vm2236_vm7, %v2238_v44, %v2234_v38  ;;  %v3014_v47 = vld [vmem:[#allocation10 + $0x30] sm:$0xff] }
 0x47b   :  { %v2225_v28 = vsel %vm2222_vm11, %v2224_v6, %v2220_v56  ;;  %v2271_v34 = vmul.f32 %v6075_v13, %v2239_v36  ;;  %v3019_v13 = vld [vmem:[#allocation10 + $0x58] sm:$0xff]  ;;  %v3018_v10 = vld [vmem:[#allocation10 + $0x50] sm:$0xff] }
 0x47c   :  { %v2270_v30 = vmul.f32 %v6068_v40, %v2225_v28  ;;  %v3017_v40 = vld [vmem:[#allocation10 + $0x48] sm:$0xff] }
 0x493   :  { %v1782_v52 = vpop.xlane.xlu1 %1781 }
 0x494   :  { %4859 = vrcp.f32 %v1782_v52  ;;  %v2195_v25 = vand.u32 2147483648, %v1782_v52  ;;  %v2193_v59 = vand.u32 2147483647, %v1782_v52  ;;  %vm2189_vm15 = vweird.f32 %v1782_v52 }
 0x496   :  { %v2196_v26 = vor.u32 1.1754944e-38, %v2195_v25  ;;  %vm2194_vm3 = vcmp.eq.f32.partialorder %v2193_v59, 8.507059e+37 }
 0x497   :  { %v1785_v7 = vpop.xlane.xlu0 %1784 }
 0x498   :  { %4861 = vrcp.f32 %v1785_v7  ;;  %v2209_v2 = vand.u32 2147483648, %v1785_v7  ;;  %vm2203_vm6 = vweird.f32 %v1785_v7  ;;  %v2207_v1 = vand.u32 2147483647, %v1785_v7 }
 0x49a   :  { %v4860_v31 = vpop.eup %4859  ;;  %v2210_v60 = vor.u32 1.1754944e-38, %v2209_v2 }
 0x49b   :  { %v2185_v51 = vmul.f32 %v4860_v31, %v1782_v52  ;;  %vm2190_vm12 = vweird.f32 %v4860_v31  ;;  %v3021_v52 = vld [vmem:[#allocation10 + $0x68] sm:$0xff] }
 0x49c   :  { %vm2191_vm1 = vmor %vm2189_vm15, %vm2190_vm12  ;;  %vm2208_vm12 = vcmp.eq.f32.partialorder %v2207_v1, 8.507059e+37  ;;  %v4911_v1 = vld [vmem:[#allocation2] sm:$0xff] }
 0x49d   :  { %v2186_v3 = vsub.f32 1.0, %v2185_v51  ;;  %v2361_v51 = vpop.f32.mrf.mxu3 }
 0x49e   :  { %v4862_v19 = vpop.eup %4861 }
 0x49f   :  { %v2187_v22 = vmul.f32 %v4860_v31, %v2186_v3  ;;  %v2199_v29 = vmul.f32 %v4862_v19, %v1785_v7  ;;  %vm2204_vm4 = vweird.f32 %v4862_v19  ;;  %v2338_v7 = vpop.f32.mrf.mxu2 }
 0x4a0   :  { %vm2205_vm8 = vmor %vm2203_vm6, %vm2204_vm4 }
 0x4a1   :  { %v2188_v46 = vadd.f32 %v4860_v31, %v2187_v22  ;;  %v2200_v62 = vsub.f32 1.0, %v2199_v29 }
 0x4a3   :  { %v2192_v32 = vsel %vm2191_vm1, %v4860_v31, %v2188_v46  ;;  %v2201_v53 = vmul.f32 %v4862_v19, %v2200_v62  ;;  %v3016_v31 = vld [vmem:[#allocation10 + $0x40] sm:$0xff] }
 0x4a4   :  { %v2197_v12 = vsel %vm2194_vm3, %v2196_v26, %v2192_v32 }
 0x4a5   :  { %v2202_v50 = vadd.f32 %v4862_v19, %v2201_v53  ;;  %v2268_v41 = vmul.f32 %v6096_v37, %v2197_v12  ;;  %v3023_v37 = vld [vmem:[#allocation10 + $0x78] sm:$0xff]  ;;  %v2453_v20 = vpop.f32.mrf.mxu3 }
 0x4a7   :  { %v2206_v55 = vsel %vm2205_vm8, %v4862_v19, %v2202_v50  ;;  %4585 = vmatmul.msk.f32.vlgmr.msrb.gmra.mxu0 %vm1503_vm10, %v2268_v41  ;;  %v2430_v49 = vpop.f32.mrf.mxu2  ;;  %v6389_v50 = vld [vmem:[#allocation11] ss:$0 sm:$0xff] }
 0x4a8   :  { %v2211_v18 = vsel %vm2208_vm12, %v2210_v60, %v2206_v55 }
 0x4a9   :  { %v2568_v11 = vpop.f32.mrf.mxu0  ;;  %v2269_v54 = vmul.f32 %v6098_v8, %v2211_v18  ;;  %v3013_v8 = vld [vmem:[#allocation10 + $0x28] sm:$0xff] }
 0x4aa   :  { %v725_v21 = vpop.permute.xlu0 %724 }
 0x4ab   :  { %3003 = vmatpush.msra.mxu3 %v725_v21  ;;  %v4708_v16 = vpop.permute.xlu1 %4707  ;;  %v4912_v21 = vld [vmem:[#allocation2 + $0x8] sm:$0xff] }
 0x4ac   :  { %v4710_v63 = vunpack.i.h.bf16 %v4708_v16  ;;  %v4709_v43 = vunpack.i.l.bf16 %v4708_v16  ;;  %4588 = vmatmul.msk.f32.vlgmr.msra.gmra.mxu3 %vm1503_vm10, %v2271_v34 }
 0x4ad   :  { %3255 = vmatpush.msrb.mxu3 %v3023_v37  ;;  %v2545_v25 = vpop.f32.mrf.mxu3 }
 0x4ae   :  { %2957 = vmatpush.msrb.mxu1 %v4709_v43  ;;  %2980 = vmatpush.msrb.mxu2 %v4710_v63 }
 0x4af   :  { %4586 = vmatmul.msk.f32.vlgmr.msrb.gmra.mxu1 %vm1503_vm10, %v2269_v54  ;;  %4587 = vmatmul.msk.f32.vlgmr.msrb.gmra.mxu2 %vm1503_vm10, %v2270_v30  ;;  %v2522_v27 = vpop.f32.mrf.mxu2 }
 0x4b0   :  { %4589 = vmatmul.msk.f32.vlgmr.msra.gmra.mxu0 %vm734_vm9, %v6310_v5  ;;  %3125 = vmatpush.msra.mxu1 %v3015_v61 }
 0x4b1   :  { %3190 = vmatpush.msra.mxu2 %v3019_v13  ;;  %3256 = vmatpush.msrb.mxu3 %v3022_v14  ;;  %v2660_v5 = vpop.f32.mrf.mxu0  ;;  %v4913_v14 = vld [vmem:[#allocation2 + $0x10] sm:$0xff] }
 0x4b2   :  { %3126 = vmatpush.msra.mxu1 %v3014_v47 }
 0x4b3   :  { %3191 = vmatpush.msra.mxu2 %v3018_v10  ;;  %3257 = vmatpush.msrb.mxu3 %v3021_v52 }
 0x4b4   :  { %3127 = vmatpush.msra.mxu1 %v3013_v8 }
 0x4b5   :  { %3192 = vmatpush.msra.mxu2 %v3017_v40  ;;  %3258 = vmatpush.msrb.mxu3 %v3020_v39 }
 0x4b6   :  { %3128 = vmatpush.msra.mxu1 %v3012_v33 }
 0x4b7   :  { %3193 = vmatpush.msra.mxu2 %v3016_v31  ;;  %4597 = vmatmul.msk.f32.vlgmr.msra.gmra.mxu1 %vm734_vm9, %v2476_v17 }
 0x4b8   :  { %4590 = vmatmul.msk.f32.gmra.mxu0 %vm734_vm9, %v6323_v57  ;;  %4605 = vmatmul.msk.f32.vlgmr.msra.gmra.mxu2 %vm734_vm9, %v2660_v5 }
 0x4b9   :  { %v2591_v58 = vpop.f32.mrf.mxu1 }
 0x4bf   :  { %4598 = vmatmul.msk.f32.gmra.mxu1 %vm734_vm9, %v2499_v15  ;;  %v4914_v15 = vld [vmem:[#allocation2 + $0x18] sm:$0xff] }
 0x4c0   :  { %4591 = vmatmul.msk.f32.gmra.mxu0 %vm734_vm9, %v2338_v7 }
 0x4c1   :  { %v2683_v3 = vpop.f32.mrf.mxu1  ;;  %v2752_v19 = vpop.f32.mrf.mxu0 }
 0x4c2   :  { %4606 = vmatmul.msk.f32.gmra.mxu2 %vm734_vm9, %v2683_v3 }
 0x4c7   :  { %4599 = vmatmul.msk.f32.gmra.mxu1 %vm734_vm9, %v2522_v27 }
 0x4c8   :  { %4592 = vmatmul.msk.f32.gmra.mxu0 %vm734_vm9, %v2361_v51 }
 0x4ca   :  { %v2844_v22 = vpop.f32.mrf.mxu0 }
 0x4cb   :  { %4613 = vmatmul.msk.f32.vlgmr.msrb.gmra.mxu3 %vm734_vm9, %v2844_v22 }
 0x4cf   :  { %4600 = vmatmul.msk.f32.gmra.mxu1 %vm734_vm9, %v2545_v25 }
 0x4d0   :  { %4593 = vmatmul.msk.f32.gmra.mxu0 %vm734_vm9, %v6315_v23  ;;  %v2614_v29 = vpop.f32.mrf.mxu2 }
 0x4d2   :  { %v2775_v59 = vpop.f32.mrf.mxu1 }
 0x4d7   :  { %4601 = vmatmul.msk.f32.gmra.mxu1 %vm734_vm9, %v2568_v11  ;;  %v2637_v24 = vpop.f32.mrf.mxu3 }
 0x4d8   :  { %4594 = vmatmul.msk.f32.gmra.mxu0 %vm734_vm9, %v2407_v35 }
 0x4da   :  { %v2867_v42 = vpop.f32.mrf.mxu1 }
 0x4db   :  { %4614 = vmatmul.msk.f32.gmra.mxu3 %vm734_vm9, %v2867_v42 }
 0x4df   :  { %4602 = vmatmul.msk.f32.gmra.mxu1 %vm734_vm9, %v2591_v58 }
 0x4e0   :  { %4595 = vmatmul.msk.f32.gmra.mxu0 %vm734_vm9, %v2430_v49  ;;  %v2706_v0 = vpop.f32.mrf.mxu2 }
 0x4e1   :  { %4607 = vmatmul.msk.f32.gmra.mxu2 %vm734_vm9, %v2706_v0 }
 0x4e7   :  { %4603 = vmatmul.msk.f32.gmra.mxu1 %vm734_vm9, %v2614_v29  ;;  %v2729_v23 = vpop.f32.mrf.mxu3  ;;  %v4915_v29 = vld [vmem:[#allocation2 + $0x20] sm:$0xff] }
 0x4e8   :  { %4596 = vmatmul.msk.f32.gmra.mxu0 %vm734_vm9, %v2453_v20 }
 0x4e9   :  { %4608 = vmatmul.msk.f32.gmra.mxu2 %vm734_vm9, %v2729_v23 }
 0x4ef   :  { %4604 = vmatmul.msk.f32.gmra.mxu1 %vm734_vm9, %v2637_v24  ;;  %v2798_v46 = vpop.f32.mrf.mxu2 }
 0x4f0   :  { %v2821_v62 = vpop.f32.mrf.mxu3 }
 0x4f1   :  { %4609 = vmatmul.msk.f32.gmra.mxu2 %vm734_vm9, %v2752_v19 }
 0x4f7   :  { %v2890_v57 = vpop.f32.mrf.mxu2 }
 0x4f8   :  { %4615 = vmatmul.msk.f32.gmra.mxu3 %vm734_vm9, %v2890_v57  ;;  %v2913_v9 = vpop.f32.mrf.mxu3 }
 0x4f9   :  { %4610 = vmatmul.msk.f32.gmra.mxu2 %vm734_vm9, %v2775_v59 }
 0x500   :  { %4616 = vmatmul.msk.f32.gmra.mxu3 %vm734_vm9, %v2913_v9  ;;  %v4916_v9 = vld [vmem:[#allocation2 + $0x28] sm:$0xff] }
 0x501   :  { %4611 = vmatmul.msk.f32.gmra.mxu2 %vm734_vm9, %v2798_v46 }
 0x509   :  { %4612 = vmatmul.msk.f32.gmra.mxu2 %vm734_vm9, %v2821_v62 }
 0x524   :  { %v2936_v48 = vpop.f32.mrf.mxu0 }
 0x525   :  { %4617 = vmatmul.msk.f32.gmra.mxu3 %vm734_vm9, %v2936_v48 }
 0x52c   :  { %v2959_v26 = vpop.f32.mrf.mxu1 }
 0x52d   :  { %4618 = vmatmul.msk.f32.gmra.mxu3 %vm734_vm9, %v2959_v26  ;;  %v3065_v38 = vpop.f32.mrf.mxu0 }
 0x52f   :  { %v3005_v32 = vpop.f32.mrf.mxu3 }
 0x532   :  { %v2982_v45 = vpop.f32.mrf.mxu2 }
 0x534   :  { %v3130_v53 = vpop.f32.mrf.mxu1 }
 0x535   :  { %4619 = vmatmul.msk.f32.gmra.mxu3 %vm734_vm9, %v2982_v45  ;;  %v3284_v12 = vadd.f32 %v3130_v53, %v3065_v38  ;;  %v3068_v55 = vpop.f32.mrf.mxu0 }
 0x53b   :  { %v3195_v44 = vpop.f32.mrf.mxu2 }
 0x53c   :  { %v3285_v2 = vadd.f32 %v3284_v12, %v3195_v44  ;;  %v3133_v36 = vpop.f32.mrf.mxu1 }
 0x53d   :  { %4620 = vmatmul.msk.f32.gmra.mxu3 %vm734_vm9, %v3005_v32  ;;  %v3287_v60 = vadd.f32 %v3133_v36, %v3068_v55  ;;  %v3071_v63 = vpop.f32.mrf.mxu0 }
 0x544   :  { %v3136_v35 = vpop.f32.mrf.mxu1 }
 0x545   :  { %v3198_v6 = vpop.f32.mrf.mxu2  ;;  %v3290_v11 = vadd.f32 %v3136_v35, %v3071_v63  ;;  %v3074_v10 = vpop.f32.mrf.mxu0  ;;  %v4918_v63 = vld [vmem:[#allocation2 + $0x38] sm:$0xff] }
 0x546   :  { %v3288_v28 = vadd.f32 %v3287_v60, %v3198_v6  ;;  %v7305_v60 = vld [vmem:[#allocation23_spill] sm:$0xff] }
 0x54c   :  { %v3139_v13 = vpop.f32.mrf.mxu1 }
 0x54d   :  { %v3293_v8 = vadd.f32 %v3139_v13, %v3074_v10  ;;  %v3077_v51 = vpop.f32.mrf.mxu0 }
 0x54e   :  { %v3260_v4 = vpop.f32.mrf.mxu3 }
 0x54f   :  { %v3286_v17 = vadd.f32 %v3285_v2, %v3260_v4  ;;  %v4917_v2 = vld [vmem:[#allocation2 + $0x30] sm:$0xff] }
 0x551   :  { %v3308_v41 = vadd.f32 %v4911_v1, %v3286_v17 }
 0x553   :  { %v6392_v56 = vadd.f32 %v6389_v50, %v3308_v41 }
 0x554   :  { %v3142_v58 = vpop.f32.mrf.mxu1 }
 0x555   :  { %3330 = vadd.xlane.f32.xlu2 %v6392_v56  ;;  %v3296_v3 = vadd.f32 %v3142_v58, %v3077_v51  ;;  %v3080_v22 = vpop.f32.mrf.mxu0  ;;  %v3541_v58 = vld [vmem:[#allocation13 + $0xe8] sm:$0xff] }
 0x55c   :  { %v3145_v20 = vpop.f32.mrf.mxu1 }
 0x55d   :  { %v3299_v24 = vadd.f32 %v3145_v20, %v3080_v22  ;;  %v3083_v26 = vpop.f32.mrf.mxu0  ;;  %v3538_v20 = vld [vmem:[#allocation13 + $0xd0] sm:$0xff]  ;;  %v3536_v22 = vld [vmem:[#allocation13 + $0xc0] sm:$0xff] }
 0x55e   :  { %v3263_v34 = vpop.f32.mrf.mxu3 }
 0x55f   :  { %v3289_v18 = vadd.f32 %v3288_v28, %v3263_v34 }
 0x561   :  { %v3309_v37 = vadd.f32 %v4912_v21, %v3289_v18 }
 0x563   :  { %v6396_v16 = vadd.f32 %v6389_v50, %v3309_v37 }
 0x564   :  { %v3201_v43 = vpop.f32.mrf.mxu2  ;;  %v3148_v57 = vpop.f32.mrf.mxu1 }
 0x565   :  { %3332 = vadd.xlane.f32.xlu0 %v6396_v16  ;;  %v3291_v54 = vadd.f32 %v3290_v11, %v3201_v43  ;;  %v3302_v32 = vadd.f32 %v3148_v57, %v3083_v26  ;;  %v3086_v41 = vpop.f32.mrf.mxu0 }
 0x56c   :  { %v3204_v52 = vpop.f32.mrf.mxu2  ;;  %v3151_v1 = vpop.f32.mrf.mxu1 }
 0x56d   :  { %v3294_v39 = vadd.f32 %v3293_v8, %v3204_v52  ;;  %v3305_v6 = vadd.f32 %v3151_v1, %v3086_v41  ;;  %v3525_v1 = vld [vmem:[#allocation13 + $0x68] sm:$0xff] }
 0x574   :  { %v3207_v49 = vpop.f32.mrf.mxu2 }
 0x575   :  { %v3297_v19 = vadd.f32 %v3296_v3, %v3207_v49 }
 0x57b   :  { %v3266_v30 = vpop.f32.mrf.mxu3 }
 0x57c   :  { %v3292_v61 = vadd.f32 %v3291_v54, %v3266_v30  ;;  %v3210_v59 = vpop.f32.mrf.mxu2 }
 0x57d   :  { %v3300_v23 = vadd.f32 %v3299_v24, %v3210_v59  ;;  %v3537_v59 = vld [vmem:[#allocation13 + $0xc8] sm:$0xff]  ;;  %v3535_v24 = vld [vmem:[#allocation13 + $0xb8] sm:$0xff] }
 0x57e   :  { %v3310_v47 = vadd.f32 %v4913_v14, %v3292_v61 }
 0x580   :  { %v6400_v40 = vadd.f32 %v6389_v50, %v3310_v47 }
 0x582   :  { %3334 = vadd.xlane.f32.xlu1 %v6400_v40 }
 0x583   :  { %v3269_v33 = vpop.f32.mrf.mxu3 }
 0x584   :  { %v3295_v7 = vadd.f32 %v3294_v39, %v3269_v33  ;;  %v3213_v45 = vpop.f32.mrf.mxu2 }
 0x585   :  { %v3303_v38 = vadd.f32 %v3302_v32, %v3213_v45  ;;  %v3528_v45 = vld [vmem:[#allocation13 + $0x80] sm:$0xff]  ;;  %v3529_v32 = vld [vmem:[#allocation13 + $0x88] sm:$0xff] }
 0x586   :  { %v3311_v31 = vadd.f32 %v4914_v15, %v3295_v7  ;;  %v3542_v7 = vld [vmem:[#allocation13 + $0xf0] sm:$0xff]  ;;  %v3543_v15 = vld [vmem:[#allocation13 + $0xf8] sm:$0xff] }
 0x587   :  { %3550 = vmatpush.msrb.mxu0 %v3542_v7  ;;  %3591 = vmatpush.msrb.mxu1 %v3543_v15 }
 0x588   :  { %v6404_v5 = vadd.f32 %v6389_v50, %v3311_v31  ;;  %v3540_v31 = vld [vmem:[#allocation13 + $0xe0] sm:$0xff] }
 0x589   :  { %3551 = vmatpush.msrb.mxu0 %v3540_v31  ;;  %3592 = vmatpush.msrb.mxu1 %v3541_v58 }
 0x58a   :  { %3336 = vadd.xlane.f32.xlu2 %v6404_v5 }
 0x58b   :  { %3552 = vmatpush.msrb.mxu0 %v3538_v20 }
 0x58c   :  { %v3216_v36 = vpop.f32.mrf.mxu2 }
 0x58d   :  { %v3306_v18 = vadd.f32 %v3305_v6, %v3216_v36  ;;  %3553 = vmatpush.msrb.mxu0 %v3536_v22  ;;  %v3522_v36 = vld [vmem:[#allocation13 + $0x50] sm:$0xff]  ;;  %v3520_v6 = vld [vmem:[#allocation13 + $0x40] sm:$0xff] }
 0x5a8   :  { %v3272_v27 = vpop.f32.mrf.mxu3 }
 0x5a9   :  { %v3298_v25 = vadd.f32 %v3297_v19, %v3272_v27  ;;  %v3539_v27 = vld [vmem:[#allocation13 + $0xd8] sm:$0xff] }
 0x5aa   :  { %3593 = vmatpush.msrb.mxu1 %v3539_v27 }
 0x5ab   :  { %v3312_v42 = vadd.f32 %v4915_v29, %v3298_v25 }
 0x5ac   :  { %3594 = vmatpush.msrb.mxu1 %v3537_v59 }
 0x5ad   :  { %v6408_v0 = vadd.f32 %v6389_v50, %v3312_v42  ;;  %v3534_v42 = vld [vmem:[#allocation13 + $0xb0] sm:$0xff] }
 0x5ae   :  { %3554 = vmatpush.msrb.mxu0 %v3534_v42  ;;  %3595 = vmatpush.msrb.mxu1 %v3535_v24 }
 0x5af   :  { %3338 = vadd.xlane.f32.xlu2 %v6408_v0 }
 0x5b0   :  { %v3275_v46 = vpop.f32.mrf.mxu3 }
 0x5b1   :  { %v3301_v62 = vadd.f32 %v3300_v23, %v3275_v46  ;;  %v3532_v46 = vld [vmem:[#allocation13 + $0xa0] sm:$0xff] }
 0x5b2   :  { %3555 = vmatpush.msrb.mxu0 %v3532_v46 }
 0x5b3   :  { %v3313_v48 = vadd.f32 %v4916_v9, %v3301_v62  ;;  %v3533_v62 = vld [vmem:[#allocation13 + $0xa8] sm:$0xff]  ;;  %v3530_v9 = vld [vmem:[#allocation13 + $0x90] sm:$0xff] }
 0x5b4   :  { %3596 = vmatpush.msrb.mxu1 %v3533_v62  ;;  %3556 = vmatpush.msrb.mxu0 %v3530_v9 }
 0x5b5   :  { %v6412_v53 = vadd.f32 %v6389_v50, %v3313_v48  ;;  %v3531_v48 = vld [vmem:[#allocation13 + $0x98] sm:$0xff] }
 0x5b6   :  { %3597 = vmatpush.msrb.mxu1 %v3531_v48  ;;  %3557 = vmatpush.msrb.mxu0 %v3528_v45 }
 0x5b7   :  { %3340 = vadd.xlane.f32.xlu2 %v6412_v53 }
 0x5b8   :  { %v3278_v44 = vpop.f32.mrf.mxu3  ;;  %3598 = vmatpush.msrb.mxu1 %v3529_v32 }
 0x5b9   :  { %v3304_v12 = vadd.f32 %v3303_v38, %v3278_v44  ;;  %v3526_v44 = vld [vmem:[#allocation13 + $0x70] sm:$0xff] }
 0x5ba   :  { %3558 = vmatpush.msrb.mxu0 %v3526_v44 }
 0x5bb   :  { %v3314_v4 = vadd.f32 %v4917_v2, %v3304_v12  ;;  %v3527_v12 = vld [vmem:[#allocation13 + $0x78] sm:$0xff] }
 0x5bc   :  { %3599 = vmatpush.msrb.mxu1 %v3527_v12 }
 0x5bd   :  { %v6416_v17 = vadd.f32 %v6389_v50, %v3314_v4  ;;  %v3524_v4 = vld [vmem:[#allocation13 + $0x60] sm:$0xff] }
 0x5be   :  { %3559 = vmatpush.msrb.mxu0 %v3524_v4  ;;  %3600 = vmatpush.msrb.mxu1 %v3525_v1 }
 0x5bf   :  { %3342 = vadd.xlane.f32.xlu1 %v6416_v17 }
 0x5c0   :  { %v3281_v34 = vpop.f32.mrf.mxu3  ;;  %3560 = vmatpush.msrb.mxu0 %v3522_v36 }
 0x5c1   :  { %v3307_v37 = vadd.f32 %v3306_v18, %v3281_v34  ;;  %v3518_v34 = vld [vmem:[#allocation13 + $0x30] sm:$0xff]  ;;  %v3519_v18 = vld [vmem:[#allocation13 + $0x38] sm:$0xff] }
 0x5c2   :  { %3561 = vmatpush.msrb.mxu0 %v3520_v6 }
 0x5c3   :  { %v3315_v43 = vadd.f32 %v4918_v63, %v3307_v37  ;;  %v3516_v37 = vld [vmem:[#allocation13 + $0x20] sm:$0xff]  ;;  %v3514_v63 = vld [vmem:[#allocation13 + $0x10] sm:$0xff] }
 0x5c4   :  { %3562 = vmatpush.msrb.mxu0 %v3518_v34 }
 0x5c5   :  { %v6426_v11 = vadd.f32 %v6389_v50, %v3315_v43  ;;  %v3515_v43 = vld [vmem:[#allocation13 + $0x18] sm:$0xff] }
 0x5c6   :  { %3563 = vmatpush.msrb.mxu0 %v3516_v37 }
 0x5c8   :  { %v3331_v55 = vpop.xlane.xlu2 %3330  ;;  %3564 = vmatpush.msrb.mxu0 %v3514_v63 }
 0x5c9   :  { %v3346_v28 = vmul.f32 %v3331_v55, %v7305_v60  ;;  %v3523_v55 = vld [vmem:[#allocation13 + $0x58] sm:$0xff] }
 0x5ca   :  { %3601 = vmatpush.msrb.mxu1 %v3523_v55 }
 0x5cb   :  { %v6421_v21 = vsub.f32 %v6392_v56, %v3346_v28  ;;  %v3521_v28 = vld [vmem:[#allocation13 + $0x48] sm:$0xff] }
 0x5cc   :  { %3602 = vmatpush.msrb.mxu1 %v3521_v28 }
 0x5cd   :  { %v3362_v35 = vmul.f32 %v6421_v21, %v6421_v21 }
 0x5ce   :  { %3603 = vmatpush.msrb.mxu1 %v3519_v18 }
 0x5cf   :  { %3370 = vadd.xlane.f32.xlu0 %v3362_v35  ;;  %v3517_v35 = vld [vmem:[#allocation13 + $0x28] sm:$0xff] }
 0x5d0   :  { %3604 = vmatpush.msrb.mxu1 %v3517_v35 }
 0x5d2   :  { %3605 = vmatpush.msrb.mxu1 %v3515_v43 }
 0x5d7   :  { %3344 = vadd.xlane.f32.xlu0 %v6426_v11 }
 0x5d8   :  { %v3333_v54 = vpop.xlane.xlu0 %3332 }
 0x5d9   :  { %v3347_v30 = vmul.f32 %v3333_v54, %v7305_v60  ;;  %v3512_v54 = vld [vmem:[#allocation13] sm:$0xff] }
 0x5da   :  { %3565 = vmatpush.msrb.mxu0 %v3512_v54 }
 0x5db   :  { %v6431_v61 = vsub.f32 %v6396_v16, %v3347_v30  ;;  %v3513_v30 = vld [vmem:[#allocation13 + $0x8] sm:$0xff] }
 0x5dc   :  { %3606 = vmatpush.msrb.mxu1 %v3513_v30 }
 0x5dd   :  { %v3363_v13 = vmul.f32 %v6431_v61, %v6431_v61 }
 0x5df   :  { %3372 = vadd.xlane.f32.xlu2 %v3363_v13 }
 0x5f5   :  { %v3335_v14 = vpop.xlane.xlu1 %3334 }
 0x5f6   :  { %v3348_v47 = vmul.f32 %v3335_v14, %v7305_v60 }
 0x5f8   :  { %v6437_v10 = vsub.f32 %v6400_v40, %v3348_v47 }
 0x5fa   :  { %v3364_v50 = vmul.f32 %v6437_v10, %v6437_v10 }
 0x5fc   :  { %3374 = vadd.xlane.f32.xlu1 %v3364_v50 }
 0x5fd   :  { %v3337_v52 = vpop.xlane.xlu2 %3336 }
 0x5fe   :  { %v3349_v8 = vmul.f32 %v3337_v52, %v7305_v60 }
 0x600   :  { %v6443_v39 = vsub.f32 %v6404_v5, %v3349_v8 }
 0x602   :  { %v3365_v33 = vmul.f32 %v6443_v39, %v6443_v39 }
 0x604   :  { %3376 = vadd.xlane.f32.xlu2 %v3365_v33 }
 0x622   :  { %v3339_v51 = vpop.xlane.xlu2 %3338 }
 0x623   :  { %v3350_v49 = vmul.f32 %v3339_v51, %v7305_v60 }
 0x625   :  { %v6449_v3 = vsub.f32 %v6408_v0, %v3350_v49 }
 0x627   :  { %v3366_v19 = vmul.f32 %v6449_v3, %v6449_v3 }
 0x629   :  { %3378 = vadd.xlane.f32.xlu0 %v3366_v19 }
 0x62a   :  { %v3341_v25 = vpop.xlane.xlu2 %3340 }
 0x62b   :  { %v3351_v29 = vmul.f32 %v3341_v25, %v7305_v60  ;;  %v6476_v25 = vld [vmem:[%s7236_s7] ss:$0 sm:$0xff] }
 0x62d   :  { %v6455_v23 = vsub.f32 %v6412_v53, %v3351_v29  ;;  %v6482_v29 = vld [vmem:[%s7237_s8] ss:$0 sm:$0xff] }
 0x62f   :  { %v3367_v57 = vmul.f32 %v6455_v23, %v6455_v23 }
 0x631   :  { %3380 = vadd.xlane.f32.xlu1 %v3367_v57 }
 0x632   :  { %v3343_v26 = vpop.xlane.xlu1 %3342 }
 0x633   :  { %v3352_v38 = vmul.f32 %v3343_v26, %v7305_v60 }
 0x635   :  { %v6461_v2 = vsub.f32 %v6416_v17, %v3352_v38 }
 0x637   :  { %v3368_v41 = vmul.f32 %v6461_v2, %v6461_v2 }
 0x639   :  { %3382 = vadd.xlane.f32.xlu2 %v3368_v41 }
 0x642   :  { %v3371_v13 = vpop.xlane.xlu0 %3370 }
 0x643   :  { %v3386_v14 = vmul.f32 %v3371_v13, %v7305_v60 }
 0x645   :  { %v3394_v47 = vadd.f32 1e-05, %v3386_v14 }
 0x647   :  { %4863 = vrsqrt.f32 %v3394_v47  ;;  %vm3408_vm10 = vweird.f32 %v3394_v47 }
 0x64a   :  { %v3345_v50 = vpop.xlane.xlu0 %3344 }
 0x64b   :  { %v3353_v52 = vmul.f32 %v3345_v50, %v7305_v60 }
 0x64d   :  { %v4864_v8 = vpop.eup %4863  ;;  %v6468_v33 = vsub.f32 %v6426_v11, %v3353_v52 }
 0x64e   :  { %v3403_v7 = vmul.f32 %v4864_v8, %v3394_v47  ;;  %vm3409_vm9 = vweird.f32 %v4864_v8 }
 0x64f   :  { %v3369_v15 = vmul.f32 %v6468_v33, %v6468_v33  ;;  %vm3410_vm13 = vmor %vm3408_vm10, %vm3409_vm9 }
 0x650   :  { %v3404_v31 = vmul.f32 %v4864_v8, %v3403_v7 }
 0x651   :  { %3384 = vadd.xlane.f32.xlu0 %v3369_v15 }
 0x652   :  { %v3405_v58 = vmul.f32 0.5, %v3404_v31  ;;  %v3373_v51 = vpop.xlane.xlu2 %3372 }
 0x653   :  { %v3387_v49 = vmul.f32 %v3373_v51, %v7305_v60 }
 0x654   :  { %v3406_v19 = vsub.f32 1.5, %v3405_v58 }
 0x655   :  { %v3395_v20 = vadd.f32 1e-05, %v3387_v49 }
 0x656   :  { %v3407_v27 = vmul.f32 %v4864_v8, %v3406_v19 }
 0x657   :  { %4865 = vrsqrt.f32 %v3395_v20  ;;  %vm3418_vm15 = vweird.f32 %v3395_v20 }
 0x658   :  { %v3411_v22 = vsel %vm3410_vm13, %v4864_v8, %v3407_v27 }
 0x659   :  { %v3482_v59 = vmul.f32 %v3411_v22, %v6421_v21 }
 0x65b   :  { %v3493_v42 = vmul.f32 %v6476_v25, %v3482_v59 }
 0x65d   :  { %v4866_v24 = vpop.eup %4865  ;;  %v3504_v46 = vadd.f32 %v6482_v29, %v3493_v42 }
 0x65e   :  { %v3413_v62 = vmul.f32 %v4866_v24, %v3395_v20  ;;  %vm3419_vm14 = vweird.f32 %v4866_v24 }
 0x65f   :  { %3566 = vmatmul.f32.vlgmr.msrb.gmra.mxu0 %v3504_v46  ;;  %3607 = vmatmul.f32.vlgmr.msrb.gmra.mxu1 %v3504_v46  ;;  %vm3420_vm0 = vmor %vm3418_vm15, %vm3419_vm14 }
 0x660   :  { %v3414_v57 = vmul.f32 %v4866_v24, %v3413_v62 }
 0x662   :  { %v3415_v9 = vmul.f32 0.5, %v3414_v57 }
 0x664   :  { %v3416_v48 = vsub.f32 1.5, %v3415_v9 }
 0x666   :  { %v3417_v26 = vmul.f32 %v4866_v24, %v3416_v48 }
 0x668   :  { %v3421_v21 = vsel %vm3420_vm0, %v4866_v24, %v3417_v26 }
 0x669   :  { %v3483_v45 = vmul.f32 %v3421_v21, %v6431_v61 }
 0x66b   :  { %v3494_v32 = vmul.f32 %v6476_v25, %v3483_v45 }
 0x66d   :  { %v3505_v44 = vadd.f32 %v6482_v29, %v3494_v32 }
 0x66f   :  { %v3375_v38 = vpop.xlane.xlu1 %3374  ;;  %3569 = vmatmul.f32.gmra.mxu0 %v3505_v44  ;;  %3610 = vmatmul.f32.gmra.mxu1 %v3505_v44 }
 0x670   :  { %v3388_v12 = vmul.f32 %v3375_v38, %v7305_v60 }
 0x672   :  { %v3396_v4 = vadd.f32 1e-05, %v3388_v12 }
 0x674   :  { %4867 = vrsqrt.f32 %v3396_v4  ;;  %vm3428_vm2 = vweird.f32 %v3396_v4 }
 0x677   :  { %v3377_v1 = vpop.xlane.xlu2 %3376 }
 0x678   :  { %v3389_v41 = vmul.f32 %v3377_v1, %v7305_v60 }
 0x67a   :  { %v4868_v36 = vpop.eup %4867  ;;  %v3397_v55 = vadd.f32 1e-05, %v3389_v41 }
 0x67b   :  { %v3423_v6 = vmul.f32 %v4868_v36, %v3396_v4  ;;  %vm3429_vm1 = vweird.f32 %v4868_v36 }
 0x67c   :  { %4869 = vrsqrt.f32 %v3397_v55  ;;  %vm3430_vm3 = vmor %vm3428_vm2, %vm3429_vm1  ;;  %vm3438_vm5 = vweird.f32 %v3397_v55 }
 0x67d   :  { %v3424_v28 = vmul.f32 %v4868_v36, %v3423_v6 }
 0x67f   :  { %v3425_v61 = vmul.f32 0.5, %v3424_v28 }
 0x681   :  { %v3426_v34 = vsub.f32 1.5, %v3425_v61 }
 0x682   :  { %v4870_v18 = vpop.eup %4869 }
 0x683   :  { %v3427_v37 = vmul.f32 %v4868_v36, %v3426_v34  ;;  %v3433_v35 = vmul.f32 %v4870_v18, %v3397_v55  ;;  %vm3439_vm4 = vweird.f32 %v4870_v18 }
 0x684   :  { %vm3440_vm6 = vmor %vm3438_vm5, %vm3439_vm4 }
 0x685   :  { %v3431_v63 = vsel %vm3430_vm3, %v4868_v36, %v3427_v37  ;;  %v3434_v43 = vmul.f32 %v4870_v18, %v3433_v35 }
 0x686   :  { %v3484_v54 = vmul.f32 %v3431_v63, %v6437_v10 }
 0x687   :  { %v3435_v30 = vmul.f32 0.5, %v3434_v43 }
 0x688   :  { %v3495_v13 = vmul.f32 %v6476_v25, %v3484_v54 }
 0x689   :  { %v3436_v14 = vsub.f32 1.5, %v3435_v30 }
 0x68a   :  { %v3506_v47 = vadd.f32 %v6482_v29, %v3495_v13 }
 0x68b   :  { %v3437_v50 = vmul.f32 %v4870_v18, %v3436_v14 }
 0x68c   :  { %3572 = vmatmul.f32.gmra.mxu0 %v3506_v47  ;;  %3613 = vmatmul.f32.gmra.mxu1 %v3506_v47 }
 0x68d   :  { %v3441_v52 = vsel %vm3440_vm6, %v4870_v18, %v3437_v50 }
 0x68e   :  { %v3485_v8 = vmul.f32 %v3441_v52, %v6443_v39 }
 0x690   :  { %v3496_v7 = vmul.f32 %v6476_v25, %v3485_v8 }
 0x692   :  { %v3507_v15 = vadd.f32 %v6482_v29, %v3496_v7 }
 0x694   :  { %3575 = vmatmul.f32.gmra.mxu0 %v3507_v15  ;;  %3616 = vmatmul.f32.gmra.mxu1 %v3507_v15 }
 0x69c   :  { %v3379_v10 = vpop.xlane.xlu0 %3378 }
 0x69d   :  { %v3390_v31 = vmul.f32 %v3379_v10, %v7305_v60  ;;  %v4351_v10 = vld [vmem:[#allocation14 + $0x78] sm:$0xff] }
 0x69e   :  { %4372 = vmatpush.msrb.mxu2 %v4351_v10 }
 0x69f   :  { %v3398_v58 = vadd.f32 1e-05, %v3390_v31  ;;  %v4367_v31 = vld [vmem:[#allocation14 + $0xf8] sm:$0xff] }
 0x6a0   :  { %4413 = vmatpush.msra.mxu3 %v4367_v31 }
 0x6a1   :  { %4871 = vrsqrt.f32 %v3398_v58  ;;  %vm3448_vm8 = vweird.f32 %v3398_v58 }
 0x6a4   :  { %v3381_v51 = vpop.xlane.xlu1 %3380 }
 0x6a5   :  { %v3391_v49 = vmul.f32 %v3381_v51, %v7305_v60 }
 0x6a7   :  { %v4872_v19 = vpop.eup %4871  ;;  %v3399_v20 = vadd.f32 1e-05, %v3391_v49 }
 0x6a8   :  { %v3443_v27 = vmul.f32 %v4872_v19, %v3398_v58  ;;  %vm3449_vm7 = vweird.f32 %v4872_v19 }
 0x6a9   :  { %4873 = vrsqrt.f32 %v3399_v20  ;;  %vm3450_vm11 = vmor %vm3448_vm8, %vm3449_vm7  ;;  %vm3458_vm9 = vweird.f32 %v3399_v20 }
 0x6aa   :  { %v3444_v22 = vmul.f32 %v4872_v19, %v3443_v27  ;;  %v4350_v27 = vld [vmem:[#allocation14 + $0x70] sm:$0xff] }
 0x6ab   :  { %4373 = vmatpush.msrb.mxu2 %v4350_v27 }
 0x6ac   :  { %v3445_v39 = vmul.f32 0.5, %v3444_v22  ;;  %v3383_v59 = vpop.xlane.xlu2 %3382  ;;  %v4366_v22 = vld [vmem:[#allocation14 + $0xf0] sm:$0xff] }
 0x6ad   :  { %v3392_v42 = vmul.f32 %v3383_v59, %v7305_v60  ;;  %4414 = vmatpush.msra.mxu3 %v4366_v22 }
 0x6ae   :  { %v3446_v24 = vsub.f32 1.5, %v3445_v39 }
 0x6af   :  { %v4874_v46 = vpop.eup %4873  ;;  %v3400_v62 = vadd.f32 1e-05, %v3392_v42  ;;  %v4349_v42 = vld [vmem:[#allocation14 + $0x68] sm:$0xff] }
 0x6b0   :  { %v3447_v57 = vmul.f32 %v4872_v19, %v3446_v24  ;;  %v3453_v9 = vmul.f32 %v4874_v46, %v3399_v20  ;;  %vm3459_vm12 = vweird.f32 %v4874_v46  ;;  %v4365_v24 = vld [vmem:[#allocation14 + $0xe8] sm:$0xff]  ;;  %4374 = vmatpush.msrb.mxu2 %v4349_v42 }
 0x6b1   :  { %4875 = vrsqrt.f32 %v3400_v62  ;;  %vm3460_vm10 = vmor %vm3458_vm9, %vm3459_vm12  ;;  %vm3468_vm14 = vweird.f32 %v3400_v62  ;;  %4415 = vmatpush.msra.mxu3 %v4365_v24 }
 0x6b2   :  { %v3451_v48 = vsel %vm3450_vm11, %v4872_v19, %v3447_v57  ;;  %v3454_v26 = vmul.f32 %v4874_v46, %v3453_v9  ;;  %v4364_v57 = vld [vmem:[#allocation14 + $0xe0] sm:$0xff] }
 0x6b3   :  { %v3486_v21 = vmul.f32 %v3451_v48, %v6449_v3  ;;  %4416 = vmatpush.msra.mxu3 %v4364_v57  ;;  %v4340_v57 = vld [vmem:[#allocation14 + $0x20] sm:$0xff] }
 0x6b4   :  { %v3455_v45 = vmul.f32 0.5, %v3454_v26  ;;  %v4363_v26 = vld [vmem:[#allocation14 + $0xd8] sm:$0xff] }
 0x6b5   :  { %v3497_v32 = vmul.f32 %v6476_v25, %v3486_v21  ;;  %4417 = vmatpush.msra.mxu3 %v4363_v26 }
 0x6b6   :  { %v3456_v38 = vsub.f32 1.5, %v3455_v45 }
 0x6b7   :  { %v4876_v44 = vpop.eup %4875  ;;  %v3508_v12 = vadd.f32 %v6482_v29, %v3497_v32 }
 0x6b8   :  { %v3457_v4 = vmul.f32 %v4874_v46, %v3456_v38  ;;  %v3463_v1 = vmul.f32 %v4876_v44, %v3400_v62  ;;  %vm3469_vm13 = vweird.f32 %v4876_v44  ;;  %v4348_v62 = vld [vmem:[#allocation14 + $0x60] sm:$0xff] }
 0x6b9   :  { %3578 = vmatmul.f32.gmra.mxu0 %v3508_v12  ;;  %3619 = vmatmul.f32.gmra.mxu1 %v3508_v12  ;;  %vm3470_vm15 = vmor %vm3468_vm14, %vm3469_vm13  ;;  %v4362_v12 = vld [vmem:[#allocation14 + $0xd0] sm:$0xff] }
 0x6ba   :  { %v3461_v41 = vsel %vm3460_vm10, %v4874_v46, %v3457_v4  ;;  %v3464_v36 = vmul.f32 %v4876_v44, %v3463_v1  ;;  %4375 = vmatpush.msrb.mxu2 %v4348_v62  ;;  %4418 = vmatpush.msra.mxu3 %v4362_v12  ;;  %v4357_v62 = vld [vmem:[#allocation14 + $0xa8] sm:$0xff] }
 0x6bb   :  { %v3487_v55 = vmul.f32 %v3461_v41, %v6455_v23 }
 0x6bc   :  { %v3465_v6 = vmul.f32 0.5, %v3464_v36 }
 0x6bd   :  { %v3498_v3 = vmul.f32 %v6476_v25, %v3487_v55  ;;  %v4345_v55 = vld [vmem:[#allocation14 + $0x48] sm:$0xff] }
 0x6be   :  { %v3466_v28 = vsub.f32 1.5, %v3465_v6  ;;  %v4361_v6 = vld [vmem:[#allocation14 + $0xc8] sm:$0xff] }
 0x6bf   :  { %v3509_v61 = vadd.f32 %v6482_v29, %v3498_v3  ;;  %4419 = vmatpush.msra.mxu3 %v4361_v6  ;;  %v4354_v6 = vld [vmem:[#allocation14 + $0x90] sm:$0xff] }
 0x6c0   :  { %v3467_v34 = vmul.f32 %v4876_v44, %v3466_v28 }
 0x6c1   :  { %3581 = vmatmul.f32.gmra.mxu0 %v3509_v61  ;;  %3622 = vmatmul.f32.gmra.mxu1 %v3509_v61 }
 0x6c2   :  { %v3471_v18 = vsel %vm3470_vm15, %v4876_v44, %v3467_v34  ;;  %v4346_v44 = vld [vmem:[#allocation14 + $0x50] sm:$0xff]  ;;  %v4344_v34 = vld [vmem:[#allocation14 + $0x40] sm:$0xff] }
 0x6c3   :  { %v3488_v37 = vmul.f32 %v3471_v18, %v6461_v2  ;;  %v3544_v2 = vld [vmem:[%s7239_s10] sm:$0x3]  ;;  %v4360_v18 = vld [vmem:[#allocation14 + $0xc0] sm:$0xff] }
 0x6c4   :  { %v3385_v23 = vpop.xlane.xlu0 %3384  ;;  %v6513_v8 = vperm.slane %v3544_v2, 0  ;;  %4420 = vmatpush.msra.mxu3 %v4360_v18 }
 0x6c5   :  { %v3499_v35 = vmul.f32 %v6476_v25, %v3488_v37  ;;  %v3393_v43 = vmul.f32 %v3385_v23, %v7305_v60  ;;  %v6515_v60 = vperm.slane %v3544_v2, 1 }
 0x6c7   :  { %v3510_v63 = vadd.f32 %v6482_v29, %v3499_v35  ;;  %v3401_v54 = vadd.f32 1e-05, %v3393_v43 }
 0x6c9   :  { %3584 = vmatmul.f32.gmra.mxu0 %v3510_v63  ;;  %3625 = vmatmul.f32.gmra.mxu1 %v3510_v63  ;;  %4877 = vrsqrt.f32 %v3401_v54  ;;  %vm3478_vm1 = vweird.f32 %v3401_v54 }
 0x6cf   :  { %v4878_v30 = vpop.eup %4877 }
 0x6d0   :  { %v3473_v13 = vmul.f32 %v4878_v30, %v3401_v54  ;;  %vm3479_vm0 = vweird.f32 %v4878_v30 }
 0x6d1   :  { %vm3480_vm2 = vmor %vm3478_vm1, %vm3479_vm0 }
 0x6d2   :  { %v3474_v14 = vmul.f32 %v4878_v30, %v3473_v13  ;;  %v4343_v13 = vld [vmem:[#allocation14 + $0x38] sm:$0xff] }
 0x6d4   :  { %v3475_v47 = vmul.f32 0.5, %v3474_v14  ;;  %v4359_v14 = vld [vmem:[#allocation14 + $0xb8] sm:$0xff] }
 0x6d5   :  { %4421 = vmatpush.msra.mxu3 %v4359_v14  ;;  %v4352_v14 = vld [vmem:[#allocation14 + $0x80] sm:$0xff] }
 0x6d6   :  { %v3476_v50 = vsub.f32 1.5, %v3475_v47 }
 0x6d8   :  { %v3477_v52 = vmul.f32 %v4878_v30, %v3476_v50 }
 0x6da   :  { %v3481_v7 = vsel %vm3480_vm2, %v4878_v30, %v3477_v52 }
 0x6db   :  { %v3489_v15 = vmul.f32 %v3481_v7, %v6468_v33  ;;  %v4342_v7 = vld [vmem:[#allocation14 + $0x30] sm:$0xff] }
 0x6dc   :  { %v3567_v58 = vpop.f32.mrf.mxu0  ;;  %v3608_v51 = vpop.f32.mrf.mxu1 }
 0x6dd   :  { %v6519_v49 = vadd.f32 %v3567_v58, %v6513_v8  ;;  %v6522_v19 = vadd.f32 %v3608_v51, %v6515_v60  ;;  %v3500_v20 = vmul.f32 %v6476_v25, %v3489_v15  ;;  %v4358_v15 = vld [vmem:[#allocation14 + $0xb0] sm:$0xff] }
 0x6de   :  { %4422 = vmatpush.msra.mxu3 %v4358_v15 }
 0x6df   :  { %v6526_v33 = vmul.f32 0.70710677, %v6519_v49  ;;  %v6529_v39 = vmul.f32 0.70710677, %v6522_v19  ;;  %v3511_v59 = vadd.f32 %v6482_v29, %v3500_v20  ;;  %v4347_v29 = vld [vmem:[#allocation14 + $0x58] sm:$0xff] }
 0x6e0   :  { %4376 = vmatpush.msrb.mxu2 %v4347_v29  ;;  %4423 = vmatpush.msra.mxu3 %v4357_v62 }
 0x6e1   :  { %v3664_v46 = vmul.f32 %v6526_v33, %v6526_v33  ;;  %v3704_v25 = vmul.f32 %v6529_v39, %v6529_v39  ;;  %3587 = vmatmul.f32.gmra.mxu0 %v3511_v59  ;;  %3628 = vmatmul.f32.gmra.mxu1 %v3511_v59 }
 0x6e2   :  { %4377 = vmatpush.msrb.mxu2 %v4346_v44 }
 0x6e3   :  { %v6536_v9 = vmin.f32 %v3664_v46, 16.0  ;;  %v6538_v48 = vmin.f32 %v3704_v25, 16.0  ;;  %v4341_v25 = vld [vmem:[#allocation14 + $0x28] sm:$0xff] }
 0x6e4   :  { %4378 = vmatpush.msrb.mxu2 %v4345_v55  ;;  %v4338_v55 = vld [vmem:[#allocation14 + $0x10] sm:$0xff] }
 0x6e5   :  { %v3666_v21 = vmul.f32 2.1237322e-06, %v6536_v9  ;;  %v3677_v45 = vmul.f32 3.8918573e-05, %v6536_v9  ;;  %v3706_v32 = vmul.f32 2.1237322e-06, %v6538_v48 }
 0x6e6   :  { %v3717_v38 = vmul.f32 3.8918573e-05, %v6538_v48  ;;  %4379 = vmatpush.msrb.mxu2 %v4344_v34 }
 0x6e7   :  { %v3667_v4 = vadd.f32 0.00028619796, %v3666_v21  ;;  %v3678_v1 = vadd.f32 0.001143296, %v3677_v45  ;;  %v3707_v41 = vadd.f32 0.00028619796, %v3706_v32 }
 0x6e8   :  { %v3718_v36 = vadd.f32 0.001143296, %v3717_v38  ;;  %4380 = vmatpush.msrb.mxu2 %v4343_v13  ;;  %v4356_v21 = vld [vmem:[#allocation14 + $0xa0] sm:$0xff] }
 0x6e9   :  { %v3668_v3 = vmul.f32 %v3667_v4, %v6536_v9  ;;  %v3679_v28 = vmul.f32 %v3678_v1, %v6536_v9  ;;  %v3708_v61 = vmul.f32 %v3707_v41, %v6538_v48  ;;  %4424 = vmatpush.msra.mxu3 %v4356_v21  ;;  %v4339_v4 = vld [vmem:[#allocation14 + $0x18] sm:$0xff]  ;;  %v4336_v13 = vld [vmem:[#allocation14] sm:$0xff] }
 0x6ea   :  { %v3719_v37 = vmul.f32 %v3718_v36, %v6538_v48  ;;  %4381 = vmatpush.msrb.mxu2 %v4342_v7  ;;  %v4355_v1 = vld [vmem:[#allocation14 + $0x98] sm:$0xff] }
 0x6eb   :  { %v3669_v35 = vadd.f32 0.0036580483, %v3668_v3  ;;  %v3680_v63 = vadd.f32 0.014752088, %v3679_v28  ;;  %v3709_v23 = vadd.f32 0.0036580483, %v3708_v61  ;;  %4425 = vmatpush.msra.mxu3 %v4355_v1 }
 0x6ec   :  { %v3720_v43 = vadd.f32 0.014752088, %v3719_v37  ;;  %v3570_v54 = vpop.f32.mrf.mxu0  ;;  %v3611_v30 = vpop.f32.mrf.mxu1  ;;  %4382 = vmatpush.msrb.mxu2 %v4341_v25 }
 0x6ed   :  { %v3670_v47 = vmul.f32 %v3669_v35, %v6536_v9  ;;  %v3681_v50 = vmul.f32 %v3680_v63, %v6536_v9  ;;  %v3710_v2 = vmul.f32 %v3709_v23, %v6538_v48  ;;  %v6552_v52 = vadd.f32 %v3570_v54, %v6513_v8  ;;  %v4337_v35 = vld [vmem:[#allocation14 + $0x8] sm:$0xff]  ;;  %4426 = vmatpush.msra.mxu3 %v4354_v6 }
 0x6ee   :  { %v3721_v10 = vmul.f32 %v3720_v43, %v6538_v48  ;;  %v6556_v31 = vadd.f32 %v3611_v30, %v6515_v60  ;;  %4383 = vmatpush.msrb.mxu2 %v4340_v57  ;;  %v4353_v54 = vld [vmem:[#allocation14 + $0x88] sm:$0xff] }
 0x6ef   :  { %v3671_v58 = vadd.f32 0.05243302, %v3670_v47  ;;  %v3682_v51 = vadd.f32 0.112945676, %v3681_v50  ;;  %v3711_v20 = vadd.f32 0.05243302, %v3710_v2  ;;  %4427 = vmatpush.msra.mxu3 %v4353_v54 }
 0x6f0   :  { %v3722_v27 = vadd.f32 0.112945676, %v3721_v10  ;;  %v6559_v22 = vmul.f32 0.70710677, %v6552_v52  ;;  %v6565_v46 = vmul.f32 0.70710677, %v6556_v31  ;;  %4384 = vmatpush.msrb.mxu2 %v4339_v4 }
 0x6f1   :  { %v3672_v59 = vmul.f32 %v3671_v58, %v6536_v9  ;;  %v3683_v42 = vmul.f32 %v3682_v51, %v6536_v9  ;;  %v3712_v24 = vmul.f32 %v3711_v20, %v6538_v48  ;;  %4428 = vmatpush.msra.mxu3 %v4352_v14 }
 0x6f2   :  { %v3723_v29 = vmul.f32 %v3722_v27, %v6538_v48  ;;  %v3744_v26 = vmul.f32 %v6559_v22, %v6559_v22  ;;  %v3784_v38 = vmul.f32 %v6565_v46, %v6565_v46  ;;  %4385 = vmatpush.msrb.mxu2 %v4338_v55 }
 0x6f3   :  { %v3673_v45 = vadd.f32 0.18741608, %v3672_v59  ;;  %v3684_v32 = vadd.f32 0.4994258, %v3683_v42  ;;  %v3713_v36 = vadd.f32 0.18741608, %v3712_v24 }
 0x6f4   :  { %v3724_v44 = vadd.f32 0.4994258, %v3723_v29  ;;  %v6572_v12 = vmin.f32 %v3744_v26, 16.0  ;;  %v6581_v37 = vmin.f32 %v3784_v38, 16.0  ;;  %4386 = vmatpush.msrb.mxu2 %v4337_v35 }
 0x6f5   :  { %v3685_v41 = vmul.f32 %v3684_v32, %v6536_v9  ;;  %v3674_v34 = vmul.f32 %v3673_v45, %v6536_v9  ;;  %v3714_v30 = vmul.f32 %v3713_v36, %v6538_v48 }
 0x6f6   :  { %v3725_v3 = vmul.f32 %v3724_v44, %v6538_v48  ;;  %v3746_v28 = vmul.f32 2.1237322e-06, %v6572_v12  ;;  %v3757_v61 = vmul.f32 3.8918573e-05, %v6572_v12  ;;  %v3786_v2 = vmul.f32 2.1237322e-06, %v6581_v37  ;;  %4387 = vmatpush.msrb.mxu2 %v4336_v13 }
 0x6f7   :  { %v6579_v18 = vadd.f32 1.0, %v3685_v41  ;;  %v3675_v9 = vadd.f32 1.1283791, %v3674_v34  ;;  %v3797_v7 = vmul.f32 3.8918573e-05, %v6581_v37 }
 0x6f8   :  { %v6583_v63 = vadd.f32 1.0, %v3725_v3  ;;  %v3747_v23 = vadd.f32 0.00028619796, %v3746_v28  ;;  %v3758_v43 = vadd.f32 0.001143296, %v3757_v61 }
 0x6f9   :  { %4879 = vrcp.f32 %v6579_v18  ;;  %v3715_v15 = vadd.f32 1.1283791, %v3714_v30  ;;  %v3787_v58 = vadd.f32 0.00028619796, %v3786_v2  ;;  %v3798_v51 = vadd.f32 0.001143296, %v3797_v7 }
 0x6fa   :  { %4881 = vrcp.f32 %v6583_v63  ;;  %v3748_v47 = vmul.f32 %v3747_v23, %v6572_v12  ;;  %v3759_v50 = vmul.f32 %v3758_v43, %v6572_v12  ;;  %v3676_v27 = vmul.f32 %v3675_v9, %v6526_v33 }
 0x6fb   :  { %vm3692_vm3 = vweird.f32 %v6579_v18  ;;  %v3788_v62 = vmul.f32 %v3787_v58, %v6581_v37  ;;  %v3696_v57 = vand.u32 2147483647, %v6579_v18  ;;  %v3799_v21 = vmul.f32 %v3798_v51, %v6581_v37 }
 0x6fc   :  { %v3749_v10 = vadd.f32 0.0036580483, %v3748_v47  ;;  %v3760_v48 = vadd.f32 0.014752088, %v3759_v50  ;;  %v3698_v33 = vand.u32 2147483648, %v6579_v18  ;;  %v3716_v32 = vmul.f32 %v3715_v15, %v6529_v39 }
 0x6fd   :  { %v3789_v1 = vadd.f32 0.0036580483, %v3788_v62  ;;  %v3800_v41 = vadd.f32 0.014752088, %v3799_v21  ;;  %v3738_v55 = vand.u32 2147483648, %v6583_v63  ;;  %vm3732_vm6 = vweird.f32 %v6583_v63 }
 0x6fe   :  { %v3750_v59 = vmul.f32 %v3749_v10, %v6572_v12  ;;  %v3761_v25 = vmul.f32 %v3760_v48, %v6572_v12  ;;  %v3736_v28 = vand.u32 2147483647, %v6583_v63  ;;  %v3699_v39 = vor.u32 1.1754944e-38, %v3698_v33 }
 0x6ff   :  { %v4880_v20 = vpop.eup %4879  ;;  %v3801_v61 = vmul.f32 %v3800_v41, %v6581_v37  ;;  %v3790_v30 = vmul.f32 %v3789_v1, %v6581_v37  ;;  %vm3697_vm8 = vcmp.eq.f32.partialorder %v3696_v57, 8.507059e+37  ;;  %v3739_v9 = vor.u32 1.1754944e-38, %v3738_v55 }
 0x700   :  { %v4882_v42 = vpop.eup %4881  ;;  %v3688_v24 = vmul.f32 %v4880_v20, %v6579_v18  ;;  %v3751_v26 = vadd.f32 0.05243302, %v3750_v59  ;;  %v3762_v38 = vadd.f32 0.112945676, %v3761_v25  ;;  %vm3693_vm4 = vweird.f32 %v4880_v20 }
 0x701   :  { %v3728_v29 = vmul.f32 %v4882_v42, %v6583_v63  ;;  %vm3733_vm5 = vweird.f32 %v4882_v42  ;;  %vm3694_vm7 = vmor %vm3692_vm3, %vm3693_vm4  ;;  %v3802_v13 = vadd.f32 0.112945676, %v3801_v61  ;;  %vm3737_vm12 = vcmp.eq.f32.partialorder %v3736_v28, 8.507059e+37 }
 0x702   :  { %v3689_v45 = vsub.f32 1.0, %v3688_v24  ;;  %v3752_v4 = vmul.f32 %v3751_v26, %v6572_v12  ;;  %v3763_v6 = vmul.f32 %v3762_v38, %v6572_v12  ;;  %vm3734_vm11 = vmor %vm3732_vm6, %vm3733_vm5  ;;  %v3632_v62 = vmul.f32 0.5, %v6519_v49 }
 0x703   :  { %v3729_v44 = vsub.f32 1.0, %v3728_v29  ;;  %v3803_v63 = vmul.f32 %v3802_v13, %v6581_v37  ;;  %v3633_v29 = vmul.f32 0.5, %v6522_v19 }
 0x704   :  { %v3690_v36 = vmul.f32 %v4880_v20, %v3689_v45  ;;  %v3764_v35 = vadd.f32 0.4994258, %v3763_v6  ;;  %v3753_v54 = vadd.f32 0.18741608, %v3752_v4 }
 0x705   :  { %v3730_v3 = vmul.f32 %v4882_v42, %v3729_v44  ;;  %v3804_v59 = vadd.f32 0.4994258, %v3803_v63 }
 0x706   :  { %v3691_v34 = vadd.f32 %v4880_v20, %v3690_v36  ;;  %v3765_v47 = vmul.f32 %v3764_v35, %v6572_v12  ;;  %v3754_v51 = vmul.f32 %v3753_v54, %v6572_v12 }
 0x707   :  { %v3731_v43 = vadd.f32 %v4882_v42, %v3730_v3 }
 0x708   :  { %v3695_v14 = vsel %vm3694_vm7, %v4880_v20, %v3691_v34  ;;  %v6615_v10 = vadd.f32 1.0, %v3765_v47  ;;  %v3791_v20 = vadd.f32 0.05243302, %v3790_v30  ;;  %v3755_v45 = vadd.f32 1.1283791, %v3754_v51 }
 0x709   :  { %v3573_v23 = vpop.f32.mrf.mxu0  ;;  %v3700_v50 = vsel %vm3697_vm8, %v3699_v39, %v3695_v14  ;;  %v3735_v2 = vsel %vm3734_vm11, %v4882_v42, %v3731_v43  ;;  %v3614_v7 = vpop.f32.mrf.mxu1 }
 0x70a   :  { %v3701_v18 = vmul.f32 %v3700_v50, %v3676_v27  ;;  %v3740_v15 = vsel %vm3737_vm12, %v3739_v9, %v3735_v2  ;;  %v6618_v48 = vadd.f32 %v3573_v23, %v6513_v8  ;;  %4883 = vrcp.f32 %v6615_v10 }
 0x70b   :  { %v3741_v58 = vmul.f32 %v3740_v15, %v3716_v32  ;;  %v6623_v42 = vadd.f32 %v3614_v7, %v6515_v60  ;;  %v3805_v27 = vmul.f32 %v3804_v59, %v6581_v37  ;;  %v3792_v33 = vmul.f32 %v3791_v20, %v6581_v37 }
 0x70c   :  { %v4621_v24 = vclamps-f32 %v3701_v18, 1.0  ;;  %v6629_v26 = vmul.f32 0.70710677, %v6618_v48  ;;  %v3756_v28 = vmul.f32 %v3755_v45, %v6559_v22  ;;  %v3778_v61 = vand.u32 2147483648, %v6615_v10 }
 0x70d   :  { %v4622_v25 = vclamps-f32 %v3741_v58, 1.0  ;;  %v6632_v32 = vadd.f32 1.0, %v3805_v27  ;;  %v6637_v4 = vmul.f32 0.70710677, %v6623_v42  ;;  %v3793_v6 = vadd.f32 0.18741608, %v3792_v33 }
 0x70e   :  { %v4304_v57 = vadd.f32 1.0, %v4621_v24  ;;  %v3824_v44 = vmul.f32 %v6629_v26, %v6629_v26  ;;  %vm3772_vm9 = vweird.f32 %v6615_v10  ;;  %v3776_v54 = vand.u32 2147483647, %v6615_v10 }
 0x70f   :  { %v4305_v21 = vadd.f32 1.0, %v4622_v25  ;;  %4885 = vrcp.f32 %v6632_v32  ;;  %v3864_v36 = vmul.f32 %v6637_v4, %v6637_v4  ;;  %v3779_v63 = vor.u32 1.1754944e-38, %v3778_v61 }
 0x710   :  { %v4320_v38 = vmul.f32 %v4304_v57, %v3632_v62  ;;  %v4884_v1 = vpop.eup %4883  ;;  %v6643_v41 = vmin.f32 %v3824_v44, 16.0  ;;  %vm3777_vm14 = vcmp.eq.f32.partialorder %v3776_v54, 8.507059e+37  ;;  %v3794_v45 = vmul.f32 %v3793_v6, %v6581_v37 }
 0x711   :  { %v3576_v12 = vpop.f32.mrf.mxu0  ;;  %v4321_v19 = vmul.f32 %v4305_v21, %v3633_v29  ;;  %v3768_v55 = vmul.f32 %v4884_v1, %v6615_v10  ;;  %v6656_v23 = vmin.f32 %v3864_v36, 16.0  ;;  %vm3773_vm10 = vweird.f32 %v4884_v1  ;;  %v3617_v2 = vpop.f32.mrf.mxu1 }
 0x712   :  { %v6640_v49 = vadd.f32 %v3576_v12, %v6513_v8  ;;  %4388 = vmatmul.f32.vlgmr.msrb.gmra.mxu2 %v4320_v38  ;;  %v3826_v34 = vmul.f32 2.1237322e-06, %v6643_v41  ;;  %v3837_v39 = vmul.f32 3.8918573e-05, %v6643_v41  ;;  %vm3774_vm13 = vmor %vm3772_vm9, %vm3773_vm10  ;;  %v6676_v62 = vadd.f32 %v3617_v2, %v6515_v60 }
 0x713   :  { %4429 = vmatmul.f32.vlgmr.msra.gmra.mxu3 %v4321_v19  ;;  %v3769_v35 = vsub.f32 1.0, %v3768_v55  ;;  %v3866_v9 = vmul.f32 2.1237322e-06, %v6656_v23  ;;  %v3877_v47 = vmul.f32 3.8918573e-05, %v6656_v23  ;;  %vm3812_vm0 = vweird.f32 %v6632_v32 }
 0x714   :  { %v6649_v3 = vmul.f32 0.70710677, %v6640_v49  ;;  %v3827_v30 = vadd.f32 0.00028619796, %v3826_v34  ;;  %v3838_v13 = vadd.f32 0.001143296, %v3837_v39 }
 0x715   :  { %v6661_v22 = vpop.eup %4885  ;;  %v3770_v14 = vmul.f32 %v4884_v1, %v3769_v35  ;;  %v3867_v51 = vadd.f32 0.00028619796, %v3866_v9  ;;  %v3878_v20 = vadd.f32 0.001143296, %v3877_v47  ;;  %v6691_v39 = vmul.f32 0.70710677, %v6676_v62 }
 0x716   :  { %v3904_v43 = vmul.f32 %v6649_v3, %v6649_v3  ;;  %v3808_v7 = vmul.f32 %v6661_v22, %v6632_v32  ;;  %v3828_v18 = vmul.f32 %v3827_v30, %v6643_v41  ;;  %v3839_v15 = vmul.f32 %v3838_v13, %v6643_v41 }
 0x717   :  { %v3771_v58 = vadd.f32 %v4884_v1, %v3770_v14  ;;  %v3868_v29 = vmul.f32 %v3867_v51, %v6656_v23  ;;  %v3879_v12 = vmul.f32 %v3878_v20, %v6656_v23  ;;  %vm3813_vm15 = vweird.f32 %v6661_v22 }
 0x718   :  { %v6665_v50 = vmin.f32 %v3904_v43, 16.0  ;;  %v3809_v24 = vsub.f32 1.0, %v3808_v7  ;;  %v3829_v25 = vadd.f32 0.0036580483, %v3828_v18  ;;  %v3840_v27 = vadd.f32 0.014752088, %v3839_v15  ;;  %vm6699_vm1 = vmor %vm3812_vm0, %vm3813_vm15 }
 0x719   :  { %v3775_v57 = vsel %vm3774_vm13, %v4884_v1, %v3771_v58  ;;  %v3869_v19 = vadd.f32 0.0036580483, %v3868_v29  ;;  %v3880_v36 = vadd.f32 0.014752088, %v3879_v12  ;;  %v3816_v1 = vand.u32 2147483647, %v6632_v32 }
 0x71a   :  { %v3906_v59 = vmul.f32 2.1237322e-06, %v6665_v50  ;;  %v3810_v33 = vmul.f32 %v6661_v22, %v3809_v24  ;;  %v3841_v10 = vmul.f32 %v3840_v27, %v6643_v41  ;;  %v3780_v38 = vsel %vm3777_vm14, %v3779_v63, %v3775_v57 }
 0x71b   :  { %v3830_v44 = vmul.f32 %v3829_v25, %v6643_v41  ;;  %v3917_v61 = vmul.f32 3.8918573e-05, %v6665_v50  ;;  %v3881_v37 = vmul.f32 %v3880_v36, %v6656_v23  ;;  %v3781_v35 = vmul.f32 %v3780_v38, %v3756_v28 }
 0x71c   :  { %v3907_v21 = vadd.f32 0.00028619796, %v3906_v59  ;;  %v3842_v55 = vadd.f32 0.112945676, %v3841_v10  ;;  %v3811_v34 = vadd.f32 %v6661_v22, %v3810_v33  ;;  %v3818_v43 = vand.u32 2147483648, %v6632_v32 }
 0x71d   :  { %v3918_v30 = vadd.f32 0.001143296, %v3917_v61  ;;  %v3831_v13 = vadd.f32 0.05243302, %v3830_v44  ;;  %v3870_v14 = vmul.f32 %v3869_v19, %v6656_v23  ;;  %v3882_v9 = vadd.f32 0.112945676, %v3881_v37 }
 0x71e   :  { %v3908_v6 = vmul.f32 %v3907_v21, %v6665_v50  ;;  %v3843_v54 = vmul.f32 %v3842_v55, %v6643_v41  ;;  %v3795_v47 = vadd.f32 1.1283791, %v3794_v45  ;;  %vm3817_vm2 = vcmp.eq.f32.partialorder %v3816_v1, 8.507059e+37 }
 0x71f   :  { %v3919_v63 = vmul.f32 %v3918_v30, %v6665_v50  ;;  %v3815_v7 = vsel %vm6699_vm1, %v6661_v22, %v3811_v34  ;;  %v3883_v32 = vmul.f32 %v3882_v9, %v6656_v23  ;;  %v3944_v15 = vmul.f32 %v6691_v39, %v6691_v39 }
 0x720   :  { %v3844_v28 = vadd.f32 0.4994258, %v3843_v54  ;;  %v3909_v18 = vadd.f32 0.0036580483, %v3908_v6  ;;  %v3819_v58 = vor.u32 1.1754944e-38, %v3818_v43  ;;  %v4623_v59 = vclamps-f32 %v3781_v35, 1.0 }
 0x721   :  { %v3920_v20 = vadd.f32 0.014752088, %v3919_v63  ;;  %v3832_v24 = vmul.f32 %v3831_v13, %v6643_v41  ;;  %v3871_v25 = vadd.f32 0.05243302, %v3870_v14  ;;  %v3884_v27 = vadd.f32 0.4994258, %v3883_v32 }
 0x722   :  { %v3845_v51 = vmul.f32 %v3844_v28, %v6643_v41  ;;  %v6712_v57 = vmin.f32 %v3944_v15, 16.0  ;;  %v3820_v29 = vsel %vm3817_vm2, %v3819_v58, %v3815_v7  ;;  %v4306_v21 = vadd.f32 1.0, %v4623_v59 }
 0x723   :  { %v3921_v22 = vmul.f32 %v3920_v20, %v6665_v50  ;;  %v3796_v45 = vmul.f32 %v3795_v47, %v6565_v46  ;;  %v3885_v33 = vmul.f32 %v3884_v27, %v6656_v23  ;;  %v3910_v10 = vmul.f32 %v3909_v18, %v6665_v50 }
 0x724   :  { %v6714_v12 = vadd.f32 1.0, %v3845_v51  ;;  %v3946_v38 = vmul.f32 2.1237322e-06, %v6712_v57  ;;  %v3634_v44 = vmul.f32 0.5, %v6552_v52  ;;  %v3872_v36 = vmul.f32 %v3871_v25, %v6656_v23 }
 0x725   :  { %v3821_v19 = vmul.f32 %v3820_v29, %v3796_v45  ;;  %v6724_v1 = vadd.f32 1.0, %v3885_v33  ;;  %v3833_v55 = vadd.f32 0.18741608, %v3832_v24  ;;  %v3922_v61 = vadd.f32 0.112945676, %v3921_v22 }
 0x726   :  { %4887 = vrcp.f32 %v6714_v12  ;;  %v3947_v34 = vadd.f32 0.00028619796, %v3946_v38  ;;  %v4322_v37 = vmul.f32 %v4306_v21, %v3634_v44  ;;  %v3911_v46 = vadd.f32 0.05243302, %v3910_v10 }
 0x727   :  { %4889 = vrcp.f32 %v6724_v1  ;;  %v3923_v6 = vmul.f32 %v3922_v61, %v6665_v50  ;;  %v3873_v35 = vadd.f32 0.18741608, %v3872_v36  ;;  %v3957_v43 = vmul.f32 3.8918573e-05, %v6712_v57 }
 0x728   :  { %4391 = vmatmul.f32.gmra.mxu2 %v4322_v37  ;;  %v3948_v52 = vmul.f32 %v3947_v34, %v6712_v57  ;;  %v4624_v54 = vclamps-f32 %v3821_v19, 1.0  ;;  %v3834_v13 = vmul.f32 %v3833_v55, %v6643_v41  ;;  %v3912_v47 = vmul.f32 %v3911_v46, %v6665_v50 }
 0x729   :  { %v3924_v14 = vadd.f32 0.4994258, %v3923_v6  ;;  %v3958_v2 = vadd.f32 0.001143296, %v3957_v43  ;;  %v3635_v28 = vmul.f32 0.5, %v6556_v31  ;;  %v6741_v18 = vmul.f32 0.5, %v6618_v48 }
 0x72a   :  { %v4307_v7 = vadd.f32 1.0, %v4624_v54  ;;  %v3874_v15 = vmul.f32 %v3873_v35, %v6656_v23  ;;  %v3949_v41 = vadd.f32 0.0036580483, %v3948_v52  ;;  %v3835_v51 = vadd.f32 1.1283791, %v3834_v13 }
 0x72b   :  { %v3925_v63 = vmul.f32 %v3924_v14, %v6665_v50  ;;  %v3959_v58 = vmul.f32 %v3958_v2, %v6712_v57  ;;  %v6746_v59 = vmul.f32 0.5, %v6623_v42  ;;  %v3858_v25 = vand.u32 2147483648, %v6714_v12 }
 0x72c   :  { %v6730_v30 = vpop.eup %4887  ;;  %v4323_v24 = vmul.f32 %v4307_v7, %v3635_v28  ;;  %v3913_v27 = vadd.f32 0.18741608, %v3912_v47  ;;  %v3856_v48 = vand.u32 2147483647, %v6714_v12  ;;  %v6754_v21 = vmul.f32 0.5, %v6640_v49 }
 0x72d   :  { %v3848_v9 = vmul.f32 %v6730_v30, %v6714_v12  ;;  %v6738_v32 = vpop.eup %4889  ;;  %v3960_v29 = vadd.f32 0.014752088, %v3959_v58  ;;  %v6756_v45 = vadd.f32 1.0, %v3925_v63  ;;  %v3875_v42 = vadd.f32 1.1283791, %v3874_v15 }
 0x72e   :  { %v3888_v23 = vmul.f32 %v6738_v32, %v6724_v1  ;;  %4432 = vmatmul.f32.gmra.mxu3 %v4323_v24  ;;  %v6759_v33 = vmul.f32 0.5, %v6676_v62  ;;  %v3950_v10 = vmul.f32 %v3949_v41, %v6712_v57  ;;  %v6764_v19 = vmul.f32 %v3835_v51, %v6629_v26 }
 0x72f   :  { %v3849_v20 = vsub.f32 1.0, %v3848_v9  ;;  %v3961_v38 = vmul.f32 %v3960_v29, %v6712_v57  ;;  %vm3852_vm3 = vweird.f32 %v6714_v12  ;;  %v3859_v55 = vor.u32 1.1754944e-38, %v3858_v25 }
 0x730   :  { %v3898_v61 = vand.u32 2147483648, %v6724_v1  ;;  %v3914_v62 = vmul.f32 %v3913_v27, %v6665_v50  ;;  %vm6772_vm4 = vcmp.eq.f32.partialorder %v3856_v48, 8.507059e+37  ;;  %v3889_v46 = vsub.f32 1.0, %v3888_v23 }
 0x731   :  { %v3850_v36 = vmul.f32 %v6730_v30, %v3849_v20  ;;  %v3962_v34 = vadd.f32 0.112945676, %v3961_v38  ;;  %4891 = vrcp.f32 %v6756_v45  ;;  %v6783_v35 = vmul.f32 %v3875_v42, %v6637_v4 }
 0x732   :  { %v3896_v52 = vand.u32 2147483647, %v6724_v1  ;;  %v3951_v50 = vadd.f32 0.05243302, %v3950_v10  ;;  %vm3853_vm5 = vweird.f32 %v6730_v30  ;;  %vm3892_vm6 = vweird.f32 %v6724_v1 }
 0x733   :  { %v3963_v43 = vmul.f32 %v3962_v34, %v6712_v57  ;;  %v3851_v54 = vadd.f32 %v6730_v30, %v3850_v36  ;;  %vm3893_vm7 = vweird.f32 %v6738_v32  ;;  %v3899_v4 = vor.u32 1.1754944e-38, %v3898_v61  ;;  %vm6801_vm8 = vmor %vm3852_vm3, %vm3853_vm5 }
 0x734   :  { %v3915_v47 = vadd.f32 1.1283791, %v3914_v62  ;;  %v3890_v2 = vmul.f32 %v6738_v32, %v3889_v46  ;;  %v3936_v41 = vand.u32 2147483647, %v6756_v45  ;;  %v3952_v58 = vmul.f32 %v3951_v50, %v6712_v57  ;;  %vm6851_vm12 = vmor %vm3892_vm6, %vm3893_vm7 }
 0x735   :  { %v3964_v28 = vadd.f32 0.4994258, %v3963_v43  ;;  %v3855_v12 = vsel %vm6801_vm8, %v6730_v30, %v3851_v54  ;;  %vm6817_vm11 = vcmp.eq.f32.partialorder %v3896_v52, 8.507059e+37  ;;  %v3938_v48 = vand.u32 2147483648, %v6756_v45 }
 0x736   :  { %v3579_v31 = vpop.f32.mrf.mxu0  ;;  %v3620_v44 = vpop.f32.mrf.mxu1  ;;  %v3891_v30 = vadd.f32 %v6738_v32, %v3890_v2  ;;  %v3860_v62 = vsel %vm6772_vm4, %v3859_v55, %v3855_v12  ;;  %v6856_v37 = vmul.f32 %v3915_v47, %v6649_v3  ;;  %vm3932_vm9 = vweird.f32 %v6756_v45 }
 0x737   :  { %v3580_v22 = vadd.f32 %v3579_v31, %v6513_v8  ;;  %v6780_v6 = vadd.f32 %v3620_v44, %v6515_v60  ;;  %v6812_v24 = vpop.eup %4891  ;;  %v3965_v25 = vmul.f32 %v3964_v28, %v6712_v57  ;;  %v6859_v2 = vmul.f32 %v3860_v62, %v6764_v19 }
 0x738   :  { %v3895_v28 = vsel %vm6851_vm12, %v6738_v32, %v3891_v30  ;;  %vm3933_vm10 = vweird.f32 %v6812_v24  ;;  %vm6892_vm13 = vcmp.eq.f32.partialorder %v3936_v41, 8.507059e+37 }
 0x739   :  { %v6768_v49 = vmul.f32 0.70710677, %v3580_v22  ;;  %v6792_v14 = vmul.f32 0.70710677, %v6780_v6  ;;  %v6823_v23 = vmul.f32 0.5, %v3580_v22  ;;  %v6831_v44 = vadd.f32 1.0, %v3965_v25  ;;  %vm6918_vm14 = vmor %vm3932_vm9, %vm3933_vm10 }
 0x73a   :  { %v3928_v22 = vmul.f32 %v6812_v24, %v6756_v45  ;;  %v3900_v32 = vsel %vm6817_vm11, %v3899_v4, %v3895_v28 }
 0x73b   :  { %v3984_v26 = vmul.f32 %v6768_v49, %v6768_v49  ;;  %v4024_v51 = vmul.f32 %v6792_v14, %v6792_v14  ;;  %4893 = vrcp.f32 %v6831_v44  ;;  %vm3972_vm15 = vweird.f32 %v6831_v44 }
 0x73d   :  { %v6789_v13 = vmin.f32 %v3984_v26, 16.0  ;;  %v6825_v42 = vmin.f32 %v4024_v51, 16.0  ;;  %v3953_v26 = vadd.f32 0.18741608, %v3952_v58 }
 0x73e   :  { %v3582_v9 = vpop.f32.mrf.mxu0  ;;  %v3623_v38 = vpop.f32.mrf.mxu1 }
 0x73f   :  { %v3986_v63 = vmul.f32 2.1237322e-06, %v6789_v13  ;;  %v3997_v7 = vmul.f32 3.8918573e-05, %v6789_v13  ;;  %v6810_v20 = vadd.f32 %v3582_v9, %v6513_v8  ;;  %v4026_v34 = vmul.f32 2.1237322e-06, %v6825_v42 }
 0x740   :  { %v4037_v46 = vmul.f32 3.8918573e-05, %v6825_v42  ;;  %v6845_v50 = vadd.f32 %v3623_v38, %v6515_v60  ;;  %v3954_v47 = vmul.f32 %v3953_v26, %v6712_v57 }
 0x741   :  { %v3987_v27 = vadd.f32 0.00028619796, %v3986_v63  ;;  %v3998_v29 = vadd.f32 0.001143296, %v3997_v7  ;;  %v6828_v10 = vmul.f32 0.70710677, %v6810_v20 }
 0x742   :  { %v4027_v9 = vadd.f32 0.00028619796, %v4026_v34  ;;  %v6864_v63 = vor.u32 1.1754944e-38, %v3938_v48  ;;  %v4038_v1 = vadd.f32 0.001143296, %v4037_v46  ;;  %v3929_v7 = vsub.f32 1.0, %v3928_v22  ;;  %v6879_v48 = vpop.eup %4893 }
 0x743   :  { %v3988_v36 = vmul.f32 %v3987_v27, %v6789_v13  ;;  %v3999_v61 = vmul.f32 %v3998_v29, %v6789_v13  ;;  %v4064_v52 = vmul.f32 %v6828_v10, %v6828_v10  ;;  %v6874_v12 = vmul.f32 0.70710677, %v6845_v50 }
 0x744   :  { %v4028_v3 = vmul.f32 %v4027_v9, %v6825_v42  ;;  %v4039_v51 = vmul.f32 %v4038_v1, %v6825_v42  ;;  %v3968_v4 = vmul.f32 %v6879_v48, %v6831_v44  ;;  %v6930_v45 = vmul.f32 0.5, %v6810_v20 }
 0x745   :  { %v3989_v43 = vadd.f32 0.0036580483, %v3988_v36  ;;  %v4000_v54 = vadd.f32 0.014752088, %v3999_v61  ;;  %v6871_v19 = vmin.f32 %v4064_v52, 16.0  ;;  %v4104_v36 = vmul.f32 %v6874_v12, %v6874_v12 }
 0x746   :  { %v4029_v29 = vadd.f32 0.0036580483, %v4028_v3  ;;  %v4040_v38 = vadd.f32 0.014752088, %v4039_v51  ;;  %v3930_v61 = vmul.f32 %v6812_v24, %v3929_v7  ;;  %v3955_v52 = vadd.f32 1.1283791, %v3954_v47 }
 0x747   :  { %v3990_v15 = vmul.f32 %v3989_v43, %v6789_v13  ;;  %v4001_v58 = vmul.f32 %v4000_v54, %v6789_v13  ;;  %v4066_v57 = vmul.f32 2.1237322e-06, %v6871_v19  ;;  %v4077_v30 = vmul.f32 3.8918573e-05, %v6871_v19 }
 0x748   :  { %v4030_v62 = vmul.f32 %v4029_v29, %v6825_v42  ;;  %v4041_v22 = vmul.f32 %v4040_v38, %v6825_v42  ;;  %v6897_v54 = vmin.f32 %v4104_v36, 16.0  ;;  %v3969_v9 = vsub.f32 1.0, %v3968_v4 }
 0x749   :  { %v3991_v25 = vadd.f32 0.05243302, %v3990_v15  ;;  %v4002_v27 = vadd.f32 0.112945676, %v4001_v58  ;;  %v4067_v34 = vadd.f32 0.00028619796, %v4066_v57  ;;  %v3931_v15 = vadd.f32 %v6812_v24, %v3930_v61 }
 0x74a   :  { %v4078_v46 = vadd.f32 0.001143296, %v4077_v30  ;;  %v4042_v28 = vadd.f32 0.112945676, %v4041_v22  ;;  %v4031_v41 = vadd.f32 0.05243302, %v4030_v62  ;;  %v3901_v29 = vmul.f32 %v3900_v32, %v6783_v35 }
 0x74b   :  { %v4003_v31 = vmul.f32 %v4002_v27, %v6789_v13  ;;  %v3992_v55 = vmul.f32 %v3991_v25, %v6789_v13  ;;  %v4068_v1 = vmul.f32 %v4067_v34, %v6871_v19  ;;  %v4106_v3 = vmul.f32 2.1237322e-06, %v6897_v54 }
 0x74c   :  { %v4079_v7 = vmul.f32 %v4078_v46, %v6871_v19  ;;  %v6905_v47 = vmul.f32 0.5, %v6780_v6  ;;  %v4043_v51 = vmul.f32 %v4042_v28, %v6825_v42  ;;  %v6910_v38 = vmul.f32 %v3955_v52, %v6691_v39 }
 0x74d   :  { %v4004_v43 = vadd.f32 0.4994258, %v4003_v31  ;;  %v4069_v25 = vadd.f32 0.0036580483, %v4068_v1  ;;  %v3993_v57 = vadd.f32 0.18741608, %v3992_v55  ;;  %v3970_v6 = vmul.f32 %v6879_v48, %v3969_v9 }
 0x74e   :  { %v4080_v27 = vadd.f32 0.014752088, %v4079_v7  ;;  %v4044_v61 = vadd.f32 0.4994258, %v4043_v51  ;;  %v4107_v35 = vadd.f32 0.00028619796, %v4106_v3  ;;  %v3935_v39 = vsel %vm6918_vm14, %v6812_v24, %v3931_v15  ;;  %v3585_v15 = vpop.f32.mrf.mxu0 }
 0x74f   :  { %v4005_v58 = vmul.f32 %v4004_v43, %v6789_v13  ;;  %v4032_v32 = vmul.f32 %v4031_v41, %v6825_v42  ;;  %v3976_v31 = vand.u32 2147483647, %v6831_v44  ;;  %v4070_v62 = vmul.f32 %v4069_v25, %v6871_v19 }
 0x750   :  { %v4081_v4 = vmul.f32 %v4080_v27, %v6871_v19  ;;  %v4625_v22 = vclamps-f32 %v6859_v2, 1.0  ;;  %v3978_v34 = vand.u32 2147483648, %v6831_v44  ;;  %v3994_v46 = vmul.f32 %v3993_v57, %v6789_v13 }
 0x751   :  { %v6912_v30 = vadd.f32 1.0, %v4005_v58  ;;  %v4045_v24 = vmul.f32 %v4044_v61, %v6825_v42  ;;  %v3940_v20 = vsel %vm6892_vm13, %v6864_v63, %v3935_v39  ;;  %v3971_v55 = vadd.f32 %v6879_v48, %v3970_v6 }
 0x752   :  { %v4082_v52 = vadd.f32 0.112945676, %v4081_v4  ;;  %vm3973_vm0 = vweird.f32 %v6879_v48  ;;  %v4108_v43 = vmul.f32 %v4107_v35, %v6897_v54  ;;  %v4033_v9 = vadd.f32 0.18741608, %v4032_v32 }
 0x753   :  { %4895 = vrcp.f32 %v6912_v30  ;;  %v6945_v28 = vadd.f32 1.0, %v4045_v24  ;;  %v4117_v13 = vmul.f32 3.8918573e-05, %v6897_v54  ;;  %vm6949_vm1 = vcmp.eq.f32.partialorder %v3976_v31, 8.507059e+37  ;;  %vm6957_vm2 = vmor %vm3972_vm15, %vm3973_vm0 }
 0x754   :  { %v4083_v2 = vmul.f32 %v4082_v52, %v6871_v19  ;;  %v4071_v7 = vadd.f32 0.05243302, %v4070_v62  ;;  %v4109_v26 = vadd.f32 0.0036580483, %v4108_v43  ;;  %v4308_v63 = vadd.f32 1.0, %v4625_v22  ;;  %v3626_v52 = vpop.f32.mrf.mxu1 }
 0x755   :  { %v3979_v3 = vor.u32 1.1754944e-38, %v3978_v34  ;;  %v3995_v51 = vadd.f32 1.1283791, %v3994_v46  ;;  %4897 = vrcp.f32 %v6945_v28  ;;  %v4626_v25 = vclamps-f32 %v3901_v29, 1.0 }
 0x756   :  { %v3941_v27 = vmul.f32 %v3940_v20, %v6856_v37  ;;  %v3975_v57 = vsel %vm6957_vm2, %v6879_v48, %v3971_v55  ;;  %v4084_v6 = vadd.f32 0.4994258, %v4083_v2  ;;  %v4034_v44 = vmul.f32 %v4033_v9, %v6825_v42 }
 0x757   :  { %v4110_v61 = vmul.f32 %v4109_v26, %v6897_v54  ;;  %v4118_v4 = vadd.f32 0.001143296, %v4117_v13  ;;  %v6971_v35 = vadd.f32 %v3585_v15, %v6513_v8  ;;  %v4072_v29 = vmul.f32 %v4071_v7, %v6871_v19 }
 0x758   :  { %v4085_v37 = vmul.f32 %v4084_v6, %v6871_v19  ;;  %v4324_v32 = vmul.f32 %v4308_v63, %v6741_v18  ;;  %v3980_v48 = vsel %vm6949_vm1, %v3979_v3, %v3975_v57  ;;  %v6979_v31 = vmul.f32 %v3995_v51, %v6768_v49 }
 0x759   :  { %v6953_v58 = vpop.eup %4895  ;;  %v4119_v42 = vmul.f32 %v4118_v4, %v6897_v54  ;;  %v4309_v62 = vadd.f32 1.0, %v4626_v25  ;;  %v4016_v34 = vand.u32 2147483647, %v6912_v30  ;;  %v4111_v24 = vadd.f32 0.05243302, %v4110_v61 }
 0x75a   :  { %v4008_v36 = vmul.f32 %v6953_v58, %v6912_v30  ;;  %v6984_v46 = vadd.f32 1.0, %v4085_v37  ;;  %4394 = vmatmul.f32.gmra.mxu2 %v4324_v32  ;;  %v4018_v18 = vand.u32 2147483648, %v6912_v30  ;;  %v6991_v43 = vmul.f32 0.70710677, %v6971_v35 }
 0x75b   :  { %v6986_v20 = vpop.eup %4897  ;;  %v4120_v55 = vadd.f32 0.014752088, %v4119_v42  ;;  %v4325_v49 = vmul.f32 %v4309_v62, %v6746_v59  ;;  %vm4012_vm3 = vweird.f32 %v6912_v30  ;;  %v4035_v9 = vadd.f32 1.1283791, %v4034_v44 }
 0x75c   :  { %v4009_v39 = vsub.f32 1.0, %v4008_v36  ;;  %v4048_v2 = vmul.f32 %v6986_v20, %v6945_v28  ;;  %v4073_v13 = vadd.f32 0.18741608, %v4072_v29  ;;  %v3981_v1 = vmul.f32 %v3980_v48, %v6910_v38 }
 0x75d   :  { %vm4013_vm4 = vweird.f32 %v6953_v58  ;;  %4899 = vrcp.f32 %v6984_v46  ;;  %4435 = vmatmul.f32.gmra.mxu3 %v4325_v49  ;;  %v7000_v7 = vadd.f32 %v3626_v52, %v6515_v60  ;;  %v4112_v63 = vmul.f32 %v4111_v24, %v6897_v54 }
 0x75e   :  { %v4010_v22 = vmul.f32 %v6953_v58, %v4009_v39  ;;  %v4049_v26 = vsub.f32 1.0, %v4048_v2  ;;  %v4121_v15 = vmul.f32 %v4120_v55, %v6897_v54  ;;  %vm7005_vm5 = vcmp.eq.f32.partialorder %v4016_v34, 8.507059e+37  ;;  %vm7021_vm6 = vmor %vm4012_vm3, %vm4013_vm4 }
 0x75f   :  { %v4019_v38 = vor.u32 1.1754944e-38, %v4018_v18  ;;  %v4056_v3 = vand.u32 2147483647, %v6945_v28  ;;  %v4144_v51 = vmul.f32 %v6991_v43, %v6991_v43  ;;  %v7013_v25 = vmul.f32 %v4035_v9, %v6792_v14 }
 0x760   :  { %v4011_v59 = vadd.f32 %v6953_v58, %v4010_v22  ;;  %v4050_v57 = vmul.f32 %v6986_v20, %v4049_v26  ;;  %v4074_v36 = vmul.f32 %v4073_v13, %v6871_v19  ;;  %v4122_v6 = vadd.f32 0.112945676, %v4121_v15 }
 0x761   :  { %v4058_v61 = vand.u32 2147483648, %v6945_v28  ;;  %v7026_v4 = vmin.f32 %v4144_v51, 16.0  ;;  %v7029_v14 = vmul.f32 0.70710677, %v7000_v7  ;;  %v4627_v39 = vclamps-f32 %v3941_v27, 1.0 }
 0x762   :  { %v4015_v19 = vsel %vm7021_vm6, %v6953_v58, %v4011_v59  ;;  %v4113_v29 = vadd.f32 0.18741608, %v4112_v63  ;;  %v4123_v37 = vmul.f32 %v4122_v6, %v6897_v54  ;;  %v4628_v30 = vclamps-f32 %v3981_v1, 1.0 }
 0x763   :  { %v7035_v32 = vpop.eup %4899  ;;  %vm7037_vm7 = vcmp.eq.f32.partialorder %v4056_v3, 8.507059e+37  ;;  %v4146_v42 = vmul.f32 2.1237322e-06, %v7026_v4  ;;  %v4157_v62 = vmul.f32 3.8918573e-05, %v7026_v4  ;;  %v4184_v27 = vmul.f32 %v7029_v14, %v7029_v14  ;;  %v3588_v3 = vpop.f32.mrf.mxu0 }
 0x764   :  { %v4310_v22 = vadd.f32 1.0, %v4627_v39  ;;  %v4051_v58 = vadd.f32 %v6986_v20, %v4050_v57  ;;  %vm4053_vm8 = vweird.f32 %v6986_v20  ;;  %v4075_v34 = vadd.f32 1.1283791, %v4074_v36 }
 0x765   :  { %v4088_v24 = vmul.f32 %v7035_v32, %v6984_v46  ;;  %vm4052_vm11 = vweird.f32 %v6945_v28  ;;  %v4124_v52 = vadd.f32 0.4994258, %v4123_v37  ;;  %v4147_v18 = vadd.f32 0.00028619796, %v4146_v42  ;;  %v3629_v42 = vpop.f32.mrf.mxu1 }
 0x766   :  { %v4158_v55 = vadd.f32 0.001143296, %v4157_v62  ;;  %v4020_v49 = vsel %vm7005_vm5, %v4019_v38, %v4015_v19  ;;  %v4114_v9 = vmul.f32 %v4113_v29, %v6897_v54  ;;  %v7053_v2 = vmin.f32 %v4184_v27, 16.0  ;;  %vm7056_vm12 = vmor %vm4052_vm11, %vm4053_vm8 }
 0x767   :  { %v4326_v13 = vmul.f32 %v4310_v22, %v6754_v21  ;;  %v4125_v59 = vmul.f32 %v4124_v52, %v6897_v54  ;;  %v4148_v28 = vmul.f32 %v4147_v18, %v7026_v4  ;;  %v4311_v63 = vadd.f32 1.0, %v4628_v30 }
 0x768   :  { %v4159_v26 = vmul.f32 %v4158_v55, %v7026_v4  ;;  %v4055_v15 = vsel %vm7056_vm12, %v6986_v20, %v4051_v58  ;;  %v4089_v41 = vsub.f32 1.0, %v4088_v24  ;;  %v4186_v38 = vmul.f32 2.1237322e-06, %v7053_v2 }
 0x769   :  { %v4197_v21 = vmul.f32 3.8918573e-05, %v7053_v2  ;;  %4397 = vmatmul.f32.gmra.mxu2 %v4326_v13  ;;  %v7068_v51 = vadd.f32 1.0, %v4125_v59  ;;  %v4149_v57 = vadd.f32 0.0036580483, %v4148_v28  ;;  %v4327_v36 = vmul.f32 %v4311_v63, %v6759_v33 }
 0x76a   :  { %v4160_v54 = vadd.f32 0.014752088, %v4159_v26  ;;  %v4059_v6 = vor.u32 1.1754944e-38, %v4058_v61  ;;  %v7072_v44 = vmul.f32 %v4075_v34, %v6828_v10  ;;  %v4187_v39 = vadd.f32 0.00028619796, %v4186_v38 }
 0x76b   :  { %v4198_v19 = vadd.f32 0.001143296, %v4197_v21  ;;  %v4021_v20 = vmul.f32 %v4020_v49, %v6979_v31  ;;  %v4096_v29 = vand.u32 2147483647, %v6984_v46  ;;  %4901 = vrcp.f32 %v7068_v51  ;;  %4438 = vmatmul.f32.gmra.mxu3 %v4327_v36 }
 0x76c   :  { %v7078_v37 = vadd.f32 %v3588_v3, %v6513_v8  ;;  %v4060_v30 = vsel %vm7037_vm7, %v4059_v6, %v4055_v15  ;;  %v4150_v33 = vmul.f32 %v4149_v57, %v7026_v4  ;;  %v4161_v10 = vmul.f32 %v4160_v54, %v7026_v4 }
 0x76d   :  { %v4188_v61 = vmul.f32 %v4187_v39, %v7053_v2  ;;  %v4090_v31 = vmul.f32 %v7035_v32, %v4089_v41  ;;  %vm4092_vm9 = vweird.f32 %v6984_v46  ;;  %v4098_v62 = vand.u32 2147483648, %v6984_v46 }
 0x76e   :  { %v4115_v27 = vadd.f32 1.1283791, %v4114_v9  ;;  %v4199_v8 = vmul.f32 %v4198_v19, %v7053_v2  ;;  %vm4093_vm10 = vweird.f32 %v7035_v32  ;;  %v4151_v48 = vadd.f32 0.05243302, %v4150_v33 }
 0x76f   :  { %v4162_v22 = vadd.f32 0.112945676, %v4161_v10  ;;  %v4189_v58 = vadd.f32 0.0036580483, %v4188_v61  ;;  %v7091_v34 = vmul.f32 %v4060_v30, %v7013_v25  ;;  %v7094_v52 = vmul.f32 0.70710677, %v7078_v37  ;;  %vm7128_vm0 = vmor %vm4092_vm9, %vm4093_vm10 }
 0x770   :  { %v4200_v24 = vadd.f32 0.014752088, %v4199_v8  ;;  %v7097_v18 = vadd.f32 %v3629_v42, %v6515_v60  ;;  %v4152_v55 = vmul.f32 %v4151_v48, %v7026_v4  ;;  %v4629_v13 = vclamps-f32 %v4021_v20, 1.0 }
 0x771   :  { %v4163_v49 = vmul.f32 %v4162_v22, %v7026_v4  ;;  %v4190_v9 = vmul.f32 %v4189_v58, %v7053_v2  ;;  %v4902_v1 = vpop.eup %4901  ;;  %v4091_v59 = vadd.f32 %v7035_v32, %v4090_v31  ;;  %v4224_v28 = vmul.f32 %v7094_v52, %v7094_v52 }
 0x772   :  { %v4201_v25 = vmul.f32 %v4200_v24, %v7053_v2  ;;  %v7107_v26 = vmul.f32 0.70710677, %v7097_v18  ;;  %vm7109_vm13 = vcmp.eq.f32.partialorder %v4096_v29, 8.507059e+37  ;;  %v4128_v63 = vmul.f32 %v4902_v1, %v7068_v51 }
 0x773   :  { %vm4132_vm14 = vweird.f32 %v7068_v51  ;;  %v4136_v15 = vand.u32 2147483647, %v7068_v51  ;;  %v4164_v41 = vadd.f32 0.4994258, %v4163_v49  ;;  %v4153_v38 = vadd.f32 0.18741608, %v4152_v55 }
 0x774   :  { %v4202_v21 = vadd.f32 0.112945676, %v4201_v25  ;;  %v7116_v3 = vmin.f32 %v4224_v28, 16.0  ;;  %v4264_v57 = vmul.f32 %v7107_v26, %v7107_v26  ;;  %v4129_v54 = vsub.f32 1.0, %v4128_v63 }
 0x775   :  { %v4165_v36 = vmul.f32 %v4164_v41, %v7026_v4  ;;  %v4191_v6 = vadd.f32 0.05243302, %v4190_v9  ;;  %v4312_v39 = vadd.f32 1.0, %v4629_v13  ;;  %vm4133_vm15 = vweird.f32 %v4902_v1 }
 0x776   :  { %v4138_v19 = vand.u32 2147483648, %v7068_v51  ;;  %v4203_v20 = vmul.f32 %v4202_v21, %v7053_v2  ;;  %v4226_v29 = vmul.f32 2.1237322e-06, %v7116_v3  ;;  %v4130_v33 = vmul.f32 %v4902_v1, %v4129_v54  ;;  %vm4134_vm1 = vmor %vm4132_vm14, %vm4133_vm15 }
 0x777   :  { %v7132_v10 = vadd.f32 1.0, %v4165_v36  ;;  %v4237_v61 = vmul.f32 3.8918573e-05, %v7116_v3  ;;  %v7135_v42 = vmin.f32 %v4264_v57, 16.0  ;;  %v4095_v31 = vsel %vm7128_vm0, %v7035_v32, %v4091_v59 }
 0x778   :  { %v4154_v8 = vmul.f32 %v4153_v38, %v7026_v4  ;;  %v4204_v48 = vadd.f32 0.4994258, %v4203_v20  ;;  %v4328_v46 = vmul.f32 %v4312_v39, %v6823_v23  ;;  %v4131_v22 = vadd.f32 %v4902_v1, %v4130_v33 }
 0x779   :  { %4903 = vrcp.f32 %v7132_v10  ;;  %v4192_v58 = vmul.f32 %v4191_v6, %v7053_v2  ;;  %v4227_v24 = vadd.f32 0.00028619796, %v4226_v29  ;;  %v4099_v55 = vor.u32 1.1754944e-38, %v4098_v62 }
 0x77a   :  { %v4139_v49 = vor.u32 1.1754944e-38, %v4138_v19  ;;  %v4205_v9 = vmul.f32 %v4204_v48, %v7053_v2  ;;  %4400 = vmatmul.f32.gmra.mxu2 %v4328_v46  ;;  %v4630_v4 = vclamps-f32 %v7091_v34, 1.0  ;;  %v4135_v32 = vsel %vm4134_vm1, %v4902_v1, %v4131_v22 }
 0x77b   :  { %vm4137_vm2 = vcmp.eq.f32.partialorder %v4136_v15, 8.507059e+37  ;;  %v4238_v23 = vadd.f32 0.001143296, %v4237_v61  ;;  %v4266_v13 = vmul.f32 2.1237322e-06, %v7135_v42  ;;  %v4100_v59 = vsel %vm7109_vm13, %v4099_v55, %v4095_v31 }
 0x77c   :  { %v4116_v62 = vmul.f32 %v4115_v27, %v6874_v12  ;;  %v4140_v25 = vsel %vm4137_vm2, %v4139_v49, %v4135_v32  ;;  %v4155_v28 = vadd.f32 1.1283791, %v4154_v8  ;;  %v4193_v51 = vadd.f32 0.18741608, %v4192_v58 }
 0x77d   :  { %v7153_v63 = vadd.f32 1.0, %v4205_v9  ;;  %v4228_v41 = vmul.f32 %v4227_v24, %v7116_v3  ;;  %v4239_v38 = vmul.f32 %v4238_v23, %v7116_v3  ;;  %v3643_v34 = vmul.f32 0.5, %v6845_v50 }
 0x77e   :  { %v4267_v1 = vadd.f32 0.00028619796, %v4266_v13  ;;  %v4277_v15 = vmul.f32 3.8918573e-05, %v7135_v42  ;;  %v4313_v21 = vadd.f32 1.0, %v4630_v4  ;;  %v4101_v60 = vmul.f32 %v4100_v59, %v7072_v44 }
 0x77f   :  { %v4904_v57 = vpop.eup %4903  ;;  %v4141_v54 = vmul.f32 %v4140_v25, %v4116_v62  ;;  %v4176_v12 = vand.u32 2147483647, %v7132_v10  ;;  %4905 = vrcp.f32 %v7153_v63  ;;  %v4156_v27 = vmul.f32 %v4155_v28, %v6991_v43 }
 0x780   :  { %v4168_v36 = vmul.f32 %v4904_v57, %v7132_v10  ;;  %v4178_v6 = vand.u32 2147483648, %v7132_v10  ;;  %v4240_v39 = vadd.f32 0.014752088, %v4239_v38  ;;  %vm4172_vm3 = vweird.f32 %v7132_v10 }
 0x781   :  { %v4194_v50 = vmul.f32 %v4193_v51, %v7053_v2  ;;  %v4229_v19 = vadd.f32 0.0036580483, %v4228_v41  ;;  %v4278_v20 = vadd.f32 0.001143296, %v4277_v15  ;;  %v4268_v30 = vmul.f32 %v4267_v1, %v7135_v42 }
 0x782   :  { %v4169_v29 = vsub.f32 1.0, %v4168_v36  ;;  %v4241_v44 = vmul.f32 %v4240_v39, %v7116_v3  ;;  %v4329_v33 = vmul.f32 %v4313_v21, %v6905_v47  ;;  %vm7170_vm4 = vcmp.eq.f32.partialorder %v4176_v12, 8.507059e+37 }
 0x783   :  { %v4279_v61 = vmul.f32 %v4278_v20, %v7135_v42  ;;  %v4631_v31 = vclamps-f32 %v4101_v60, 1.0  ;;  %v4632_v8 = vclamps-f32 %v4141_v54, 1.0  ;;  %vm4173_vm5 = vweird.f32 %v4904_v57 }
 0x784   :  { %v4170_v48 = vmul.f32 %v4904_v57, %v4169_v29  ;;  %v4179_v2 = vor.u32 1.1754944e-38, %v4178_v6  ;;  %v4242_v46 = vadd.f32 0.112945676, %v4241_v44  ;;  %4441 = vmatmul.f32.gmra.mxu3 %v4329_v33  ;;  %v4230_v58 = vmul.f32 %v4229_v19, %v7116_v3  ;;  %vm4174_vm6 = vmor %vm4172_vm3, %vm4173_vm5 }
 0x785   :  { %v4906_v22 = vpop.eup %4905  ;;  %v4280_v24 = vadd.f32 0.014752088, %v4279_v61  ;;  %v4314_v55 = vadd.f32 1.0, %v4631_v31  ;;  %v4315_v49 = vadd.f32 1.0, %v4632_v8  ;;  %v4195_v9 = vadd.f32 1.1283791, %v4194_v50 }
 0x786   :  { %v4171_v47 = vadd.f32 %v4904_v57, %v4170_v48  ;;  %v4208_v4 = vmul.f32 %v4906_v22, %v7153_v63  ;;  %v4269_v32 = vadd.f32 0.0036580483, %v4268_v30  ;;  %v4216_v23 = vand.u32 2147483647, %v7153_v63  ;;  %v7197_v61 = vld [vmem:[%s7241_s12] ss:$0 sm:$0xff] }
 0x787   :  { %v4243_v13 = vmul.f32 %v4242_v46, %v7116_v3  ;;  %v4281_v59 = vmul.f32 %v4280_v24, %v7135_v42  ;;  %v4330_v62 = vmul.f32 %v4314_v55, %v6930_v45  ;;  %v4218_v51 = vand.u32 2147483648, %v7153_v63  ;;  %s5165_s12 = smov [#allocation16]  }
 0x788   :  { %v4175_v25 = vsel %vm4174_vm6, %v4904_v57, %v4171_v47  ;;  %v4209_v28 = vsub.f32 1.0, %v4208_v4  ;;  %v4331_v41 = vmul.f32 %v4315_v49, %v3643_v34  ;;  %v4231_v1 = vadd.f32 0.05243302, %v4230_v58  ;;  %s4474_s19 = sshll.u32 %s5165_s12, 4  ;;  %s4475_s19 = int_to_ptr.vmem [resolvable:$true] %s4474_s19 }
 0x789   :  { %v4180_v38 = vsel %vm7170_vm4, %v4179_v2, %v4175_v25  ;;  %v4244_v15 = vadd.f32 0.4994258, %v4243_v13  ;;  %v4282_v10 = vadd.f32 0.112945676, %v4281_v59  ;;  %4403 = vmatmul.f32.gmra.mxu2 %v4330_v62  ;;  %vm4213_vm7 = vweird.f32 %v4906_v22 }
 0x78a   :  { %v4181_v21 = vmul.f32 %v4180_v38, %v4156_v27  ;;  %v4210_v60 = vmul.f32 %v4906_v22, %v4209_v28  ;;  %v4270_v54 = vmul.f32 %v4269_v32, %v7135_v42  ;;  %v4196_v57 = vmul.f32 %v4195_v9, %v7029_v14 }
 0x78b   :  { %v4245_v12 = vmul.f32 %v4244_v15, %v7116_v3  ;;  %v4283_v45 = vmul.f32 %v4282_v10, %v7135_v42  ;;  %vm4212_vm8 = vweird.f32 %v7153_v63  ;;  %v4219_v6 = vor.u32 1.1754944e-38, %v4218_v51 }
 0x78c   :  { %v4211_v36 = vadd.f32 %v4906_v22, %v4210_v60  ;;  %4444 = vmatmul.f32.gmra.mxu3 %v4331_v41  ;;  %v4633_v34 = vclamps-f32 %v4181_v21, 1.0  ;;  %vm4214_vm11 = vmor %vm4212_vm8, %vm4213_vm7  ;;  %v4232_v39 = vmul.f32 %v4231_v1, %v7116_v3  ;;  %vm4217_vm12 = vcmp.eq.f32.partialorder %v4216_v23, 8.507059e+37 }
 0x78d   :  { %v4246_v27 = vadd.f32 1.0, %v4245_v12  ;;  %v4284_v50 = vadd.f32 0.4994258, %v4283_v45  ;;  %v4271_v20 = vadd.f32 0.05243302, %v4270_v54  ;;  %v3644_v44 = vmul.f32 0.5, %v6971_v35 }
 0x78e   :  { %v4215_v19 = vsel %vm4214_vm11, %v4906_v22, %v4211_v36  ;;  %v4316_v29 = vadd.f32 1.0, %v4633_v34  ;;  %v4233_v63 = vadd.f32 0.18741608, %v4232_v39  ;;  %v3645_v46 = vmul.f32 0.5, %v7000_v7 }
 0x78f   :  { %v4220_v30 = vsel %vm4217_vm12, %v4219_v6, %v4215_v19  ;;  %4907 = vrcp.f32 %v4246_v27  ;;  %v4285_v33 = vmul.f32 %v4284_v50, %v7135_v42  ;;  %v4272_v31 = vmul.f32 %v4271_v20, %v7135_v42 }
 0x790   :  { %v4221_v14 = vmul.f32 %v4220_v30, %v4196_v57  ;;  %v4332_v43 = vmul.f32 %v4316_v29, %v3644_v44  ;;  %v4234_v22 = vmul.f32 %v4233_v63, %v7116_v3  ;;  %v4258_v13 = vand.u32 2147483648, %v4246_v27 }
 0x791   :  { %v4286_v8 = vadd.f32 1.0, %v4285_v33  ;;  %v4273_v49 = vadd.f32 0.18741608, %v4272_v31  ;;  %v4256_v7 = vand.u32 2147483647, %v4246_v27  ;;  %vm4252_vm10 = vweird.f32 %v4246_v27 }
 0x792   :  { %v4634_v48 = vclamps-f32 %v4221_v14, 1.0  ;;  %4406 = vmatmul.f32.gmra.mxu2 %v4332_v43  ;;  %v4235_v23 = vadd.f32 1.1283791, %v4234_v22  ;;  %v4259_v38 = vor.u32 1.1754944e-38, %v4258_v13  ;;  %v3646_v34 = vmul.f32 0.5, %v7078_v37 }
 0x793   :  { %4909 = vrcp.f32 %v4286_v8  ;;  %v4274_v3 = vmul.f32 %v4273_v49, %v7135_v42  ;;  %vm4257_vm14 = vcmp.eq.f32.partialorder %v4256_v7, 8.507059e+37  ;;  %v4298_v21 = vand.u32 2147483648, %v4286_v8 }
 0x794   :  { %v4317_v58 = vadd.f32 1.0, %v4634_v48  ;;  %v4236_v41 = vmul.f32 %v4235_v23, %v7094_v52  ;;  %v4296_v54 = vand.u32 2147483647, %v4286_v8  ;;  %vm4292_vm0 = vweird.f32 %v4286_v8 }
 0x795   :  { %v4389_v2 = vpop.f32.mrf.mxu2  ;;  %v4908_v35 = vpop.eup %4907  ;;  %v4275_v10 = vadd.f32 1.1283791, %v4274_v3  ;;  %v4299_v42 = vor.u32 1.1754944e-38, %v4298_v21  ;;  %v3647_v20 = vmul.f32 0.5, %v7097_v18 }
 0x796   :  { %v4390_v24 = vadd.f32 %v7197_v61, %v4389_v2  ;;  %v4248_v55 = vmul.f32 %v4908_v35, %v4246_v27  ;;  %v4430_v47 = vpop.f32.mrf.mxu3  ;;  %v4333_v9 = vmul.f32 %v4317_v58, %v3645_v46  ;;  %vm4253_vm9 = vweird.f32 %v4908_v35 }
 0x797   :  { %vm4254_vm13 = vmor %vm4252_vm10, %vm4253_vm9  ;;  %v4276_v36 = vmul.f32 %v4275_v10, %v7107_v26  ;;  %vm4297_vm2 = vcmp.eq.f32.partialorder %v4296_v54, 8.507059e+37 }
 0x798   :  { %v4431_v4 = vadd.f32 %v4430_v47, %v4390_v24  ;;  %v4249_v32 = vsub.f32 1.0, %v4248_v55  ;;  %4447 = vmatmul.f32.gmra.mxu3 %v4333_v9 }
 0x799   :  { %v4910_v62 = vpop.eup %4909 }
 0x79a   :  { %v4454_v59 = vadd.f32 %v4431_v4, %v6392_v56  ;;  %v4250_v25 = vmul.f32 %v4908_v35, %v4249_v32  ;;  %v4288_v28 = vmul.f32 %v4910_v62, %v4286_v8  ;;  %vm4293_vm15 = vweird.f32 %v4910_v62 }
 0x79b   :  { %vm4294_vm1 = vmor %vm4292_vm0, %vm4293_vm15 }
 0x79c   :  { %4462 = vst [vmem:[#allocation16] sm:$0xff] %v4454_v59  ;;  %v4251_v51 = vadd.f32 %v4908_v35, %v4250_v25  ;;  %v4289_v1 = vsub.f32 1.0, %v4288_v28 }
 0x79e   :  { %v4255_v15 = vsel %vm4254_vm13, %v4908_v35, %v4251_v51  ;;  %v4290_v60 = vmul.f32 %v4910_v62, %v4289_v1 }
 0x79f   :  { %v4260_v56 = vsel %vm4257_vm14, %v4259_v38, %v4255_v15 }
 0x7a0   :  { %v4261_v12 = vmul.f32 %v4260_v56, %v4236_v41  ;;  %v4291_v45 = vadd.f32 %v4910_v62, %v4290_v60 }
 0x7a2   :  { %v4635_v57 = vclamps-f32 %v4261_v12, 1.0  ;;  %v4295_v52 = vsel %vm4294_vm1, %v4910_v62, %v4291_v45 }
 0x7a3   :  { %v4300_v6 = vsel %vm4297_vm2, %v4299_v42, %v4295_v52 }
 0x7a4   :  { %v4318_v39 = vadd.f32 1.0, %v4635_v57  ;;  %v4301_v27 = vmul.f32 %v4300_v6, %v4276_v36 }
 0x7a6   :  { %v4334_v50 = vmul.f32 %v4318_v39, %v3646_v34  ;;  %v4636_v19 = vclamps-f32 %v4301_v27, 1.0 }
 0x7a8   :  { %4409 = vmatmul.f32.gmra.mxu2 %v4334_v50  ;;  %v4319_v29 = vadd.f32 1.0, %v4636_v19 }
 0x7aa   :  { %v4335_v44 = vmul.f32 %v4319_v29, %v3647_v20 }
 0x7ab   :  { %v4392_v30 = vpop.f32.mrf.mxu2 }
 0x7ac   :  { %4450 = vmatmul.f32.gmra.mxu3 %v4335_v44  ;;  %v4393_v14 = vadd.f32 %v7197_v61, %v4392_v30 }
 0x7b1   :  { %v4433_v33 = vpop.f32.mrf.mxu3 }
 0x7b2   :  { %v4434_v26 = vadd.f32 %v4433_v33, %v4393_v14 }
 0x7b4   :  { %v4455_v63 = vadd.f32 %v4434_v26, %v6396_v16 }
 0x7b6   :  { %4463 = vst [vmem:[#allocation16 + $0x8] sm:$0xff] %v4455_v63 }
 0x7dd   :  { %v4395_v37 = vpop.f32.mrf.mxu2 }
 0x7de   :  { %v4396_v43 = vadd.f32 %v7197_v61, %v4395_v37 }
 0x7e0   :  { %v4436_v31 = vpop.f32.mrf.mxu3 }
 0x7e1   :  { %v4437_v8 = vadd.f32 %v4436_v31, %v4396_v43 }
 0x7e3   :  { %v4456_v48 = vadd.f32 %v4437_v8, %v6400_v40 }
 0x7e5   :  { %4464 = vst [vmem:[#allocation16 + $0x10] sm:$0xff] %v4456_v48 }
 0x7ec   :  { %v4398_v18 = vpop.f32.mrf.mxu2 }
 0x7ed   :  { %v4399_v2 = vadd.f32 %v7197_v61, %v4398_v18 }
 0x7ee   :  { %v4439_v35 = vpop.f32.mrf.mxu3 }
 0x7ef   :  { %v4440_v46 = vadd.f32 %v4439_v35, %v4399_v2 }
 0x7f1   :  { %v4457_v22 = vadd.f32 %v4440_v46, %v6404_v5 }
 0x7f3   :  { %4465 = vst [vmem:[#allocation16 + $0x18] sm:$0xff] %v4457_v22 }
 0x7fd   :  { %v4401_v58 = vpop.f32.mrf.mxu2 }
 0x7fe   :  { %v4402_v16 = vadd.f32 %v7197_v61, %v4401_v58 }
 0x807   :  { %v4442_v24 = vpop.f32.mrf.mxu3 }
 0x808   :  { %v4443_v55 = vadd.f32 %v4442_v24, %v4402_v16 }
 0x80a   :  { %v4458_v49 = vadd.f32 %v4443_v55, %v6408_v0 }
 0x80c   :  { %4466 = vst [vmem:[#allocation16 + $0x20] sm:$0xff] %v4458_v49  ;;  %v4404_v47 = vpop.f32.mrf.mxu2 }
 0x80d   :  { %v4405_v40 = vadd.f32 %v7197_v61, %v4404_v47 }
 0x80f   :  { %v4445_v9 = vpop.f32.mrf.mxu3 }
 0x810   :  { %v4446_v4 = vadd.f32 %v4445_v9, %v4405_v40 }
 0x812   :  { %v4459_v32 = vadd.f32 %v4446_v4, %v6412_v53 }
 0x814   :  { %4467 = vst [vmem:[#allocation16 + $0x28] sm:$0xff] %v4459_v32 }
 0x815   :  { %v4407_v23 = vpop.f32.mrf.mxu2 }
 0x816   :  { %v4408_v5 = vadd.f32 %v7197_v61, %v4407_v23 }
 0x81b   :  { %v4448_v13 = vpop.f32.mrf.mxu3 }
 0x81c   :  { %v4449_v59 = vadd.f32 %v4448_v13, %v4408_v5 }
 0x81e   :  { %v4460_v62 = vadd.f32 %v4449_v59, %v6416_v17 }
 0x820   :  { %4468 = vst [vmem:[#allocation16 + $0x30] sm:$0xff] %v4460_v62 }
 0x82b   :  { %v4410_v25 = vpop.f32.mrf.mxu2 }
 0x82c   :  { %v4411_v0 = vadd.f32 %v7197_v61, %v4410_v25 }
 0x82f   :  { %v4451_v7 = vpop.f32.mrf.mxu3 }
 0x830   :  { %v4452_v53 = vadd.f32 %v4451_v7, %v4411_v0 }
 0x832   :  { %v4461_v3 = vadd.f32 %v4452_v53, %v6426_v11 }
 0x834   :  { %4469 = vst [vmem:[#allocation16 + $0x38] sm:$0xff] %v4461_v3 }
 0x835   :  { %4482 = dma.vmem_to_hbm [thread:$0]  %s4475_s19, 1024, %s4477_s1, [#allocation4], %s5153_s28, %s5153_s28, %s5154_s29  }
 0x836   :  { %5145 = dma.done.wait [#allocation4], 1024  }
 0x837   :  { %5146 = vsyncadd [#allocation4], 4294966272 }
 0x838   :  { %4487 = vsyncpa [#allocation3], 1 }
 0x839   :  { %4488 = vsyncpa [#allocation6], 1 }
 0x83a   :  { %4489 = vsyncpa [#allocation9], 1 }
 0x83b   :  { %4490 = vsyncpa [#allocation12], 1 }
 0x83c   :  { %4491 = vsyncpa [#allocation15], 1 }
 0x83d   :  { %4492 = vsyncpa [#allocation4], 1 }

// kernel: tpu_custom_call.1
= control target key start
LH: loop header
LB: loop body
LE: loop exit
PB: predicated region body
PF: predicated region fallthrough
CT: control target
= control target key end

     0   :  { %18 = vsyncpa [#allocation3], 0  ;;  %s7229_s0 = inlined_call_operand.hbm [shape: f32[8,8,128], index: 0, kind: input, shape index: {}]   ;;  %s7230_s1 = inlined_call_operand.hbm [shape: f32[1,128], index: 1, kind: input, shape index: {}]   ;;  %s7231_s2 = inlined_call_operand.hbm [shape: f32[1,128], index: 2, kind: input, shape index: {}]   ;;  %s7232_s3 = inlined_call_operand.hbm [shape: f32[128,384], index: 3, kind: input, shape index: {}]   ;;  %s7233_s4 = inlined_call_operand.vmem [shape: f32[1,384], index: 4, kind: input, shape index: {}]   ;;  %s7234_s5 = inlined_call_operand.hbm [shape: f32[4,32,128], index: 5, kind: input, shape index: {}]   ;;  %s7235_s6 = inlined_call_operand.hbm [shape: f32[1,128], index: 6, kind: input, shape index: {}]   ;;  %s7236_s7 = inlined_call_operand.vmem [shape: f32[1,128], index: 7, kind: input, shape index: {}]   ;;  %s7237_s8 = inlined_call_operand.vmem [shape: f32[1,128], index: 8, kind: input, shape index: {}]   ;;  %s7238_s9 = inlined_call_operand.hbm [shape: f32[128,256], index: 9, kind: input, shape index: {}]   ;;  %s7239_s10 = inlined_call_operand.vmem [shape: f32[1,256], index: 10, kind: input, shape index: {}]   ;;  %s7240_s11 = inlined_call_operand.hbm [shape: f32[256,128], index: 11, kind: input, shape index: {}]   ;;  %s7241_s12 = inlined_call_operand.vmem [shape: f32[1,128], index: 12, kind: input, shape index: {}]   ;;  %s7242_s13 = inlined_call_operand.hbm [shape: f32[8,8,128], index: 13, kind: output, shape index: {}]  }
   0x1   :  { %19 = vsyncpa [#allocation6], 0 }
   0x2   :  { %20 = vsyncpa [#allocation9], 0 }
   0x3   :  { %21 = vsyncpa [#allocation12], 0 }
   0x4   :  { %22 = vsyncpa [#allocation15], 0  ;;  %s42_s27 = sshll.u32 %s7230_s1, 4  ;;  %s43_s27 = int_to_ptr.hbm [resolvable:$true] %s42_s27 }
   0x5   :  { %23 = vsyncpa [#allocation4], 0  ;;  %s5147_s28 = smov [#allocation5]   ;;  %s63_s15 = sshll.u32 %s7232_s3, 4  ;;  %s64_s15 = int_to_ptr.hbm [resolvable:$true] %s63_s15 }
   0x6   :  { %s44_s29 = sshll.u32 %s5147_s28, 4  ;;  %s5148_s16 = smov [#allocation8]   ;;  %s45_s29 = int_to_ptr.vmem [resolvable:$true] %s44_s29 }
   0x7   :  { %47 = dma.hbm_to_vmem [thread:$0]  %s43_s27, 16, %s45_s29, [#allocation6]  }
   0x8   :  { %s65_s17 = sshll.u32 %s5148_s16, 4  ;;  %s5149_s18 = smov 384   ;;  %s66_s17 = int_to_ptr.vmem [resolvable:$true] %s65_s17 }
   0x9   :  { %s5150_s19 = smov 24   ;;  %s92_s1 = sshll.u32 %s7235_s6, 4  ;;  %s93_s1 = int_to_ptr.hbm [resolvable:$true] %s92_s1 }
   0xa   :  { %71 = dma.hbm_to_vmem [thread:$0]  %s64_s15, 6144, %s66_s17, [#allocation9], %s5149_s18, %s5149_s18, %s5150_s19  }
   0xb   :  { %s5151_s22 = smov [#allocation11]   ;;  %s28_s3 = sshll.u32 %s7229_s0, 4  ;;  %s29_s3 = int_to_ptr.hbm [resolvable:$true] %s28_s3 }
   0xc   :  { %s94_s23 = sshll.u32 %s5151_s22, 4  ;;  %s5152_s26 = smov [#allocation2]   ;;  %s95_s23 = int_to_ptr.vmem [resolvable:$true] %s94_s23 }
   0xd   :  { %97 = dma.hbm_to_vmem [thread:$0]  %s93_s1, 16, %s95_s23, [#allocation12]  }
   0xe   :  { %s30_s27 = sshll.u32 %s5152_s26, 4  ;;  %s5153_s28 = smov 128   ;;  %s31_s27 = int_to_ptr.vmem [resolvable:$true] %s30_s27 }
   0xf   :  { %s5154_s29 = smov 8   ;;  %s53_s14 = sshll.u32 %s7231_s2, 4  ;;  %s54_s14 = int_to_ptr.hbm [resolvable:$true] %s53_s14 }
  0x10   :  { %36 = dma.hbm_to_vmem [thread:$0]  %s29_s3, 1024, %s31_s27, [#allocation3], %s5153_s28, %s5153_s28, %s5154_s29  }
  0x11   :  { %s5155_s15 = smov [#allocation7]   ;;  %s78_s18 = sshll.u32 %s7234_s5, 4  ;;  %s79_s18 = int_to_ptr.hbm [resolvable:$true] %s78_s18 }
  0x12   :  { %s55_s16 = sshll.u32 %s5155_s15, 4  ;;  %s5156_s19 = smov [#allocation10]   ;;  %s56_s16 = int_to_ptr.vmem [resolvable:$true] %s55_s16 }
  0x13   :  { %58 = dma.hbm_to_vmem [thread:$0]  %s54_s14, 16, %s56_s16, [#allocation6]  }
  0x14   :  { %s80_s20 = sshll.u32 %s5156_s19, 4  ;;  %s106_s22 = sshll.u32 %s7238_s9, 4  ;;  %s81_s20 = int_to_ptr.vmem [resolvable:$true] %s80_s20  ;;  %s107_s22 = int_to_ptr.hbm [resolvable:$true] %s106_s22 }
  0x15   :  { %86 = dma.hbm_to_vmem [thread:$0]  %s79_s18, 2048, %s81_s20, [#allocation9], %s5153_s28, %s5153_s28, %s5154_s29  }
  0x16   :  { %s5157_s2 = smov [#allocation13]   ;;  %s121_s5 = sshll.u32 %s7240_s11, 4  ;;  %s122_s5 = int_to_ptr.hbm [resolvable:$true] %s121_s5 }
  0x17   :  { %s108_s23 = sshll.u32 %s5157_s2, 4  ;;  %s5158_s3 = smov 256   ;;  %s109_s23 = int_to_ptr.vmem [resolvable:$true] %s108_s23 }
  0x18   :  { %s5159_s26 = smov 16   ;;  %s5160_s27 = smov [#allocation14]  }
  0x19   :  { %114 = dma.hbm_to_vmem [thread:$0]  %s107_s22, 4096, %s109_s23, [#allocation12], %s5158_s3, %s5158_s3, %s5159_s26  }
  0x1a   :  { %s123_s6 = sshll.u32 %s5160_s27, 4  ;;  %s124_s6 = int_to_ptr.vmem [resolvable:$true] %s123_s6 }
  0x1b   :  { %129 = dma.hbm_to_vmem [thread:$0]  %s122_s5, 4096, %s124_s6, [#allocation15], %s5153_s28, %s5153_s28, %s5154_s29  }
  0x1c   :  { %5135 = dma.done.wait [#allocation3], 1024  }
  0x1d   :  { %5136 = vsyncadd [#allocation3], 4294966272 }
  0x1e   :  { %5137 = dma.done.wait [#allocation6], 32  }
  0x1f   :  { %5138 = vsyncadd [#allocation6], 4294967264 }
  0x20   :  { %5139 = dma.done.wait [#allocation9], 8192  }
  0x21   :  { %5140 = vsyncadd [#allocation9], 4294959104 }
  0x22   :  { %5141 = dma.done.wait [#allocation12], 4112  }
  0x23   :  { %5142 = vsyncadd [#allocation12], 4294963184 }
  0x24   :  { %5143 = dma.done.wait [#allocation15], 4096  }
  0x25   :  { %5144 = vsyncadd [#allocation15], 4294963200  ;;  %v168_v0 = vld [vmem:[#allocation2 + $0x20] sm:$0xff]  ;;  %v166_v1 = vld [vmem:[#allocation2 + $0x10] sm:$0xff]  ;;  %v5161_v7 = vmov 128.0   ;;  %s5163_s30 = smov 32  }
  0x26   :  { %v164_v2 = vld [vmem:[#allocation2] sm:$0xff]  ;;  %182 = vadd.xlane.f32.xlu2 %v168_v0  ;;  %178 = vadd.xlane.f32.xlu1 %v166_v1  ;;  %v169_v3 = vld [vmem:[#allocation2 + $0x28] sm:$0xff]  ;;  %v167_v4 = vld [vmem:[#allocation2 + $0x18] sm:$0xff]  ;;  %4717 = vrcp.f32 %v5161_v7  ;;  %s5164_s14 = smov 64   ;;  %s4476_s1 = sshll.u32 %s7242_s13, 4  ;;  %s4477_s1 = int_to_ptr.hbm [resolvable:$true] %s4476_s1 }
  0x27   :  { %174 = vadd.xlane.f32.xlu0 %v164_v2  ;;  %v165_v5 = vld [vmem:[#allocation2 + $0x8] sm:$0xff]  ;;  %v170_v6 = vld [vmem:[#allocation2 + $0x30] sm:$0xff]  ;;  %v410_v18 = vld [vmem:[#allocation8 + $0x178] sm:$0xff] }
  0x28   :  { %v408_v16 = vld [vmem:[#allocation8 + $0x168] sm:$0xff]  ;;  %v409_v17 = vld [vmem:[#allocation8 + $0x170] sm:$0xff]  ;;  %v406_v22 = vld [vmem:[#allocation8 + $0x158] sm:$0xff]  ;;  %501 = vmatpush.msra.mxu2 %v410_v18 }
  0x29   :  { %419 = vmatpush.msra.mxu0 %v408_v16  ;;  %460 = vmatpush.msra.mxu1 %v409_v17  ;;  %v405_v21 = vld [vmem:[#allocation8 + $0x150] sm:$0xff]  ;;  %v407_v23 = vld [vmem:[#allocation8 + $0x160] sm:$0xff]  ;;  %v402_v49 = vld [vmem:[#allocation8 + $0x138] sm:$0xff] }
  0x2a   :  { %502 = vmatpush.msra.mxu2 %v407_v23  ;;  %v5291_v39 = vld [vmem:[#allocation2 + $0x38] sm:$0xff]  ;;  %v403_v50 = vld [vmem:[#allocation8 + $0x140] sm:$0xff]  ;;  %v404_v51 = vld [vmem:[#allocation8 + $0x148] sm:$0xff] }
  0x2b   :  { %420 = vmatpush.msra.mxu0 %v405_v21  ;;  %461 = vmatpush.msra.mxu1 %v406_v22  ;;  %v399_v52 = vld [vmem:[#allocation8 + $0x120] sm:$0xff]  ;;  %v400_v53 = vld [vmem:[#allocation8 + $0x128] sm:$0xff]  ;;  %v401_v54 = vld [vmem:[#allocation8 + $0x130] sm:$0xff] }
  0x2c   :  { %v4718_v8 = vpop.eup %4717  ;;  %503 = vmatpush.msra.mxu2 %v404_v51  ;;  %v396_v55 = vld [vmem:[#allocation8 + $0x108] sm:$0xff]  ;;  %v397_v56 = vld [vmem:[#allocation8 + $0x110] sm:$0xff]  ;;  %v398_v57 = vld [vmem:[#allocation8 + $0x118] sm:$0xff] }
  0x2d   :  { %v191_v9 = vmul.f32 128.0, %v4718_v8  ;;  %vm195_vm0 = vweird.f32 %v4718_v8  ;;  %421 = vmatpush.msra.mxu0 %v402_v49  ;;  %462 = vmatpush.msra.mxu1 %v403_v50  ;;  %v393_v58 = vld [vmem:[#allocation8 + $0xf0] sm:$0xff]  ;;  %v394_v59 = vld [vmem:[#allocation8 + $0xf8] sm:$0xff]  ;;  %v395_v60 = vld [vmem:[#allocation8 + $0x100] sm:$0xff] }
  0x2e   :  { %184 = vadd.xlane.f32.xlu2 %v169_v3  ;;  %180 = vadd.xlane.f32.xlu1 %v167_v4  ;;  %v390_v61 = vld [vmem:[#allocation8 + $0xd8] sm:$0xff]  ;;  %v391_v62 = vld [vmem:[#allocation8 + $0xe0] sm:$0xff]  ;;  %v392_v63 = vld [vmem:[#allocation8 + $0xe8] sm:$0xff] }
  0x2f   :  { %176 = vadd.xlane.f32.xlu0 %v165_v5  ;;  %v192_v10 = vsub.f32 1.0, %v191_v9  ;;  %422 = vmatpush.msra.mxu0 %v399_v52  ;;  %v382_v7 = vld [vmem:[#allocation8 + $0x98] sm:$0xff]  ;;  %v372_v16 = vld [vmem:[#allocation8 + $0x48] sm:$0xff]  ;;  %v373_v17 = vld [vmem:[#allocation8 + $0x50] sm:$0xff] }
  0x30   :  { %463 = vmatpush.msra.mxu1 %v400_v53  ;;  %504 = vmatpush.msra.mxu2 %v401_v54  ;;  %v378_v9 = vld [vmem:[#allocation8 + $0x78] sm:$0xff]  ;;  %v371_v21 = vld [vmem:[#allocation8 + $0x40] sm:$0xff] }
  0x31   :  { %v193_v11 = vmul.f32 %v4718_v8, %v192_v10  ;;  %423 = vmatpush.msra.mxu0 %v396_v55  ;;  %v379_v10 = vld [vmem:[#allocation8 + $0x80] sm:$0xff]  ;;  %v374_v18 = vld [vmem:[#allocation8 + $0x58] sm:$0xff] }
  0x32   :  { %464 = vmatpush.msra.mxu1 %v397_v56  ;;  %505 = vmatpush.msra.mxu2 %v398_v57  ;;  %v366_v22 = vld [vmem:[#allocation8 + $0x18] sm:$0xff]  ;;  %v367_v23 = vld [vmem:[#allocation8 + $0x20] sm:$0xff] }
  0x33   :  { %v194_v12 = vadd.f32 %v4718_v8, %v193_v11  ;;  %424 = vmatpush.msra.mxu0 %v393_v58  ;;  %v380_v11 = vld [vmem:[#allocation8 + $0x88] sm:$0xff] }
  0x34   :  { %465 = vmatpush.msra.mxu1 %v394_v59  ;;  %506 = vmatpush.msra.mxu2 %v395_v60 }
  0x35   :  { %v5269_v13 = vsel %vm195_vm0, %v4718_v8, %v194_v12  ;;  %425 = vmatpush.msra.mxu0 %v390_v61  ;;  %v383_v8 = vld [vmem:[#allocation8 + $0xa0] sm:$0xff] }
  0x36   :  { %186 = vadd.xlane.f32.xlu1 %v170_v6  ;;  %7254 = vst [vmem:[#allocation23_spill] sm:$0xff] %v5269_v13  ;;  %466 = vmatpush.msra.mxu1 %v391_v62  ;;  %v375_v12 = vld [vmem:[#allocation8 + $0x60] sm:$0xff] }
  0x37   :  { %507 = vmatpush.msra.mxu2 %v392_v63 }
  0x99   :  { %v183_v14 = vpop.xlane.xlu2 %182  ;;  %v179_v15 = vpop.xlane.xlu1 %178 }
  0x9a   :  { %v199_v19 = vmul.f32 %v5269_v13, %v179_v15  ;;  %v175_v20 = vpop.xlane.xlu0 %174  ;;  %v201_v35 = vmul.f32 %v5269_v13, %v183_v14  ;;  %v376_v14 = vld [vmem:[#allocation8 + $0x68] sm:$0xff]  ;;  %v377_v15 = vld [vmem:[#allocation8 + $0x70] sm:$0xff] }
  0x9b   :  { %v197_v24 = vmul.f32 %v5269_v13, %v175_v20  ;;  %v370_v20 = vld [vmem:[#allocation8 + $0x38] sm:$0xff] }
  0x9c   :  { %v5273_v25 = vsub.f32 %v166_v1, %v199_v19  ;;  %v5296_v41 = vsub.f32 %v168_v0, %v201_v35  ;;  %v387_v0 = vld [vmem:[#allocation8 + $0xc0] sm:$0xff]  ;;  %v388_v1 = vld [vmem:[#allocation8 + $0xc8] sm:$0xff]  ;;  %v369_v19 = vld [vmem:[#allocation8 + $0x30] sm:$0xff] }
  0x9d   :  { %v5275_v26 = vsub.f32 %v164_v2, %v197_v24  ;;  %v389_v2 = vld [vmem:[#allocation8 + $0xd0] sm:$0xff]  ;;  %426 = vmatpush.msra.mxu0 %v387_v0  ;;  %467 = vmatpush.msra.mxu1 %v388_v1  ;;  %v368_v24 = vld [vmem:[#allocation8 + $0x28] sm:$0xff] }
  0x9e   :  { %v215_v27 = vmul.f32 %v5273_v25, %v5273_v25  ;;  %v217_v44 = vmul.f32 %v5296_v41, %v5296_v41  ;;  %508 = vmatpush.msra.mxu2 %v389_v2 }
  0x9f   :  { %v213_v28 = vmul.f32 %v5275_v26, %v5275_v26 }
  0xa0   :  { %225 = vadd.xlane.f32.xlu1 %v215_v27  ;;  %v363_v27 = vld [vmem:[#allocation8] sm:$0xff] }
  0xa1   :  { %221 = vadd.xlane.f32.xlu0 %v213_v28  ;;  %v185_v29 = vpop.xlane.xlu2 %184  ;;  %v181_v30 = vpop.xlane.xlu1 %180  ;;  %v364_v28 = vld [vmem:[#allocation8 + $0x8] sm:$0xff] }
  0xa2   :  { %v202_v31 = vmul.f32 %v5269_v13, %v185_v29  ;;  %v177_v32 = vpop.xlane.xlu0 %176  ;;  %v200_v37 = vmul.f32 %v5269_v13, %v181_v30  ;;  %v365_v29 = vld [vmem:[#allocation8 + $0x10] sm:$0xff] }
  0xa3   :  { %v198_v33 = vmul.f32 %v5269_v13, %v177_v32 }
  0xa4   :  { %v5283_v34 = vsub.f32 %v169_v3, %v202_v31  ;;  %v5298_v42 = vsub.f32 %v167_v4, %v200_v37  ;;  %v384_v3 = vld [vmem:[#allocation8 + $0xa8] sm:$0xff]  ;;  %v385_v4 = vld [vmem:[#allocation8 + $0xb0] sm:$0xff] }
  0xa5   :  { %v5286_v36 = vsub.f32 %v165_v5, %v198_v33  ;;  %v386_v5 = vld [vmem:[#allocation8 + $0xb8] sm:$0xff]  ;;  %427 = vmatpush.msra.mxu0 %v384_v3  ;;  %468 = vmatpush.msra.mxu1 %v385_v4 }
  0xa6   :  { %v218_v38 = vmul.f32 %v5283_v34, %v5283_v34  ;;  %v216_v45 = vmul.f32 %v5298_v42, %v5298_v42  ;;  %509 = vmatpush.msra.mxu2 %v386_v5  ;;  %v5327_v4 = vld [vmem:[#allocation5] ss:$0 sm:$0xff] }
  0xa7   :  { %v214_v40 = vmul.f32 %v5286_v36, %v5286_v36  ;;  %469 = vmatpush.msra.mxu1 %v382_v7 }
  0xa8   :  { %231 = vadd.xlane.f32.xlu1 %v218_v38  ;;  %510 = vmatpush.msra.mxu2 %v383_v8 }
  0xa9   :  { %188 = vadd.xlane.f32.xlu0 %v5291_v39  ;;  %223 = vadd.xlane.f32.xlu2 %v214_v40  ;;  %v187_v43 = vpop.xlane.xlu1 %186 }
  0xaa   :  { %v203_v46 = vmul.f32 %v5269_v13, %v187_v43  ;;  %470 = vmatpush.msra.mxu1 %v379_v10  ;;  %511 = vmatpush.msra.mxu2 %v380_v11 }
  0xac   :  { %v5305_v47 = vsub.f32 %v170_v6, %v203_v46  ;;  %v381_v6 = vld [vmem:[#allocation8 + $0x90] sm:$0xff]  ;;  %471 = vmatpush.msra.mxu1 %v376_v14  ;;  %512 = vmatpush.msra.mxu2 %v377_v15 }
  0xad   :  { %428 = vmatpush.msra.mxu0 %v381_v6 }
  0xae   :  { %v219_v48 = vmul.f32 %v5305_v47, %v5305_v47  ;;  %472 = vmatpush.msra.mxu1 %v373_v17  ;;  %513 = vmatpush.msra.mxu2 %v374_v18 }
  0xaf   :  { %429 = vmatpush.msra.mxu0 %v378_v9  ;;  %v5333_v9 = vld [vmem:[#allocation7] ss:$0 sm:$0xff] }
  0xb0   :  { %473 = vmatpush.msra.mxu1 %v370_v20  ;;  %514 = vmatpush.msra.mxu2 %v371_v21 }
  0xb1   :  { %229 = vadd.xlane.f32.xlu0 %v217_v44  ;;  %227 = vadd.xlane.f32.xlu2 %v216_v45 }
  0xb2   :  { %430 = vmatpush.msra.mxu0 %v375_v12  ;;  %474 = vmatpush.msra.mxu1 %v367_v23 }
  0xb3   :  { %515 = vmatpush.msra.mxu2 %v368_v24 }
  0xb4   :  { %431 = vmatpush.msra.mxu0 %v372_v16  ;;  %475 = vmatpush.msra.mxu1 %v364_v28 }
  0xb5   :  { %516 = vmatpush.msra.mxu2 %v365_v29 }
  0xb6   :  { %432 = vmatpush.msra.mxu0 %v369_v19 }
  0xb8   :  { %433 = vmatpush.msra.mxu0 %v366_v22 }
  0xb9   :  { %233 = vadd.xlane.f32.xlu2 %v219_v48 }
  0xba   :  { %434 = vmatpush.msra.mxu0 %v363_v27 }
 0x113   :  { %v226_v30 = vpop.xlane.xlu1 %225 }
 0x114   :  { %v239_v31 = vmul.f32 %v226_v30, %v5269_v13  ;;  %v222_v32 = vpop.xlane.xlu0 %221 }
 0x115   :  { %v237_v33 = vmul.f32 %v222_v32, %v5269_v13 }
 0x116   :  { %v247_v35 = vadd.f32 1e-05, %v239_v31 }
 0x117   :  { %v245_v37 = vadd.f32 1e-05, %v237_v33 }
 0x118   :  { %4719 = vrsqrt.f32 %v247_v35  ;;  %vm279_vm6 = vweird.f32 %v247_v35 }
 0x119   :  { %4721 = vrsqrt.f32 %v245_v37  ;;  %vm259_vm2 = vweird.f32 %v245_v37 }
 0x11b   :  { %v232_v54 = vpop.xlane.xlu1 %231 }
 0x11c   :  { %v224_v38 = vpop.xlane.xlu2 %223  ;;  %v189_v40 = vpop.xlane.xlu0 %188  ;;  %v242_v62 = vmul.f32 %v232_v54, %v5269_v13 }
 0x11d   :  { %v238_v43 = vmul.f32 %v224_v38, %v5269_v13  ;;  %v204_v44 = vmul.f32 %v5269_v13, %v189_v40 }
 0x11e   :  { %v5313_v45 = vpop.eup %4719  ;;  %v5330_v7 = vadd.f32 1e-05, %v242_v62 }
 0x11f   :  { %v4722_v46 = vpop.eup %4721  ;;  %v246_v48 = vadd.f32 1e-05, %v238_v43  ;;  %v5316_v49 = vsub.f32 %v5291_v39, %v204_v44  ;;  %v274_v50 = vmul.f32 %v5313_v45, %v247_v35  ;;  %vm280_vm7 = vweird.f32 %v5313_v45 }
 0x120   :  { %v254_v51 = vmul.f32 %v4722_v46, %v245_v37  ;;  %vm260_vm1 = vweird.f32 %v4722_v46  ;;  %vm5341_vm9 = vmor %vm279_vm6, %vm280_vm7  ;;  %vm309_vm0 = vweird.f32 %v5330_v7 }
 0x121   :  { %4723 = vrsqrt.f32 %v246_v48  ;;  %v220_v52 = vmul.f32 %v5316_v49, %v5316_v49  ;;  %v275_v55 = vmul.f32 %v5313_v45, %v274_v50  ;;  %vm261_vm3 = vmor %vm259_vm2, %vm260_vm1  ;;  %vm269_vm4 = vweird.f32 %v246_v48 }
 0x122   :  { %v255_v53 = vmul.f32 %v4722_v46, %v254_v51 }
 0x123   :  { %235 = vadd.xlane.f32.xlu0 %v220_v52  ;;  %v276_v0 = vmul.f32 0.5, %v275_v55 }
 0x124   :  { %v256_v56 = vmul.f32 0.5, %v255_v53  ;;  %v228_v57 = vpop.xlane.xlu2 %227  ;;  %v230_v58 = vpop.xlane.xlu0 %229 }
 0x125   :  { %v240_v59 = vmul.f32 %v228_v57, %v5269_v13  ;;  %v241_v39 = vmul.f32 %v230_v58, %v5269_v13  ;;  %v277_v10 = vsub.f32 1.5, %v276_v0 }
 0x126   :  { %v257_v60 = vsub.f32 1.5, %v256_v56 }
 0x127   :  { %v4724_v61 = vpop.eup %4723  ;;  %v248_v63 = vadd.f32 1e-05, %v240_v59  ;;  %v5325_v3 = vadd.f32 1e-05, %v241_v39  ;;  %v278_v19 = vmul.f32 %v5313_v45, %v277_v10 }
 0x128   :  { %v258_v1 = vmul.f32 %v4722_v46, %v257_v60  ;;  %v264_v2 = vmul.f32 %v4724_v61, %v246_v48  ;;  %vm270_vm5 = vweird.f32 %v4724_v61 }
 0x129   :  { %4725 = vrsqrt.f32 %v248_v63  ;;  %vm271_vm8 = vmor %vm269_vm4, %vm270_vm5  ;;  %v282_v30 = vsel %vm5341_vm9, %v5313_v45, %v278_v19  ;;  %vm289_vm10 = vweird.f32 %v248_v63  ;;  %vm299_vm13 = vweird.f32 %v5325_v3 }
 0x12a   :  { %v265_v5 = vmul.f32 %v4724_v61, %v264_v2  ;;  %4727 = vrsqrt.f32 %v5325_v3  ;;  %v262_v6 = vsel %vm261_vm3, %v4722_v46, %v258_v1  ;;  %v335_v40 = vmul.f32 %v282_v30, %v5273_v25 }
 0x12b   :  { %v333_v8 = vmul.f32 %v262_v6, %v5275_v26  ;;  %4729 = vrsqrt.f32 %v5330_v7  ;;  %vm734_vm9 = vcmask 261120  }
 0x12c   :  { %v266_v11 = vmul.f32 0.5, %v265_v5  ;;  %v234_v12 = vpop.xlane.xlu2 %233  ;;  %v346_v45 = vmul.f32 %v5327_v4, %v335_v40 }
 0x12d   :  { %v344_v14 = vmul.f32 %v5327_v4, %v333_v8  ;;  %v243_v17 = vmul.f32 %v234_v12, %v5269_v13 }
 0x12e   :  { %v267_v15 = vsub.f32 1.5, %v266_v11  ;;  %v357_v52 = vadd.f32 %v5333_v9, %v346_v45 }
 0x12f   :  { %v4726_v16 = vpop.eup %4725  ;;  %v355_v26 = vadd.f32 %v5333_v9, %v344_v14  ;;  %v251_v28 = vadd.f32 1e-05, %v243_v17 }
 0x130   :  { %v4728_v18 = vpop.eup %4727  ;;  %v268_v20 = vmul.f32 %v4724_v61, %v267_v15  ;;  %v284_v21 = vmul.f32 %v4726_v16, %v248_v63  ;;  %vm290_vm11 = vweird.f32 %v4726_v16 }
 0x131   :  { %v294_v23 = vmul.f32 %v4728_v18, %v5325_v3  ;;  %435 = vmatmul.f32.vlgmr.msra.gmra.mxu0 %v355_v26  ;;  %476 = vmatmul.f32.vlgmr.msra.gmra.mxu1 %v355_v26  ;;  %v4730_v33 = vpop.eup %4729  ;;  %4731 = vrsqrt.f32 %v251_v28  ;;  %vm291_vm12 = vmor %vm289_vm10, %vm290_vm11  ;;  %vm300_vm14 = vweird.f32 %v4728_v18  ;;  %vm319_vm3 = vweird.f32 %v251_v28 }
 0x132   :  { %v285_v24 = vmul.f32 %v4726_v16, %v284_v21  ;;  %517 = vmatmul.f32.vlgmr.msra.gmra.mxu2 %v355_v26  ;;  %v272_v27 = vsel %vm271_vm8, %v4724_v61, %v268_v20  ;;  %v304_v43 = vmul.f32 %v4730_v33, %v5330_v7  ;;  %vm301_vm15 = vmor %vm299_vm13, %vm300_vm14  ;;  %vm310_vm1 = vweird.f32 %v4730_v33  ;;  %v5374_v26 = vld [vmem:[%s7233_s4] sm:$0x7]  ;;  %s5162_s4 = smov 96  }
 0x133   :  { %v334_v29 = vmul.f32 %v272_v27, %v5286_v36  ;;  %v295_v32 = vmul.f32 %v4728_v18, %v294_v23  ;;  %vm311_vm2 = vmor %vm309_vm0, %vm310_vm1  ;;  %v5377_v19 = vperm.slane %v5374_v26, 0  ;;  %v5380_v20 = vperm.slane %v5374_v26, 1 }
 0x134   :  { %v286_v31 = vmul.f32 0.5, %v285_v24  ;;  %v305_v46 = vmul.f32 %v4730_v33, %v304_v43  ;;  %vm1503_vm10 = vcmask 64512  }
 0x135   :  { %v345_v35 = vmul.f32 %v5327_v4, %v334_v29  ;;  %v296_v44 = vmul.f32 0.5, %v295_v32 }
 0x136   :  { %v287_v37 = vsub.f32 1.5, %v286_v31  ;;  %v306_v53 = vmul.f32 0.5, %v305_v46 }
 0x137   :  { %v356_v38 = vadd.f32 %v5333_v9, %v345_v35  ;;  %v297_v50 = vsub.f32 1.5, %v296_v44  ;;  %v4732_v51 = vpop.eup %4731 }
 0x138   :  { %v288_v36 = vmul.f32 %v4726_v16, %v287_v37  ;;  %v314_v55 = vmul.f32 %v4732_v51, %v251_v28  ;;  %v307_v57 = vsub.f32 1.5, %v306_v53  ;;  %vm320_vm4 = vweird.f32 %v4732_v51 }
 0x139   :  { %438 = vmatmul.f32.gmra.mxu0 %v356_v38  ;;  %479 = vmatmul.f32.gmra.mxu1 %v356_v38  ;;  %v298_v54 = vmul.f32 %v4728_v18, %v297_v50  ;;  %vm321_vm5 = vmor %vm319_vm3, %vm320_vm4 }
 0x13a   :  { %520 = vmatmul.f32.gmra.mxu2 %v356_v38  ;;  %v292_v48 = vsel %vm291_vm12, %v4726_v16, %v288_v36  ;;  %v315_v58 = vmul.f32 %v4732_v51, %v314_v55 }
 0x13b   :  { %v336_v25 = vmul.f32 %v292_v48, %v5298_v42  ;;  %v302_v59 = vsel %vm301_vm15, %v4728_v18, %v298_v54  ;;  %v308_v42 = vmul.f32 %v4730_v33, %v307_v57 }
 0x13c   :  { %v337_v60 = vmul.f32 %v302_v59, %v5296_v41  ;;  %v316_v61 = vmul.f32 0.5, %v315_v58 }
 0x13d   :  { %v347_v56 = vmul.f32 %v5327_v4, %v336_v25  ;;  %v312_v63 = vsel %vm311_vm2, %v4730_v33, %v308_v42 }
 0x13e   :  { %v348_v62 = vmul.f32 %v5327_v4, %v337_v60  ;;  %v317_v0 = vsub.f32 1.5, %v316_v61  ;;  %v338_v2 = vmul.f32 %v312_v63, %v5283_v34  ;;  %v5493_v61 = vperm.slane %v5374_v26, 2 }
 0x13f   :  { %v358_v39 = vadd.f32 %v5333_v9, %v347_v56 }
 0x140   :  { %v359_v1 = vadd.f32 %v5333_v9, %v348_v62  ;;  %v318_v3 = vmul.f32 %v4732_v51, %v317_v0  ;;  %v349_v41 = vmul.f32 %v5327_v4, %v338_v2 }
 0x141   :  { %441 = vmatmul.f32.gmra.mxu0 %v357_v52  ;;  %482 = vmatmul.f32.gmra.mxu1 %v357_v52 }
 0x142   :  { %523 = vmatmul.f32.gmra.mxu2 %v357_v52  ;;  %v322_v5 = vsel %vm321_vm5, %v4732_v51, %v318_v3  ;;  %v360_v6 = vadd.f32 %v5333_v9, %v349_v41 }
 0x143   :  { %v339_v7 = vmul.f32 %v322_v5, %v5305_v47 }
 0x145   :  { %v350_v8 = vmul.f32 %v5327_v4, %v339_v7 }
 0x147   :  { %v361_v10 = vadd.f32 %v5333_v9, %v350_v8 }
 0x149   :  { %444 = vmatmul.f32.gmra.mxu0 %v358_v39  ;;  %485 = vmatmul.f32.gmra.mxu1 %v358_v39 }
 0x14a   :  { %526 = vmatmul.f32.gmra.mxu2 %v358_v39 }
 0x151   :  { %447 = vmatmul.f32.gmra.mxu0 %v359_v1  ;;  %488 = vmatmul.f32.gmra.mxu1 %v359_v1 }
 0x152   :  { %529 = vmatmul.f32.gmra.mxu2 %v359_v1 }
 0x159   :  { %450 = vmatmul.f32.gmra.mxu0 %v360_v6  ;;  %491 = vmatmul.f32.gmra.mxu1 %v360_v6 }
 0x15a   :  { %532 = vmatmul.f32.gmra.mxu2 %v360_v6 }
 0x161   :  { %453 = vmatmul.f32.gmra.mxu0 %v361_v10  ;;  %494 = vmatmul.f32.gmra.mxu1 %v361_v10 }
 0x162   :  { %535 = vmatmul.f32.gmra.mxu2 %v361_v10 }
 0x196   :  { %v236_v34 = vpop.xlane.xlu0 %235 }
 0x197   :  { %v244_v11 = vmul.f32 %v236_v34, %v5269_v13 }
 0x199   :  { %v252_v12 = vadd.f32 1e-05, %v244_v11 }
 0x19b   :  { %4733 = vrsqrt.f32 %v252_v12  ;;  %vm329_vm7 = vweird.f32 %v252_v12 }
 0x1a1   :  { %v4734_v14 = vpop.eup %4733 }
 0x1a2   :  { %v324_v15 = vmul.f32 %v4734_v14, %v252_v12  ;;  %vm330_vm6 = vweird.f32 %v4734_v14 }
 0x1a3   :  { %vm331_vm8 = vmor %vm329_vm7, %vm330_vm6 }
 0x1a4   :  { %v325_v16 = vmul.f32 %v4734_v14, %v324_v15 }
 0x1a6   :  { %v326_v17 = vmul.f32 0.5, %v325_v16 }
 0x1a8   :  { %v327_v47 = vsub.f32 1.5, %v326_v17 }
 0x1aa   :  { %v328_v18 = vmul.f32 %v4734_v14, %v327_v47 }
 0x1ac   :  { %v332_v21 = vsel %vm331_vm8, %v4734_v14, %v328_v18 }
 0x1ad   :  { %v340_v22 = vmul.f32 %v332_v21, %v5316_v49 }
 0x1ae   :  { %v436_v23 = vpop.f32.mrf.mxu0  ;;  %v477_v24 = vpop.f32.mrf.mxu1 }
 0x1af   :  { %v437_v27 = vadd.f32 %v436_v23, %v5377_v19  ;;  %v478_v28 = vadd.f32 %v477_v24, %v5380_v20  ;;  %v351_v29 = vmul.f32 %v5327_v4, %v340_v22 }
 0x1b1   :  { %606 = vrot.lane.b32.xlu1 %v478_v28, %s5162_s4  ;;  %4493 = vmatpush.xpose.msk.msra.mxu3 %vm734_vm9, %v478_v28  ;;  %v362_v30 = vadd.f32 %v5333_v9, %v351_v29 }
 0x1b2   :  { %550 = vrot.lane.b32.xlu2 %v437_v27, %s5162_s4  ;;  %638 = vrot.lane.b32.xlu0 %v478_v28, %s5163_s30 }
 0x1b3   :  { %456 = vmatmul.f32.gmra.mxu0 %v362_v30  ;;  %497 = vmatmul.f32.gmra.mxu1 %v362_v30 }
 0x1b4   :  { %538 = vmatmul.f32.gmra.mxu2 %v362_v30  ;;  %4494 = vmatmul.msk.f32.vlgmr.msra.gmra.mxu3 %vm734_vm9, %v437_v27 }
 0x1b5   :  { %v518_v57 = vpop.f32.mrf.mxu2 }
 0x1b6   :  { %v439_v49 = vpop.f32.mrf.mxu0  ;;  %v480_v31 = vpop.f32.mrf.mxu1  ;;  %v5500_v0 = vadd.f32 %v518_v57, %v5493_v61 }
 0x1b7   :  { %v5393_v4 = vadd.f32 %v480_v31, %v5380_v20  ;;  %v5399_v9 = vadd.f32 %v439_v49, %v5377_v19 }
 0x1b9   :  { %622 = vrot.lane.b32.xlu1 %v478_v28, %s5164_s14  ;;  %4495 = vmatpush.xpose.msk.msrb.mxu3 %vm734_vm9, %v5393_v4 }
 0x1ba   :  { %566 = vrot.lane.b32.xlu2 %v437_v27, %s5164_s14  ;;  %608 = vrot.lane.b32.xlu0 %v5393_v4, %s5162_s4 }
 0x1bc   :  { %4496 = vmatmul.msk.f32.vlgmr.msrb.gmra.mxu3 %vm734_vm9, %v5399_v9 }
 0x1bd   :  { %v521_v58 = vpop.f32.mrf.mxu2 }
 0x1be   :  { %v442_v32 = vpop.f32.mrf.mxu0  ;;  %v483_v33 = vpop.f32.mrf.mxu1  ;;  %v5497_v62 = vadd.f32 %v521_v58, %v5493_v61 }
 0x1bf   :  { %v5407_v35 = vadd.f32 %v483_v33, %v5380_v20  ;;  %v443_v37 = vadd.f32 %v442_v32, %v5377_v19 }
 0x1c0   :  { %v5506_v2 = vpack.i.bf16 %v5497_v62, %v5500_v0 }
 0x1c1   :  { %582 = vrot.lane.b32.xlu1 %v437_v27, %s5163_s30  ;;  %4497 = vmatpush.xpose.msk.msra.mxu3 %vm734_vm9, %v5407_v35 }
 0x1c2   :  { %552 = vrot.lane.b32.xlu2 %v5399_v9, %s5162_s4  ;;  %624 = vrot.lane.b32.xlu0 %v5393_v4, %s5164_s14 }
 0x1c4   :  { %4498 = vmatmul.msk.f32.vlgmr.msra.gmra.mxu3 %vm734_vm9, %v443_v37 }
 0x1c5   :  { %v5484_v59 = vpop.f32.mrf.mxu2 }
 0x1c6   :  { %v445_v38 = vpop.f32.mrf.mxu0  ;;  %v486_v40 = vpop.f32.mrf.mxu1 }
 0x1c7   :  { %v487_v43 = vadd.f32 %v486_v40, %v5380_v20  ;;  %v5423_v36 = vadd.f32 %v445_v38, %v5377_v19 }
 0x1c9   :  { %568 = vrot.lane.b32.xlu1 %v5399_v9, %s5164_s14  ;;  %4499 = vmatpush.xpose.msk.msrb.mxu3 %vm734_vm9, %v487_v43 }
 0x1ca   :  { %628 = vrot.lane.b32.xlu2 %v487_v43, %s5164_s14  ;;  %554 = vrot.lane.b32.xlu0 %v443_v37, %s5162_s4 }
 0x1cc   :  { %4500 = vmatmul.msk.f32.vlgmr.msrb.gmra.mxu3 %vm734_vm9, %v5423_v36 }
 0x1cd   :  { %v5488_v60 = vpop.f32.mrf.mxu2 }
 0x1ce   :  { %v448_v44 = vpop.f32.mrf.mxu0  ;;  %v489_v45 = vpop.f32.mrf.mxu1 }
 0x1cf   :  { %v5430_v46 = vadd.f32 %v489_v45, %v5380_v20  ;;  %v449_v48 = vadd.f32 %v448_v44, %v5377_v19 }
 0x1d1   :  { %610 = vrot.lane.b32.xlu1 %v5407_v35, %s5162_s4  ;;  %4501 = vmatpush.xpose.msk.msra.mxu3 %vm734_vm9, %v5430_v46 }
 0x1d2   :  { %626 = vrot.lane.b32.xlu0 %v5407_v35, %s5164_s14  ;;  %614 = vrot.lane.b32.xlu2 %v5430_v46, %s5162_s4 }
 0x1d4   :  { %4502 = vmatmul.msk.f32.vlgmr.msra.gmra.mxu3 %vm734_vm9, %v449_v48 }
 0x1d5   :  { %v5502_v1 = vpop.f32.mrf.mxu2 }
 0x1d6   :  { %v451_v50 = vpop.f32.mrf.mxu0  ;;  %v492_v51 = vpop.f32.mrf.mxu1 }
 0x1d7   :  { %v493_v52 = vadd.f32 %v492_v51, %v5380_v20  ;;  %v5446_v25 = vadd.f32 %v451_v50, %v5377_v19 }
 0x1d9   :  { %570 = vrot.lane.b32.xlu1 %v443_v37, %s5164_s14  ;;  %4503 = vmatpush.xpose.msk.msrb.mxu3 %vm734_vm9, %v493_v52 }
 0x1da   :  { %612 = vrot.lane.b32.xlu0 %v487_v43, %s5162_s4  ;;  %630 = vrot.lane.b32.xlu2 %v5430_v46, %s5164_s14 }
 0x1dc   :  { %4504 = vmatmul.msk.f32.vlgmr.msrb.gmra.mxu3 %vm734_vm9, %v5446_v25 }
 0x1dd   :  { %v533_v6 = vpop.f32.mrf.mxu2 }
 0x1de   :  { %v495_v53 = vpop.f32.mrf.mxu1  ;;  %v454_v54 = vpop.f32.mrf.mxu0  ;;  %v5571_v32 = vadd.f32 %v533_v6, %v5493_v61 }
 0x1df   :  { %v5454_v55 = vadd.f32 %v495_v53, %v5380_v20  ;;  %v5461_v56 = vadd.f32 %v454_v54, %v5377_v19 }
 0x1e0   :  { %7259 = vst [vmem:[#allocation26_spill] sm:$0xff] %v5571_v32 }
 0x1e1   :  { %556 = vrot.lane.b32.xlu1 %v5423_v36, %s5162_s4  ;;  %4505 = vmatpush.xpose.msk.msra.mxu3 %vm734_vm9, %v5454_v55 }
 0x1e2   :  { %572 = vrot.lane.b32.xlu0 %v5423_v36, %s5164_s14  ;;  %616 = vrot.lane.b32.xlu2 %v493_v52, %s5162_s4 }
 0x1e4   :  { %4506 = vmatmul.msk.f32.vlgmr.msra.gmra.mxu3 %vm734_vm9, %v5461_v56 }
 0x1e5   :  { %v536_v15 = vpop.f32.mrf.mxu2 }
 0x1e6   :  { %v5547_v22 = vadd.f32 %v536_v15, %v5493_v61 }
 0x1e8   :  { %7258 = vst [vmem:[#allocation25_spill] sm:$0xff] %v5547_v22 }
 0x1e9   :  { %558 = vrot.lane.b32.xlu1 %v449_v48, %s5162_s4 }
 0x1ea   :  { %576 = vrot.lane.b32.xlu2 %v5446_v25, %s5164_s14  ;;  %574 = vrot.lane.b32.xlu0 %v449_v48, %s5164_s14 }
 0x1f1   :  { %632 = vrot.lane.b32.xlu1 %v493_v52, %s5164_s14 }
 0x1f2   :  { %618 = vrot.lane.b32.xlu2 %v5454_v55, %s5162_s4  ;;  %560 = vrot.lane.b32.xlu0 %v5446_v25, %s5162_s4 }
 0x1f9   :  { %634 = vrot.lane.b32.xlu1 %v5454_v55, %s5164_s14 }
 0x1fa   :  { %578 = vrot.lane.b32.xlu2 %v5461_v56, %s5164_s14  ;;  %562 = vrot.lane.b32.xlu0 %v5461_v56, %s5162_s4 }
 0x202   :  { %586 = vrot.lane.b32.xlu0 %v443_v37, %s5163_s30 }
 0x20a   :  { %644 = vrot.lane.b32.xlu0 %v487_v43, %s5163_s30 }
 0x20c   :  { %v551_v39 = vpop.permute.xlu2 %550 }
 0x212   :  { %590 = vrot.lane.b32.xlu0 %v449_v48, %s5163_s30  ;;  %v5613_v48 = vadd.f32 %v5484_v59, %v5493_v61 }
 0x214   :  { %v5490_v42 = vpop.permute.xlu2 %566 }
 0x21a   :  { %648 = vrot.lane.b32.xlu0 %v493_v52, %s5163_s30 }
 0x21c   :  { %v553_v63 = vpop.permute.xlu2 %552 }
 0x222   :  { %4672 = vrot.lane.b32.xlu0 %v5506_v2, %s5164_s14 }
 0x223   :  { %v607_v3 = vpop.permute.xlu1 %606 }
 0x224   :  { %v5510_v41 = vpop.permute.xlu2 %628  ;;  %v5512_v5 = vpop.permute.xlu0 %638 }
 0x22a   :  { %4687 = vrot.lane.b32.xlu0 %v5506_v2, %s5163_s30 }
 0x22b   :  { %v623_v7 = vpop.permute.xlu1 %622 }
 0x22c   :  { %v615_v8 = vpop.permute.xlu2 %614  ;;  %v609_v10 = vpop.permute.xlu0 %608 }
 0x22d   :  { %4517 = vmatpush.xpose.msk.msrb.mxu0 %vm734_vm9, %v615_v8 }
 0x230   :  { %v457_v34 = vpop.f32.mrf.mxu0  ;;  %v498_v11 = vpop.f32.mrf.mxu1 }
 0x231   :  { %4525 = vmatpush.xpose.msk.msra.mxu0 %vm734_vm9, %v623_v7  ;;  %v458_v12 = vadd.f32 %v457_v34, %v5377_v19  ;;  %v5520_v14 = vadd.f32 %v498_v11, %v5380_v20 }
 0x233   :  { %v5522_v16 = vpop.permute.xlu1 %582  ;;  %636 = vrot.lane.b32.xlu0 %v5520_v14, %s5164_s14  ;;  %620 = vrot.lane.b32.xlu1 %v5520_v14, %s5162_s4 }
 0x234   :  { %v631_v17 = vpop.permute.xlu2 %630  ;;  %4507 = vmatpush.xpose.msk.msrb.mxu3 %vm734_vm9, %v5520_v14  ;;  %564 = vrot.lane.b32.xlu2 %v458_v12, %s5162_s4  ;;  %v625_v47 = vpop.permute.xlu0 %624 }
 0x237   :  { %4508 = vmatmul.msk.f32.vlgmr.msrb.gmra.mxu3 %vm734_vm9, %v458_v12  ;;  %v539_v26 = vpop.f32.mrf.mxu2  ;;  %v5550_v23 = vpop.f32.mrf.mxu3 }
 0x238   :  { %4509 = vmatpush.xpose.msk.msra.mxu3 %vm734_vm9, %v607_v3  ;;  %v5542_v21 = vadd.f32 %v539_v26, %v5493_v61 }
 0x23a   :  { %7257 = vst [vmem:[#allocation24_spill] sm:$0xff] %v5542_v21  ;;  %v5554_v24 = vpack.i.bf16 %v5542_v21, %v5547_v22 }
 0x23b   :  { %v5534_v18 = vpop.permute.xlu1 %568  ;;  %584 = vrot.lane.b32.xlu1 %v5399_v9, %s5163_s30  ;;  %596 = vrot.lane.b32.xlu0 %v458_v12, %s5163_s30 }
 0x23c   :  { %4511 = vmatpush.xpose.msk.msrb.mxu3 %vm734_vm9, %v609_v10  ;;  %v617_v19 = vpop.permute.xlu2 %616  ;;  %642 = vrot.lane.b32.xlu2 %v5407_v35, %s5163_s30  ;;  %v555_v20 = vpop.permute.xlu0 %554 }
 0x23d   :  { %4519 = vmatpush.xpose.msk.msrb.mxu1 %vm734_vm9, %v617_v19 }
 0x23f   :  { %4510 = vmatmul.msk.f32.vlgmr.msra.gmra.mxu3 %vm734_vm9, %v551_v39  ;;  %v5564_v30 = vpop.f32.mrf.mxu3 }
 0x240   :  { %v1507_v39 = vsel %vm1503_vm10, %v5564_v30, -inf }
 0x241   :  { %4527 = vmatpush.xpose.msk.msra.mxu1 %vm734_vm9, %v625_v47 }
 0x243   :  { %v611_v27 = vpop.permute.xlu1 %610  ;;  %646 = vrot.lane.b32.xlu1 %v5430_v46, %s5163_s30  ;;  %4692 = vrot.lane.b32.xlu0 %v5554_v24, %s5162_s4  ;;  %v5608_v46 = vadd.f32 %v5502_v1, %v5493_v61 }
 0x244   :  { %v577_v28 = vpop.permute.xlu2 %576  ;;  %640 = vrot.lane.b32.xlu2 %v5393_v4, %s5163_s30  ;;  %v627_v29 = vpop.permute.xlu0 %626  ;;  %4513 = vmatpush.xpose.msk.msra.mxu3 %vm734_vm9, %v611_v27  ;;  %v5578_v4 = vadd.f32 %v5488_v60, %v5493_v61 }
 0x245   :  { %7260 = vst [vmem:[#allocation27_spill] sm:$0xff] %v5608_v46  ;;  %v4661_v51 = vpack.i.bf16 %v5613_v48, %v5608_v46 }
 0x246   :  { %v4666_v33 = vpack.i.bf16 %v5578_v4, %v5571_v32 }
 0x247   :  { %4512 = vmatmul.msk.f32.vlgmr.msrb.gmra.mxu3 %vm734_vm9, %v553_v63  ;;  %v5588_v38 = vpop.f32.mrf.mxu3  ;;  %v1504_v63 = vsel %vm1503_vm10, %v5550_v23, -inf }
 0x248   :  { %v1510_v6 = vsel %vm1503_vm10, %v5588_v38, -inf }
 0x24b   :  { %v571_v49 = vpop.permute.xlu1 %570  ;;  %594 = vrot.lane.b32.xlu1 %v5461_v56, %s5163_s30 }
 0x24c   :  { %v619_v31 = vpop.permute.xlu2 %618  ;;  %588 = vrot.lane.b32.xlu2 %v5423_v36, %s5163_s30  ;;  %v613_v9 = vpop.permute.xlu0 %612 }
 0x24d   :  { %4515 = vmatpush.xpose.msk.msrb.mxu3 %vm734_vm9, %v613_v9  ;;  %4521 = vmatpush.xpose.msk.msrb.mxu2 %vm734_vm9, %v619_v31 }
 0x24f   :  { %4514 = vmatmul.msk.f32.vlgmr.msra.gmra.mxu3 %vm734_vm9, %v555_v20  ;;  %v5596_v36 = vpop.f32.mrf.mxu3 }
 0x250   :  { %v1513_v11 = vsel %vm1503_vm10, %v5596_v36, -inf }
 0x251   :  { %4529 = vmatpush.xpose.msk.msra.mxu2 %vm734_vm9, %v627_v29 }
 0x253   :  { %v557_v35 = vpop.permute.xlu1 %556  ;;  %4667 = vrot.lane.b32.xlu1 %v4666_v33, %s5162_s4 }
 0x254   :  { %650 = vrot.lane.b32.xlu2 %v5454_v55, %s5163_s30  ;;  %v5586_v37 = vpop.permute.xlu0 %572  ;;  %v579_v55 = vpop.permute.xlu2 %578 }
 0x257   :  { %4516 = vmatmul.msk.f32.vlgmr.msrb.gmra.mxu3 %vm734_vm9, %v557_v35  ;;  %v5615_v50 = vpop.f32.mrf.mxu3 }
 0x258   :  { %v1516_v53 = vsel %vm1503_vm10, %v5615_v50, -inf }
 0x25b   :  { %v559_v40 = vpop.permute.xlu1 %558  ;;  %4682 = vrot.lane.b32.xlu1 %v4666_v33, %s5164_s14 }
 0x25c   :  { %592 = vrot.lane.b32.xlu2 %v5446_v25, %s5163_s30  ;;  %v575_v43 = vpop.permute.xlu0 %574  ;;  %4518 = vmatmul.msk.f32.vlgmr.msrb.gmra.mxu0 %vm734_vm9, %v559_v40 }
 0x25d   :  { %4533 = vmatpush.xpose.msk.msrb.mxu0 %vm734_vm9, %v631_v17 }
 0x263   :  { %v633_v44 = vpop.permute.xlu1 %632  ;;  %580 = vrot.lane.b32.xlu1 %v458_v12, %s5164_s14 }
 0x264   :  { %4657 = vrot.lane.b32.xlu2 %v5506_v2, %s5162_s4  ;;  %v561_v45 = vpop.permute.xlu0 %560  ;;  %4526 = vmatmul.msk.f32.vlgmr.msra.gmra.mxu0 %vm734_vm9, %v5490_v42  ;;  %v5637_v42 = vpop.f32.mrf.mxu3 }
 0x265   :  { %4520 = vmatmul.msk.f32.vlgmr.msrb.gmra.mxu1 %vm734_vm9, %v561_v45  ;;  %4541 = vmatpush.xpose.msk.msra.mxu0 %vm734_vm9, %v5512_v5  ;;  %v1519_v1 = vsel %vm1503_vm10, %v5637_v42, -inf }
 0x266   :  { %4535 = vmatpush.xpose.msk.msrb.mxu1 %vm734_vm9, %v633_v44 }
 0x26b   :  { %v635_v52 = vpop.permute.xlu1 %634  ;;  %652 = vrot.lane.b32.xlu1 %v5520_v14, %s5163_s30 }
 0x26c   :  { %4662 = vrot.lane.b32.xlu2 %v4661_v51, %s5162_s4  ;;  %v563_v25 = vpop.permute.xlu0 %562  ;;  %4534 = vmatmul.msk.f32.vlgmr.msrb.gmra.mxu0 %vm734_vm9, %v575_v43  ;;  %v5649_v3 = vpop.f32.mrf.mxu3 }
 0x26d   :  { %4522 = vmatmul.msk.f32.vlgmr.msrb.gmra.mxu2 %vm734_vm9, %v563_v25  ;;  %4528 = vmatmul.msk.f32.vlgmr.msra.gmra.mxu1 %vm734_vm9, %v5534_v18  ;;  %v1522_v7 = vsel %vm1503_vm10, %v5649_v3, -inf }
 0x26e   :  { %4537 = vmatpush.xpose.msk.msrb.mxu2 %vm734_vm9, %v635_v52  ;;  %1517 = vmax.xlane.f32.xlu0 %v1516_v53 }
 0x274   :  { %4677 = vrot.lane.b32.xlu2 %v4661_v51, %s5164_s14  ;;  %v587_v54 = vpop.permute.xlu0 %586  ;;  %4542 = vmatmul.msk.f32.vlgmr.msra.gmra.mxu0 %vm734_vm9, %v5522_v16 }
 0x275   :  { %4530 = vmatmul.msk.f32.vlgmr.msra.gmra.mxu2 %vm734_vm9, %v571_v49  ;;  %4536 = vmatmul.msk.f32.vlgmr.msrb.gmra.mxu1 %vm734_vm9, %v577_v28 }
 0x27c   :  { %v645_v56 = vpop.permute.xlu0 %644 }
 0x27d   :  { %4538 = vmatmul.msk.f32.vlgmr.msrb.gmra.mxu2 %vm734_vm9, %v579_v55 }
 0x284   :  { %v591_v57 = vpop.permute.xlu0 %590 }
 0x28c   :  { %v649_v58 = vpop.permute.xlu0 %648 }
 0x28e   :  { %v565_v59 = vpop.permute.xlu2 %564 }
 0x294   :  { %v5639_v61 = vpop.permute.xlu0 %4672 }
 0x295   :  { %1508 = vmax.xlane.f32.xlu1 %v1507_v39 }
 0x296   :  { %v643_v60 = vpop.permute.xlu2 %642 }
 0x297   :  { %4545 = vmatpush.xpose.msk.msra.mxu2 %vm734_vm9, %v643_v60 }
 0x29a   :  { %4546 = vmatmul.msk.f32.vlgmr.msra.gmra.mxu2 %vm734_vm9, %v587_v54 }
 0x29c   :  { %v5651_v5 = vpop.permute.xlu0 %4687 }
 0x29d   :  { %1505 = vmax.xlane.f32.xlu2 %v1504_v63  ;;  %1520 = vmax.xlane.f32.xlu1 %v1519_v1  ;;  %7261 = vst [vmem:[#allocation28_spill] sm:$0xff] %v5651_v5 }
 0x29e   :  { %v641_v2 = vpop.permute.xlu2 %640 }
 0x29f   :  { %4543 = vmatpush.xpose.msk.msra.mxu1 %vm734_vm9, %v641_v2 }
 0x2a3   :  { %4551 = vmatpush.xpose.msk.msrb.mxu1 %vm734_vm9, %v649_v58 }
 0x2a5   :  { %1511 = vmax.xlane.f32.xlu2 %v1510_v6  ;;  %v621_v8 = vpop.permute.xlu1 %620  ;;  %1523 = vmax.xlane.f32.xlu1 %v1522_v7  ;;  %v637_v34 = vpop.permute.xlu0 %636 }
 0x2a6   :  { %v589_v10 = vpop.permute.xlu2 %588  ;;  %4523 = vmatpush.xpose.msk.msra.mxu3 %vm734_vm9, %v621_v8 }
 0x2a9   :  { %4524 = vmatmul.msk.f32.vlgmr.msra.gmra.mxu3 %vm734_vm9, %v565_v59 }
 0x2aa   :  { %4531 = vmatpush.xpose.msk.msrb.mxu3 %vm734_vm9, %v5510_v41 }
 0x2ad   :  { %1514 = vmax.xlane.f32.xlu2 %v1513_v11  ;;  %v585_v12 = vpop.permute.xlu1 %584  ;;  %v597_v27 = vpop.permute.xlu0 %596 }
 0x2ae   :  { %4539 = vmatpush.xpose.msk.msra.mxu3 %vm734_vm9, %v637_v34  ;;  %v651_v14 = vpop.permute.xlu2 %650  ;;  %4544 = vmatmul.msk.f32.vlgmr.msra.gmra.mxu1 %vm734_vm9, %v585_v12 }
 0x2af   :  { %4553 = vmatpush.xpose.msk.msrb.mxu2 %vm734_vm9, %v651_v14  ;;  %2313 = vmatpush.msra.mxu1 %v5497_v62 }
 0x2b1   :  { %4532 = vmatmul.msk.f32.vlgmr.msrb.gmra.mxu3 %vm734_vm9, %v5586_v37 }
 0x2b2   :  { %4547 = vmatpush.xpose.msk.msrb.mxu3 %vm734_vm9, %v645_v56 }
 0x2b3   :  { %2336 = vmatpush.msra.mxu2 %v5613_v48 }
 0x2b5   :  { %v647_v41 = vpop.permute.xlu1 %646  ;;  %v5700_v31 = vpop.permute.xlu0 %4692 }
 0x2b6   :  { %v593_v15 = vpop.permute.xlu2 %592  ;;  %4549 = vmatpush.xpose.msk.msrb.mxu0 %vm734_vm9, %v647_v41 }
 0x2b7   :  { %4552 = vmatmul.msk.f32.vlgmr.msrb.gmra.mxu1 %vm734_vm9, %v593_v15 }
 0x2b8   :  { %2405 = vmatpush.msrb.mxu1 %v5571_v32 }
 0x2b9   :  { %4550 = vmatmul.msk.f32.vlgmr.msrb.gmra.mxu0 %vm734_vm9, %v591_v57 }
 0x2ba   :  { %2290 = vmatpush.msra.mxu0 %v5500_v0  ;;  %v5676_v62 = vpop.f32.mrf.mxu3 }
 0x2bb   :  { %v1525_v16 = vsel %vm1503_vm10, %v5676_v62, -inf }
 0x2bc   :  { %2382 = vmatpush.msrb.mxu0 %v5608_v46  ;;  %1526 = vmax.xlane.f32.xlu1 %v1525_v16 }
 0x2bd   :  { %v595_v17 = vpop.permute.xlu1 %594 }
 0x2be   :  { %4554 = vmatmul.msk.f32.vlgmr.msrb.gmra.mxu2 %vm734_vm9, %v595_v17  ;;  %v5728_v55 = vpop.permute.xlu2 %4657 }
 0x2bf   :  { %2428 = vmatpush.msrb.mxu2 %v5547_v22 }
 0x2c2   :  { %v5683_v47 = vpop.f32.mrf.mxu3 }
 0x2c3   :  { %v1528_v0 = vsel %vm1503_vm10, %v5683_v47, -inf }
 0x2c4   :  { %1529 = vmax.xlane.f32.xlu0 %v1528_v0 }
 0x2c5   :  { %v5687_v26 = vpop.permute.xlu1 %4667 }
 0x2c6   :  { %v5734_v58 = vpop.permute.xlu2 %4662 }
 0x2ca   :  { %v5689_v18 = vpop.f32.mrf.mxu3 }
 0x2cb   :  { %v1531_v19 = vsel %vm1503_vm10, %v5689_v18, -inf }
 0x2cc   :  { %1532 = vmax.xlane.f32.xlu0 %v1531_v19 }
 0x2cd   :  { %v5693_v20 = vpop.permute.xlu1 %4682 }
 0x2ce   :  { %7262 = vst [vmem:[#allocation29_spill] sm:$0xff] %v5693_v20  ;;  %v5736_v59 = vpop.permute.xlu2 %4677 }
 0x2d2   :  { %v5695_v28 = vpop.f32.mrf.mxu3 }
 0x2d3   :  { %v1534_v29 = vsel %vm1503_vm10, %v5695_v28, -inf }
 0x2d4   :  { %1535 = vmax.xlane.f32.xlu0 %v1534_v29 }
 0x2d5   :  { %v581_v49 = vpop.permute.xlu1 %580 }
 0x2d6   :  { %4540 = vmatmul.msk.f32.vlgmr.msra.gmra.mxu3 %vm734_vm9, %v581_v49 }
 0x2d9   :  { %v5702_v9 = vpop.f32.mrf.mxu0 }
 0x2da   :  { %v5704_v33 = vpop.f32.mrf.mxu3 }
 0x2db   :  { %v1537_v35 = vsel %vm1503_vm10, %v5704_v33, -inf }
 0x2dc   :  { %1538 = vmax.xlane.f32.xlu0 %v1537_v35 }
 0x2dd   :  { %v653_v37 = vpop.permute.xlu1 %652 }
 0x2de   :  { %4548 = vmatmul.msk.f32.vlgmr.msrb.gmra.mxu3 %vm734_vm9, %v589_v10 }
 0x2df   :  { %4555 = vmatpush.xpose.msk.msra.mxu3 %vm734_vm9, %v653_v37  ;;  %v1540_v37 = vsel %vm1503_vm10, %v5702_v9, -inf }
 0x2e1   :  { %v1518_v40 = vpop.xlane.xlu0 %1517  ;;  %v5711_v43 = vpop.f32.mrf.mxu0 }
 0x2e2   :  { %v1604_v44 = vsub.f32 %v5615_v50, %v1518_v40  ;;  %v5714_v45 = vpop.f32.mrf.mxu1  ;;  %v1552_v0 = vsel %vm1503_vm10, %v5711_v43, -inf }
 0x2e3   :  { %2359 = vmatpush.msrb.mxu3 %v5578_v4 }
 0x2e4   :  { %v1640_v51 = vmul.f32 1.442695, %v1604_v44 }
 0x2e6   :  { %4556 = vmatmul.msk.f32.vlgmr.msra.gmra.mxu3 %vm734_vm9, %v597_v27  ;;  %4735 = vpow2.f32 %v1640_v51 }
 0x2e7   :  { %2451 = vmatpush.msra.mxu3 %v5542_v21 }
 0x2e9   :  { %v5718_v52 = vpop.f32.mrf.mxu0 }
 0x2ea   :  { %v1564_v25 = vsel %vm1503_vm10, %v5718_v52, -inf  ;;  %v5722_v53 = vpop.f32.mrf.mxu1 }
 0x2eb   :  { %1565 = vmax.xlane.f32.xlu0 %v1564_v25 }
 0x2ec   :  { %v5724_v54 = vpop.eup %4735 }
 0x2ed   :  { %v1708_v50 = vsel %vm1503_vm10, %v5724_v54, 0.0 }
 0x2f0   :  { %v5745_v12 = vpop.f32.mrf.mxu2 }
 0x2f2   :  { %v5730_v56 = vpop.f32.mrf.mxu1 }
 0x2f3   :  { %1709 = vadd.xlane.f32.xlu0 %v1708_v50  ;;  %v1567_v57 = vsel %vm1503_vm10, %v5730_v56, -inf }
 0x2f8   :  { %v5759_v27 = vpop.f32.mrf.mxu2 }
 0x2fb   :  { %1568 = vmax.xlane.f32.xlu0 %v1567_v57 }
 0x300   :  { %v5770_v51 = vpop.f32.mrf.mxu2 }
 0x301   :  { %v1570_v57 = vsel %vm1503_vm10, %v5770_v51, -inf }
 0x308   :  { %v1509_v39 = vpop.xlane.xlu1 %1508 }
 0x309   :  { %v1601_v60 = vsub.f32 %v5564_v30, %v1509_v39 }
 0x30b   :  { %v1634_v63 = vmul.f32 1.442695, %v1601_v60 }
 0x30d   :  { %4737 = vpow2.f32 %v1634_v63 }
 0x310   :  { %v1506_v1 = vpop.xlane.xlu2 %1505  ;;  %v1521_v2 = vpop.xlane.xlu1 %1520 }
 0x311   :  { %v1600_v6 = vsub.f32 %v5550_v23, %v1506_v1  ;;  %v1605_v7 = vsub.f32 %v5637_v42, %v1521_v2  ;;  %v1543_v1 = vsel %vm1503_vm10, %v5714_v45, -inf  ;;  %v1555_v2 = vsel %vm1503_vm10, %v5722_v53, -inf }
 0x313   :  { %v5741_v8 = vpop.eup %4737  ;;  %v1632_v10 = vmul.f32 1.442695, %v1600_v6  ;;  %v1642_v34 = vmul.f32 1.442695, %v1605_v7 }
 0x314   :  { %v1699_v11 = vsel %vm1503_vm10, %v5741_v8, 0.0 }
 0x315   :  { %4739 = vpow2.f32 %v1632_v10  ;;  %1700 = vadd.xlane.f32.xlu1 %v1699_v11  ;;  %v1546_v10 = vsel %vm1503_vm10, %v5745_v12, -inf }
 0x316   :  { %4741 = vpow2.f32 %v1642_v34  ;;  %v5793_v34 = vpop.f32.mrf.mxu0 }
 0x318   :  { %v1512_v30 = vpop.xlane.xlu2 %1511  ;;  %v1524_v14 = vpop.xlane.xlu1 %1523 }
 0x319   :  { %v1606_v41 = vsub.f32 %v5649_v3, %v1524_v14  ;;  %v1602_v23 = vsub.f32 %v5588_v38, %v1512_v30  ;;  %v1576_v14 = vsel %vm1503_vm10, %v5793_v34, -inf }
 0x31b   :  { %v5748_v15 = vpop.eup %4739  ;;  %v1644_v42 = vmul.f32 1.442695, %v1606_v41  ;;  %v1636_v3 = vmul.f32 1.442695, %v1602_v23 }
 0x31c   :  { %v5751_v16 = vpop.eup %4741  ;;  %v1696_v17 = vsel %vm1503_vm10, %v5748_v15, 0.0 }
 0x31d   :  { %1697 = vadd.xlane.f32.xlu2 %v1696_v17  ;;  %1553 = vmax.xlane.f32.xlu1 %v1552_v0  ;;  %v1711_v19 = vsel %vm1503_vm10, %v5751_v16, 0.0  ;;  %4743 = vpow2.f32 %v1644_v42 }
 0x31e   :  { %1712 = vadd.xlane.f32.xlu0 %v1711_v19  ;;  %4745 = vpow2.f32 %v1636_v3 }
 0x320   :  { %v1515_v38 = vpop.xlane.xlu2 %1514 }
 0x321   :  { %v1603_v29 = vsub.f32 %v5596_v36, %v1515_v38 }
 0x323   :  { %v1638_v49 = vmul.f32 1.442695, %v1603_v29  ;;  %v5762_v35 = vpop.eup %4743  ;;  %v5810_v29 = vpop.f32.mrf.mxu2 }
 0x324   :  { %v1714_v40 = vsel %vm1503_vm10, %v5762_v35, 0.0  ;;  %v5768_v44 = vpop.eup %4745 }
 0x325   :  { %4747 = vpow2.f32 %v1638_v49  ;;  %1541 = vmax.xlane.f32.xlu2 %v1540_v37  ;;  %v1702_v36 = vsel %vm1503_vm10, %v5768_v44, 0.0 }
 0x326   :  { %1715 = vadd.xlane.f32.xlu0 %v1714_v40 }
 0x32b   :  { %v5772_v25 = vpop.eup %4747  ;;  %v5795_v11 = vpop.f32.mrf.mxu1 }
 0x32c   :  { %v1705_v50 = vsel %vm1503_vm10, %v5772_v25, 0.0  ;;  %v1579_v41 = vsel %vm1503_vm10, %v5795_v11, -inf  ;;  %v5801_v23 = vpop.f32.mrf.mxu3 }
 0x32d   :  { %1703 = vadd.xlane.f32.xlu2 %v1702_v36  ;;  %1706 = vadd.xlane.f32.xlu1 %v1705_v50  ;;  %v1549_v19 = vsel %vm1503_vm10, %v5801_v23, -inf }
 0x32e   :  { %1571 = vmax.xlane.f32.xlu0 %v1570_v57 }
 0x32f   :  { %v1527_v39 = vpop.xlane.xlu1 %1526 }
 0x330   :  { %v1607_v60 = vsub.f32 %v5676_v62, %v1527_v39  ;;  %v1558_v62 = vsel %vm1503_vm10, %v5759_v27, -inf }
 0x332   :  { %v1646_v63 = vmul.f32 1.442695, %v1607_v60 }
 0x334   :  { %4749 = vpow2.f32 %v1646_v63  ;;  %v5812_v49 = vpop.f32.mrf.mxu3  ;;  %v5821_v39 = vpop.f32.mrf.mxu1 }
 0x335   :  { %1544 = vmax.xlane.f32.xlu2 %v1543_v1  ;;  %1556 = vmax.xlane.f32.xlu1 %v1555_v2  ;;  %v1561_v40 = vsel %vm1503_vm10, %v5812_v49, -inf  ;;  %7264 = vst [vmem:[#allocation31_spill] sm:$0xff] %v5821_v39  ;;  %v1591_v1 = vsel %vm1503_vm10, %v5821_v39, -inf }
 0x336   :  { %v5803_v42 = vpop.f32.mrf.mxu0 }
 0x337   :  { %v1530_v30 = vpop.xlane.xlu0 %1529  ;;  %7263 = vst [vmem:[#allocation30_spill] sm:$0xff] %v5803_v42  ;;  %v1588_v3 = vsel %vm1503_vm10, %v5803_v42, -inf }
 0x338   :  { %v1608_v17 = vsub.f32 %v5683_v47, %v1530_v30  ;;  %v1582_v47 = vsel %vm1503_vm10, %v5810_v29, -inf }
 0x33a   :  { %v5785_v6 = vpop.eup %4749  ;;  %v1648_v38 = vmul.f32 1.442695, %v1608_v17 }
 0x33b   :  { %v1717_v7 = vsel %vm1503_vm10, %v5785_v6, 0.0 }
 0x33c   :  { %1718 = vadd.xlane.f32.xlu0 %v1717_v7  ;;  %4751 = vpow2.f32 %v1648_v38 }
 0x33d   :  { %1547 = vmax.xlane.f32.xlu2 %v1546_v10  ;;  %1559 = vmax.xlane.f32.xlu1 %v1558_v62 }
 0x33f   :  { %v1533_v0 = vpop.xlane.xlu0 %1532 }
 0x340   :  { %v1609_v37 = vsub.f32 %v5689_v18, %v1533_v0 }
 0x341   :  { %v5832_v7 = vpop.f32.mrf.mxu2 }
 0x342   :  { %v1650_v50 = vmul.f32 1.442695, %v1609_v37  ;;  %v5819_v57 = vpop.eup %4751 }
 0x343   :  { %v1720_v2 = vsel %vm1503_vm10, %v5819_v57, 0.0 }
 0x344   :  { %4753 = vpow2.f32 %v1650_v50 }
 0x345   :  { %1577 = vmax.xlane.f32.xlu2 %v1576_v14  ;;  %1580 = vmax.xlane.f32.xlu1 %v1579_v41 }
 0x347   :  { %v1536_v36 = vpop.xlane.xlu0 %1535 }
 0x348   :  { %v1610_v18 = vsub.f32 %v5695_v28, %v1536_v36  ;;  %v1594_v28 = vsel %vm1503_vm10, %v5832_v7, -inf }
 0x34a   :  { %v1652_v10 = vmul.f32 1.442695, %v1610_v18  ;;  %v5834_v30 = vpop.eup %4753 }
 0x34b   :  { %v1723_v0 = vsel %vm1503_vm10, %v5834_v30, 0.0 }
 0x34c   :  { %4755 = vpow2.f32 %v1652_v10 }
 0x34d   :  { %1550 = vmax.xlane.f32.xlu2 %v1549_v19  ;;  %1589 = vmax.xlane.f32.xlu1 %v1588_v3 }
 0x34f   :  { %v1539_v62 = vpop.xlane.xlu0 %1538 }
 0x350   :  { %v1611_v17 = vsub.f32 %v5704_v33, %v1539_v62 }
 0x352   :  { %v1654_v19 = vmul.f32 1.442695, %v1611_v17  ;;  %v5845_v3 = vpop.eup %4755 }
 0x354   :  { %4757 = vpow2.f32 %v1654_v19 }
 0x355   :  { %1583 = vmax.xlane.f32.xlu2 %v1582_v47  ;;  %1562 = vmax.xlane.f32.xlu1 %v1561_v40  ;;  %v1726_v47 = vsel %vm1503_vm10, %v5845_v3, 0.0 }
 0x359   :  { %v5823_v60 = vpop.f32.mrf.mxu3 }
 0x35a   :  { %v1573_v63 = vsel %vm1503_vm10, %v5823_v60, -inf  ;;  %v5853_v33 = vpop.eup %4757 }
 0x35b   :  { %1574 = vmax.xlane.f32.xlu0 %v1573_v63  ;;  %7265 = vst [vmem:[#allocation32_spill] sm:$0xff] %v5853_v33  ;;  %v1729_v40 = vsel %vm1503_vm10, %v5853_v33, 0.0 }
 0x35d   :  { %1592 = vmax.xlane.f32.xlu1 %v1591_v1  ;;  %1721 = vadd.xlane.f32.xlu2 %v1720_v2 }
 0x35e   :  { %v5857_v36 = vpop.xlane.xlu0 %1565 }
 0x361   :  { %v5836_v14 = vpop.f32.mrf.mxu3 }
 0x362   :  { %v1585_v41 = vsel %vm1503_vm10, %v5836_v14, -inf }
 0x363   :  { %1595 = vmax.xlane.f32.xlu0 %v1594_v28 }
 0x365   :  { %1586 = vmax.xlane.f32.xlu1 %v1585_v41  ;;  %1724 = vadd.xlane.f32.xlu2 %v1723_v0 }
 0x366   :  { %v5859_v50 = vpop.xlane.xlu0 %1709 }
 0x367   :  { %4759 = vrcp.f32 %v5859_v50  ;;  %vm1853_vm8 = vweird.f32 %v5859_v50 }
 0x369   :  { %v5847_v38 = vpop.f32.mrf.mxu3 }
 0x36a   :  { %v1597_v37 = vsel %vm1503_vm10, %v5847_v38, -inf }
 0x36d   :  { %1598 = vmax.xlane.f32.xlu1 %v1597_v37  ;;  %1727 = vadd.xlane.f32.xlu2 %v1726_v47  ;;  %v5864_v1 = vpop.eup %4759 }
 0x36e   :  { %v5862_v18 = vpop.xlane.xlu0 %1568  ;;  %v1849_v17 = vmul.f32 %v5864_v1, %v5859_v50  ;;  %vm1854_vm4 = vweird.f32 %v5864_v1 }
 0x370   :  { %v1850_v21 = vsub.f32 1.0, %v1849_v17  ;;  %v4660_v17 = vunpack.i.h.bf16 %v5728_v55 }
 0x375   :  { %1730 = vadd.xlane.f32.xlu1 %v1729_v40 }
 0x388   :  { %v1701_v63 = vpop.xlane.xlu1 %1700 }
 0x389   :  { %4761 = vrcp.f32 %v1701_v63  ;;  %v1817_v37 = vand.u32 2147483648, %v1701_v63  ;;  %v1815_v40 = vand.u32 2147483647, %v1701_v63  ;;  %vm1811_vm12 = vweird.f32 %v1701_v63 }
 0x38b   :  { %v1818_v5 = vor.u32 1.1754944e-38, %v1817_v37  ;;  %vm1816_vm14 = vcmp.eq.f32.partialorder %v1815_v40, 8.507059e+37 }
 0x38f   :  { %v4762_v2 = vpop.eup %4761 }
 0x390   :  { %v1807_v10 = vmul.f32 %v4762_v2, %v1701_v63  ;;  %v1698_v62 = vpop.xlane.xlu2 %1697  ;;  %v1554_v28 = vpop.xlane.xlu1 %1553  ;;  %vm1812_vm11 = vweird.f32 %v4762_v2  ;;  %v1851_v63 = vmul.f32 %v5864_v1, %v1850_v21 }
 0x391   :  { %4763 = vrcp.f32 %v1698_v62  ;;  %v5866_v41 = vpop.xlane.xlu0 %1712  ;;  %v1616_v19 = vsub.f32 %v5711_v43, %v1554_v28  ;;  %vm1813_vm13 = vmor %vm1811_vm12, %vm1812_vm11  ;;  %vm1797_vm1 = vweird.f32 %v1698_v62 }
 0x392   :  { %v1808_v0 = vsub.f32 1.0, %v1807_v10  ;;  %4765 = vrcp.f32 %v5866_v41  ;;  %vm1867_vm3 = vweird.f32 %v5866_v41  ;;  %vm5918_vm11 = vmor %vm1853_vm8, %vm1854_vm4 }
 0x393   :  { %v1664_v13 = vmul.f32 1.442695, %v1616_v19  ;;  %v1801_v19 = vand.u32 2147483647, %v1698_v62 }
 0x394   :  { %v1809_v47 = vmul.f32 %v4762_v2, %v1808_v0 }
 0x395   :  { %4767 = vpow2.f32 %v1664_v13  ;;  %vm1802_vm6 = vcmp.eq.f32.partialorder %v1801_v19, 8.507059e+37  ;;  %v4659_v19 = vunpack.i.l.bf16 %v5728_v55  ;;  %v4669_v55 = vunpack.i.l.bf16 %v5687_v26 }
 0x396   :  { %v1810_v22 = vadd.f32 %v4762_v2, %v1809_v47  ;;  %v1803_v47 = vand.u32 2147483648, %v1698_v62 }
 0x397   :  { %v4764_v32 = vpop.eup %4763 }
 0x398   :  { %v4766_v39 = vpop.eup %4765  ;;  %v1814_v42 = vsel %vm1813_vm13, %v4762_v2, %v1810_v22  ;;  %v1793_v10 = vmul.f32 %v4764_v32, %v1698_v62  ;;  %v1542_v46 = vpop.xlane.xlu2 %1541  ;;  %vm1798_vm15 = vweird.f32 %v4764_v32 }
 0x399   :  { %v1819_v43 = vsel %vm1816_vm14, %v1818_v5, %v1814_v42  ;;  %v1863_v28 = vmul.f32 %v4766_v39, %v5866_v41  ;;  %v1612_v0 = vsub.f32 %v5702_v9, %v1542_v46  ;;  %v5874_v20 = vpop.xlane.xlu0 %1715  ;;  %v1873_v42 = vand.u32 2147483648, %v5866_v41  ;;  %vm5887_vm2 = vmor %vm1797_vm1, %vm1798_vm15 }
 0x39a   :  { %v1794_v13 = vsub.f32 1.0, %v1793_v10  ;;  %v2241_v22 = vmul.f32 %v5741_v8, %v1819_v43  ;;  %4769 = vrcp.f32 %v5874_v20  ;;  %vm1868_vm0 = vweird.f32 %v4766_v39 }
 0x39b   :  { %v1864_v37 = vsub.f32 1.0, %v1863_v28  ;;  %v1656_v33 = vmul.f32 1.442695, %v1612_v0  ;;  %v5879_v2 = vpop.eup %4767  ;;  %v1871_v8 = vand.u32 2147483647, %v5866_v41  ;;  %v1804_v43 = vor.u32 1.1754944e-38, %v1803_v47  ;;  %vm5896_vm5 = vmor %vm1867_vm3, %vm1868_vm0 }
 0x39c   :  { %v1795_v5 = vmul.f32 %v4764_v32, %v1794_v13  ;;  %4558 = vmatmul.msk.f32.vlgmr.msra.gmra.mxu1 %vm1503_vm10, %v2241_v22  ;;  %v1744_v21 = vsel %vm1503_vm10, %v5879_v2, 0.0  ;;  %v1874_v13 = vor.u32 1.1754944e-38, %v1873_v42 }
 0x39d   :  { %v1865_v46 = vmul.f32 %v4766_v39, %v1864_v37  ;;  %4771 = vpow2.f32 %v1656_v33  ;;  %2497 = vmatpush.msra.mxu1 %v4660_v17  ;;  %1745 = vadd.xlane.f32.xlu2 %v1744_v21  ;;  %v1852_v17 = vadd.f32 %v5864_v1, %v1851_v63  ;;  %vm1872_vm7 = vcmp.eq.f32.partialorder %v1871_v8, 8.507059e+37 }
 0x39e   :  { %v1796_v9 = vadd.f32 %v4764_v32, %v1795_v5  ;;  %v1857_v5 = vand.u32 2147483647, %v5859_v50  ;;  %v1620_v21 = vsub.f32 %v5718_v52, %v5857_v36 }
 0x39f   :  { %v1866_v10 = vadd.f32 %v4766_v39, %v1865_v46  ;;  %v1856_v42 = vsel %vm5918_vm11, %v5864_v1, %v1852_v17 }
 0x3a0   :  { %v1800_v33 = vsel %vm5887_vm2, %v4764_v32, %v1796_v9  ;;  %v5900_v28 = vpop.xlane.xlu2 %1703  ;;  %v5902_v0 = vpop.xlane.xlu1 %1706  ;;  %v1859_v32 = vand.u32 2147483648, %v5859_v50  ;;  %vm1858_vm12 = vcmp.eq.f32.partialorder %v1857_v5, 8.507059e+37  ;;  %v1672_v17 = vmul.f32 1.442695, %v1620_v21 }
 0x3a1   :  { %v1870_v41 = vsel %vm5896_vm5, %v4766_v39, %v1866_v10  ;;  %v5907_v37 = vpop.eup %4769  ;;  %v1805_v47 = vsel %vm1802_vm6, %v1804_v43, %v1800_v33  ;;  %4773 = vrcp.f32 %v5900_v28  ;;  %v5935_v10 = vpop.xlane.xlu0 %1571  ;;  %v4664_v43 = vunpack.i.l.bf16 %v5734_v58 }
 0x3a2   :  { %v1875_v63 = vsel %vm1872_vm7, %v1874_v13, %v1870_v41  ;;  %4775 = vrcp.f32 %v5902_v0  ;;  %v2240_v46 = vmul.f32 %v5748_v15, %v1805_v47  ;;  %v1860_v9 = vor.u32 1.1754944e-38, %v1859_v32 }
 0x3a3   :  { %v5911_v22 = vpop.eup %4771  ;;  %v1877_v8 = vmul.f32 %v5907_v37, %v5874_v20  ;;  %v2245_v40 = vmul.f32 %v5751_v16, %v1875_v63  ;;  %v1829_v5 = vand.u32 2147483647, %v5900_v28  ;;  %vm1825_vm15 = vweird.f32 %v5900_v28 }
 0x3a4   :  { %v1732_v50 = vsel %vm1503_vm10, %v5911_v22, 0.0  ;;  %4557 = vmatmul.msk.f32.vlgmr.msra.gmra.mxu0 %vm1503_vm10, %v2240_v46  ;;  %v1861_v1 = vsel %vm1858_vm12, %v1860_v9, %v1856_v42  ;;  %v1843_v46 = vand.u32 2147483647, %v5902_v0  ;;  %vm1839_vm1 = vweird.f32 %v5902_v0 }
 0x3a5   :  { %1733 = vadd.xlane.f32.xlu1 %v1732_v50  ;;  %2474 = vmatpush.msra.mxu0 %v4659_v19  ;;  %v1878_v41 = vsub.f32 1.0, %v1877_v8  ;;  %v2244_v39 = vmul.f32 %v5724_v54, %v1861_v1  ;;  %v1831_v19 = vand.u32 2147483648, %v5900_v28  ;;  %vm1882_vm2 = vweird.f32 %v5907_v37 }
 0x3a6   :  { %4562 = vmatmul.msk.f32.vlgmr.msrb.gmra.mxu1 %vm1503_vm10, %v2245_v40  ;;  %vm1830_vm3 = vcmp.eq.f32.partialorder %v1829_v5, 8.507059e+37  ;;  %vm1844_vm5 = vcmp.eq.f32.partialorder %v1843_v46, 8.507059e+37  ;;  %vm1881_vm6 = vweird.f32 %v5874_v20 }
 0x3a7   :  { %v4774_v15 = vpop.eup %4773  ;;  %2589 = vmatpush.msrb.mxu1 %v4669_v55  ;;  %v1879_v21 = vmul.f32 %v5907_v37, %v1878_v41  ;;  %v1832_v40 = vor.u32 1.1754944e-38, %v1831_v19  ;;  %v4665_v19 = vunpack.i.h.bf16 %v5734_v58  ;;  %vm5979_vm7 = vmor %vm1881_vm6, %vm1882_vm2 }
 0x3a8   :  { %v1545_v52 = vpop.xlane.xlu2 %1544  ;;  %v1557_v36 = vpop.xlane.xlu1 %1556  ;;  %v1821_v62 = vmul.f32 %v4774_v15, %v5900_v28  ;;  %vm1826_vm13 = vweird.f32 %v4774_v15 }
 0x3a9   :  { %v4776_v33 = vpop.eup %4775  ;;  %v1613_v16 = vsub.f32 %v5714_v45, %v1545_v52  ;;  %v1617_v32 = vsub.f32 %v5722_v53, %v1557_v36  ;;  %v1845_v45 = vand.u32 2147483648, %v5902_v0  ;;  %vm1827_vm0 = vmor %vm1825_vm15, %vm1826_vm13 }
 0x3aa   :  { %v1835_v13 = vmul.f32 %v4776_v33, %v5902_v0  ;;  %v1822_v47 = vsub.f32 1.0, %v1821_v62  ;;  %vm1840_vm14 = vweird.f32 %v4776_v33  ;;  %v1880_v62 = vadd.f32 %v5907_v37, %v1879_v21 }
 0x3ab   :  { %v1658_v63 = vmul.f32 1.442695, %v1613_v16  ;;  %v1666_v50 = vmul.f32 1.442695, %v1617_v32  ;;  %vm1841_vm4 = vmor %vm1839_vm1, %vm1840_vm14  ;;  %v1846_v28 = vor.u32 1.1754944e-38, %v1845_v45  ;;  %v1887_v0 = vand.u32 2147483648, %v5874_v20 }
 0x3ac   :  { %v1836_v42 = vsub.f32 1.0, %v1835_v13  ;;  %v1823_v9 = vmul.f32 %v4774_v15, %v1822_v47  ;;  %4561 = vmatmul.msk.f32.vlgmr.msrb.gmra.mxu0 %vm1503_vm10, %v2244_v39  ;;  %v4670_v39 = vunpack.i.h.bf16 %v5687_v26 }
 0x3ad   :  { %4777 = vpow2.f32 %v1658_v63  ;;  %2566 = vmatpush.msrb.mxu0 %v4664_v43  ;;  %v1888_v26 = vor.u32 1.1754944e-38, %v1887_v0 }
 0x3ae   :  { %v1837_v53 = vmul.f32 %v4776_v33, %v1836_v42  ;;  %4779 = vpow2.f32 %v1666_v50  ;;  %v1824_v8 = vadd.f32 %v4774_v15, %v1823_v9 }
 0x3af   :  { %4781 = vpow2.f32 %v1672_v17  ;;  %v5952_v54 = vpop.xlane.xlu0 %1718 }
 0x3b0   :  { %v1838_v55 = vadd.f32 %v4776_v33, %v1837_v53  ;;  %4783 = vrcp.f32 %v5952_v54  ;;  %v1548_v1 = vpop.xlane.xlu2 %1547  ;;  %v5956_v52 = vpop.xlane.xlu1 %1559  ;;  %v1828_v36 = vsel %vm1827_vm0, %v4774_v15, %v1824_v8  ;;  %v1885_v15 = vand.u32 2147483647, %v5874_v20 }
 0x3b1   :  { %v1833_v16 = vsel %vm1830_vm3, %v1832_v40, %v1828_v36  ;;  %v1614_v13 = vsub.f32 %v5745_v12, %v1548_v1  ;;  %v1899_v53 = vand.u32 2147483647, %v5952_v54  ;;  %v1901_v8 = vand.u32 2147483648, %v5952_v54 }
 0x3b2   :  { %v1842_v17 = vsel %vm1841_vm4, %v4776_v33, %v1838_v55  ;;  %v2242_v47 = vmul.f32 %v5768_v44, %v1833_v16  ;;  %vm1886_vm8 = vcmp.eq.f32.partialorder %v1885_v15, 8.507059e+37  ;;  %vm1895_vm12 = vweird.f32 %v5952_v54 }
 0x3b3   :  { %v5961_v41 = vpop.eup %4777  ;;  %v1847_v43 = vsel %vm1844_vm5, %v1846_v28, %v1842_v17  ;;  %v1660_v42 = vmul.f32 1.442695, %v1614_v13  ;;  %v4694_v28 = vunpack.i.l.bf16 %v5700_v31  ;;  %vm1900_vm14 = vcmp.eq.f32.partialorder %v1899_v53, 8.507059e+37 }
 0x3b4   :  { %v5966_v32 = vpop.eup %4779  ;;  %v2243_v5 = vmul.f32 %v5772_v25, %v1847_v43  ;;  %v1735_v33 = vsel %vm1503_vm10, %v5961_v41, 0.0  ;;  %v1884_v25 = vsel %vm5979_vm7, %v5907_v37, %v1880_v62  ;;  %4559 = vmatmul.msk.f32.vlgmr.msra.gmra.mxu2 %vm1503_vm10, %v2242_v47  ;;  %v1621_v37 = vsub.f32 %v5730_v56, %v5862_v18 }
 0x3b5   :  { %v5973_v63 = vpop.eup %4781  ;;  %1736 = vadd.xlane.f32.xlu0 %v1735_v33  ;;  %v1747_v20 = vsel %vm1503_vm10, %v5966_v32, 0.0  ;;  %2520 = vmatpush.msra.mxu2 %v4665_v19  ;;  %v1889_v9 = vsel %vm1886_vm8, %v1888_v26, %v1884_v25  ;;  %4785 = vpow2.f32 %v1660_v42  ;;  %v1902_v56 = vor.u32 1.1754944e-38, %v1901_v8 }
 0x3b6   :  { %v4784_v44 = vpop.eup %4783  ;;  %4560 = vmatmul.msk.f32.vlgmr.msrb.gmra.mxu3 %vm1503_vm10, %v2243_v5  ;;  %1748 = vadd.xlane.f32.xlu1 %v1747_v20  ;;  %v2246_v1 = vmul.f32 %v5762_v35, %v1889_v9  ;;  %v1756_v36 = vsel %vm1503_vm10, %v5973_v63, 0.0  ;;  %v4695_v13 = vunpack.i.h.bf16 %v5700_v31  ;;  %v1618_v33 = vsub.f32 %v5759_v27, %v5956_v52 }
 0x3b7   :  { %v1891_v58 = vmul.f32 %v4784_v44, %v5952_v54  ;;  %2543 = vmatpush.msrb.mxu3 %v4670_v39  ;;  %vm1896_vm11 = vweird.f32 %v4784_v44  ;;  %v1622_v25 = vsub.f32 %v5770_v51, %v5935_v10 }
 0x3b8   :  { %v1578_v46 = vpop.xlane.xlu2 %1577  ;;  %v1581_v50 = vpop.xlane.xlu1 %1580  ;;  %vm1897_vm13 = vmor %vm1895_vm12, %vm1896_vm11 }
 0x3b9   :  { %v1892_v45 = vsub.f32 1.0, %v1891_v58  ;;  %v1624_v21 = vsub.f32 %v5793_v34, %v1578_v46  ;;  %v1674_v34 = vmul.f32 1.442695, %v1621_v37  ;;  %v1625_v47 = vsub.f32 %v5795_v11, %v1581_v50 }
 0x3ba   :  { %v1676_v46 = vmul.f32 1.442695, %v1622_v25  ;;  %v4674_v25 = vunpack.i.l.bf16 %v5639_v61 }
 0x3bb   :  { %v1893_v40 = vmul.f32 %v4784_v44, %v1892_v45  ;;  %v1680_v55 = vmul.f32 1.442695, %v1624_v21  ;;  %v6004_v0 = vpop.eup %4785  ;;  %v1682_v31 = vmul.f32 1.442695, %v1625_v47 }
 0x3bc   :  { %4563 = vmatmul.msk.f32.vlgmr.msrb.gmra.mxu2 %vm1503_vm10, %v2246_v1 }
 0x3bd   :  { %v1894_v62 = vadd.f32 %v4784_v44, %v1893_v40  ;;  %4787 = vpow2.f32 %v1680_v55  ;;  %1757 = vadd.xlane.f32.xlu0 %v1756_v36  ;;  %2612 = vmatpush.msrb.mxu2 %v4694_v28 }
 0x3be   :  { %4789 = vpow2.f32 %v1674_v34 }
 0x3bf   :  { %v1898_v18 = vsel %vm1897_vm13, %v4784_v44, %v1894_v62 }
 0x3c0   :  { %v1903_v16 = vsel %vm1900_vm14, %v1902_v56, %v1898_v18  ;;  %v1551_v35 = vpop.xlane.xlu2 %1550  ;;  %v6002_v17 = vpop.xlane.xlu1 %1589 }
 0x3c1   :  { %v1615_v43 = vsub.f32 %v5801_v23, %v1551_v35  ;;  %v2247_v54 = vmul.f32 %v5785_v6, %v1903_v16  ;;  %v1738_v6 = vsel %vm1503_vm10, %v6004_v0, 0.0  ;;  %v1668_v23 = vmul.f32 1.442695, %v1618_v33 }
 0x3c3   :  { %v6009_v15 = vpop.eup %4787  ;;  %v1662_v5 = vmul.f32 1.442695, %v1615_v43  ;;  %4564 = vmatmul.msk.f32.vlgmr.msra.gmra.mxu3 %vm1503_vm10, %v2247_v54 }
 0x3c4   :  { %2635 = vmatpush.msra.mxu3 %v4695_v13  ;;  %v1768_v39 = vsel %vm1503_vm10, %v6009_v15, 0.0  ;;  %v6019_v12 = vpop.eup %4789 }
 0x3c5   :  { %4791 = vpow2.f32 %v1662_v5  ;;  %1769 = vadd.xlane.f32.xlu2 %v1768_v39  ;;  %1739 = vadd.xlane.f32.xlu0 %v1738_v6  ;;  %v1759_v58 = vsel %vm1503_vm10, %v6019_v12, 0.0 }
 0x3c6   :  { %4793 = vpow2.f32 %v1682_v31 }
 0x3c7   :  { %4795 = vpow2.f32 %v1668_v23 }
 0x3c8   :  { %v1584_v19 = vpop.xlane.xlu2 %1583  ;;  %v1563_v11 = vpop.xlane.xlu1 %1562 }
 0x3c9   :  { %v1626_v20 = vsub.f32 %v5810_v29, %v1584_v19  ;;  %v1619_v52 = vsub.f32 %v5812_v49, %v1563_v11 }
 0x3cb   :  { %v6022_v44 = vpop.eup %4791  ;;  %v1684_v27 = vmul.f32 1.442695, %v1626_v20  ;;  %v1670_v42 = vmul.f32 1.442695, %v1619_v52 }
 0x3cc   :  { %v1741_v26 = vsel %vm1503_vm10, %v6022_v44, 0.0  ;;  %v6033_v49 = vpop.eup %4793 }
 0x3cd   :  { %4797 = vpow2.f32 %v1684_v27  ;;  %1742 = vadd.xlane.f32.xlu1 %v1741_v26  ;;  %1760 = vadd.xlane.f32.xlu0 %v1759_v58  ;;  %v6035_v51 = vpop.eup %4795  ;;  %v1771_v37 = vsel %vm1503_vm10, %v6033_v49, 0.0 }
 0x3ce   :  { %v1575_v29 = vpop.xlane.xlu0 %1574  ;;  %v1750_v53 = vsel %vm1503_vm10, %v6035_v51, 0.0 }
 0x3cf   :  { %v1623_v45 = vsub.f32 %v5823_v60, %v1575_v29 }
 0x3d0   :  { %v6031_v50 = vpop.xlane.xlu1 %1592  ;;  %v1722_v9 = vpop.xlane.xlu2 %1721 }
 0x3d1   :  { %4799 = vrcp.f32 %v1722_v9  ;;  %v1678_v55 = vmul.f32 1.442695, %v1623_v45  ;;  %v1913_v18 = vand.u32 2147483647, %v1722_v9  ;;  %v1915_v16 = vand.u32 2147483648, %v1722_v9 }
 0x3d2   :  { %4801 = vpow2.f32 %v1670_v42  ;;  %vm1909_vm0 = vweird.f32 %v1722_v9 }
 0x3d3   :  { %v6037_v10 = vpop.eup %4797  ;;  %4803 = vpow2.f32 %v1676_v46  ;;  %v1916_v33 = vor.u32 1.1754944e-38, %v1915_v16  ;;  %vm1914_vm2 = vcmp.eq.f32.partialorder %v1913_v18, 8.507059e+37 }
 0x3d4   :  { %v1774_v21 = vsel %vm1503_vm10, %v6037_v10, 0.0 }
 0x3d5   :  { %1775 = vadd.xlane.f32.xlu2 %v1774_v21  ;;  %1772 = vadd.xlane.f32.xlu1 %v1771_v37 }
 0x3d6   :  { %1751 = vadd.xlane.f32.xlu0 %v1750_v53  ;;  %v1596_v40 = vpop.xlane.xlu0 %1595 }
 0x3d7   :  { %v4800_v8 = vpop.eup %4799  ;;  %v1630_v35 = vsub.f32 %v5832_v7, %v1596_v40 }
 0x3d8   :  { %v1905_v1 = vmul.f32 %v4800_v8, %v1722_v9  ;;  %v1587_v36 = vpop.xlane.xlu1 %1586  ;;  %v1725_v28 = vpop.xlane.xlu2 %1724  ;;  %vm1910_vm15 = vweird.f32 %v4800_v8 }
 0x3d9   :  { %v6046_v62 = vpop.eup %4801  ;;  %v1627_v60 = vsub.f32 %v5836_v14, %v1587_v36  ;;  %4805 = vrcp.f32 %v1725_v28  ;;  %vm1911_vm1 = vmor %vm1909_vm0, %vm1910_vm15  ;;  %v1692_v39 = vmul.f32 1.442695, %v1630_v35  ;;  %v1929_v26 = vand.u32 2147483648, %v1725_v28 }
 0x3da   :  { %v6049_v56 = vpop.eup %4803  ;;  %v1906_v34 = vsub.f32 1.0, %v1905_v1  ;;  %4807 = vpow2.f32 %v1678_v55  ;;  %v1753_v13 = vsel %vm1503_vm10, %v6046_v62, 0.0  ;;  %v1927_v42 = vand.u32 2147483647, %v1725_v28 }
 0x3db   :  { %v1686_v43 = vmul.f32 1.442695, %v1627_v60  ;;  %v1762_v14 = vsel %vm1503_vm10, %v6049_v56, 0.0  ;;  %vm1923_vm4 = vweird.f32 %v1725_v28  ;;  %v1930_v21 = vor.u32 1.1754944e-38, %v1929_v26 }
 0x3dc   :  { %v1907_v54 = vmul.f32 %v4800_v8, %v1906_v34  ;;  %vm1928_vm6 = vcmp.eq.f32.partialorder %v1927_v42, 8.507059e+37  ;;  %v4675_v60 = vunpack.i.h.bf16 %v5639_v61  ;;  %v7276_v42 = vld [vmem:[#allocation27_spill] sm:$0xff] }
 0x3dd   :  { %4809 = vpow2.f32 %v1686_v43  ;;  %1754 = vadd.xlane.f32.xlu1 %v1753_v13 }
 0x3de   :  { %v1908_v47 = vadd.f32 %v4800_v8, %v1907_v54  ;;  %1763 = vadd.xlane.f32.xlu0 %v1762_v14 }
 0x3df   :  { %v4806_v5 = vpop.eup %4805 }
 0x3e0   :  { %v1912_v7 = vsel %vm1911_vm1, %v4800_v8, %v1908_v47  ;;  %v1919_v6 = vmul.f32 %v4806_v5, %v1725_v28  ;;  %v1599_v31 = vpop.xlane.xlu1 %1598  ;;  %v1728_v23 = vpop.xlane.xlu2 %1727  ;;  %vm1924_vm3 = vweird.f32 %v4806_v5 }
 0x3e1   :  { %v1917_v19 = vsel %vm1914_vm2, %v1916_v33, %v1912_v7  ;;  %4811 = vrcp.f32 %v1728_v23  ;;  %v6056_v11 = vpop.eup %4807  ;;  %v1631_v58 = vsub.f32 %v5847_v38, %v1599_v31  ;;  %vm1925_vm5 = vmor %vm1923_vm4, %vm1924_vm3  ;;  %v1943_v28 = vand.u32 2147483648, %v1728_v23 }
 0x3e2   :  { %v1920_v20 = vsub.f32 1.0, %v1919_v6  ;;  %v2248_v27 = vmul.f32 %v5819_v57, %v1917_v19  ;;  %4813 = vpow2.f32 %v1692_v39  ;;  %v1765_v57 = vsel %vm1503_vm10, %v6056_v11, 0.0 }
 0x3e3   :  { %v6059_v52 = vpop.eup %4809  ;;  %v1694_v38 = vmul.f32 1.442695, %v1631_v58  ;;  %v1941_v18 = vand.u32 2147483647, %v1728_v23  ;;  %vm1937_vm8 = vweird.f32 %v1728_v23  ;;  %v1944_v54 = vor.u32 1.1754944e-38, %v1943_v28  ;;  %v7275_v58 = vld [vmem:[#allocation29_spill] sm:$0xff] }
 0x3e4   :  { %v1921_v29 = vmul.f32 %v4806_v5, %v1920_v20  ;;  %4565 = vmatmul.msk.f32.vlgmr.msra.gmra.mxu0 %vm1503_vm10, %v2248_v27  ;;  %v1777_v46 = vsel %vm1503_vm10, %v6059_v52, 0.0  ;;  %v4680_v33 = vunpack.i.h.bf16 %v5736_v59  ;;  %v4701_v20 = vpack.i.bf16 %v5578_v4, %v5613_v48 }
 0x3e5   :  { %2658 = vmatpush.msra.mxu0 %v4674_v25  ;;  %1778 = vadd.xlane.f32.xlu2 %v1777_v46  ;;  %vm1942_vm12 = vcmp.eq.f32.partialorder %v1941_v18, 8.507059e+37  ;;  %v7274_v25 = vld [vmem:[#allocation32_spill] sm:$0xff] }
 0x3e6   :  { %v1922_v9 = vadd.f32 %v4806_v5, %v1921_v29  ;;  %1766 = vadd.xlane.f32.xlu0 %v1765_v57  ;;  %v4685_v29 = vunpack.i.h.bf16 %v7275_v58  ;;  %v7278_v57 = vld [vmem:[#allocation31_spill] sm:$0xff] }
 0x3e7   :  { %v4812_v45 = vpop.eup %4811 }
 0x3e8   :  { %v1926_v37 = vsel %vm1925_vm5, %v4806_v5, %v1922_v9  ;;  %v1933_v53 = vmul.f32 %v4812_v45, %v1728_v23  ;;  %v1731_v8 = vpop.xlane.xlu1 %1730  ;;  %v6068_v40 = vpop.eup %4813  ;;  %vm1938_vm7 = vweird.f32 %v4812_v45  ;;  %v1629_v9 = vsub.f32 %v7278_v57, %v6031_v50 }
 0x3e9   :  { %v1931_v55 = vsel %vm1928_vm6, %v1930_v21, %v1926_v37  ;;  %4815 = vrcp.f32 %v1731_v8  ;;  %v1786_v16 = vsel %vm1503_vm10, %v6068_v40, 0.0  ;;  %vm1939_vm11 = vmor %vm1937_vm8, %vm1938_vm7  ;;  %v1957_v39 = vand.u32 2147483648, %v1731_v8 }
 0x3ea   :  { %v1934_v1 = vsub.f32 1.0, %v1933_v53  ;;  %v2249_v36 = vmul.f32 %v5834_v30, %v1931_v55  ;;  %4817 = vpow2.f32 %v1694_v38  ;;  %v1955_v6 = vand.u32 2147483647, %v1731_v8 }
 0x3eb   :  { %vm1951_vm14 = vweird.f32 %v1731_v8 }
 0x3ec   :  { %v1935_v34 = vmul.f32 %v4812_v45, %v1934_v1  ;;  %4566 = vmatmul.msk.f32.vlgmr.msra.gmra.mxu1 %vm1503_vm10, %v2249_v36  ;;  %vm1956_vm0 = vcmp.eq.f32.partialorder %v1955_v6, 8.507059e+37 }
 0x3ed   :  { %2681 = vmatpush.msra.mxu1 %v4675_v60  ;;  %1787 = vadd.xlane.f32.xlu2 %v1786_v16 }
 0x3ee   :  { %v1936_v35 = vadd.f32 %v4812_v45, %v1935_v34 }
 0x3ef   :  { %v4816_v43 = vpop.eup %4815 }
 0x3f0   :  { %v1940_v30 = vsel %vm1939_vm11, %v4812_v45, %v1936_v35  ;;  %v1947_v61 = vmul.f32 %v4816_v43, %v1731_v8  ;;  %v6075_v13 = vpop.eup %4817  ;;  %vm1952_vm13 = vweird.f32 %v4816_v43  ;;  %v1690_v45 = vmul.f32 1.442695, %v1629_v9 }
 0x3f1   :  { %v1945_v14 = vsel %vm1942_vm12, %v1944_v54, %v1940_v30  ;;  %v1789_v31 = vsel %vm1503_vm10, %v6075_v13, 0.0  ;;  %vm1953_vm15 = vmor %vm1951_vm14, %vm1952_vm13 }
 0x3f2   :  { %v1948_v47 = vsub.f32 1.0, %v1947_v61  ;;  %v2250_v5 = vmul.f32 %v5845_v3, %v1945_v14  ;;  %v1958_v3 = vor.u32 1.1754944e-38, %v1957_v39 }
 0x3f4   :  { %v1949_v7 = vmul.f32 %v4816_v43, %v1948_v47  ;;  %4567 = vmatmul.msk.f32.vlgmr.msra.gmra.mxu2 %vm1503_vm10, %v2250_v5 }
 0x3f5   :  { %2704 = vmatpush.msra.mxu2 %v4680_v33  ;;  %1790 = vadd.xlane.f32.xlu2 %v1789_v31 }
 0x3f6   :  { %v1950_v23 = vadd.f32 %v4816_v43, %v1949_v7  ;;  %4697 = vrot.lane.b32.xlu1 %v5554_v24, %s5164_s14  ;;  %v7277_v24 = vld [vmem:[#allocation30_spill] sm:$0xff]  ;;  %v4679_v7 = vunpack.i.l.bf16 %v5736_v59 }
 0x3f7   :  { %v1628_v46 = vsub.f32 %v7277_v24, %v6002_v17 }
 0x3f8   :  { %v1954_v19 = vsel %vm1953_vm15, %v4816_v43, %v1950_v23 }
 0x3f9   :  { %v1959_v27 = vsel %vm1956_vm0, %v1958_v3, %v1954_v19  ;;  %v1688_v48 = vmul.f32 1.442695, %v1628_v46 }
 0x3fa   :  { %4702 = vrot.lane.b32.xlu0 %v4701_v20, %s5163_s30  ;;  %v2251_v26 = vmul.f32 %v7274_v25, %v1959_v27 }
 0x3fc   :  { %4568 = vmatmul.msk.f32.vlgmr.msrb.gmra.mxu3 %vm1503_vm10, %v2251_v26  ;;  %v7279_v26 = vld [vmem:[#allocation28_spill] sm:$0xff] }
 0x3fd   :  { %2727 = vmatpush.msrb.mxu3 %v4685_v29  ;;  %v4689_v29 = vunpack.i.l.bf16 %v7279_v26 }
 0x40d   :  { %718 = vrot.lane.b32.xlu2 %v7276_v42, %s5163_s30 }
 0x410   :  { %v1746_v4 = vpop.xlane.xlu2 %1745 }
 0x411   :  { %4819 = vrcp.f32 %v1746_v4  ;;  %v2027_v14 = vand.u32 2147483648, %v1746_v4  ;;  %vm2021_vm6 = vweird.f32 %v1746_v4  ;;  %v2025_v5 = vand.u32 2147483647, %v1746_v4 }
 0x412   :  { %4821 = vpow2.f32 %v1688_v48 }
 0x413   :  { %4823 = vpow2.f32 %v1690_v45  ;;  %v2028_v31 = vor.u32 1.1754944e-38, %v2027_v14  ;;  %vm2026_vm8 = vcmp.eq.f32.partialorder %v2025_v5, 8.507059e+37  ;;  %v7280_v45 = vld [vmem:[#allocation26_spill] sm:$0xff] }
 0x417   :  { %v4820_v38 = vpop.eup %4819 }
 0x418   :  { %v1734_v21 = vpop.xlane.xlu1 %1733  ;;  %v6096_v37 = vpop.eup %4821  ;;  %v2017_v53 = vmul.f32 %v4820_v38, %v1746_v4  ;;  %vm2022_vm3 = vweird.f32 %v4820_v38 }
 0x419   :  { %4825 = vrcp.f32 %v1734_v21  ;;  %v6098_v8 = vpop.eup %4823  ;;  %v1780_v17 = vsel %vm1503_vm10, %v6096_v37, 0.0  ;;  %v1971_v28 = vand.u32 2147483648, %v1734_v21  ;;  %v1969_v16 = vand.u32 2147483647, %v1734_v21  ;;  %vm2023_vm7 = vmor %vm2021_vm6, %vm2022_vm3 }
 0x41a   :  { %v2018_v50 = vsub.f32 1.0, %v2017_v53  ;;  %v1783_v60 = vsel %vm1503_vm10, %v6098_v8, 0.0  ;;  %vm1965_vm2 = vweird.f32 %v1734_v21 }
 0x41b   :  { %v1972_v43 = vor.u32 1.1754944e-38, %v1971_v28  ;;  %vm1970_vm5 = vcmp.eq.f32.partialorder %v1969_v16, 8.507059e+37 }
 0x41c   :  { %v2019_v34 = vmul.f32 %v4820_v38, %v2018_v50 }
 0x41e   :  { %v2020_v30 = vadd.f32 %v4820_v38, %v2019_v34 }
 0x41f   :  { %v4826_v55 = vpop.eup %4825 }
 0x420   :  { %1781 = vadd.xlane.f32.xlu1 %v1780_v17  ;;  %v1961_v1 = vmul.f32 %v4826_v55, %v1734_v21  ;;  %vm1966_vm1 = vweird.f32 %v4826_v55  ;;  %v2024_v6 = vsel %vm2023_vm7, %v4820_v38, %v2020_v30  ;;  %v7281_v21 = vld [vmem:[#allocation25_spill] sm:$0xff]  ;;  %v4684_v30 = vunpack.i.l.bf16 %v7275_v58 }
 0x421   :  { %vm1967_vm4 = vmor %vm1965_vm2, %vm1966_vm1  ;;  %v2029_v3 = vsel %vm2026_vm8, %v2028_v31, %v2024_v6  ;;  %v4706_v38 = vpack.i.bf16 %v7281_v21, %v7280_v45 }
 0x422   :  { %v1962_v36 = vsub.f32 1.0, %v1961_v1  ;;  %v2256_v59 = vmul.f32 %v5879_v2, %v2029_v3 }
 0x424   :  { %1784 = vadd.xlane.f32.xlu0 %v1783_v60  ;;  %v1963_v18 = vmul.f32 %v4826_v55, %v1962_v36 }
 0x426   :  { %v1964_v35 = vadd.f32 %v4826_v55, %v1963_v18 }
 0x428   :  { %v1737_v54 = vpop.xlane.xlu0 %1736  ;;  %v1968_v61 = vsel %vm1967_vm4, %v4826_v55, %v1964_v35  ;;  %v7282_v55 = vld [vmem:[#allocation24_spill] sm:$0xff] }
 0x429   :  { %4827 = vrcp.f32 %v1737_v54  ;;  %v1973_v47 = vsel %vm1970_vm5, %v1972_v43, %v1968_v61  ;;  %v6104_v33 = vpop.xlane.xlu1 %1748  ;;  %v1985_v24 = vand.u32 2147483648, %v1737_v54  ;;  %v1983_v57 = vand.u32 2147483647, %v1737_v54 }
 0x42a   :  { %v2252_v39 = vmul.f32 %v5911_v22, %v1973_v47  ;;  %4829 = vrcp.f32 %v6104_v33  ;;  %vm1979_vm12 = vweird.f32 %v1737_v54  ;;  %v2041_v34 = vand.u32 2147483648, %v6104_v33 }
 0x42b   :  { %v1986_v2 = vor.u32 1.1754944e-38, %v1985_v24  ;;  %vm1984_vm14 = vcmp.eq.f32.partialorder %v1983_v57, 8.507059e+37  ;;  %vm2035_vm1 = vweird.f32 %v6104_v33  ;;  %v2039_v35 = vand.u32 2147483647, %v6104_v33 }
 0x42c   :  { %4569 = vmatmul.msk.f32.vlgmr.msrb.gmra.mxu0 %vm1503_vm10, %v2252_v39 }
 0x42d   :  { %2750 = vmatpush.msrb.mxu0 %v4679_v7  ;;  %vm2040_vm5 = vcmp.eq.f32.partialorder %v2039_v35, 8.507059e+37 }
 0x42f   :  { %v4828_v23 = vpop.eup %4827 }
 0x430   :  { %v1975_v19 = vmul.f32 %v4828_v23, %v1737_v54  ;;  %v1758_v20 = vpop.xlane.xlu0 %1757  ;;  %v4830_v27 = vpop.eup %4829  ;;  %vm1980_vm11 = vweird.f32 %v4828_v23 }
 0x431   :  { %4831 = vrcp.f32 %v1758_v20  ;;  %v2031_v22 = vmul.f32 %v4830_v27, %v6104_v33  ;;  %vm1981_vm13 = vmor %vm1979_vm12, %vm1980_vm11  ;;  %vm2036_vm15 = vweird.f32 %v4830_v27  ;;  %v2083_v16 = vand.u32 2147483648, %v1758_v20 }
 0x432   :  { %v1976_v25 = vsub.f32 1.0, %v1975_v19  ;;  %v2081_v43 = vand.u32 2147483647, %v1758_v20  ;;  %vm6131_vm2 = vmor %vm2035_vm1, %vm2036_vm15  ;;  %vm2077_vm3 = vweird.f32 %v1758_v20 }
 0x433   :  { %v2032_v46 = vsub.f32 1.0, %v2031_v22  ;;  %v2084_v7 = vor.u32 1.1754944e-38, %v2083_v16  ;;  %v4690_v22 = vunpack.i.h.bf16 %v7279_v26 }
 0x434   :  { %v1977_v42 = vmul.f32 %v4828_v23, %v1976_v25  ;;  %4573 = vmatmul.msk.f32.vlgmr.msra.gmra.mxu0 %vm1503_vm10, %v2256_v59  ;;  %vm2082_vm6 = vcmp.eq.f32.partialorder %v2081_v43, 8.507059e+37 }
 0x435   :  { %2842 = vmatpush.msra.mxu0 %v4689_v29  ;;  %v2033_v48 = vmul.f32 %v4830_v27, %v2032_v46 }
 0x436   :  { %v1978_v9 = vadd.f32 %v4828_v23, %v1977_v42 }
 0x437   :  { %v4832_v4 = vpop.eup %4831  ;;  %v2034_v28 = vadd.f32 %v4830_v27, %v2033_v48 }
 0x438   :  { %v1982_v53 = vsel %vm1981_vm13, %v4828_v23, %v1978_v9  ;;  %v2073_v17 = vmul.f32 %v4832_v4, %v1758_v20  ;;  %724 = vrot.lane.b32.xlu0 %v7282_v55, %s5163_s30  ;;  %v6119_v50 = vpop.xlane.xlu2 %1769  ;;  %v6121_v1 = vpop.xlane.xlu0 %1739  ;;  %vm2078_vm0 = vweird.f32 %v4832_v4 }
 0x439   :  { %4833 = vrcp.f32 %v6119_v50  ;;  %4707 = vrot.lane.b32.xlu1 %v4706_v38, %s5163_s30  ;;  %v1987_v36 = vsel %vm1984_vm14, %v1986_v2, %v1982_v53  ;;  %v2038_v5 = vsel %vm6131_vm2, %v4830_v27, %v2034_v28  ;;  %vm6137_vm4 = vmor %vm2077_vm3, %vm2078_vm0  ;;  %vm2133_vm11 = vweird.f32 %v6119_v50 }
 0x43a   :  { %v2074_v60 = vsub.f32 1.0, %v2073_v17  ;;  %4835 = vrcp.f32 %v6121_v1  ;;  %v2253_v54 = vmul.f32 %v5961_v41, %v1987_v36  ;;  %v2042_v41 = vor.u32 1.1754944e-38, %v2041_v34 }
 0x43b   :  { %v2139_v57 = vand.u32 2147483648, %v6119_v50  ;;  %v1999_v9 = vand.u32 2147483648, %v6121_v1  ;;  %v2137_v26 = vand.u32 2147483647, %v6119_v50  ;;  %vm1993_vm13 = vweird.f32 %v6121_v1 }
 0x43c   :  { %v2075_v18 = vmul.f32 %v4832_v4, %v2074_v60  ;;  %4570 = vmatmul.msk.f32.vlgmr.msrb.gmra.mxu1 %vm1503_vm10, %v2253_v54  ;;  %v2043_v19 = vsel %vm2040_vm5, %v2042_v41, %v2038_v5 }
 0x43d   :  { %2773 = vmatpush.msrb.mxu1 %v4684_v30  ;;  %v2257_v42 = vmul.f32 %v5966_v32, %v2043_v19  ;;  %v1997_v32 = vand.u32 2147483647, %v6121_v1  ;;  %vm2138_vm15 = vcmp.eq.f32.partialorder %v2137_v26, 8.507059e+37 }
 0x43e   :  { %v2076_v14 = vadd.f32 %v4832_v4, %v2075_v18 }
 0x43f   :  { %v4834_v47 = vpop.eup %4833  ;;  %vm1998_vm0 = vcmp.eq.f32.partialorder %v1997_v32, 8.507059e+37 }
 0x440   :  { %v4836_v33 = vpop.eup %4835  ;;  %v2080_v58 = vsel %vm6137_vm4, %v4832_v4, %v2076_v14  ;;  %v2129_v6 = vmul.f32 %v4834_v47, %v6119_v50  ;;  %v6145_v31 = vpop.xlane.xlu1 %1742  ;;  %vm2134_vm7 = vweird.f32 %v4834_v47  ;;  %v2140_v50 = vor.u32 1.1754944e-38, %v2139_v57 }
 0x441   :  { %v6147_v23 = vpop.xlane.xlu0 %1760  ;;  %v1989_v3 = vmul.f32 %v4836_v33, %v6121_v1  ;;  %4837 = vrcp.f32 %v6145_v31  ;;  %v2085_v20 = vsel %vm2082_vm6, %v2084_v7, %v2080_v58  ;;  %vm1994_vm8 = vweird.f32 %v4836_v33  ;;  %vm6158_vm12 = vmor %vm2133_vm11, %vm2134_vm7 }
 0x442   :  { %v2130_v27 = vsub.f32 1.0, %v2129_v6  ;;  %4839 = vrcp.f32 %v6147_v23  ;;  %v2260_v24 = vmul.f32 %v5973_v63, %v2085_v20  ;;  %vm6168_vm14 = vmor %vm1993_vm13, %vm1994_vm8  ;;  %v2000_v1 = vor.u32 1.1754944e-38, %v1999_v9 }
 0x443   :  { %v1990_v25 = vsub.f32 1.0, %v1989_v3  ;;  %vm2007_vm1 = vweird.f32 %v6145_v31  ;;  %v2013_v35 = vand.u32 2147483648, %v6145_v31  ;;  %v2097_v30 = vand.u32 2147483648, %v6147_v23 }
 0x444   :  { %v2131_v59 = vmul.f32 %v4834_v47, %v2130_v27  ;;  %4574 = vmatmul.msk.f32.vlgmr.msra.gmra.mxu1 %vm1503_vm10, %v2257_v42  ;;  %4577 = vmatmul.msk.f32.vlgmr.msrb.gmra.mxu0 %vm1503_vm10, %v2260_v24  ;;  %v2011_v61 = vand.u32 2147483647, %v6145_v31  ;;  %v2095_v14 = vand.u32 2147483647, %v6147_v23  ;;  %vm2091_vm5 = vweird.f32 %v6147_v23 }
 0x445   :  { %v1991_v29 = vmul.f32 %v4836_v33, %v1990_v25  ;;  %2865 = vmatpush.msra.mxu1 %v4690_v22 }
 0x446   :  { %v2132_v46 = vadd.f32 %v4834_v47, %v2131_v59  ;;  %vm2012_vm7 = vcmp.eq.f32.partialorder %v2011_v61, 8.507059e+37  ;;  %vm2096_vm8 = vcmp.eq.f32.partialorder %v2095_v14, 8.507059e+37 }
 0x447   :  { %v4838_v4 = vpop.eup %4837  ;;  %v1992_v45 = vadd.f32 %v4836_v33, %v1991_v29 }
 0x448   :  { %v2003_v21 = vmul.f32 %v4838_v4, %v6145_v31  ;;  %v6173_v38 = vpop.xlane.xlu1 %1772  ;;  %v4840_v53 = vpop.eup %4839  ;;  %v2136_v2 = vsel %vm6158_vm12, %v4834_v47, %v2132_v46  ;;  %vm2008_vm2 = vweird.f32 %v4838_v4 }
 0x449   :  { %v1996_v17 = vsel %vm6168_vm14, %v4836_v33, %v1992_v45  ;;  %v6179_v55 = vpop.xlane.xlu0 %1751  ;;  %v2087_v60 = vmul.f32 %v4840_v53, %v6147_v23  ;;  %4841 = vrcp.f32 %v6173_v38  ;;  %v2141_v28 = vsel %vm2138_vm15, %v2140_v50, %v2136_v2  ;;  %vm6191_vm4 = vmor %vm2007_vm1, %vm2008_vm2  ;;  %v6196_v41 = vpop.xlane.xlu2 %1775 }
 0x44a   :  { %v2004_v36 = vsub.f32 1.0, %v2003_v21  ;;  %v2001_v34 = vsel %vm1998_vm0, %v2000_v1, %v1996_v17  ;;  %4843 = vrcp.f32 %v6179_v55  ;;  %vm2092_vm3 = vweird.f32 %v4840_v53 }
 0x44b   :  { %v2088_v16 = vsub.f32 1.0, %v2087_v60  ;;  %v2254_v47 = vmul.f32 %v6004_v0, %v2001_v34  ;;  %v2264_v5 = vmul.f32 %v6009_v15, %v2141_v28  ;;  %vm2093_vm6 = vmor %vm2091_vm5, %vm2092_vm3  ;;  %v2014_v15 = vor.u32 1.1754944e-38, %v2013_v35 }
 0x44c   :  { %v2005_v18 = vmul.f32 %v4838_v4, %v2004_v36  ;;  %v2098_v23 = vor.u32 1.1754944e-38, %v2097_v30  ;;  %v2151_v59 = vand.u32 2147483647, %v6173_v38  ;;  %v2153_v29 = vand.u32 2147483648, %v6173_v38 }
 0x44d   :  { %v2089_v54 = vmul.f32 %v4840_v53, %v2088_v16  ;;  %4571 = vmatmul.msk.f32.vlgmr.msrb.gmra.mxu2 %vm1503_vm10, %v2254_v47  ;;  %4581 = vmatmul.msk.f32.vlgmr.msra.gmra.mxu0 %vm1503_vm10, %v2264_v5  ;;  %v2053_v42 = vand.u32 2147483647, %v6179_v55  ;;  %vm2147_vm12 = vweird.f32 %v6173_v38  ;;  %v2055_v9 = vand.u32 2147483648, %v6179_v55 }
 0x44e   :  { %v2006_v43 = vadd.f32 %v4838_v4, %v2005_v18  ;;  %vm6227_vm15 = vcmp.eq.f32.partialorder %v2151_v59, 8.507059e+37  ;;  %vm2049_vm0 = vweird.f32 %v6179_v55 }
 0x44f   :  { %v2090_v33 = vadd.f32 %v4840_v53, %v2089_v54  ;;  %v4842_v7 = vpop.eup %4841  ;;  %vm6232_vm1 = vcmp.eq.f32.partialorder %v2053_v42, 8.507059e+37  ;;  %v2167_v42 = vand.u32 2147483648, %v6196_v41 }
 0x450   :  { %v6198_v58 = vpop.xlane.xlu1 %1754  ;;  %v2010_v6 = vsel %vm6191_vm4, %v4838_v4, %v2006_v43  ;;  %v2143_v3 = vmul.f32 %v4842_v7, %v6173_v38  ;;  %v4844_v19 = vpop.eup %4843  ;;  %vm2148_vm11 = vweird.f32 %v4842_v7 }
 0x451   :  { %4845 = vrcp.f32 %v6198_v58  ;;  %v6205_v0 = vpop.xlane.xlu0 %1763  ;;  %v2094_v31 = vsel %vm2093_vm6, %v4840_v53, %v2090_v33  ;;  %v2015_v20 = vsel %vm2012_vm7, %v2014_v15, %v2010_v6  ;;  %v2045_v22 = vmul.f32 %v4844_v19, %v6179_v55  ;;  %vm6223_vm14 = vmor %vm2147_vm12, %vm2148_vm11 }
 0x452   :  { %4847 = vrcp.f32 %v6196_v41  ;;  %v2099_v27 = vsel %vm2096_vm8, %v2098_v23, %v2094_v31  ;;  %v2144_v25 = vsub.f32 1.0, %v2143_v3  ;;  %v2255_v4 = vmul.f32 %v6022_v44, %v2015_v20 }
 0x453   :  { %4849 = vrcp.f32 %v6205_v0  ;;  %v2046_v46 = vsub.f32 1.0, %v2045_v22  ;;  %v2261_v48 = vmul.f32 %v6019_v12, %v2099_v27  ;;  %vm2050_vm13 = vweird.f32 %v4844_v19 }
 0x454   :  { %v2145_v24 = vmul.f32 %v4842_v7, %v2144_v25  ;;  %v2154_v44 = vor.u32 1.1754944e-38, %v2153_v29  ;;  %4572 = vmatmul.msk.f32.vlgmr.msra.gmra.mxu3 %vm1503_vm10, %v2255_v4  ;;  %vm2051_vm2 = vmor %vm2049_vm0, %vm2050_vm13  ;;  %v2056_v55 = vor.u32 1.1754944e-38, %v2055_v9  ;;  %v2067_v60 = vand.u32 2147483647, %v6198_v58 }
 0x455   :  { %v2047_v45 = vmul.f32 %v4844_v19, %v2046_v46  ;;  %4578 = vmatmul.msk.f32.vlgmr.msrb.gmra.mxu1 %vm1503_vm10, %v2261_v48  ;;  %v2069_v28 = vand.u32 2147483648, %v6198_v58  ;;  %vm2063_vm4 = vweird.f32 %v6198_v58  ;;  %vm2105_vm8 = vweird.f32 %v6205_v0 }
 0x456   :  { %v2146_v26 = vadd.f32 %v4842_v7, %v2145_v24  ;;  %vm2068_vm6 = vcmp.eq.f32.partialorder %v2067_v60, 8.507059e+37  ;;  %v2109_v3 = vand.u32 2147483647, %v6205_v0  ;;  %v2165_v53 = vand.u32 2147483647, %v6196_v41 }
 0x457   :  { %v4846_v57 = vpop.eup %4845  ;;  %v2048_v17 = vadd.f32 %v4844_v19, %v2047_v45  ;;  %v2070_v14 = vor.u32 1.1754944e-38, %v2069_v28  ;;  %v2168_v38 = vor.u32 1.1754944e-38, %v2167_v42 }
 0x458   :  { %v2059_v32 = vmul.f32 %v4846_v57, %v6198_v58  ;;  %v6219_v63 = vpop.xlane.xlu2 %1778  ;;  %v6221_v21 = vpop.eup %4847  ;;  %v2150_v2 = vsel %vm6223_vm14, %v4842_v7, %v2146_v26  ;;  %vm2064_vm3 = vweird.f32 %v4846_v57  ;;  %vm2110_vm12 = vcmp.eq.f32.partialorder %v2109_v3, 8.507059e+37 }
 0x459   :  { %4851 = vrcp.f32 %v6219_v63  ;;  %v6241_v1 = vpop.xlane.xlu0 %1766  ;;  %v4850_v36 = vpop.eup %4849  ;;  %v2155_v34 = vsel %vm6227_vm15, %v2154_v44, %v2150_v2  ;;  %v2052_v18 = vsel %vm2051_vm2, %v4844_v19, %v2048_v17  ;;  %v2157_v43 = vmul.f32 %v6221_v21, %v6196_v41  ;;  %vm2065_vm5 = vmor %vm2063_vm4, %vm2064_vm3 }
 0x45a   :  { %v2060_v50 = vsub.f32 1.0, %v2059_v32  ;;  %v2101_v35 = vmul.f32 %v4850_v36, %v6205_v0  ;;  %v2057_v54 = vsel %vm6232_vm1, %v2056_v55, %v2052_v18  ;;  %4853 = vrcp.f32 %v6241_v1 }
 0x45b   :  { %v2258_v47 = vmul.f32 %v6035_v51, %v2057_v54  ;;  %v2265_v5 = vmul.f32 %v6033_v49, %v2155_v34  ;;  %v2158_v15 = vsub.f32 1.0, %v2157_v43  ;;  %vm2106_vm7 = vweird.f32 %v4850_v36  ;;  %v3011_v54 = vld [vmem:[#allocation10 + $0x18] sm:$0xff] }
 0x45c   :  { %v2061_v16 = vmul.f32 %v4846_v57, %v2060_v50  ;;  %v2102_v61 = vsub.f32 1.0, %v2101_v35  ;;  %v2111_v49 = vand.u32 2147483648, %v6205_v0  ;;  %vm2107_vm11 = vmor %vm2105_vm8, %vm2106_vm7  ;;  %v2123_v24 = vand.u32 2147483647, %v6241_v1 }
 0x45d   :  { %4575 = vmatmul.msk.f32.vlgmr.msra.gmra.mxu2 %vm1503_vm10, %v2258_v47  ;;  %4582 = vmatmul.msk.f32.vlgmr.msra.gmra.mxu1 %vm1503_vm10, %v2265_v5  ;;  %v2159_v25 = vmul.f32 %v6221_v21, %v2158_v15  ;;  %v2125_v0 = vand.u32 2147483648, %v6241_v1  ;;  %vm2162_vm14 = vweird.f32 %v6221_v21  ;;  %vm2161_vm15 = vweird.f32 %v6196_v41  ;;  %v6310_v5 = vpop.f32.mrf.mxu0 }
 0x45e   :  { %v2062_v30 = vadd.f32 %v4846_v57, %v2061_v16  ;;  %v2103_v7 = vmul.f32 %v4850_v36, %v2102_v61  ;;  %v2112_v59 = vor.u32 1.1754944e-38, %v2111_v49  ;;  %vm2119_vm0 = vweird.f32 %v6241_v1  ;;  %vm6284_vm2 = vmor %vm2161_vm15, %vm2162_vm14  ;;  %v3009_v61 = vld [vmem:[#allocation10 + $0x8] sm:$0xff] }
 0x45f   :  { %v6257_v39 = vpop.eup %4851  ;;  %v2160_v48 = vadd.f32 %v6221_v21, %v2159_v25  ;;  %v2126_v44 = vor.u32 1.1754944e-38, %v2125_v0  ;;  %vm2124_vm4 = vcmp.eq.f32.partialorder %v2123_v24, 8.507059e+37  ;;  %v2179_v55 = vand.u32 2147483647, %v6219_v63 }
 0x460   :  { %v2066_v33 = vsel %vm2065_vm5, %v4846_v57, %v2062_v30  ;;  %v6259_v6 = vpop.xlane.xlu2 %1787  ;;  %v2171_v58 = vmul.f32 %v6257_v39, %v6219_v63  ;;  %v2104_v51 = vadd.f32 %v4850_v36, %v2103_v7  ;;  %v4854_v23 = vpop.eup %4853  ;;  %vm2176_vm3 = vweird.f32 %v6257_v39  ;;  %v3010_v30 = vld [vmem:[#allocation10 + $0x10] sm:$0xff] }
 0x461   :  { %v2071_v31 = vsel %vm2068_vm6, %v2070_v14, %v2066_v33  ;;  %v2115_v27 = vmul.f32 %v4854_v23, %v6241_v1  ;;  %vm2120_vm13 = vweird.f32 %v4854_v23  ;;  %v2164_v41 = vsel %vm6284_vm2, %v6221_v21, %v2160_v48  ;;  %v3008_v14 = vld [vmem:[#allocation10] sm:$0xff] }
 0x462   :  { %v2259_v19 = vmul.f32 %v6046_v62, %v2071_v31  ;;  %v2172_v20 = vsub.f32 1.0, %v2171_v58  ;;  %v2108_v22 = vsel %vm2107_vm11, %v4850_v36, %v2104_v51  ;;  %vm2121_vm1 = vmor %vm2119_vm0, %vm2120_vm13  ;;  %vm2175_vm5 = vweird.f32 %v6219_v63 }
 0x463   :  { %v2116_v29 = vsub.f32 1.0, %v2115_v27  ;;  %v2113_v46 = vsel %vm2110_vm12, %v2112_v59, %v2108_v22  ;;  %vm2166_vm6 = vcmp.eq.f32.partialorder %v2165_v53, 8.507059e+37  ;;  %vm2177_vm7 = vmor %vm2175_vm5, %vm2176_vm3  ;;  %vm2180_vm8 = vcmp.eq.f32.partialorder %v2179_v55, 8.507059e+37 }
 0x464   :  { %4576 = vmatmul.msk.f32.vlgmr.msrb.gmra.mxu3 %vm1503_vm10, %v2259_v19  ;;  %v2173_v62 = vmul.f32 %v6257_v39, %v2172_v20  ;;  %v2262_v12 = vmul.f32 %v6049_v56, %v2113_v46  ;;  %v2181_v56 = vand.u32 2147483648, %v6219_v63  ;;  %v2169_v18 = vsel %vm2166_vm6, %v2168_v38, %v2164_v41 }
 0x465   :  { %v2117_v57 = vmul.f32 %v4854_v23, %v2116_v29  ;;  %v2266_v43 = vmul.f32 %v6037_v10, %v2169_v18  ;;  %vm2217_vm11 = vweird.f32 %v6259_v6  ;;  %v2221_v27 = vand.u32 2147483647, %v6259_v6 }
 0x466   :  { %v2174_v17 = vadd.f32 %v6257_v39, %v2173_v62  ;;  %v2182_v35 = vor.u32 1.1754944e-38, %v2181_v56  ;;  %v2223_v42 = vand.u32 2147483648, %v6259_v6 }
 0x467   :  { %v2118_v45 = vadd.f32 %v4854_v23, %v2117_v57  ;;  %v6323_v57 = vpop.f32.mrf.mxu1 }
 0x468   :  { %v4698_v9 = vpop.permute.xlu1 %4697  ;;  %v6276_v4 = vpop.xlane.xlu2 %1790  ;;  %v2178_v21 = vsel %vm2177_vm7, %v6257_v39, %v2174_v17 }
 0x469   :  { %v4700_v26 = vunpack.i.h.bf16 %v4698_v9  ;;  %v4699_v32 = vunpack.i.l.bf16 %v4698_v9  ;;  %v2122_v50 = vsel %vm2121_vm1, %v4854_v23, %v2118_v45  ;;  %v2183_v63 = vsel %vm2180_vm8, %v2182_v35, %v2178_v21  ;;  %v6315_v23 = vpop.f32.mrf.mxu0 }
 0x46a   :  { %v2127_v36 = vsel %vm2124_vm4, %v2126_v44, %v2122_v50  ;;  %4855 = vrcp.f32 %v6276_v4  ;;  %v2237_v0 = vand.u32 2147483648, %v6276_v4  ;;  %vm2231_vm0 = vweird.f32 %v6276_v4 }
 0x46b   :  { %2819 = vmatpush.msra.mxu3 %v4700_v26  ;;  %2796 = vmatpush.msrb.mxu2 %v4699_v32  ;;  %v2263_v34 = vmul.f32 %v6056_v11, %v2127_v36  ;;  %v2267_v11 = vmul.f32 %v6059_v52, %v2183_v63  ;;  %4857 = vrcp.f32 %v6259_v6  ;;  %v2235_v48 = vand.u32 2147483647, %v6276_v4 }
 0x46c   :  { %v4703_v1 = vpop.permute.xlu0 %4702  ;;  %4579 = vmatmul.msk.f32.vlgmr.msrb.gmra.mxu2 %vm1503_vm10, %v2262_v12  ;;  %v2238_v44 = vor.u32 1.1754944e-38, %v2237_v0 }
 0x46d   :  { %v4705_v60 = vunpack.i.h.bf16 %v4703_v1  ;;  %v4704_v28 = vunpack.i.l.bf16 %v4703_v1  ;;  %4580 = vmatmul.msk.f32.vlgmr.msra.gmra.mxu3 %vm1503_vm10, %v2263_v34  ;;  %vm2236_vm7 = vcmp.eq.f32.partialorder %v2235_v48, 8.507059e+37 }
 0x46f   :  { %2888 = vmatpush.msra.mxu2 %v4704_v28  ;;  %2911 = vmatpush.msrb.mxu3 %v4705_v60  ;;  %v2407_v35 = vpop.f32.mrf.mxu1 }
 0x470   :  { %v719_v16 = vpop.permute.xlu2 %718  ;;  %v4856_v47 = vpop.eup %4855 }
 0x471   :  { %2934 = vmatpush.msrb.mxu0 %v719_v16  ;;  %v6308_v10 = vpop.eup %4857  ;;  %v2227_v39 = vmul.f32 %v4856_v47, %v6276_v4  ;;  %vm2232_vm13 = vweird.f32 %v4856_v47  ;;  %v2476_v17 = vpop.f32.mrf.mxu0 }
 0x472   :  { %v2213_v33 = vmul.f32 %v6308_v10, %v6259_v6  ;;  %vm2218_vm14 = vweird.f32 %v6308_v10  ;;  %vm6329_vm2 = vmor %vm2231_vm0, %vm2232_vm13  ;;  %v2224_v6 = vor.u32 1.1754944e-38, %v2223_v42 }
 0x473   :  { %3060 = vmatpush.msra.mxu0 %v3011_v54  ;;  %v2228_v15 = vsub.f32 1.0, %v2227_v39  ;;  %vm6339_vm5 = vmor %vm2217_vm11, %vm2218_vm14  ;;  %vm2222_vm11 = vcmp.eq.f32.partialorder %v2221_v27, 8.507059e+37  ;;  %v3020_v39 = vld [vmem:[#allocation10 + $0x60] sm:$0xff] }
 0x474   :  { %4583 = vmatmul.msk.f32.vlgmr.msra.gmra.mxu2 %vm1503_vm10, %v2266_v43  ;;  %v2214_v58 = vsub.f32 1.0, %v2213_v33  ;;  %v3012_v33 = vld [vmem:[#allocation10 + $0x20] sm:$0xff] }
 0x475   :  { %4584 = vmatmul.msk.f32.vlgmr.msrb.gmra.mxu3 %vm1503_vm10, %v2267_v11  ;;  %3061 = vmatpush.msra.mxu0 %v3010_v30  ;;  %v2229_v49 = vmul.f32 %v4856_v47, %v2228_v15 }
 0x476   :  { %v2215_v20 = vmul.f32 %v6308_v10, %v2214_v58 }
 0x477   :  { %3062 = vmatpush.msra.mxu0 %v3009_v61  ;;  %v2230_v24 = vadd.f32 %v4856_v47, %v2229_v49  ;;  %v3015_v61 = vld [vmem:[#allocation10 + $0x38] sm:$0xff]  ;;  %v2499_v15 = vpop.f32.mrf.mxu1 }
 0x478   :  { %v2216_v9 = vadd.f32 %v6308_v10, %v2215_v20 }
 0x479   :  { %3063 = vmatpush.msra.mxu0 %v3008_v14  ;;  %v2234_v38 = vsel %vm6329_vm2, %v4856_v47, %v2230_v24  ;;  %v3022_v14 = vld [vmem:[#allocation10 + $0x70] sm:$0xff] }
 0x47a   :  { %v2220_v56 = vsel %vm6339_vm5, %v6308_v10, %v2216_v9  ;;  %v2239_v36 = vsel %vm2236_vm7, %v2238_v44, %v2234_v38  ;;  %v3014_v47 = vld [vmem:[#allocation10 + $0x30] sm:$0xff] }
 0x47b   :  { %v2225_v28 = vsel %vm2222_vm11, %v2224_v6, %v2220_v56  ;;  %v2271_v34 = vmul.f32 %v6075_v13, %v2239_v36  ;;  %v3019_v13 = vld [vmem:[#allocation10 + $0x58] sm:$0xff]  ;;  %v3018_v10 = vld [vmem:[#allocation10 + $0x50] sm:$0xff] }
 0x47c   :  { %v2270_v30 = vmul.f32 %v6068_v40, %v2225_v28  ;;  %v3017_v40 = vld [vmem:[#allocation10 + $0x48] sm:$0xff] }
 0x493   :  { %v1782_v52 = vpop.xlane.xlu1 %1781 }
 0x494   :  { %4859 = vrcp.f32 %v1782_v52  ;;  %v2195_v25 = vand.u32 2147483648, %v1782_v52  ;;  %v2193_v59 = vand.u32 2147483647, %v1782_v52  ;;  %vm2189_vm15 = vweird.f32 %v1782_v52 }
 0x496   :  { %v2196_v26 = vor.u32 1.1754944e-38, %v2195_v25  ;;  %vm2194_vm3 = vcmp.eq.f32.partialorder %v2193_v59, 8.507059e+37 }
 0x497   :  { %v1785_v7 = vpop.xlane.xlu0 %1784 }
 0x498   :  { %4861 = vrcp.f32 %v1785_v7  ;;  %v2209_v2 = vand.u32 2147483648, %v1785_v7  ;;  %vm2203_vm6 = vweird.f32 %v1785_v7  ;;  %v2207_v1 = vand.u32 2147483647, %v1785_v7 }
 0x49a   :  { %v4860_v31 = vpop.eup %4859  ;;  %v2210_v60 = vor.u32 1.1754944e-38, %v2209_v2 }
 0x49b   :  { %v2185_v51 = vmul.f32 %v4860_v31, %v1782_v52  ;;  %vm2190_vm12 = vweird.f32 %v4860_v31  ;;  %v3021_v52 = vld [vmem:[#allocation10 + $0x68] sm:$0xff] }
 0x49c   :  { %vm2191_vm1 = vmor %vm2189_vm15, %vm2190_vm12  ;;  %vm2208_vm12 = vcmp.eq.f32.partialorder %v2207_v1, 8.507059e+37  ;;  %v4911_v1 = vld [vmem:[#allocation2] sm:$0xff] }
 0x49d   :  { %v2186_v3 = vsub.f32 1.0, %v2185_v51  ;;  %v2361_v51 = vpop.f32.mrf.mxu3 }
 0x49e   :  { %v4862_v19 = vpop.eup %4861 }
 0x49f   :  { %v2187_v22 = vmul.f32 %v4860_v31, %v2186_v3  ;;  %v2199_v29 = vmul.f32 %v4862_v19, %v1785_v7  ;;  %vm2204_vm4 = vweird.f32 %v4862_v19  ;;  %v2338_v7 = vpop.f32.mrf.mxu2 }
 0x4a0   :  { %vm2205_vm8 = vmor %vm2203_vm6, %vm2204_vm4 }
 0x4a1   :  { %v2188_v46 = vadd.f32 %v4860_v31, %v2187_v22  ;;  %v2200_v62 = vsub.f32 1.0, %v2199_v29 }
 0x4a3   :  { %v2192_v32 = vsel %vm2191_vm1, %v4860_v31, %v2188_v46  ;;  %v2201_v53 = vmul.f32 %v4862_v19, %v2200_v62  ;;  %v3016_v31 = vld [vmem:[#allocation10 + $0x40] sm:$0xff] }
 0x4a4   :  { %v2197_v12 = vsel %vm2194_vm3, %v2196_v26, %v2192_v32 }
 0x4a5   :  { %v2202_v50 = vadd.f32 %v4862_v19, %v2201_v53  ;;  %v2268_v41 = vmul.f32 %v6096_v37, %v2197_v12  ;;  %v3023_v37 = vld [vmem:[#allocation10 + $0x78] sm:$0xff]  ;;  %v2453_v20 = vpop.f32.mrf.mxu3 }
 0x4a7   :  { %v2206_v55 = vsel %vm2205_vm8, %v4862_v19, %v2202_v50  ;;  %4585 = vmatmul.msk.f32.vlgmr.msrb.gmra.mxu0 %vm1503_vm10, %v2268_v41  ;;  %v2430_v49 = vpop.f32.mrf.mxu2  ;;  %v6389_v50 = vld [vmem:[#allocation11] ss:$0 sm:$0xff] }
 0x4a8   :  { %v2211_v18 = vsel %vm2208_vm12, %v2210_v60, %v2206_v55 }
 0x4a9   :  { %v2568_v11 = vpop.f32.mrf.mxu0  ;;  %v2269_v54 = vmul.f32 %v6098_v8, %v2211_v18  ;;  %v3013_v8 = vld [vmem:[#allocation10 + $0x28] sm:$0xff] }
 0x4aa   :  { %v725_v21 = vpop.permute.xlu0 %724 }
 0x4ab   :  { %3003 = vmatpush.msra.mxu3 %v725_v21  ;;  %v4708_v16 = vpop.permute.xlu1 %4707  ;;  %v4912_v21 = vld [vmem:[#allocation2 + $0x8] sm:$0xff] }
 0x4ac   :  { %v4710_v63 = vunpack.i.h.bf16 %v4708_v16  ;;  %v4709_v43 = vunpack.i.l.bf16 %v4708_v16  ;;  %4588 = vmatmul.msk.f32.vlgmr.msra.gmra.mxu3 %vm1503_vm10, %v2271_v34 }
 0x4ad   :  { %3255 = vmatpush.msrb.mxu3 %v3023_v37  ;;  %v2545_v25 = vpop.f32.mrf.mxu3 }
 0x4ae   :  { %2957 = vmatpush.msrb.mxu1 %v4709_v43  ;;  %2980 = vmatpush.msrb.mxu2 %v4710_v63 }
 0x4af   :  { %4586 = vmatmul.msk.f32.vlgmr.msrb.gmra.mxu1 %vm1503_vm10, %v2269_v54  ;;  %4587 = vmatmul.msk.f32.vlgmr.msrb.gmra.mxu2 %vm1503_vm10, %v2270_v30  ;;  %v2522_v27 = vpop.f32.mrf.mxu2 }
 0x4b0   :  { %4589 = vmatmul.msk.f32.vlgmr.msra.gmra.mxu0 %vm734_vm9, %v6310_v5  ;;  %3125 = vmatpush.msra.mxu1 %v3015_v61 }
 0x4b1   :  { %3190 = vmatpush.msra.mxu2 %v3019_v13  ;;  %3256 = vmatpush.msrb.mxu3 %v3022_v14  ;;  %v2660_v5 = vpop.f32.mrf.mxu0  ;;  %v4913_v14 = vld [vmem:[#allocation2 + $0x10] sm:$0xff] }
 0x4b2   :  { %3126 = vmatpush.msra.mxu1 %v3014_v47 }
 0x4b3   :  { %3191 = vmatpush.msra.mxu2 %v3018_v10  ;;  %3257 = vmatpush.msrb.mxu3 %v3021_v52 }
 0x4b4   :  { %3127 = vmatpush.msra.mxu1 %v3013_v8 }
 0x4b5   :  { %3192 = vmatpush.msra.mxu2 %v3017_v40  ;;  %3258 = vmatpush.msrb.mxu3 %v3020_v39 }
 0x4b6   :  { %3128 = vmatpush.msra.mxu1 %v3012_v33 }
 0x4b7   :  { %3193 = vmatpush.msra.mxu2 %v3016_v31  ;;  %4597 = vmatmul.msk.f32.vlgmr.msra.gmra.mxu1 %vm734_vm9, %v2476_v17 }
 0x4b8   :  { %4590 = vmatmul.msk.f32.gmra.mxu0 %vm734_vm9, %v6323_v57  ;;  %4605 = vmatmul.msk.f32.vlgmr.msra.gmra.mxu2 %vm734_vm9, %v2660_v5 }
 0x4b9   :  { %v2591_v58 = vpop.f32.mrf.mxu1 }
 0x4bf   :  { %4598 = vmatmul.msk.f32.gmra.mxu1 %vm734_vm9, %v2499_v15  ;;  %v4914_v15 = vld [vmem:[#allocation2 + $0x18] sm:$0xff] }
 0x4c0   :  { %4591 = vmatmul.msk.f32.gmra.mxu0 %vm734_vm9, %v2338_v7 }
 0x4c1   :  { %v2683_v3 = vpop.f32.mrf.mxu1  ;;  %v2752_v19 = vpop.f32.mrf.mxu0 }
 0x4c2   :  { %4606 = vmatmul.msk.f32.gmra.mxu2 %vm734_vm9, %v2683_v3 }
 0x4c7   :  { %4599 = vmatmul.msk.f32.gmra.mxu1 %vm734_vm9, %v2522_v27 }
 0x4c8   :  { %4592 = vmatmul.msk.f32.gmra.mxu0 %vm734_vm9, %v2361_v51 }
 0x4ca   :  { %v2844_v22 = vpop.f32.mrf.mxu0 }
 0x4cb   :  { %4613 = vmatmul.msk.f32.vlgmr.msrb.gmra.mxu3 %vm734_vm9, %v2844_v22 }
 0x4cf   :  { %4600 = vmatmul.msk.f32.gmra.mxu1 %vm734_vm9, %v2545_v25 }
 0x4d0   :  { %4593 = vmatmul.msk.f32.gmra.mxu0 %vm734_vm9, %v6315_v23  ;;  %v2614_v29 = vpop.f32.mrf.mxu2 }
 0x4d2   :  { %v2775_v59 = vpop.f32.mrf.mxu1 }
 0x4d7   :  { %4601 = vmatmul.msk.f32.gmra.mxu1 %vm734_vm9, %v2568_v11  ;;  %v2637_v24 = vpop.f32.mrf.mxu3 }
 0x4d8   :  { %4594 = vmatmul.msk.f32.gmra.mxu0 %vm734_vm9, %v2407_v35 }
 0x4da   :  { %v2867_v42 = vpop.f32.mrf.mxu1 }
 0x4db   :  { %4614 = vmatmul.msk.f32.gmra.mxu3 %vm734_vm9, %v2867_v42 }
 0x4df   :  { %4602 = vmatmul.msk.f32.gmra.mxu1 %vm734_vm9, %v2591_v58 }
 0x4e0   :  { %4595 = vmatmul.msk.f32.gmra.mxu0 %vm734_vm9, %v2430_v49  ;;  %v2706_v0 = vpop.f32.mrf.mxu2 }
 0x4e1   :  { %4607 = vmatmul.msk.f32.gmra.mxu2 %vm734_vm9, %v2706_v0 }
 0x4e7   :  { %4603 = vmatmul.msk.f32.gmra.mxu1 %vm734_vm9, %v2614_v29  ;;  %v2729_v23 = vpop.f32.mrf.mxu3  ;;  %v4915_v29 = vld [vmem:[#allocation2 + $0x20] sm:$0xff] }
 0x4e8   :  { %4596 = vmatmul.msk.f32.gmra.mxu0 %vm734_vm9, %v2453_v20 }
 0x4e9   :  { %4608 = vmatmul.msk.f32.gmra.mxu2 %vm734_vm9, %v2729_v23 }
 0x4ef   :  { %4604 = vmatmul.msk.f32.gmra.mxu1 %vm734_vm9, %v2637_v24  ;;  %v2798_v46 = vpop.f32.mrf.mxu2 }
 0x4f0   :  { %v2821_v62 = vpop.f32.mrf.mxu3 }
 0x4f1   :  { %4609 = vmatmul.msk.f32.gmra.mxu2 %vm734_vm9, %v2752_v19 }
 0x4f7   :  { %v2890_v57 = vpop.f32.mrf.mxu2 }
 0x4f8   :  { %4615 = vmatmul.msk.f32.gmra.mxu3 %vm734_vm9, %v2890_v57  ;;  %v2913_v9 = vpop.f32.mrf.mxu3 }
 0x4f9   :  { %4610 = vmatmul.msk.f32.gmra.mxu2 %vm734_vm9, %v2775_v59 }
 0x500   :  { %4616 = vmatmul.msk.f32.gmra.mxu3 %vm734_vm9, %v2913_v9  ;;  %v4916_v9 = vld [vmem:[#allocation2 + $0x28] sm:$0xff] }
 0x501   :  { %4611 = vmatmul.msk.f32.gmra.mxu2 %vm734_vm9, %v2798_v46 }
 0x509   :  { %4612 = vmatmul.msk.f32.gmra.mxu2 %vm734_vm9, %v2821_v62 }
 0x524   :  { %v2936_v48 = vpop.f32.mrf.mxu0 }
 0x525   :  { %4617 = vmatmul.msk.f32.gmra.mxu3 %vm734_vm9, %v2936_v48 }
 0x52c   :  { %v2959_v26 = vpop.f32.mrf.mxu1 }
 0x52d   :  { %4618 = vmatmul.msk.f32.gmra.mxu3 %vm734_vm9, %v2959_v26  ;;  %v3065_v38 = vpop.f32.mrf.mxu0 }
 0x52f   :  { %v3005_v32 = vpop.f32.mrf.mxu3 }
 0x532   :  { %v2982_v45 = vpop.f32.mrf.mxu2 }
 0x534   :  { %v3130_v53 = vpop.f32.mrf.mxu1 }
 0x535   :  { %4619 = vmatmul.msk.f32.gmra.mxu3 %vm734_vm9, %v2982_v45  ;;  %v3284_v12 = vadd.f32 %v3130_v53, %v3065_v38  ;;  %v3068_v55 = vpop.f32.mrf.mxu0 }
 0x53b   :  { %v3195_v44 = vpop.f32.mrf.mxu2 }
 0x53c   :  { %v3285_v2 = vadd.f32 %v3284_v12, %v3195_v44  ;;  %v3133_v36 = vpop.f32.mrf.mxu1 }
 0x53d   :  { %4620 = vmatmul.msk.f32.gmra.mxu3 %vm734_vm9, %v3005_v32  ;;  %v3287_v60 = vadd.f32 %v3133_v36, %v3068_v55  ;;  %v3071_v63 = vpop.f32.mrf.mxu0 }
 0x544   :  { %v3136_v35 = vpop.f32.mrf.mxu1 }
 0x545   :  { %v3198_v6 = vpop.f32.mrf.mxu2  ;;  %v3290_v11 = vadd.f32 %v3136_v35, %v3071_v63  ;;  %v3074_v10 = vpop.f32.mrf.mxu0  ;;  %v4918_v63 = vld [vmem:[#allocation2 + $0x38] sm:$0xff] }
 0x546   :  { %v3288_v28 = vadd.f32 %v3287_v60, %v3198_v6  ;;  %v7305_v60 = vld [vmem:[#allocation23_spill] sm:$0xff] }
 0x54c   :  { %v3139_v13 = vpop.f32.mrf.mxu1 }
 0x54d   :  { %v3293_v8 = vadd.f32 %v3139_v13, %v3074_v10  ;;  %v3077_v51 = vpop.f32.mrf.mxu0 }
 0x54e   :  { %v3260_v4 = vpop.f32.mrf.mxu3 }
 0x54f   :  { %v3286_v17 = vadd.f32 %v3285_v2, %v3260_v4  ;;  %v4917_v2 = vld [vmem:[#allocation2 + $0x30] sm:$0xff] }
 0x551   :  { %v3308_v41 = vadd.f32 %v4911_v1, %v3286_v17 }
 0x553   :  { %v6392_v56 = vadd.f32 %v6389_v50, %v3308_v41 }
 0x554   :  { %v3142_v58 = vpop.f32.mrf.mxu1 }
 0x555   :  { %3330 = vadd.xlane.f32.xlu2 %v6392_v56  ;;  %v3296_v3 = vadd.f32 %v3142_v58, %v3077_v51  ;;  %v3080_v22 = vpop.f32.mrf.mxu0  ;;  %v3541_v58 = vld [vmem:[#allocation13 + $0xe8] sm:$0xff] }
 0x55c   :  { %v3145_v20 = vpop.f32.mrf.mxu1 }
 0x55d   :  { %v3299_v24 = vadd.f32 %v3145_v20, %v3080_v22  ;;  %v3083_v26 = vpop.f32.mrf.mxu0  ;;  %v3538_v20 = vld [vmem:[#allocation13 + $0xd0] sm:$0xff]  ;;  %v3536_v22 = vld [vmem:[#allocation13 + $0xc0] sm:$0xff] }
 0x55e   :  { %v3263_v34 = vpop.f32.mrf.mxu3 }
 0x55f   :  { %v3289_v18 = vadd.f32 %v3288_v28, %v3263_v34 }
 0x561   :  { %v3309_v37 = vadd.f32 %v4912_v21, %v3289_v18 }
 0x563   :  { %v6396_v16 = vadd.f32 %v6389_v50, %v3309_v37 }
 0x564   :  { %v3201_v43 = vpop.f32.mrf.mxu2  ;;  %v3148_v57 = vpop.f32.mrf.mxu1 }
 0x565   :  { %3332 = vadd.xlane.f32.xlu0 %v6396_v16  ;;  %v3291_v54 = vadd.f32 %v3290_v11, %v3201_v43  ;;  %v3302_v32 = vadd.f32 %v3148_v57, %v3083_v26  ;;  %v3086_v41 = vpop.f32.mrf.mxu0 }
 0x56c   :  { %v3204_v52 = vpop.f32.mrf.mxu2  ;;  %v3151_v1 = vpop.f32.mrf.mxu1 }
 0x56d   :  { %v3294_v39 = vadd.f32 %v3293_v8, %v3204_v52  ;;  %v3305_v6 = vadd.f32 %v3151_v1, %v3086_v41  ;;  %v3525_v1 = vld [vmem:[#allocation13 + $0x68] sm:$0xff] }
 0x574   :  { %v3207_v49 = vpop.f32.mrf.mxu2 }
 0x575   :  { %v3297_v19 = vadd.f32 %v3296_v3, %v3207_v49 }
 0x57b   :  { %v3266_v30 = vpop.f32.mrf.mxu3 }
 0x57c   :  { %v3292_v61 = vadd.f32 %v3291_v54, %v3266_v30  ;;  %v3210_v59 = vpop.f32.mrf.mxu2 }
 0x57d   :  { %v3300_v23 = vadd.f32 %v3299_v24, %v3210_v59  ;;  %v3537_v59 = vld [vmem:[#allocation13 + $0xc8] sm:$0xff]  ;;  %v3535_v24 = vld [vmem:[#allocation13 + $0xb8] sm:$0xff] }
 0x57e   :  { %v3310_v47 = vadd.f32 %v4913_v14, %v3292_v61 }
 0x580   :  { %v6400_v40 = vadd.f32 %v6389_v50, %v3310_v47 }
 0x582   :  { %3334 = vadd.xlane.f32.xlu1 %v6400_v40 }
 0x583   :  { %v3269_v33 = vpop.f32.mrf.mxu3 }
 0x584   :  { %v3295_v7 = vadd.f32 %v3294_v39, %v3269_v33  ;;  %v3213_v45 = vpop.f32.mrf.mxu2 }
 0x585   :  { %v3303_v38 = vadd.f32 %v3302_v32, %v3213_v45  ;;  %v3528_v45 = vld [vmem:[#allocation13 + $0x80] sm:$0xff]  ;;  %v3529_v32 = vld [vmem:[#allocation13 + $0x88] sm:$0xff] }
 0x586   :  { %v3311_v31 = vadd.f32 %v4914_v15, %v3295_v7  ;;  %v3542_v7 = vld [vmem:[#allocation13 + $0xf0] sm:$0xff]  ;;  %v3543_v15 = vld [vmem:[#allocation13 + $0xf8] sm:$0xff] }
 0x587   :  { %3550 = vmatpush.msrb.mxu0 %v3542_v7  ;;  %3591 = vmatpush.msrb.mxu1 %v3543_v15 }
 0x588   :  { %v6404_v5 = vadd.f32 %v6389_v50, %v3311_v31  ;;  %v3540_v31 = vld [vmem:[#allocation13 + $0xe0] sm:$0xff] }
 0x589   :  { %3551 = vmatpush.msrb.mxu0 %v3540_v31  ;;  %3592 = vmatpush.msrb.mxu1 %v3541_v58 }
 0x58a   :  { %3336 = vadd.xlane.f32.xlu2 %v6404_v5 }
 0x58b   :  { %3552 = vmatpush.msrb.mxu0 %v3538_v20 }
 0x58c   :  { %v3216_v36 = vpop.f32.mrf.mxu2 }
 0x58d   :  { %v3306_v18 = vadd.f32 %v3305_v6, %v3216_v36  ;;  %3553 = vmatpush.msrb.mxu0 %v3536_v22  ;;  %v3522_v36 = vld [vmem:[#allocation13 + $0x50] sm:$0xff]  ;;  %v3520_v6 = vld [vmem:[#allocation13 + $0x40] sm:$0xff] }
 0x5a8   :  { %v3272_v27 = vpop.f32.mrf.mxu3 }
 0x5a9   :  { %v3298_v25 = vadd.f32 %v3297_v19, %v3272_v27  ;;  %v3539_v27 = vld [vmem:[#allocation13 + $0xd8] sm:$0xff] }
 0x5aa   :  { %3593 = vmatpush.msrb.mxu1 %v3539_v27 }
 0x5ab   :  { %v3312_v42 = vadd.f32 %v4915_v29, %v3298_v25 }
 0x5ac   :  { %3594 = vmatpush.msrb.mxu1 %v3537_v59 }
 0x5ad   :  { %v6408_v0 = vadd.f32 %v6389_v50, %v3312_v42  ;;  %v3534_v42 = vld [vmem:[#allocation13 + $0xb0] sm:$0xff] }
 0x5ae   :  { %3554 = vmatpush.msrb.mxu0 %v3534_v42  ;;  %3595 = vmatpush.msrb.mxu1 %v3535_v24 }
 0x5af   :  { %3338 = vadd.xlane.f32.xlu2 %v6408_v0 }
 0x5b0   :  { %v3275_v46 = vpop.f32.mrf.mxu3 }
 0x5b1   :  { %v3301_v62 = vadd.f32 %v3300_v23, %v3275_v46  ;;  %v3532_v46 = vld [vmem:[#allocation13 + $0xa0] sm:$0xff] }
 0x5b2   :  { %3555 = vmatpush.msrb.mxu0 %v3532_v46 }
 0x5b3   :  { %v3313_v48 = vadd.f32 %v4916_v9, %v3301_v62  ;;  %v3533_v62 = vld [vmem:[#allocation13 + $0xa8] sm:$0xff]  ;;  %v3530_v9 = vld [vmem:[#allocation13 + $0x90] sm:$0xff] }
 0x5b4   :  { %3596 = vmatpush.msrb.mxu1 %v3533_v62  ;;  %3556 = vmatpush.msrb.mxu0 %v3530_v9 }
 0x5b5   :  { %v6412_v53 = vadd.f32 %v6389_v50, %v3313_v48  ;;  %v3531_v48 = vld [vmem:[#allocation13 + $0x98] sm:$0xff] }
 0x5b6   :  { %3597 = vmatpush.msrb.mxu1 %v3531_v48  ;;  %3557 = vmatpush.msrb.mxu0 %v3528_v45 }
 0x5b7   :  { %3340 = vadd.xlane.f32.xlu2 %v6412_v53 }
 0x5b8   :  { %v3278_v44 = vpop.f32.mrf.mxu3  ;;  %3598 = vmatpush.msrb.mxu1 %v3529_v32 }
 0x5b9   :  { %v3304_v12 = vadd.f32 %v3303_v38, %v3278_v44  ;;  %v3526_v44 = vld [vmem:[#allocation13 + $0x70] sm:$0xff] }
 0x5ba   :  { %3558 = vmatpush.msrb.mxu0 %v3526_v44 }
 0x5bb   :  { %v3314_v4 = vadd.f32 %v4917_v2, %v3304_v12  ;;  %v3527_v12 = vld [vmem:[#allocation13 + $0x78] sm:$0xff] }
 0x5bc   :  { %3599 = vmatpush.msrb.mxu1 %v3527_v12 }
 0x5bd   :  { %v6416_v17 = vadd.f32 %v6389_v50, %v3314_v4  ;;  %v3524_v4 = vld [vmem:[#allocation13 + $0x60] sm:$0xff] }
 0x5be   :  { %3559 = vmatpush.msrb.mxu0 %v3524_v4  ;;  %3600 = vmatpush.msrb.mxu1 %v3525_v1 }
 0x5bf   :  { %3342 = vadd.xlane.f32.xlu1 %v6416_v17 }
 0x5c0   :  { %v3281_v34 = vpop.f32.mrf.mxu3  ;;  %3560 = vmatpush.msrb.mxu0 %v3522_v36 }
 0x5c1   :  { %v3307_v37 = vadd.f32 %v3306_v18, %v3281_v34  ;;  %v3518_v34 = vld [vmem:[#allocation13 + $0x30] sm:$0xff]  ;;  %v3519_v18 = vld [vmem:[#allocation13 + $0x38] sm:$0xff] }
 0x5c2   :  { %3561 = vmatpush.msrb.mxu0 %v3520_v6 }
 0x5c3   :  { %v3315_v43 = vadd.f32 %v4918_v63, %v3307_v37  ;;  %v3516_v37 = vld [vmem:[#allocation13 + $0x20] sm:$0xff]  ;;  %v3514_v63 = vld [vmem:[#allocation13 + $0x10] sm:$0xff] }
 0x5c4   :  { %3562 = vmatpush.msrb.mxu0 %v3518_v34 }
 0x5c5   :  { %v6426_v11 = vadd.f32 %v6389_v50, %v3315_v43  ;;  %v3515_v43 = vld [vmem:[#allocation13 + $0x18] sm:$0xff] }
 0x5c6   :  { %3563 = vmatpush.msrb.mxu0 %v3516_v37 }
 0x5c8   :  { %v3331_v55 = vpop.xlane.xlu2 %3330  ;;  %3564 = vmatpush.msrb.mxu0 %v3514_v63 }
 0x5c9   :  { %v3346_v28 = vmul.f32 %v3331_v55, %v7305_v60  ;;  %v3523_v55 = vld [vmem:[#allocation13 + $0x58] sm:$0xff] }
 0x5ca   :  { %3601 = vmatpush.msrb.mxu1 %v3523_v55 }
 0x5cb   :  { %v6421_v21 = vsub.f32 %v6392_v56, %v3346_v28  ;;  %v3521_v28 = vld [vmem:[#allocation13 + $0x48] sm:$0xff] }
 0x5cc   :  { %3602 = vmatpush.msrb.mxu1 %v3521_v28 }
 0x5cd   :  { %v3362_v35 = vmul.f32 %v6421_v21, %v6421_v21 }
 0x5ce   :  { %3603 = vmatpush.msrb.mxu1 %v3519_v18 }
 0x5cf   :  { %3370 = vadd.xlane.f32.xlu0 %v3362_v35  ;;  %v3517_v35 = vld [vmem:[#allocation13 + $0x28] sm:$0xff] }
 0x5d0   :  { %3604 = vmatpush.msrb.mxu1 %v3517_v35 }
 0x5d2   :  { %3605 = vmatpush.msrb.mxu1 %v3515_v43 }
 0x5d7   :  { %3344 = vadd.xlane.f32.xlu0 %v6426_v11 }
 0x5d8   :  { %v3333_v54 = vpop.xlane.xlu0 %3332 }
 0x5d9   :  { %v3347_v30 = vmul.f32 %v3333_v54, %v7305_v60  ;;  %v3512_v54 = vld [vmem:[#allocation13] sm:$0xff] }
 0x5da   :  { %3565 = vmatpush.msrb.mxu0 %v3512_v54 }
 0x5db   :  { %v6431_v61 = vsub.f32 %v6396_v16, %v3347_v30  ;;  %v3513_v30 = vld [vmem:[#allocation13 + $0x8] sm:$0xff] }
 0x5dc   :  { %3606 = vmatpush.msrb.mxu1 %v3513_v30 }
 0x5dd   :  { %v3363_v13 = vmul.f32 %v6431_v61, %v6431_v61 }
 0x5df   :  { %3372 = vadd.xlane.f32.xlu2 %v3363_v13 }
 0x5f5   :  { %v3335_v14 = vpop.xlane.xlu1 %3334 }
 0x5f6   :  { %v3348_v47 = vmul.f32 %v3335_v14, %v7305_v60 }
 0x5f8   :  { %v6437_v10 = vsub.f32 %v6400_v40, %v3348_v47 }
 0x5fa   :  { %v3364_v50 = vmul.f32 %v6437_v10, %v6437_v10 }
 0x5fc   :  { %3374 = vadd.xlane.f32.xlu1 %v3364_v50 }
 0x5fd   :  { %v3337_v52 = vpop.xlane.xlu2 %3336 }
 0x5fe   :  { %v3349_v8 = vmul.f32 %v3337_v52, %v7305_v60 }
 0x600   :  { %v6443_v39 = vsub.f32 %v6404_v5, %v3349_v8 }
 0x602   :  { %v3365_v33 = vmul.f32 %v6443_v39, %v6443_v39 }
 0x604   :  { %3376 = vadd.xlane.f32.xlu2 %v3365_v33 }
 0x622   :  { %v3339_v51 = vpop.xlane.xlu2 %3338 }
 0x623   :  { %v3350_v49 = vmul.f32 %v3339_v51, %v7305_v60 }
 0x625   :  { %v6449_v3 = vsub.f32 %v6408_v0, %v3350_v49 }
 0x627   :  { %v3366_v19 = vmul.f32 %v6449_v3, %v6449_v3 }
 0x629   :  { %3378 = vadd.xlane.f32.xlu0 %v3366_v19 }
 0x62a   :  { %v3341_v25 = vpop.xlane.xlu2 %3340 }
 0x62b   :  { %v3351_v29 = vmul.f32 %v3341_v25, %v7305_v60  ;;  %v6476_v25 = vld [vmem:[%s7236_s7] ss:$0 sm:$0xff] }
 0x62d   :  { %v6455_v23 = vsub.f32 %v6412_v53, %v3351_v29  ;;  %v6482_v29 = vld [vmem:[%s7237_s8] ss:$0 sm:$0xff] }
 0x62f   :  { %v3367_v57 = vmul.f32 %v6455_v23, %v6455_v23 }
 0x631   :  { %3380 = vadd.xlane.f32.xlu1 %v3367_v57 }
 0x632   :  { %v3343_v26 = vpop.xlane.xlu1 %3342 }
 0x633   :  { %v3352_v38 = vmul.f32 %v3343_v26, %v7305_v60 }
 0x635   :  { %v6461_v2 = vsub.f32 %v6416_v17, %v3352_v38 }
 0x637   :  { %v3368_v41 = vmul.f32 %v6461_v2, %v6461_v2 }
 0x639   :  { %3382 = vadd.xlane.f32.xlu2 %v3368_v41 }
 0x642   :  { %v3371_v13 = vpop.xlane.xlu0 %3370 }
 0x643   :  { %v3386_v14 = vmul.f32 %v3371_v13, %v7305_v60 }
 0x645   :  { %v3394_v47 = vadd.f32 1e-05, %v3386_v14 }
 0x647   :  { %4863 = vrsqrt.f32 %v3394_v47  ;;  %vm3408_vm10 = vweird.f32 %v3394_v47 }
 0x64a   :  { %v3345_v50 = vpop.xlane.xlu0 %3344 }
 0x64b   :  { %v3353_v52 = vmul.f32 %v3345_v50, %v7305_v60 }
 0x64d   :  { %v4864_v8 = vpop.eup %4863  ;;  %v6468_v33 = vsub.f32 %v6426_v11, %v3353_v52 }
 0x64e   :  { %v3403_v7 = vmul.f32 %v4864_v8, %v3394_v47  ;;  %vm3409_vm9 = vweird.f32 %v4864_v8 }
 0x64f   :  { %v3369_v15 = vmul.f32 %v6468_v33, %v6468_v33  ;;  %vm3410_vm13 = vmor %vm3408_vm10, %vm3409_vm9 }
 0x650   :  { %v3404_v31 = vmul.f32 %v4864_v8, %v3403_v7 }
 0x651   :  { %3384 = vadd.xlane.f32.xlu0 %v3369_v15 }
 0x652   :  { %v3405_v58 = vmul.f32 0.5, %v3404_v31  ;;  %v3373_v51 = vpop.xlane.xlu2 %3372 }
 0x653   :  { %v3387_v49 = vmul.f32 %v3373_v51, %v7305_v60 }
 0x654   :  { %v3406_v19 = vsub.f32 1.5, %v3405_v58 }
 0x655   :  { %v3395_v20 = vadd.f32 1e-05, %v3387_v49 }
 0x656   :  { %v3407_v27 = vmul.f32 %v4864_v8, %v3406_v19 }
 0x657   :  { %4865 = vrsqrt.f32 %v3395_v20  ;;  %vm3418_vm15 = vweird.f32 %v3395_v20 }
 0x658   :  { %v3411_v22 = vsel %vm3410_vm13, %v4864_v8, %v3407_v27 }
 0x659   :  { %v3482_v59 = vmul.f32 %v3411_v22, %v6421_v21 }
 0x65b   :  { %v3493_v42 = vmul.f32 %v6476_v25, %v3482_v59 }
 0x65d   :  { %v4866_v24 = vpop.eup %4865  ;;  %v3504_v46 = vadd.f32 %v6482_v29, %v3493_v42 }
 0x65e   :  { %v3413_v62 = vmul.f32 %v4866_v24, %v3395_v20  ;;  %vm3419_vm14 = vweird.f32 %v4866_v24 }
 0x65f   :  { %3566 = vmatmul.f32.vlgmr.msrb.gmra.mxu0 %v3504_v46  ;;  %3607 = vmatmul.f32.vlgmr.msrb.gmra.mxu1 %v3504_v46  ;;  %vm3420_vm0 = vmor %vm3418_vm15, %vm3419_vm14 }
 0x660   :  { %v3414_v57 = vmul.f32 %v4866_v24, %v3413_v62 }
 0x662   :  { %v3415_v9 = vmul.f32 0.5, %v3414_v57 }
 0x664   :  { %v3416_v48 = vsub.f32 1.5, %v3415_v9 }
 0x666   :  { %v3417_v26 = vmul.f32 %v4866_v24, %v3416_v48 }
 0x668   :  { %v3421_v21 = vsel %vm3420_vm0, %v4866_v24, %v3417_v26 }
 0x669   :  { %v3483_v45 = vmul.f32 %v3421_v21, %v6431_v61 }
 0x66b   :  { %v3494_v32 = vmul.f32 %v6476_v25, %v3483_v45 }
 0x66d   :  { %v3505_v44 = vadd.f32 %v6482_v29, %v3494_v32 }
 0x66f   :  { %v3375_v38 = vpop.xlane.xlu1 %3374  ;;  %3569 = vmatmul.f32.gmra.mxu0 %v3505_v44  ;;  %3610 = vmatmul.f32.gmra.mxu1 %v3505_v44 }
 0x670   :  { %v3388_v12 = vmul.f32 %v3375_v38, %v7305_v60 }
 0x672   :  { %v3396_v4 = vadd.f32 1e-05, %v3388_v12 }
 0x674   :  { %4867 = vrsqrt.f32 %v3396_v4  ;;  %vm3428_vm2 = vweird.f32 %v3396_v4 }
 0x677   :  { %v3377_v1 = vpop.xlane.xlu2 %3376 }
 0x678   :  { %v3389_v41 = vmul.f32 %v3377_v1, %v7305_v60 }
 0x67a   :  { %v4868_v36 = vpop.eup %4867  ;;  %v3397_v55 = vadd.f32 1e-05, %v3389_v41 }
 0x67b   :  { %v3423_v6 = vmul.f32 %v4868_v36, %v3396_v4  ;;  %vm3429_vm1 = vweird.f32 %v4868_v36 }
 0x67c   :  { %4869 = vrsqrt.f32 %v3397_v55  ;;  %vm3430_vm3 = vmor %vm3428_vm2, %vm3429_vm1  ;;  %vm3438_vm5 = vweird.f32 %v3397_v55 }
 0x67d   :  { %v3424_v28 = vmul.f32 %v4868_v36, %v3423_v6 }
 0x67f   :  { %v3425_v61 = vmul.f32 0.5, %v3424_v28 }
 0x681   :  { %v3426_v34 = vsub.f32 1.5, %v3425_v61 }
 0x682   :  { %v4870_v18 = vpop.eup %4869 }
 0x683   :  { %v3427_v37 = vmul.f32 %v4868_v36, %v3426_v34  ;;  %v3433_v35 = vmul.f32 %v4870_v18, %v3397_v55  ;;  %vm3439_vm4 = vweird.f32 %v4870_v18 }
 0x684   :  { %vm3440_vm6 = vmor %vm3438_vm5, %vm3439_vm4 }
 0x685   :  { %v3431_v63 = vsel %vm3430_vm3, %v4868_v36, %v3427_v37  ;;  %v3434_v43 = vmul.f32 %v4870_v18, %v3433_v35 }
 0x686   :  { %v3484_v54 = vmul.f32 %v3431_v63, %v6437_v10 }
 0x687   :  { %v3435_v30 = vmul.f32 0.5, %v3434_v43 }
 0x688   :  { %v3495_v13 = vmul.f32 %v6476_v25, %v3484_v54 }
 0x689   :  { %v3436_v14 = vsub.f32 1.5, %v3435_v30 }
 0x68a   :  { %v3506_v47 = vadd.f32 %v6482_v29, %v3495_v13 }
 0x68b   :  { %v3437_v50 = vmul.f32 %v4870_v18, %v3436_v14 }
 0x68c   :  { %3572 = vmatmul.f32.gmra.mxu0 %v3506_v47  ;;  %3613 = vmatmul.f32.gmra.mxu1 %v3506_v47 }
 0x68d   :  { %v3441_v52 = vsel %vm3440_vm6, %v4870_v18, %v3437_v50 }
 0x68e   :  { %v3485_v8 = vmul.f32 %v3441_v52, %v6443_v39 }
 0x690   :  { %v3496_v7 = vmul.f32 %v6476_v25, %v3485_v8 }
 0x692   :  { %v3507_v15 = vadd.f32 %v6482_v29, %v3496_v7 }
 0x694   :  { %3575 = vmatmul.f32.gmra.mxu0 %v3507_v15  ;;  %3616 = vmatmul.f32.gmra.mxu1 %v3507_v15 }
 0x69c   :  { %v3379_v10 = vpop.xlane.xlu0 %3378 }
 0x69d   :  { %v3390_v31 = vmul.f32 %v3379_v10, %v7305_v60  ;;  %v4351_v10 = vld [vmem:[#allocation14 + $0x78] sm:$0xff] }
 0x69e   :  { %4372 = vmatpush.msrb.mxu2 %v4351_v10 }
 0x69f   :  { %v3398_v58 = vadd.f32 1e-05, %v3390_v31  ;;  %v4367_v31 = vld [vmem:[#allocation14 + $0xf8] sm:$0xff] }
 0x6a0   :  { %4413 = vmatpush.msra.mxu3 %v4367_v31 }
 0x6a1   :  { %4871 = vrsqrt.f32 %v3398_v58  ;;  %vm3448_vm8 = vweird.f32 %v3398_v58 }
 0x6a4   :  { %v3381_v51 = vpop.xlane.xlu1 %3380 }
 0x6a5   :  { %v3391_v49 = vmul.f32 %v3381_v51, %v7305_v60 }
 0x6a7   :  { %v4872_v19 = vpop.eup %4871  ;;  %v3399_v20 = vadd.f32 1e-05, %v3391_v49 }
 0x6a8   :  { %v3443_v27 = vmul.f32 %v4872_v19, %v3398_v58  ;;  %vm3449_vm7 = vweird.f32 %v4872_v19 }
 0x6a9   :  { %4873 = vrsqrt.f32 %v3399_v20  ;;  %vm3450_vm11 = vmor %vm3448_vm8, %vm3449_vm7  ;;  %vm3458_vm9 = vweird.f32 %v3399_v20 }
 0x6aa   :  { %v3444_v22 = vmul.f32 %v4872_v19, %v3443_v27  ;;  %v4350_v27 = vld [vmem:[#allocation14 + $0x70] sm:$0xff] }
 0x6ab   :  { %4373 = vmatpush.msrb.mxu2 %v4350_v27 }
 0x6ac   :  { %v3445_v39 = vmul.f32 0.5, %v3444_v22  ;;  %v3383_v59 = vpop.xlane.xlu2 %3382  ;;  %v4366_v22 = vld [vmem:[#allocation14 + $0xf0] sm:$0xff] }
 0x6ad   :  { %v3392_v42 = vmul.f32 %v3383_v59, %v7305_v60  ;;  %4414 = vmatpush.msra.mxu3 %v4366_v22 }
 0x6ae   :  { %v3446_v24 = vsub.f32 1.5, %v3445_v39 }
 0x6af   :  { %v4874_v46 = vpop.eup %4873  ;;  %v3400_v62 = vadd.f32 1e-05, %v3392_v42  ;;  %v4349_v42 = vld [vmem:[#allocation14 + $0x68] sm:$0xff] }
 0x6b0   :  { %v3447_v57 = vmul.f32 %v4872_v19, %v3446_v24  ;;  %v3453_v9 = vmul.f32 %v4874_v46, %v3399_v20  ;;  %vm3459_vm12 = vweird.f32 %v4874_v46  ;;  %v4365_v24 = vld [vmem:[#allocation14 + $0xe8] sm:$0xff]  ;;  %4374 = vmatpush.msrb.mxu2 %v4349_v42 }
 0x6b1   :  { %4875 = vrsqrt.f32 %v3400_v62  ;;  %vm3460_vm10 = vmor %vm3458_vm9, %vm3459_vm12  ;;  %vm3468_vm14 = vweird.f32 %v3400_v62  ;;  %4415 = vmatpush.msra.mxu3 %v4365_v24 }
 0x6b2   :  { %v3451_v48 = vsel %vm3450_vm11, %v4872_v19, %v3447_v57  ;;  %v3454_v26 = vmul.f32 %v4874_v46, %v3453_v9  ;;  %v4364_v57 = vld [vmem:[#allocation14 + $0xe0] sm:$0xff] }
 0x6b3   :  { %v3486_v21 = vmul.f32 %v3451_v48, %v6449_v3  ;;  %4416 = vmatpush.msra.mxu3 %v4364_v57  ;;  %v4340_v57 = vld [vmem:[#allocation14 + $0x20] sm:$0xff] }
 0x6b4   :  { %v3455_v45 = vmul.f32 0.5, %v3454_v26  ;;  %v4363_v26 = vld [vmem:[#allocation14 + $0xd8] sm:$0xff] }
 0x6b5   :  { %v3497_v32 = vmul.f32 %v6476_v25, %v3486_v21  ;;  %4417 = vmatpush.msra.mxu3 %v4363_v26 }
 0x6b6   :  { %v3456_v38 = vsub.f32 1.5, %v3455_v45 }
 0x6b7   :  { %v4876_v44 = vpop.eup %4875  ;;  %v3508_v12 = vadd.f32 %v6482_v29, %v3497_v32 }
 0x6b8   :  { %v3457_v4 = vmul.f32 %v4874_v46, %v3456_v38  ;;  %v3463_v1 = vmul.f32 %v4876_v44, %v3400_v62  ;;  %vm3469_vm13 = vweird.f32 %v4876_v44  ;;  %v4348_v62 = vld [vmem:[#allocation14 + $0x60] sm:$0xff] }
 0x6b9   :  { %3578 = vmatmul.f32.gmra.mxu0 %v3508_v12  ;;  %3619 = vmatmul.f32.gmra.mxu1 %v3508_v12  ;;  %vm3470_vm15 = vmor %vm3468_vm14, %vm3469_vm13  ;;  %v4362_v12 = vld [vmem:[#allocation14 + $0xd0] sm:$0xff] }
 0x6ba   :  { %v3461_v41 = vsel %vm3460_vm10, %v4874_v46, %v3457_v4  ;;  %v3464_v36 = vmul.f32 %v4876_v44, %v3463_v1  ;;  %4375 = vmatpush.msrb.mxu2 %v4348_v62  ;;  %4418 = vmatpush.msra.mxu3 %v4362_v12  ;;  %v4357_v62 = vld [vmem:[#allocation14 + $0xa8] sm:$0xff] }
 0x6bb   :  { %v3487_v55 = vmul.f32 %v3461_v41, %v6455_v23 }
 0x6bc   :  { %v3465_v6 = vmul.f32 0.5, %v3464_v36 }
 0x6bd   :  { %v3498_v3 = vmul.f32 %v6476_v25, %v3487_v55  ;;  %v4345_v55 = vld [vmem:[#allocation14 + $0x48] sm:$0xff] }
 0x6be   :  { %v3466_v28 = vsub.f32 1.5, %v3465_v6  ;;  %v4361_v6 = vld [vmem:[#allocation14 + $0xc8] sm:$0xff] }
 0x6bf   :  { %v3509_v61 = vadd.f32 %v6482_v29, %v3498_v3  ;;  %4419 = vmatpush.msra.mxu3 %v4361_v6  ;;  %v4354_v6 = vld [vmem:[#allocation14 + $0x90] sm:$0xff] }
 0x6c0   :  { %v3467_v34 = vmul.f32 %v4876_v44, %v3466_v28 }
 0x6c1   :  { %3581 = vmatmul.f32.gmra.mxu0 %v3509_v61  ;;  %3622 = vmatmul.f32.gmra.mxu1 %v3509_v61 }
 0x6c2   :  { %v3471_v18 = vsel %vm3470_vm15, %v4876_v44, %v3467_v34  ;;  %v4346_v44 = vld [vmem:[#allocation14 + $0x50] sm:$0xff]  ;;  %v4344_v34 = vld [vmem:[#allocation14 + $0x40] sm:$0xff] }
 0x6c3   :  { %v3488_v37 = vmul.f32 %v3471_v18, %v6461_v2  ;;  %v3544_v2 = vld [vmem:[%s7239_s10] sm:$0x3]  ;;  %v4360_v18 = vld [vmem:[#allocation14 + $0xc0] sm:$0xff] }
 0x6c4   :  { %v3385_v23 = vpop.xlane.xlu0 %3384  ;;  %v6513_v8 = vperm.slane %v3544_v2, 0  ;;  %4420 = vmatpush.msra.mxu3 %v4360_v18 }
 0x6c5   :  { %v3499_v35 = vmul.f32 %v6476_v25, %v3488_v37  ;;  %v3393_v43 = vmul.f32 %v3385_v23, %v7305_v60  ;;  %v6515_v60 = vperm.slane %v3544_v2, 1 }
 0x6c7   :  { %v3510_v63 = vadd.f32 %v6482_v29, %v3499_v35  ;;  %v3401_v54 = vadd.f32 1e-05, %v3393_v43 }
 0x6c9   :  { %3584 = vmatmul.f32.gmra.mxu0 %v3510_v63  ;;  %3625 = vmatmul.f32.gmra.mxu1 %v3510_v63  ;;  %4877 = vrsqrt.f32 %v3401_v54  ;;  %vm3478_vm1 = vweird.f32 %v3401_v54 }
 0x6cf   :  { %v4878_v30 = vpop.eup %4877 }
 0x6d0   :  { %v3473_v13 = vmul.f32 %v4878_v30, %v3401_v54  ;;  %vm3479_vm0 = vweird.f32 %v4878_v30 }
 0x6d1   :  { %vm3480_vm2 = vmor %vm3478_vm1, %vm3479_vm0 }
 0x6d2   :  { %v3474_v14 = vmul.f32 %v4878_v30, %v3473_v13  ;;  %v4343_v13 = vld [vmem:[#allocation14 + $0x38] sm:$0xff] }
 0x6d4   :  { %v3475_v47 = vmul.f32 0.5, %v3474_v14  ;;  %v4359_v14 = vld [vmem:[#allocation14 + $0xb8] sm:$0xff] }
 0x6d5   :  { %4421 = vmatpush.msra.mxu3 %v4359_v14  ;;  %v4352_v14 = vld [vmem:[#allocation14 + $0x80] sm:$0xff] }
 0x6d6   :  { %v3476_v50 = vsub.f32 1.5, %v3475_v47 }
 0x6d8   :  { %v3477_v52 = vmul.f32 %v4878_v30, %v3476_v50 }
 0x6da   :  { %v3481_v7 = vsel %vm3480_vm2, %v4878_v30, %v3477_v52 }
 0x6db   :  { %v3489_v15 = vmul.f32 %v3481_v7, %v6468_v33  ;;  %v4342_v7 = vld [vmem:[#allocation14 + $0x30] sm:$0xff] }
 0x6dc   :  { %v3567_v58 = vpop.f32.mrf.mxu0  ;;  %v3608_v51 = vpop.f32.mrf.mxu1 }
 0x6dd   :  { %v6519_v49 = vadd.f32 %v3567_v58, %v6513_v8  ;;  %v6522_v19 = vadd.f32 %v3608_v51, %v6515_v60  ;;  %v3500_v20 = vmul.f32 %v6476_v25, %v3489_v15  ;;  %v4358_v15 = vld [vmem:[#allocation14 + $0xb0] sm:$0xff] }
 0x6de   :  { %4422 = vmatpush.msra.mxu3 %v4358_v15 }
 0x6df   :  { %v6526_v33 = vmul.f32 0.70710677, %v6519_v49  ;;  %v6529_v39 = vmul.f32 0.70710677, %v6522_v19  ;;  %v3511_v59 = vadd.f32 %v6482_v29, %v3500_v20  ;;  %v4347_v29 = vld [vmem:[#allocation14 + $0x58] sm:$0xff] }
 0x6e0   :  { %4376 = vmatpush.msrb.mxu2 %v4347_v29  ;;  %4423 = vmatpush.msra.mxu3 %v4357_v62 }
 0x6e1   :  { %v3664_v46 = vmul.f32 %v6526_v33, %v6526_v33  ;;  %v3704_v25 = vmul.f32 %v6529_v39, %v6529_v39  ;;  %3587 = vmatmul.f32.gmra.mxu0 %v3511_v59  ;;  %3628 = vmatmul.f32.gmra.mxu1 %v3511_v59 }
 0x6e2   :  { %4377 = vmatpush.msrb.mxu2 %v4346_v44 }
 0x6e3   :  { %v6536_v9 = vmin.f32 %v3664_v46, 16.0  ;;  %v6538_v48 = vmin.f32 %v3704_v25, 16.0  ;;  %v4341_v25 = vld [vmem:[#allocation14 + $0x28] sm:$0xff] }
 0x6e4   :  { %4378 = vmatpush.msrb.mxu2 %v4345_v55  ;;  %v4338_v55 = vld [vmem:[#allocation14 + $0x10] sm:$0xff] }
 0x6e5   :  { %v3666_v21 = vmul.f32 2.1237322e-06, %v6536_v9  ;;  %v3677_v45 = vmul.f32 3.8918573e-05, %v6536_v9  ;;  %v3706_v32 = vmul.f32 2.1237322e-06, %v6538_v48 }
 0x6e6   :  { %v3717_v38 = vmul.f32 3.8918573e-05, %v6538_v48  ;;  %4379 = vmatpush.msrb.mxu2 %v4344_v34 }
 0x6e7   :  { %v3667_v4 = vadd.f32 0.00028619796, %v3666_v21  ;;  %v3678_v1 = vadd.f32 0.001143296, %v3677_v45  ;;  %v3707_v41 = vadd.f32 0.00028619796, %v3706_v32 }
 0x6e8   :  { %v3718_v36 = vadd.f32 0.001143296, %v3717_v38  ;;  %4380 = vmatpush.msrb.mxu2 %v4343_v13  ;;  %v4356_v21 = vld [vmem:[#allocation14 + $0xa0] sm:$0xff] }
 0x6e9   :  { %v3668_v3 = vmul.f32 %v3667_v4, %v6536_v9  ;;  %v3679_v28 = vmul.f32 %v3678_v1, %v6536_v9  ;;  %v3708_v61 = vmul.f32 %v3707_v41, %v6538_v48  ;;  %4424 = vmatpush.msra.mxu3 %v4356_v21  ;;  %v4339_v4 = vld [vmem:[#allocation14 + $0x18] sm:$0xff]  ;;  %v4336_v13 = vld [vmem:[#allocation14] sm:$0xff] }
 0x6ea   :  { %v3719_v37 = vmul.f32 %v3718_v36, %v6538_v48  ;;  %4381 = vmatpush.msrb.mxu2 %v4342_v7  ;;  %v4355_v1 = vld [vmem:[#allocation14 + $0x98] sm:$0xff] }
 0x6eb   :  { %v3669_v35 = vadd.f32 0.0036580483, %v3668_v3  ;;  %v3680_v63 = vadd.f32 0.014752088, %v3679_v28  ;;  %v3709_v23 = vadd.f32 0.0036580483, %v3708_v61  ;;  %4425 = vmatpush.msra.mxu3 %v4355_v1 }
 0x6ec   :  { %v3720_v43 = vadd.f32 0.014752088, %v3719_v37  ;;  %v3570_v54 = vpop.f32.mrf.mxu0  ;;  %v3611_v30 = vpop.f32.mrf.mxu1  ;;  %4382 = vmatpush.msrb.mxu2 %v4341_v25 }
 0x6ed   :  { %v3670_v47 = vmul.f32 %v3669_v35, %v6536_v9  ;;  %v3681_v50 = vmul.f32 %v3680_v63, %v6536_v9  ;;  %v3710_v2 = vmul.f32 %v3709_v23, %v6538_v48  ;;  %v6552_v52 = vadd.f32 %v3570_v54, %v6513_v8  ;;  %v4337_v35 = vld [vmem:[#allocation14 + $0x8] sm:$0xff]  ;;  %4426 = vmatpush.msra.mxu3 %v4354_v6 }
 0x6ee   :  { %v3721_v10 = vmul.f32 %v3720_v43, %v6538_v48  ;;  %v6556_v31 = vadd.f32 %v3611_v30, %v6515_v60  ;;  %4383 = vmatpush.msrb.mxu2 %v4340_v57  ;;  %v4353_v54 = vld [vmem:[#allocation14 + $0x88] sm:$0xff] }
 0x6ef   :  { %v3671_v58 = vadd.f32 0.05243302, %v3670_v47  ;;  %v3682_v51 = vadd.f32 0.112945676, %v3681_v50  ;;  %v3711_v20 = vadd.f32 0.05243302, %v3710_v2  ;;  %4427 = vmatpush.msra.mxu3 %v4353_v54 }
 0x6f0   :  { %v3722_v27 = vadd.f32 0.112945676, %v3721_v10  ;;  %v6559_v22 = vmul.f32 0.70710677, %v6552_v52  ;;  %v6565_v46 = vmul.f32 0.70710677, %v6556_v31  ;;  %4384 = vmatpush.msrb.mxu2 %v4339_v4 }
 0x6f1   :  { %v3672_v59 = vmul.f32 %v3671_v58, %v6536_v9  ;;  %v3683_v42 = vmul.f32 %v3682_v51, %v6536_v9  ;;  %v3712_v24 = vmul.f32 %v3711_v20, %v6538_v48  ;;  %4428 = vmatpush.msra.mxu3 %v4352_v14 }
 0x6f2   :  { %v3723_v29 = vmul.f32 %v3722_v27, %v6538_v48  ;;  %v3744_v26 = vmul.f32 %v6559_v22, %v6559_v22  ;;  %v3784_v38 = vmul.f32 %v6565_v46, %v6565_v46  ;;  %4385 = vmatpush.msrb.mxu2 %v4338_v55 }
 0x6f3   :  { %v3673_v45 = vadd.f32 0.18741608, %v3672_v59  ;;  %v3684_v32 = vadd.f32 0.4994258, %v3683_v42  ;;  %v3713_v36 = vadd.f32 0.18741608, %v3712_v24 }
 0x6f4   :  { %v3724_v44 = vadd.f32 0.4994258, %v3723_v29  ;;  %v6572_v12 = vmin.f32 %v3744_v26, 16.0  ;;  %v6581_v37 = vmin.f32 %v3784_v38, 16.0  ;;  %4386 = vmatpush.msrb.mxu2 %v4337_v35 }
 0x6f5   :  { %v3685_v41 = vmul.f32 %v3684_v32, %v6536_v9  ;;  %v3674_v34 = vmul.f32 %v3673_v45, %v6536_v9  ;;  %v3714_v30 = vmul.f32 %v3713_v36, %v6538_v48 }
 0x6f6   :  { %v3725_v3 = vmul.f32 %v3724_v44, %v6538_v48  ;;  %v3746_v28 = vmul.f32 2.1237322e-06, %v6572_v12  ;;  %v3757_v61 = vmul.f32 3.8918573e-05, %v6572_v12  ;;  %v3786_v2 = vmul.f32 2.1237322e-06, %v6581_v37  ;;  %4387 = vmatpush.msrb.mxu2 %v4336_v13 }
 0x6f7   :  { %v6579_v18 = vadd.f32 1.0, %v3685_v41  ;;  %v3675_v9 = vadd.f32 1.1283791, %v3674_v34  ;;  %v3797_v7 = vmul.f32 3.8918573e-05, %v6581_v37 }
 0x6f8   :  { %v6583_v63 = vadd.f32 1.0, %v3725_v3  ;;  %v3747_v23 = vadd.f32 0.00028619796, %v3746_v28  ;;  %v3758_v43 = vadd.f32 0.001143296, %v3757_v61 }
 0x6f9   :  { %4879 = vrcp.f32 %v6579_v18  ;;  %v3715_v15 = vadd.f32 1.1283791, %v3714_v30  ;;  %v3787_v58 = vadd.f32 0.00028619796, %v3786_v2  ;;  %v3798_v51 = vadd.f32 0.001143296, %v3797_v7 }
 0x6fa   :  { %4881 = vrcp.f32 %v6583_v63  ;;  %v3748_v47 = vmul.f32 %v3747_v23, %v6572_v12  ;;  %v3759_v50 = vmul.f32 %v3758_v43, %v6572_v12  ;;  %v3676_v27 = vmul.f32 %v3675_v9, %v6526_v33 }
 0x6fb   :  { %vm3692_vm3 = vweird.f32 %v6579_v18  ;;  %v3788_v62 = vmul.f32 %v3787_v58, %v6581_v37  ;;  %v3696_v57 = vand.u32 2147483647, %v6579_v18  ;;  %v3799_v21 = vmul.f32 %v3798_v51, %v6581_v37 }
 0x6fc   :  { %v3749_v10 = vadd.f32 0.0036580483, %v3748_v47  ;;  %v3760_v48 = vadd.f32 0.014752088, %v3759_v50  ;;  %v3698_v33 = vand.u32 2147483648, %v6579_v18  ;;  %v3716_v32 = vmul.f32 %v3715_v15, %v6529_v39 }
 0x6fd   :  { %v3789_v1 = vadd.f32 0.0036580483, %v3788_v62  ;;  %v3800_v41 = vadd.f32 0.014752088, %v3799_v21  ;;  %v3738_v55 = vand.u32 2147483648, %v6583_v63  ;;  %vm3732_vm6 = vweird.f32 %v6583_v63 }
 0x6fe   :  { %v3750_v59 = vmul.f32 %v3749_v10, %v6572_v12  ;;  %v3761_v25 = vmul.f32 %v3760_v48, %v6572_v12  ;;  %v3736_v28 = vand.u32 2147483647, %v6583_v63  ;;  %v3699_v39 = vor.u32 1.1754944e-38, %v3698_v33 }
 0x6ff   :  { %v4880_v20 = vpop.eup %4879  ;;  %v3801_v61 = vmul.f32 %v3800_v41, %v6581_v37  ;;  %v3790_v30 = vmul.f32 %v3789_v1, %v6581_v37  ;;  %vm3697_vm8 = vcmp.eq.f32.partialorder %v3696_v57, 8.507059e+37  ;;  %v3739_v9 = vor.u32 1.1754944e-38, %v3738_v55 }
 0x700   :  { %v4882_v42 = vpop.eup %4881  ;;  %v3688_v24 = vmul.f32 %v4880_v20, %v6579_v18  ;;  %v3751_v26 = vadd.f32 0.05243302, %v3750_v59  ;;  %v3762_v38 = vadd.f32 0.112945676, %v3761_v25  ;;  %vm3693_vm4 = vweird.f32 %v4880_v20 }
 0x701   :  { %v3728_v29 = vmul.f32 %v4882_v42, %v6583_v63  ;;  %vm3733_vm5 = vweird.f32 %v4882_v42  ;;  %vm3694_vm7 = vmor %vm3692_vm3, %vm3693_vm4  ;;  %v3802_v13 = vadd.f32 0.112945676, %v3801_v61  ;;  %vm3737_vm12 = vcmp.eq.f32.partialorder %v3736_v28, 8.507059e+37 }
 0x702   :  { %v3689_v45 = vsub.f32 1.0, %v3688_v24  ;;  %v3752_v4 = vmul.f32 %v3751_v26, %v6572_v12  ;;  %v3763_v6 = vmul.f32 %v3762_v38, %v6572_v12  ;;  %vm3734_vm11 = vmor %vm3732_vm6, %vm3733_vm5  ;;  %v3632_v62 = vmul.f32 0.5, %v6519_v49 }
 0x703   :  { %v3729_v44 = vsub.f32 1.0, %v3728_v29  ;;  %v3803_v63 = vmul.f32 %v3802_v13, %v6581_v37  ;;  %v3633_v29 = vmul.f32 0.5, %v6522_v19 }
 0x704   :  { %v3690_v36 = vmul.f32 %v4880_v20, %v3689_v45  ;;  %v3764_v35 = vadd.f32 0.4994258, %v3763_v6  ;;  %v3753_v54 = vadd.f32 0.18741608, %v3752_v4 }
 0x705   :  { %v3730_v3 = vmul.f32 %v4882_v42, %v3729_v44  ;;  %v3804_v59 = vadd.f32 0.4994258, %v3803_v63 }
 0x706   :  { %v3691_v34 = vadd.f32 %v4880_v20, %v3690_v36  ;;  %v3765_v47 = vmul.f32 %v3764_v35, %v6572_v12  ;;  %v3754_v51 = vmul.f32 %v3753_v54, %v6572_v12 }
 0x707   :  { %v3731_v43 = vadd.f32 %v4882_v42, %v3730_v3 }
 0x708   :  { %v3695_v14 = vsel %vm3694_vm7, %v4880_v20, %v3691_v34  ;;  %v6615_v10 = vadd.f32 1.0, %v3765_v47  ;;  %v3791_v20 = vadd.f32 0.05243302, %v3790_v30  ;;  %v3755_v45 = vadd.f32 1.1283791, %v3754_v51 }
 0x709   :  { %v3573_v23 = vpop.f32.mrf.mxu0  ;;  %v3700_v50 = vsel %vm3697_vm8, %v3699_v39, %v3695_v14  ;;  %v3735_v2 = vsel %vm3734_vm11, %v4882_v42, %v3731_v43  ;;  %v3614_v7 = vpop.f32.mrf.mxu1 }
 0x70a   :  { %v3701_v18 = vmul.f32 %v3700_v50, %v3676_v27  ;;  %v3740_v15 = vsel %vm3737_vm12, %v3739_v9, %v3735_v2  ;;  %v6618_v48 = vadd.f32 %v3573_v23, %v6513_v8  ;;  %4883 = vrcp.f32 %v6615_v10 }
 0x70b   :  { %v3741_v58 = vmul.f32 %v3740_v15, %v3716_v32  ;;  %v6623_v42 = vadd.f32 %v3614_v7, %v6515_v60  ;;  %v3805_v27 = vmul.f32 %v3804_v59, %v6581_v37  ;;  %v3792_v33 = vmul.f32 %v3791_v20, %v6581_v37 }
 0x70c   :  { %v4621_v24 = vclamps-f32 %v3701_v18, 1.0  ;;  %v6629_v26 = vmul.f32 0.70710677, %v6618_v48  ;;  %v3756_v28 = vmul.f32 %v3755_v45, %v6559_v22  ;;  %v3778_v61 = vand.u32 2147483648, %v6615_v10 }
 0x70d   :  { %v4622_v25 = vclamps-f32 %v3741_v58, 1.0  ;;  %v6632_v32 = vadd.f32 1.0, %v3805_v27  ;;  %v6637_v4 = vmul.f32 0.70710677, %v6623_v42  ;;  %v3793_v6 = vadd.f32 0.18741608, %v3792_v33 }
 0x70e   :  { %v4304_v57 = vadd.f32 1.0, %v4621_v24  ;;  %v3824_v44 = vmul.f32 %v6629_v26, %v6629_v26  ;;  %vm3772_vm9 = vweird.f32 %v6615_v10  ;;  %v3776_v54 = vand.u32 2147483647, %v6615_v10 }
 0x70f   :  { %v4305_v21 = vadd.f32 1.0, %v4622_v25  ;;  %4885 = vrcp.f32 %v6632_v32  ;;  %v3864_v36 = vmul.f32 %v6637_v4, %v6637_v4  ;;  %v3779_v63 = vor.u32 1.1754944e-38, %v3778_v61 }
 0x710   :  { %v4320_v38 = vmul.f32 %v4304_v57, %v3632_v62  ;;  %v4884_v1 = vpop.eup %4883  ;;  %v6643_v41 = vmin.f32 %v3824_v44, 16.0  ;;  %vm3777_vm14 = vcmp.eq.f32.partialorder %v3776_v54, 8.507059e+37  ;;  %v3794_v45 = vmul.f32 %v3793_v6, %v6581_v37 }
 0x711   :  { %v3576_v12 = vpop.f32.mrf.mxu0  ;;  %v4321_v19 = vmul.f32 %v4305_v21, %v3633_v29  ;;  %v3768_v55 = vmul.f32 %v4884_v1, %v6615_v10  ;;  %v6656_v23 = vmin.f32 %v3864_v36, 16.0  ;;  %vm3773_vm10 = vweird.f32 %v4884_v1  ;;  %v3617_v2 = vpop.f32.mrf.mxu1 }
 0x712   :  { %v6640_v49 = vadd.f32 %v3576_v12, %v6513_v8  ;;  %4388 = vmatmul.f32.vlgmr.msrb.gmra.mxu2 %v4320_v38  ;;  %v3826_v34 = vmul.f32 2.1237322e-06, %v6643_v41  ;;  %v3837_v39 = vmul.f32 3.8918573e-05, %v6643_v41  ;;  %vm3774_vm13 = vmor %vm3772_vm9, %vm3773_vm10  ;;  %v6676_v62 = vadd.f32 %v3617_v2, %v6515_v60 }
 0x713   :  { %4429 = vmatmul.f32.vlgmr.msra.gmra.mxu3 %v4321_v19  ;;  %v3769_v35 = vsub.f32 1.0, %v3768_v55  ;;  %v3866_v9 = vmul.f32 2.1237322e-06, %v6656_v23  ;;  %v3877_v47 = vmul.f32 3.8918573e-05, %v6656_v23  ;;  %vm3812_vm0 = vweird.f32 %v6632_v32 }
 0x714   :  { %v6649_v3 = vmul.f32 0.70710677, %v6640_v49  ;;  %v3827_v30 = vadd.f32 0.00028619796, %v3826_v34  ;;  %v3838_v13 = vadd.f32 0.001143296, %v3837_v39 }
 0x715   :  { %v6661_v22 = vpop.eup %4885  ;;  %v3770_v14 = vmul.f32 %v4884_v1, %v3769_v35  ;;  %v3867_v51 = vadd.f32 0.00028619796, %v3866_v9  ;;  %v3878_v20 = vadd.f32 0.001143296, %v3877_v47  ;;  %v6691_v39 = vmul.f32 0.70710677, %v6676_v62 }
 0x716   :  { %v3904_v43 = vmul.f32 %v6649_v3, %v6649_v3  ;;  %v3808_v7 = vmul.f32 %v6661_v22, %v6632_v32  ;;  %v3828_v18 = vmul.f32 %v3827_v30, %v6643_v41  ;;  %v3839_v15 = vmul.f32 %v3838_v13, %v6643_v41 }
 0x717   :  { %v3771_v58 = vadd.f32 %v4884_v1, %v3770_v14  ;;  %v3868_v29 = vmul.f32 %v3867_v51, %v6656_v23  ;;  %v3879_v12 = vmul.f32 %v3878_v20, %v6656_v23  ;;  %vm3813_vm15 = vweird.f32 %v6661_v22 }
 0x718   :  { %v6665_v50 = vmin.f32 %v3904_v43, 16.0  ;;  %v3809_v24 = vsub.f32 1.0, %v3808_v7  ;;  %v3829_v25 = vadd.f32 0.0036580483, %v3828_v18  ;;  %v3840_v27 = vadd.f32 0.014752088, %v3839_v15  ;;  %vm6699_vm1 = vmor %vm3812_vm0, %vm3813_vm15 }
 0x719   :  { %v3775_v57 = vsel %vm3774_vm13, %v4884_v1, %v3771_v58  ;;  %v3869_v19 = vadd.f32 0.0036580483, %v3868_v29  ;;  %v3880_v36 = vadd.f32 0.014752088, %v3879_v12  ;;  %v3816_v1 = vand.u32 2147483647, %v6632_v32 }
 0x71a   :  { %v3906_v59 = vmul.f32 2.1237322e-06, %v6665_v50  ;;  %v3810_v33 = vmul.f32 %v6661_v22, %v3809_v24  ;;  %v3841_v10 = vmul.f32 %v3840_v27, %v6643_v41  ;;  %v3780_v38 = vsel %vm3777_vm14, %v3779_v63, %v3775_v57 }
 0x71b   :  { %v3830_v44 = vmul.f32 %v3829_v25, %v6643_v41  ;;  %v3917_v61 = vmul.f32 3.8918573e-05, %v6665_v50  ;;  %v3881_v37 = vmul.f32 %v3880_v36, %v6656_v23  ;;  %v3781_v35 = vmul.f32 %v3780_v38, %v3756_v28 }
 0x71c   :  { %v3907_v21 = vadd.f32 0.00028619796, %v3906_v59  ;;  %v3842_v55 = vadd.f32 0.112945676, %v3841_v10  ;;  %v3811_v34 = vadd.f32 %v6661_v22, %v3810_v33  ;;  %v3818_v43 = vand.u32 2147483648, %v6632_v32 }
 0x71d   :  { %v3918_v30 = vadd.f32 0.001143296, %v3917_v61  ;;  %v3831_v13 = vadd.f32 0.05243302, %v3830_v44  ;;  %v3870_v14 = vmul.f32 %v3869_v19, %v6656_v23  ;;  %v3882_v9 = vadd.f32 0.112945676, %v3881_v37 }
 0x71e   :  { %v3908_v6 = vmul.f32 %v3907_v21, %v6665_v50  ;;  %v3843_v54 = vmul.f32 %v3842_v55, %v6643_v41  ;;  %v3795_v47 = vadd.f32 1.1283791, %v3794_v45  ;;  %vm3817_vm2 = vcmp.eq.f32.partialorder %v3816_v1, 8.507059e+37 }
 0x71f   :  { %v3919_v63 = vmul.f32 %v3918_v30, %v6665_v50  ;;  %v3815_v7 = vsel %vm6699_vm1, %v6661_v22, %v3811_v34  ;;  %v3883_v32 = vmul.f32 %v3882_v9, %v6656_v23  ;;  %v3944_v15 = vmul.f32 %v6691_v39, %v6691_v39 }
 0x720   :  { %v3844_v28 = vadd.f32 0.4994258, %v3843_v54  ;;  %v3909_v18 = vadd.f32 0.0036580483, %v3908_v6  ;;  %v3819_v58 = vor.u32 1.1754944e-38, %v3818_v43  ;;  %v4623_v59 = vclamps-f32 %v3781_v35, 1.0 }
 0x721   :  { %v3920_v20 = vadd.f32 0.014752088, %v3919_v63  ;;  %v3832_v24 = vmul.f32 %v3831_v13, %v6643_v41  ;;  %v3871_v25 = vadd.f32 0.05243302, %v3870_v14  ;;  %v3884_v27 = vadd.f32 0.4994258, %v3883_v32 }
 0x722   :  { %v3845_v51 = vmul.f32 %v3844_v28, %v6643_v41  ;;  %v6712_v57 = vmin.f32 %v3944_v15, 16.0  ;;  %v3820_v29 = vsel %vm3817_vm2, %v3819_v58, %v3815_v7  ;;  %v4306_v21 = vadd.f32 1.0, %v4623_v59 }
 0x723   :  { %v3921_v22 = vmul.f32 %v3920_v20, %v6665_v50  ;;  %v3796_v45 = vmul.f32 %v3795_v47, %v6565_v46  ;;  %v3885_v33 = vmul.f32 %v3884_v27, %v6656_v23  ;;  %v3910_v10 = vmul.f32 %v3909_v18, %v6665_v50 }
 0x724   :  { %v6714_v12 = vadd.f32 1.0, %v3845_v51  ;;  %v3946_v38 = vmul.f32 2.1237322e-06, %v6712_v57  ;;  %v3634_v44 = vmul.f32 0.5, %v6552_v52  ;;  %v3872_v36 = vmul.f32 %v3871_v25, %v6656_v23 }
 0x725   :  { %v3821_v19 = vmul.f32 %v3820_v29, %v3796_v45  ;;  %v6724_v1 = vadd.f32 1.0, %v3885_v33  ;;  %v3833_v55 = vadd.f32 0.18741608, %v3832_v24  ;;  %v3922_v61 = vadd.f32 0.112945676, %v3921_v22 }
 0x726   :  { %4887 = vrcp.f32 %v6714_v12  ;;  %v3947_v34 = vadd.f32 0.00028619796, %v3946_v38  ;;  %v4322_v37 = vmul.f32 %v4306_v21, %v3634_v44  ;;  %v3911_v46 = vadd.f32 0.05243302, %v3910_v10 }
 0x727   :  { %4889 = vrcp.f32 %v6724_v1  ;;  %v3923_v6 = vmul.f32 %v3922_v61, %v6665_v50  ;;  %v3873_v35 = vadd.f32 0.18741608, %v3872_v36  ;;  %v3957_v43 = vmul.f32 3.8918573e-05, %v6712_v57 }
 0x728   :  { %4391 = vmatmul.f32.gmra.mxu2 %v4322_v37  ;;  %v3948_v52 = vmul.f32 %v3947_v34, %v6712_v57  ;;  %v4624_v54 = vclamps-f32 %v3821_v19, 1.0  ;;  %v3834_v13 = vmul.f32 %v3833_v55, %v6643_v41  ;;  %v3912_v47 = vmul.f32 %v3911_v46, %v6665_v50 }
 0x729   :  { %v3924_v14 = vadd.f32 0.4994258, %v3923_v6  ;;  %v3958_v2 = vadd.f32 0.001143296, %v3957_v43  ;;  %v3635_v28 = vmul.f32 0.5, %v6556_v31  ;;  %v6741_v18 = vmul.f32 0.5, %v6618_v48 }
 0x72a   :  { %v4307_v7 = vadd.f32 1.0, %v4624_v54  ;;  %v3874_v15 = vmul.f32 %v3873_v35, %v6656_v23  ;;  %v3949_v41 = vadd.f32 0.0036580483, %v3948_v52  ;;  %v3835_v51 = vadd.f32 1.1283791, %v3834_v13 }
 0x72b   :  { %v3925_v63 = vmul.f32 %v3924_v14, %v6665_v50  ;;  %v3959_v58 = vmul.f32 %v3958_v2, %v6712_v57  ;;  %v6746_v59 = vmul.f32 0.5, %v6623_v42  ;;  %v3858_v25 = vand.u32 2147483648, %v6714_v12 }
 0x72c   :  { %v6730_v30 = vpop.eup %4887  ;;  %v4323_v24 = vmul.f32 %v4307_v7, %v3635_v28  ;;  %v3913_v27 = vadd.f32 0.18741608, %v3912_v47  ;;  %v3856_v48 = vand.u32 2147483647, %v6714_v12  ;;  %v6754_v21 = vmul.f32 0.5, %v6640_v49 }
 0x72d   :  { %v3848_v9 = vmul.f32 %v6730_v30, %v6714_v12  ;;  %v6738_v32 = vpop.eup %4889  ;;  %v3960_v29 = vadd.f32 0.014752088, %v3959_v58  ;;  %v6756_v45 = vadd.f32 1.0, %v3925_v63  ;;  %v3875_v42 = vadd.f32 1.1283791, %v3874_v15 }
 0x72e   :  { %v3888_v23 = vmul.f32 %v6738_v32, %v6724_v1  ;;  %4432 = vmatmul.f32.gmra.mxu3 %v4323_v24  ;;  %v6759_v33 = vmul.f32 0.5, %v6676_v62  ;;  %v3950_v10 = vmul.f32 %v3949_v41, %v6712_v57  ;;  %v6764_v19 = vmul.f32 %v3835_v51, %v6629_v26 }
 0x72f   :  { %v3849_v20 = vsub.f32 1.0, %v3848_v9  ;;  %v3961_v38 = vmul.f32 %v3960_v29, %v6712_v57  ;;  %vm3852_vm3 = vweird.f32 %v6714_v12  ;;  %v3859_v55 = vor.u32 1.1754944e-38, %v3858_v25 }
 0x730   :  { %v3898_v61 = vand.u32 2147483648, %v6724_v1  ;;  %v3914_v62 = vmul.f32 %v3913_v27, %v6665_v50  ;;  %vm6772_vm4 = vcmp.eq.f32.partialorder %v3856_v48, 8.507059e+37  ;;  %v3889_v46 = vsub.f32 1.0, %v3888_v23 }
 0x731   :  { %v3850_v36 = vmul.f32 %v6730_v30, %v3849_v20  ;;  %v3962_v34 = vadd.f32 0.112945676, %v3961_v38  ;;  %4891 = vrcp.f32 %v6756_v45  ;;  %v6783_v35 = vmul.f32 %v3875_v42, %v6637_v4 }
 0x732   :  { %v3896_v52 = vand.u32 2147483647, %v6724_v1  ;;  %v3951_v50 = vadd.f32 0.05243302, %v3950_v10  ;;  %vm3853_vm5 = vweird.f32 %v6730_v30  ;;  %vm3892_vm6 = vweird.f32 %v6724_v1 }
 0x733   :  { %v3963_v43 = vmul.f32 %v3962_v34, %v6712_v57  ;;  %v3851_v54 = vadd.f32 %v6730_v30, %v3850_v36  ;;  %vm3893_vm7 = vweird.f32 %v6738_v32  ;;  %v3899_v4 = vor.u32 1.1754944e-38, %v3898_v61  ;;  %vm6801_vm8 = vmor %vm3852_vm3, %vm3853_vm5 }
 0x734   :  { %v3915_v47 = vadd.f32 1.1283791, %v3914_v62  ;;  %v3890_v2 = vmul.f32 %v6738_v32, %v3889_v46  ;;  %v3936_v41 = vand.u32 2147483647, %v6756_v45  ;;  %v3952_v58 = vmul.f32 %v3951_v50, %v6712_v57  ;;  %vm6851_vm12 = vmor %vm3892_vm6, %vm3893_vm7 }
 0x735   :  { %v3964_v28 = vadd.f32 0.4994258, %v3963_v43  ;;  %v3855_v12 = vsel %vm6801_vm8, %v6730_v30, %v3851_v54  ;;  %vm6817_vm11 = vcmp.eq.f32.partialorder %v3896_v52, 8.507059e+37  ;;  %v3938_v48 = vand.u32 2147483648, %v6756_v45 }
 0x736   :  { %v3579_v31 = vpop.f32.mrf.mxu0  ;;  %v3620_v44 = vpop.f32.mrf.mxu1  ;;  %v3891_v30 = vadd.f32 %v6738_v32, %v3890_v2  ;;  %v3860_v62 = vsel %vm6772_vm4, %v3859_v55, %v3855_v12  ;;  %v6856_v37 = vmul.f32 %v3915_v47, %v6649_v3  ;;  %vm3932_vm9 = vweird.f32 %v6756_v45 }
 0x737   :  { %v3580_v22 = vadd.f32 %v3579_v31, %v6513_v8  ;;  %v6780_v6 = vadd.f32 %v3620_v44, %v6515_v60  ;;  %v6812_v24 = vpop.eup %4891  ;;  %v3965_v25 = vmul.f32 %v3964_v28, %v6712_v57  ;;  %v6859_v2 = vmul.f32 %v3860_v62, %v6764_v19 }
 0x738   :  { %v3895_v28 = vsel %vm6851_vm12, %v6738_v32, %v3891_v30  ;;  %vm3933_vm10 = vweird.f32 %v6812_v24  ;;  %vm6892_vm13 = vcmp.eq.f32.partialorder %v3936_v41, 8.507059e+37 }
 0x739   :  { %v6768_v49 = vmul.f32 0.70710677, %v3580_v22  ;;  %v6792_v14 = vmul.f32 0.70710677, %v6780_v6  ;;  %v6823_v23 = vmul.f32 0.5, %v3580_v22  ;;  %v6831_v44 = vadd.f32 1.0, %v3965_v25  ;;  %vm6918_vm14 = vmor %vm3932_vm9, %vm3933_vm10 }
 0x73a   :  { %v3928_v22 = vmul.f32 %v6812_v24, %v6756_v45  ;;  %v3900_v32 = vsel %vm6817_vm11, %v3899_v4, %v3895_v28 }
 0x73b   :  { %v3984_v26 = vmul.f32 %v6768_v49, %v6768_v49  ;;  %v4024_v51 = vmul.f32 %v6792_v14, %v6792_v14  ;;  %4893 = vrcp.f32 %v6831_v44  ;;  %vm3972_vm15 = vweird.f32 %v6831_v44 }
 0x73d   :  { %v6789_v13 = vmin.f32 %v3984_v26, 16.0  ;;  %v6825_v42 = vmin.f32 %v4024_v51, 16.0  ;;  %v3953_v26 = vadd.f32 0.18741608, %v3952_v58 }
 0x73e   :  { %v3582_v9 = vpop.f32.mrf.mxu0  ;;  %v3623_v38 = vpop.f32.mrf.mxu1 }
 0x73f   :  { %v3986_v63 = vmul.f32 2.1237322e-06, %v6789_v13  ;;  %v3997_v7 = vmul.f32 3.8918573e-05, %v6789_v13  ;;  %v6810_v20 = vadd.f32 %v3582_v9, %v6513_v8  ;;  %v4026_v34 = vmul.f32 2.1237322e-06, %v6825_v42 }
 0x740   :  { %v4037_v46 = vmul.f32 3.8918573e-05, %v6825_v42  ;;  %v6845_v50 = vadd.f32 %v3623_v38, %v6515_v60  ;;  %v3954_v47 = vmul.f32 %v3953_v26, %v6712_v57 }
 0x741   :  { %v3987_v27 = vadd.f32 0.00028619796, %v3986_v63  ;;  %v3998_v29 = vadd.f32 0.001143296, %v3997_v7  ;;  %v6828_v10 = vmul.f32 0.70710677, %v6810_v20 }
 0x742   :  { %v4027_v9 = vadd.f32 0.00028619796, %v4026_v34  ;;  %v6864_v63 = vor.u32 1.1754944e-38, %v3938_v48  ;;  %v4038_v1 = vadd.f32 0.001143296, %v4037_v46  ;;  %v3929_v7 = vsub.f32 1.0, %v3928_v22  ;;  %v6879_v48 = vpop.eup %4893 }
 0x743   :  { %v3988_v36 = vmul.f32 %v3987_v27, %v6789_v13  ;;  %v3999_v61 = vmul.f32 %v3998_v29, %v6789_v13  ;;  %v4064_v52 = vmul.f32 %v6828_v10, %v6828_v10  ;;  %v6874_v12 = vmul.f32 0.70710677, %v6845_v50 }
 0x744   :  { %v4028_v3 = vmul.f32 %v4027_v9, %v6825_v42  ;;  %v4039_v51 = vmul.f32 %v4038_v1, %v6825_v42  ;;  %v3968_v4 = vmul.f32 %v6879_v48, %v6831_v44  ;;  %v6930_v45 = vmul.f32 0.5, %v6810_v20 }
 0x745   :  { %v3989_v43 = vadd.f32 0.0036580483, %v3988_v36  ;;  %v4000_v54 = vadd.f32 0.014752088, %v3999_v61  ;;  %v6871_v19 = vmin.f32 %v4064_v52, 16.0  ;;  %v4104_v36 = vmul.f32 %v6874_v12, %v6874_v12 }
 0x746   :  { %v4029_v29 = vadd.f32 0.0036580483, %v4028_v3  ;;  %v4040_v38 = vadd.f32 0.014752088, %v4039_v51  ;;  %v3930_v61 = vmul.f32 %v6812_v24, %v3929_v7  ;;  %v3955_v52 = vadd.f32 1.1283791, %v3954_v47 }
 0x747   :  { %v3990_v15 = vmul.f32 %v3989_v43, %v6789_v13  ;;  %v4001_v58 = vmul.f32 %v4000_v54, %v6789_v13  ;;  %v4066_v57 = vmul.f32 2.1237322e-06, %v6871_v19  ;;  %v4077_v30 = vmul.f32 3.8918573e-05, %v6871_v19 }
 0x748   :  { %v4030_v62 = vmul.f32 %v4029_v29, %v6825_v42  ;;  %v4041_v22 = vmul.f32 %v4040_v38, %v6825_v42  ;;  %v6897_v54 = vmin.f32 %v4104_v36, 16.0  ;;  %v3969_v9 = vsub.f32 1.0, %v3968_v4 }
 0x749   :  { %v3991_v25 = vadd.f32 0.05243302, %v3990_v15  ;;  %v4002_v27 = vadd.f32 0.112945676, %v4001_v58  ;;  %v4067_v34 = vadd.f32 0.00028619796, %v4066_v57  ;;  %v3931_v15 = vadd.f32 %v6812_v24, %v3930_v61 }
 0x74a   :  { %v4078_v46 = vadd.f32 0.001143296, %v4077_v30  ;;  %v4042_v28 = vadd.f32 0.112945676, %v4041_v22  ;;  %v4031_v41 = vadd.f32 0.05243302, %v4030_v62  ;;  %v3901_v29 = vmul.f32 %v3900_v32, %v6783_v35 }
 0x74b   :  { %v4003_v31 = vmul.f32 %v4002_v27, %v6789_v13  ;;  %v3992_v55 = vmul.f32 %v3991_v25, %v6789_v13  ;;  %v4068_v1 = vmul.f32 %v4067_v34, %v6871_v19  ;;  %v4106_v3 = vmul.f32 2.1237322e-06, %v6897_v54 }
 0x74c   :  { %v4079_v7 = vmul.f32 %v4078_v46, %v6871_v19  ;;  %v6905_v47 = vmul.f32 0.5, %v6780_v6  ;;  %v4043_v51 = vmul.f32 %v4042_v28, %v6825_v42  ;;  %v6910_v38 = vmul.f32 %v3955_v52, %v6691_v39 }
 0x74d   :  { %v4004_v43 = vadd.f32 0.4994258, %v4003_v31  ;;  %v4069_v25 = vadd.f32 0.0036580483, %v4068_v1  ;;  %v3993_v57 = vadd.f32 0.18741608, %v3992_v55  ;;  %v3970_v6 = vmul.f32 %v6879_v48, %v3969_v9 }
 0x74e   :  { %v4080_v27 = vadd.f32 0.014752088, %v4079_v7  ;;  %v4044_v61 = vadd.f32 0.4994258, %v4043_v51  ;;  %v4107_v35 = vadd.f32 0.00028619796, %v4106_v3  ;;  %v3935_v39 = vsel %vm6918_vm14, %v6812_v24, %v3931_v15  ;;  %v3585_v15 = vpop.f32.mrf.mxu0 }
 0x74f   :  { %v4005_v58 = vmul.f32 %v4004_v43, %v6789_v13  ;;  %v4032_v32 = vmul.f32 %v4031_v41, %v6825_v42  ;;  %v3976_v31 = vand.u32 2147483647, %v6831_v44  ;;  %v4070_v62 = vmul.f32 %v4069_v25, %v6871_v19 }
 0x750   :  { %v4081_v4 = vmul.f32 %v4080_v27, %v6871_v19  ;;  %v4625_v22 = vclamps-f32 %v6859_v2, 1.0  ;;  %v3978_v34 = vand.u32 2147483648, %v6831_v44  ;;  %v3994_v46 = vmul.f32 %v3993_v57, %v6789_v13 }
 0x751   :  { %v6912_v30 = vadd.f32 1.0, %v4005_v58  ;;  %v4045_v24 = vmul.f32 %v4044_v61, %v6825_v42  ;;  %v3940_v20 = vsel %vm6892_vm13, %v6864_v63, %v3935_v39  ;;  %v3971_v55 = vadd.f32 %v6879_v48, %v3970_v6 }
 0x752   :  { %v4082_v52 = vadd.f32 0.112945676, %v4081_v4  ;;  %vm3973_vm0 = vweird.f32 %v6879_v48  ;;  %v4108_v43 = vmul.f32 %v4107_v35, %v6897_v54  ;;  %v4033_v9 = vadd.f32 0.18741608, %v4032_v32 }
 0x753   :  { %4895 = vrcp.f32 %v6912_v30  ;;  %v6945_v28 = vadd.f32 1.0, %v4045_v24  ;;  %v4117_v13 = vmul.f32 3.8918573e-05, %v6897_v54  ;;  %vm6949_vm1 = vcmp.eq.f32.partialorder %v3976_v31, 8.507059e+37  ;;  %vm6957_vm2 = vmor %vm3972_vm15, %vm3973_vm0 }
 0x754   :  { %v4083_v2 = vmul.f32 %v4082_v52, %v6871_v19  ;;  %v4071_v7 = vadd.f32 0.05243302, %v4070_v62  ;;  %v4109_v26 = vadd.f32 0.0036580483, %v4108_v43  ;;  %v4308_v63 = vadd.f32 1.0, %v4625_v22  ;;  %v3626_v52 = vpop.f32.mrf.mxu1 }
 0x755   :  { %v3979_v3 = vor.u32 1.1754944e-38, %v3978_v34  ;;  %v3995_v51 = vadd.f32 1.1283791, %v3994_v46  ;;  %4897 = vrcp.f32 %v6945_v28  ;;  %v4626_v25 = vclamps-f32 %v3901_v29, 1.0 }
 0x756   :  { %v3941_v27 = vmul.f32 %v3940_v20, %v6856_v37  ;;  %v3975_v57 = vsel %vm6957_vm2, %v6879_v48, %v3971_v55  ;;  %v4084_v6 = vadd.f32 0.4994258, %v4083_v2  ;;  %v4034_v44 = vmul.f32 %v4033_v9, %v6825_v42 }
 0x757   :  { %v4110_v61 = vmul.f32 %v4109_v26, %v6897_v54  ;;  %v4118_v4 = vadd.f32 0.001143296, %v4117_v13  ;;  %v6971_v35 = vadd.f32 %v3585_v15, %v6513_v8  ;;  %v4072_v29 = vmul.f32 %v4071_v7, %v6871_v19 }
 0x758   :  { %v4085_v37 = vmul.f32 %v4084_v6, %v6871_v19  ;;  %v4324_v32 = vmul.f32 %v4308_v63, %v6741_v18  ;;  %v3980_v48 = vsel %vm6949_vm1, %v3979_v3, %v3975_v57  ;;  %v6979_v31 = vmul.f32 %v3995_v51, %v6768_v49 }
 0x759   :  { %v6953_v58 = vpop.eup %4895  ;;  %v4119_v42 = vmul.f32 %v4118_v4, %v6897_v54  ;;  %v4309_v62 = vadd.f32 1.0, %v4626_v25  ;;  %v4016_v34 = vand.u32 2147483647, %v6912_v30  ;;  %v4111_v24 = vadd.f32 0.05243302, %v4110_v61 }
 0x75a   :  { %v4008_v36 = vmul.f32 %v6953_v58, %v6912_v30  ;;  %v6984_v46 = vadd.f32 1.0, %v4085_v37  ;;  %4394 = vmatmul.f32.gmra.mxu2 %v4324_v32  ;;  %v4018_v18 = vand.u32 2147483648, %v6912_v30  ;;  %v6991_v43 = vmul.f32 0.70710677, %v6971_v35 }
 0x75b   :  { %v6986_v20 = vpop.eup %4897  ;;  %v4120_v55 = vadd.f32 0.014752088, %v4119_v42  ;;  %v4325_v49 = vmul.f32 %v4309_v62, %v6746_v59  ;;  %vm4012_vm3 = vweird.f32 %v6912_v30  ;;  %v4035_v9 = vadd.f32 1.1283791, %v4034_v44 }
 0x75c   :  { %v4009_v39 = vsub.f32 1.0, %v4008_v36  ;;  %v4048_v2 = vmul.f32 %v6986_v20, %v6945_v28  ;;  %v4073_v13 = vadd.f32 0.18741608, %v4072_v29  ;;  %v3981_v1 = vmul.f32 %v3980_v48, %v6910_v38 }
 0x75d   :  { %vm4013_vm4 = vweird.f32 %v6953_v58  ;;  %4899 = vrcp.f32 %v6984_v46  ;;  %4435 = vmatmul.f32.gmra.mxu3 %v4325_v49  ;;  %v7000_v7 = vadd.f32 %v3626_v52, %v6515_v60  ;;  %v4112_v63 = vmul.f32 %v4111_v24, %v6897_v54 }
 0x75e   :  { %v4010_v22 = vmul.f32 %v6953_v58, %v4009_v39  ;;  %v4049_v26 = vsub.f32 1.0, %v4048_v2  ;;  %v4121_v15 = vmul.f32 %v4120_v55, %v6897_v54  ;;  %vm7005_vm5 = vcmp.eq.f32.partialorder %v4016_v34, 8.507059e+37  ;;  %vm7021_vm6 = vmor %vm4012_vm3, %vm4013_vm4 }
 0x75f   :  { %v4019_v38 = vor.u32 1.1754944e-38, %v4018_v18  ;;  %v4056_v3 = vand.u32 2147483647, %v6945_v28  ;;  %v4144_v51 = vmul.f32 %v6991_v43, %v6991_v43  ;;  %v7013_v25 = vmul.f32 %v4035_v9, %v6792_v14 }
 0x760   :  { %v4011_v59 = vadd.f32 %v6953_v58, %v4010_v22  ;;  %v4050_v57 = vmul.f32 %v6986_v20, %v4049_v26  ;;  %v4074_v36 = vmul.f32 %v4073_v13, %v6871_v19  ;;  %v4122_v6 = vadd.f32 0.112945676, %v4121_v15 }
 0x761   :  { %v4058_v61 = vand.u32 2147483648, %v6945_v28  ;;  %v7026_v4 = vmin.f32 %v4144_v51, 16.0  ;;  %v7029_v14 = vmul.f32 0.70710677, %v7000_v7  ;;  %v4627_v39 = vclamps-f32 %v3941_v27, 1.0 }
 0x762   :  { %v4015_v19 = vsel %vm7021_vm6, %v6953_v58, %v4011_v59  ;;  %v4113_v29 = vadd.f32 0.18741608, %v4112_v63  ;;  %v4123_v37 = vmul.f32 %v4122_v6, %v6897_v54  ;;  %v4628_v30 = vclamps-f32 %v3981_v1, 1.0 }
 0x763   :  { %v7035_v32 = vpop.eup %4899  ;;  %vm7037_vm7 = vcmp.eq.f32.partialorder %v4056_v3, 8.507059e+37  ;;  %v4146_v42 = vmul.f32 2.1237322e-06, %v7026_v4  ;;  %v4157_v62 = vmul.f32 3.8918573e-05, %v7026_v4  ;;  %v4184_v27 = vmul.f32 %v7029_v14, %v7029_v14  ;;  %v3588_v3 = vpop.f32.mrf.mxu0 }
 0x764   :  { %v4310_v22 = vadd.f32 1.0, %v4627_v39  ;;  %v4051_v58 = vadd.f32 %v6986_v20, %v4050_v57  ;;  %vm4053_vm8 = vweird.f32 %v6986_v20  ;;  %v4075_v34 = vadd.f32 1.1283791, %v4074_v36 }
 0x765   :  { %v4088_v24 = vmul.f32 %v7035_v32, %v6984_v46  ;;  %vm4052_vm11 = vweird.f32 %v6945_v28  ;;  %v4124_v52 = vadd.f32 0.4994258, %v4123_v37  ;;  %v4147_v18 = vadd.f32 0.00028619796, %v4146_v42  ;;  %v3629_v42 = vpop.f32.mrf.mxu1 }
 0x766   :  { %v4158_v55 = vadd.f32 0.001143296, %v4157_v62  ;;  %v4020_v49 = vsel %vm7005_vm5, %v4019_v38, %v4015_v19  ;;  %v4114_v9 = vmul.f32 %v4113_v29, %v6897_v54  ;;  %v7053_v2 = vmin.f32 %v4184_v27, 16.0  ;;  %vm7056_vm12 = vmor %vm4052_vm11, %vm4053_vm8 }
 0x767   :  { %v4326_v13 = vmul.f32 %v4310_v22, %v6754_v21  ;;  %v4125_v59 = vmul.f32 %v4124_v52, %v6897_v54  ;;  %v4148_v28 = vmul.f32 %v4147_v18, %v7026_v4  ;;  %v4311_v63 = vadd.f32 1.0, %v4628_v30 }
 0x768   :  { %v4159_v26 = vmul.f32 %v4158_v55, %v7026_v4  ;;  %v4055_v15 = vsel %vm7056_vm12, %v6986_v20, %v4051_v58  ;;  %v4089_v41 = vsub.f32 1.0, %v4088_v24  ;;  %v4186_v38 = vmul.f32 2.1237322e-06, %v7053_v2 }
 0x769   :  { %v4197_v21 = vmul.f32 3.8918573e-05, %v7053_v2  ;;  %4397 = vmatmul.f32.gmra.mxu2 %v4326_v13  ;;  %v7068_v51 = vadd.f32 1.0, %v4125_v59  ;;  %v4149_v57 = vadd.f32 0.0036580483, %v4148_v28  ;;  %v4327_v36 = vmul.f32 %v4311_v63, %v6759_v33 }
 0x76a   :  { %v4160_v54 = vadd.f32 0.014752088, %v4159_v26  ;;  %v4059_v6 = vor.u32 1.1754944e-38, %v4058_v61  ;;  %v7072_v44 = vmul.f32 %v4075_v34, %v6828_v10  ;;  %v4187_v39 = vadd.f32 0.00028619796, %v4186_v38 }
 0x76b   :  { %v4198_v19 = vadd.f32 0.001143296, %v4197_v21  ;;  %v4021_v20 = vmul.f32 %v4020_v49, %v6979_v31  ;;  %v4096_v29 = vand.u32 2147483647, %v6984_v46  ;;  %4901 = vrcp.f32 %v7068_v51  ;;  %4438 = vmatmul.f32.gmra.mxu3 %v4327_v36 }
 0x76c   :  { %v7078_v37 = vadd.f32 %v3588_v3, %v6513_v8  ;;  %v4060_v30 = vsel %vm7037_vm7, %v4059_v6, %v4055_v15  ;;  %v4150_v33 = vmul.f32 %v4149_v57, %v7026_v4  ;;  %v4161_v10 = vmul.f32 %v4160_v54, %v7026_v4 }
 0x76d   :  { %v4188_v61 = vmul.f32 %v4187_v39, %v7053_v2  ;;  %v4090_v31 = vmul.f32 %v7035_v32, %v4089_v41  ;;  %vm4092_vm9 = vweird.f32 %v6984_v46  ;;  %v4098_v62 = vand.u32 2147483648, %v6984_v46 }
 0x76e   :  { %v4115_v27 = vadd.f32 1.1283791, %v4114_v9  ;;  %v4199_v8 = vmul.f32 %v4198_v19, %v7053_v2  ;;  %vm4093_vm10 = vweird.f32 %v7035_v32  ;;  %v4151_v48 = vadd.f32 0.05243302, %v4150_v33 }
 0x76f   :  { %v4162_v22 = vadd.f32 0.112945676, %v4161_v10  ;;  %v4189_v58 = vadd.f32 0.0036580483, %v4188_v61  ;;  %v7091_v34 = vmul.f32 %v4060_v30, %v7013_v25  ;;  %v7094_v52 = vmul.f32 0.70710677, %v7078_v37  ;;  %vm7128_vm0 = vmor %vm4092_vm9, %vm4093_vm10 }
 0x770   :  { %v4200_v24 = vadd.f32 0.014752088, %v4199_v8  ;;  %v7097_v18 = vadd.f32 %v3629_v42, %v6515_v60  ;;  %v4152_v55 = vmul.f32 %v4151_v48, %v7026_v4  ;;  %v4629_v13 = vclamps-f32 %v4021_v20, 1.0 }
 0x771   :  { %v4163_v49 = vmul.f32 %v4162_v22, %v7026_v4  ;;  %v4190_v9 = vmul.f32 %v4189_v58, %v7053_v2  ;;  %v4902_v1 = vpop.eup %4901  ;;  %v4091_v59 = vadd.f32 %v7035_v32, %v4090_v31  ;;  %v4224_v28 = vmul.f32 %v7094_v52, %v7094_v52 }
 0x772   :  { %v4201_v25 = vmul.f32 %v4200_v24, %v7053_v2  ;;  %v7107_v26 = vmul.f32 0.70710677, %v7097_v18  ;;  %vm7109_vm13 = vcmp.eq.f32.partialorder %v4096_v29, 8.507059e+37  ;;  %v4128_v63 = vmul.f32 %v4902_v1, %v7068_v51 }
 0x773   :  { %vm4132_vm14 = vweird.f32 %v7068_v51  ;;  %v4136_v15 = vand.u32 2147483647, %v7068_v51  ;;  %v4164_v41 = vadd.f32 0.4994258, %v4163_v49  ;;  %v4153_v38 = vadd.f32 0.18741608, %v4152_v55 }
 0x774   :  { %v4202_v21 = vadd.f32 0.112945676, %v4201_v25  ;;  %v7116_v3 = vmin.f32 %v4224_v28, 16.0  ;;  %v4264_v57 = vmul.f32 %v7107_v26, %v7107_v26  ;;  %v4129_v54 = vsub.f32 1.0, %v4128_v63 }
 0x775   :  { %v4165_v36 = vmul.f32 %v4164_v41, %v7026_v4  ;;  %v4191_v6 = vadd.f32 0.05243302, %v4190_v9  ;;  %v4312_v39 = vadd.f32 1.0, %v4629_v13  ;;  %vm4133_vm15 = vweird.f32 %v4902_v1 }
 0x776   :  { %v4138_v19 = vand.u32 2147483648, %v7068_v51  ;;  %v4203_v20 = vmul.f32 %v4202_v21, %v7053_v2  ;;  %v4226_v29 = vmul.f32 2.1237322e-06, %v7116_v3  ;;  %v4130_v33 = vmul.f32 %v4902_v1, %v4129_v54  ;;  %vm4134_vm1 = vmor %vm4132_vm14, %vm4133_vm15 }
 0x777   :  { %v7132_v10 = vadd.f32 1.0, %v4165_v36  ;;  %v4237_v61 = vmul.f32 3.8918573e-05, %v7116_v3  ;;  %v7135_v42 = vmin.f32 %v4264_v57, 16.0  ;;  %v4095_v31 = vsel %vm7128_vm0, %v7035_v32, %v4091_v59 }
 0x778   :  { %v4154_v8 = vmul.f32 %v4153_v38, %v7026_v4  ;;  %v4204_v48 = vadd.f32 0.4994258, %v4203_v20  ;;  %v4328_v46 = vmul.f32 %v4312_v39, %v6823_v23  ;;  %v4131_v22 = vadd.f32 %v4902_v1, %v4130_v33 }
 0x779   :  { %4903 = vrcp.f32 %v7132_v10  ;;  %v4192_v58 = vmul.f32 %v4191_v6, %v7053_v2  ;;  %v4227_v24 = vadd.f32 0.00028619796, %v4226_v29  ;;  %v4099_v55 = vor.u32 1.1754944e-38, %v4098_v62 }
 0x77a   :  { %v4139_v49 = vor.u32 1.1754944e-38, %v4138_v19  ;;  %v4205_v9 = vmul.f32 %v4204_v48, %v7053_v2  ;;  %4400 = vmatmul.f32.gmra.mxu2 %v4328_v46  ;;  %v4630_v4 = vclamps-f32 %v7091_v34, 1.0  ;;  %v4135_v32 = vsel %vm4134_vm1, %v4902_v1, %v4131_v22 }
 0x77b   :  { %vm4137_vm2 = vcmp.eq.f32.partialorder %v4136_v15, 8.507059e+37  ;;  %v4238_v23 = vadd.f32 0.001143296, %v4237_v61  ;;  %v4266_v13 = vmul.f32 2.1237322e-06, %v7135_v42  ;;  %v4100_v59 = vsel %vm7109_vm13, %v4099_v55, %v4095_v31 }
 0x77c   :  { %v4116_v62 = vmul.f32 %v4115_v27, %v6874_v12  ;;  %v4140_v25 = vsel %vm4137_vm2, %v4139_v49, %v4135_v32  ;;  %v4155_v28 = vadd.f32 1.1283791, %v4154_v8  ;;  %v4193_v51 = vadd.f32 0.18741608, %v4192_v58 }
 0x77d   :  { %v7153_v63 = vadd.f32 1.0, %v4205_v9  ;;  %v4228_v41 = vmul.f32 %v4227_v24, %v7116_v3  ;;  %v4239_v38 = vmul.f32 %v4238_v23, %v7116_v3  ;;  %v3643_v34 = vmul.f32 0.5, %v6845_v50 }
 0x77e   :  { %v4267_v1 = vadd.f32 0.00028619796, %v4266_v13  ;;  %v4277_v15 = vmul.f32 3.8918573e-05, %v7135_v42  ;;  %v4313_v21 = vadd.f32 1.0, %v4630_v4  ;;  %v4101_v60 = vmul.f32 %v4100_v59, %v7072_v44 }
 0x77f   :  { %v4904_v57 = vpop.eup %4903  ;;  %v4141_v54 = vmul.f32 %v4140_v25, %v4116_v62  ;;  %v4176_v12 = vand.u32 2147483647, %v7132_v10  ;;  %4905 = vrcp.f32 %v7153_v63  ;;  %v4156_v27 = vmul.f32 %v4155_v28, %v6991_v43 }
 0x780   :  { %v4168_v36 = vmul.f32 %v4904_v57, %v7132_v10  ;;  %v4178_v6 = vand.u32 2147483648, %v7132_v10  ;;  %v4240_v39 = vadd.f32 0.014752088, %v4239_v38  ;;  %vm4172_vm3 = vweird.f32 %v7132_v10 }
 0x781   :  { %v4194_v50 = vmul.f32 %v4193_v51, %v7053_v2  ;;  %v4229_v19 = vadd.f32 0.0036580483, %v4228_v41  ;;  %v4278_v20 = vadd.f32 0.001143296, %v4277_v15  ;;  %v4268_v30 = vmul.f32 %v4267_v1, %v7135_v42 }
 0x782   :  { %v4169_v29 = vsub.f32 1.0, %v4168_v36  ;;  %v4241_v44 = vmul.f32 %v4240_v39, %v7116_v3  ;;  %v4329_v33 = vmul.f32 %v4313_v21, %v6905_v47  ;;  %vm7170_vm4 = vcmp.eq.f32.partialorder %v4176_v12, 8.507059e+37 }
 0x783   :  { %v4279_v61 = vmul.f32 %v4278_v20, %v7135_v42  ;;  %v4631_v31 = vclamps-f32 %v4101_v60, 1.0  ;;  %v4632_v8 = vclamps-f32 %v4141_v54, 1.0  ;;  %vm4173_vm5 = vweird.f32 %v4904_v57 }
 0x784   :  { %v4170_v48 = vmul.f32 %v4904_v57, %v4169_v29  ;;  %v4179_v2 = vor.u32 1.1754944e-38, %v4178_v6  ;;  %v4242_v46 = vadd.f32 0.112945676, %v4241_v44  ;;  %4441 = vmatmul.f32.gmra.mxu3 %v4329_v33  ;;  %v4230_v58 = vmul.f32 %v4229_v19, %v7116_v3  ;;  %vm4174_vm6 = vmor %vm4172_vm3, %vm4173_vm5 }
 0x785   :  { %v4906_v22 = vpop.eup %4905  ;;  %v4280_v24 = vadd.f32 0.014752088, %v4279_v61  ;;  %v4314_v55 = vadd.f32 1.0, %v4631_v31  ;;  %v4315_v49 = vadd.f32 1.0, %v4632_v8  ;;  %v4195_v9 = vadd.f32 1.1283791, %v4194_v50 }
 0x786   :  { %v4171_v47 = vadd.f32 %v4904_v57, %v4170_v48  ;;  %v4208_v4 = vmul.f32 %v4906_v22, %v7153_v63  ;;  %v4269_v32 = vadd.f32 0.0036580483, %v4268_v30  ;;  %v4216_v23 = vand.u32 2147483647, %v7153_v63  ;;  %v7197_v61 = vld [vmem:[%s7241_s12] ss:$0 sm:$0xff] }
 0x787   :  { %v4243_v13 = vmul.f32 %v4242_v46, %v7116_v3  ;;  %v4281_v59 = vmul.f32 %v4280_v24, %v7135_v42  ;;  %v4330_v62 = vmul.f32 %v4314_v55, %v6930_v45  ;;  %v4218_v51 = vand.u32 2147483648, %v7153_v63  ;;  %s5165_s12 = smov [#allocation16]  }
 0x788   :  { %v4175_v25 = vsel %vm4174_vm6, %v4904_v57, %v4171_v47  ;;  %v4209_v28 = vsub.f32 1.0, %v4208_v4  ;;  %v4331_v41 = vmul.f32 %v4315_v49, %v3643_v34  ;;  %v4231_v1 = vadd.f32 0.05243302, %v4230_v58  ;;  %s4474_s19 = sshll.u32 %s5165_s12, 4  ;;  %s4475_s19 = int_to_ptr.vmem [resolvable:$true] %s4474_s19 }
 0x789   :  { %v4180_v38 = vsel %vm7170_vm4, %v4179_v2, %v4175_v25  ;;  %v4244_v15 = vadd.f32 0.4994258, %v4243_v13  ;;  %v4282_v10 = vadd.f32 0.112945676, %v4281_v59  ;;  %4403 = vmatmul.f32.gmra.mxu2 %v4330_v62  ;;  %vm4213_vm7 = vweird.f32 %v4906_v22 }
 0x78a   :  { %v4181_v21 = vmul.f32 %v4180_v38, %v4156_v27  ;;  %v4210_v60 = vmul.f32 %v4906_v22, %v4209_v28  ;;  %v4270_v54 = vmul.f32 %v4269_v32, %v7135_v42  ;;  %v4196_v57 = vmul.f32 %v4195_v9, %v7029_v14 }
 0x78b   :  { %v4245_v12 = vmul.f32 %v4244_v15, %v7116_v3  ;;  %v4283_v45 = vmul.f32 %v4282_v10, %v7135_v42  ;;  %vm4212_vm8 = vweird.f32 %v7153_v63  ;;  %v4219_v6 = vor.u32 1.1754944e-38, %v4218_v51 }
 0x78c   :  { %v4211_v36 = vadd.f32 %v4906_v22, %v4210_v60  ;;  %4444 = vmatmul.f32.gmra.mxu3 %v4331_v41  ;;  %v4633_v34 = vclamps-f32 %v4181_v21, 1.0  ;;  %vm4214_vm11 = vmor %vm4212_vm8, %vm4213_vm7  ;;  %v4232_v39 = vmul.f32 %v4231_v1, %v7116_v3  ;;  %vm4217_vm12 = vcmp.eq.f32.partialorder %v4216_v23, 8.507059e+37 }
 0x78d   :  { %v4246_v27 = vadd.f32 1.0, %v4245_v12  ;;  %v4284_v50 = vadd.f32 0.4994258, %v4283_v45  ;;  %v4271_v20 = vadd.f32 0.05243302, %v4270_v54  ;;  %v3644_v44 = vmul.f32 0.5, %v6971_v35 }
 0x78e   :  { %v4215_v19 = vsel %vm4214_vm11, %v4906_v22, %v4211_v36  ;;  %v4316_v29 = vadd.f32 1.0, %v4633_v34  ;;  %v4233_v63 = vadd.f32 0.18741608, %v4232_v39  ;;  %v3645_v46 = vmul.f32 0.5, %v7000_v7 }
 0x78f   :  { %v4220_v30 = vsel %vm4217_vm12, %v4219_v6, %v4215_v19  ;;  %4907 = vrcp.f32 %v4246_v27  ;;  %v4285_v33 = vmul.f32 %v4284_v50, %v7135_v42  ;;  %v4272_v31 = vmul.f32 %v4271_v20, %v7135_v42 }
 0x790   :  { %v4221_v14 = vmul.f32 %v4220_v30, %v4196_v57  ;;  %v4332_v43 = vmul.f32 %v4316_v29, %v3644_v44  ;;  %v4234_v22 = vmul.f32 %v4233_v63, %v7116_v3  ;;  %v4258_v13 = vand.u32 2147483648, %v4246_v27 }
 0x791   :  { %v4286_v8 = vadd.f32 1.0, %v4285_v33  ;;  %v4273_v49 = vadd.f32 0.18741608, %v4272_v31  ;;  %v4256_v7 = vand.u32 2147483647, %v4246_v27  ;;  %vm4252_vm10 = vweird.f32 %v4246_v27 }
 0x792   :  { %v4634_v48 = vclamps-f32 %v4221_v14, 1.0  ;;  %4406 = vmatmul.f32.gmra.mxu2 %v4332_v43  ;;  %v4235_v23 = vadd.f32 1.1283791, %v4234_v22  ;;  %v4259_v38 = vor.u32 1.1754944e-38, %v4258_v13  ;;  %v3646_v34 = vmul.f32 0.5, %v7078_v37 }
 0x793   :  { %4909 = vrcp.f32 %v4286_v8  ;;  %v4274_v3 = vmul.f32 %v4273_v49, %v7135_v42  ;;  %vm4257_vm14 = vcmp.eq.f32.partialorder %v4256_v7, 8.507059e+37  ;;  %v4298_v21 = vand.u32 2147483648, %v4286_v8 }
 0x794   :  { %v4317_v58 = vadd.f32 1.0, %v4634_v48  ;;  %v4236_v41 = vmul.f32 %v4235_v23, %v7094_v52  ;;  %v4296_v54 = vand.u32 2147483647, %v4286_v8  ;;  %vm4292_vm0 = vweird.f32 %v4286_v8 }
 0x795   :  { %v4389_v2 = vpop.f32.mrf.mxu2  ;;  %v4908_v35 = vpop.eup %4907  ;;  %v4275_v10 = vadd.f32 1.1283791, %v4274_v3  ;;  %v4299_v42 = vor.u32 1.1754944e-38, %v4298_v21  ;;  %v3647_v20 = vmul.f32 0.5, %v7097_v18 }
 0x796   :  { %v4390_v24 = vadd.f32 %v7197_v61, %v4389_v2  ;;  %v4248_v55 = vmul.f32 %v4908_v35, %v4246_v27  ;;  %v4430_v47 = vpop.f32.mrf.mxu3  ;;  %v4333_v9 = vmul.f32 %v4317_v58, %v3645_v46  ;;  %vm4253_vm9 = vweird.f32 %v4908_v35 }
 0x797   :  { %vm4254_vm13 = vmor %vm4252_vm10, %vm4253_vm9  ;;  %v4276_v36 = vmul.f32 %v4275_v10, %v7107_v26  ;;  %vm4297_vm2 = vcmp.eq.f32.partialorder %v4296_v54, 8.507059e+37 }
 0x798   :  { %v4431_v4 = vadd.f32 %v4430_v47, %v4390_v24  ;;  %v4249_v32 = vsub.f32 1.0, %v4248_v55  ;;  %4447 = vmatmul.f32.gmra.mxu3 %v4333_v9 }
 0x799   :  { %v4910_v62 = vpop.eup %4909 }
 0x79a   :  { %v4454_v59 = vadd.f32 %v4431_v4, %v6392_v56  ;;  %v4250_v25 = vmul.f32 %v4908_v35, %v4249_v32  ;;  %v4288_v28 = vmul.f32 %v4910_v62, %v4286_v8  ;;  %vm4293_vm15 = vweird.f32 %v4910_v62 }
 0x79b   :  { %vm4294_vm1 = vmor %vm4292_vm0, %vm4293_vm15 }
 0x79c   :  { %4462 = vst [vmem:[#allocation16] sm:$0xff] %v4454_v59  ;;  %v4251_v51 = vadd.f32 %v4908_v35, %v4250_v25  ;;  %v4289_v1 = vsub.f32 1.0, %v4288_v28 }
 0x79e   :  { %v4255_v15 = vsel %vm4254_vm13, %v4908_v35, %v4251_v51  ;;  %v4290_v60 = vmul.f32 %v4910_v62, %v4289_v1 }
 0x79f   :  { %v4260_v56 = vsel %vm4257_vm14, %v4259_v38, %v4255_v15 }
 0x7a0   :  { %v4261_v12 = vmul.f32 %v4260_v56, %v4236_v41  ;;  %v4291_v45 = vadd.f32 %v4910_v62, %v4290_v60 }
 0x7a2   :  { %v4635_v57 = vclamps-f32 %v4261_v12, 1.0  ;;  %v4295_v52 = vsel %vm4294_vm1, %v4910_v62, %v4291_v45 }
 0x7a3   :  { %v4300_v6 = vsel %vm4297_vm2, %v4299_v42, %v4295_v52 }
 0x7a4   :  { %v4318_v39 = vadd.f32 1.0, %v4635_v57  ;;  %v4301_v27 = vmul.f32 %v4300_v6, %v4276_v36 }
 0x7a6   :  { %v4334_v50 = vmul.f32 %v4318_v39, %v3646_v34  ;;  %v4636_v19 = vclamps-f32 %v4301_v27, 1.0 }
 0x7a8   :  { %4409 = vmatmul.f32.gmra.mxu2 %v4334_v50  ;;  %v4319_v29 = vadd.f32 1.0, %v4636_v19 }
 0x7aa   :  { %v4335_v44 = vmul.f32 %v4319_v29, %v3647_v20 }
 0x7ab   :  { %v4392_v30 = vpop.f32.mrf.mxu2 }
 0x7ac   :  { %4450 = vmatmul.f32.gmra.mxu3 %v4335_v44  ;;  %v4393_v14 = vadd.f32 %v7197_v61, %v4392_v30 }
 0x7b1   :  { %v4433_v33 = vpop.f32.mrf.mxu3 }
 0x7b2   :  { %v4434_v26 = vadd.f32 %v4433_v33, %v4393_v14 }
 0x7b4   :  { %v4455_v63 = vadd.f32 %v4434_v26, %v6396_v16 }
 0x7b6   :  { %4463 = vst [vmem:[#allocation16 + $0x8] sm:$0xff] %v4455_v63 }
 0x7dd   :  { %v4395_v37 = vpop.f32.mrf.mxu2 }
 0x7de   :  { %v4396_v43 = vadd.f32 %v7197_v61, %v4395_v37 }
 0x7e0   :  { %v4436_v31 = vpop.f32.mrf.mxu3 }
 0x7e1   :  { %v4437_v8 = vadd.f32 %v4436_v31, %v4396_v43 }
 0x7e3   :  { %v4456_v48 = vadd.f32 %v4437_v8, %v6400_v40 }
 0x7e5   :  { %4464 = vst [vmem:[#allocation16 + $0x10] sm:$0xff] %v4456_v48 }
 0x7ec   :  { %v4398_v18 = vpop.f32.mrf.mxu2 }
 0x7ed   :  { %v4399_v2 = vadd.f32 %v7197_v61, %v4398_v18 }
 0x7ee   :  { %v4439_v35 = vpop.f32.mrf.mxu3 }
 0x7ef   :  { %v4440_v46 = vadd.f32 %v4439_v35, %v4399_v2 }
 0x7f1   :  { %v4457_v22 = vadd.f32 %v4440_v46, %v6404_v5 }
 0x7f3   :  { %4465 = vst [vmem:[#allocation16 + $0x18] sm:$0xff] %v4457_v22 }
 0x7fd   :  { %v4401_v58 = vpop.f32.mrf.mxu2 }
 0x7fe   :  { %v4402_v16 = vadd.f32 %v7197_v61, %v4401_v58 }
 0x807   :  { %v4442_v24 = vpop.f32.mrf.mxu3 }
 0x808   :  { %v4443_v55 = vadd.f32 %v4442_v24, %v4402_v16 }
 0x80a   :  { %v4458_v49 = vadd.f32 %v4443_v55, %v6408_v0 }
 0x80c   :  { %4466 = vst [vmem:[#allocation16 + $0x20] sm:$0xff] %v4458_v49  ;;  %v4404_v47 = vpop.f32.mrf.mxu2 }
 0x80d   :  { %v4405_v40 = vadd.f32 %v7197_v61, %v4404_v47 }
 0x80f   :  { %v4445_v9 = vpop.f32.mrf.mxu3 }
 0x810   :  { %v4446_v4 = vadd.f32 %v4445_v9, %v4405_v40 }
 0x812   :  { %v4459_v32 = vadd.f32 %v4446_v4, %v6412_v53 }
 0x814   :  { %4467 = vst [vmem:[#allocation16 + $0x28] sm:$0xff] %v4459_v32 }
 0x815   :  { %v4407_v23 = vpop.f32.mrf.mxu2 }
 0x816   :  { %v4408_v5 = vadd.f32 %v7197_v61, %v4407_v23 }
 0x81b   :  { %v4448_v13 = vpop.f32.mrf.mxu3 }
 0x81c   :  { %v4449_v59 = vadd.f32 %v4448_v13, %v4408_v5 }
 0x81e   :  { %v4460_v62 = vadd.f32 %v4449_v59, %v6416_v17 }
 0x820   :  { %4468 = vst [vmem:[#allocation16 + $0x30] sm:$0xff] %v4460_v62 }
 0x82b   :  { %v4410_v25 = vpop.f32.mrf.mxu2 }
 0x82c   :  { %v4411_v0 = vadd.f32 %v7197_v61, %v4410_v25 }
 0x82f   :  { %v4451_v7 = vpop.f32.mrf.mxu3 }
 0x830   :  { %v4452_v53 = vadd.f32 %v4451_v7, %v4411_v0 }
 0x832   :  { %v4461_v3 = vadd.f32 %v4452_v53, %v6426_v11 }
 0x834   :  { %4469 = vst [vmem:[#allocation16 + $0x38] sm:$0xff] %v4461_v3 }
 0x835   :  { %4482 = dma.vmem_to_hbm [thread:$0]  %s4475_s19, 1024, %s4477_s1, [#allocation4], %s5153_s28, %s5153_s28, %s5154_s29  }
 0x836   :  { %5145 = dma.done.wait [#allocation4], 1024  }
 0x837   :  { %5146 = vsyncadd [#allocation4], 4294966272 }
 0x838   :  { %4487 = vsyncpa [#allocation3], 1 }
 0x839   :  { %4488 = vsyncpa [#allocation6], 1 }
 0x83a   :  { %4489 = vsyncpa [#allocation9], 1 }
 0x83b   :  { %4490 = vsyncpa [#allocation12], 1 }
 0x83c   :  { %4491 = vsyncpa [#allocation15], 1 }
 0x83d   :  { %4492 = vsyncpa [#allocation4], 1 }

</bundles_post_ra>
